<compile_context>
chip_gen: v5e
topology: v5e:2x2
jax: 0.10.0
libtpu: 0.0.40
codegen_flags: <defaults>
</compile_context>

<pallas_src>
import functools

import jax
import jax.numpy as jnp
from jax.experimental import pallas as pl
from jax.experimental.pallas import tpu as pltpu

EPS = 1e-5
LANE = 128


def _round_up(x, m):
    return (x + m - 1) // m * m


def _vmem_limit_bytes():
    # v5e/v6e: 128 MiB physical VMEM, v7x: 64 MiB.  Defaults (16/32 MiB) are
    # too small for production CycleGAN shapes (C=256, 64x64).
    try:
        cap = pltpu.get_tpu_info().vmem_capacity_bytes
    except Exception:
        cap = 64 * 1024 * 1024
    return int(min(max(cap - 16 * 1024 * 1024, 32 * 1024 * 1024),
                   100 * 1024 * 1024))


# ----------------------------- Pallas kernel ------------------------------

def _residual_block_kernel(x_ref, w1_ref, w2_ref, o_ref, pad_ref, *,
                           h, w, wp, cp, compute_dtype):
    """Fused ConvBlock(ReLU) -> ConvBlock(Identity) -> +x for one image.

    x_ref   : (1, h, w, cp) f32 NHWC input block (channels zero-padded to cp)
    w1_ref  : (9, cp, cp)   tap-major conv1 weights [kh*3+kw, ci, co]
    w2_ref  : (9, cp, cp)   tap-major conv2 weights
    o_ref   : (1, h, w, cp) output block
    pad_ref : (h+2, wp, cp) f32 VMEM scratch, reflect-padded activation of the
              current conv block (reused by both blocks).  wp = round_up(w+2, 8);
              cols [0, w+1] hold the padded image, cols [w+2, wp) are zeroed
              alignment columns that are cropped from all stats / stores.
    """
    hp = h + 2
    m_out = h * wp
    inv_n = 1.0 / (h * w)

    def fill_padded(img):
        """Write reflect-pad(img, 1) into pad_ref (standard pad layout)."""
        pad_ref[1:h + 1, 1:w + 1, :] = img
        pad_ref[1:h + 1, 0:1, :] = img[:, 1:2, :]                   # left
        pad_ref[1:h + 1, w + 1:w + 2, :] = img[:, w - 2:w - 1, :]   # right
        if wp > w + 2:                                              # alignment
            pad_ref[:, w + 2:, :] = jnp.zeros((hp, wp - (w + 2), cp),
                                              jnp.float32)
        # Full-width row copies handle the corners (reflect of reflect).
        pad_ref[0:1, :, :] = pad_ref[2:3, :, :]                     # top
        pad_ref[h + 1:h + 2, :, :] = pad_ref[h - 1:h, :, :]         # bottom

    def conv3x3(w_ref):
        """3x3 'same' conv of pad_ref -> (h, wp, cp) f32 (valid cols [0, w))."""
        # One cast per conv block; flattening is layout-free since wp % 8 == 0.
        flat = pad_ref[...].reshape(hp * wp, cp).astype(compute_dtype)
        acc = None
        for kw in range(3):
            # kh taps are sublane-aligned contiguous slabs -> 3 chained MXU
            # dots per kw group (MRB-friendly accumulation on v7x).
            q = None
            for kh in range(3):
                slab = flat[kh * wp:kh * wp + m_out, :]
                p = jnp.dot(slab, w_ref[kh * 3 + kw],
                            preferred_element_type=jnp.float32)
                q = p if q is None else q + p
            if kw:
                # Column shift q[m] <- q[m + kw]; wrapped rows land only in
                # the cropped alignment columns, never in valid pixels.
                q = pltpu.roll(q, shift=m_out - kw, axis=0)
            acc = q if acc is None else acc + q
        return acc.reshape(h, wp, cp)

    def instance_norm(z3, relu):
        """Per-channel IN (biased var) over the w valid columns; fused act."""
        zv = z3[:, :w, :]                         # aligned slice of valid cols
        s = jnp.sum(jnp.sum(zv, axis=1, keepdims=True), axis=0, keepdims=True)
        ss = jnp.sum(jnp.sum(zv * zv, axis=1, keepdims=True), axis=0,
                     keepdims=True)
        mean = s * inv_n
        var = jnp.maximum(ss * inv_n - mean * mean, 0.0)
        out = (zv - mean) * jax.lax.rsqrt(var + EPS)
        if relu:
            out = jnp.maximum(out, 0.0)
        return out                                # (h, w, cp) f32

    xin = x_ref[0]                                # (h, w, cp) f32

    # --- Block 1: reflect-pad -> conv3x3 -> InstanceNorm -> ReLU ------------
    fill_padded(xin)
    a1 = instance_norm(conv3x3(w1_ref), relu=True)

    # --- Block 2: reflect-pad -> conv3x3 -> InstanceNorm -> residual --------
    fill_padded(a1)
    a2 = instance_norm(conv3x3(w2_ref), relu=False)

    o_ref[0] = (xin + a2).astype(o_ref.dtype)     # 3-D residual add + store


# ------------------------------- JAX wrapper --------------------------------

def _prep_weight(wt, c, cp, dtype):
    """PyTorch conv weight (C_out, C_in, 3, 3) -> (9, cp_in, cp_out) tap-major."""
    wm = jnp.transpose(wt, (2, 3, 1, 0)).reshape(9, c, c)   # [kh*3+kw, ci, co]
    if cp != c:
        wm = jnp.pad(wm, ((0, 0), (0, cp - c), (0, cp - c)))
    return wm.astype(dtype)


def residual_block(x, params, *, compute_dtype=jnp.bfloat16):
    """ResidualBlock forward. x: (N, C, H, W) float32."""
    w1, b1, w2, b2 = params
    # Biases cancel exactly under affine=False InstanceNorm (mean subtraction).
    del b1, b2
    n, c, h, w = x.shape
    cp = _round_up(c, LANE)          # lane-dense channels (no-op at C=256)
    wp = _round_up(w + 2, 8)         # padded width, sublane-aligned

    # NCHW -> NHWC; zero-pad channels to cp.  Reflect padding is done inside
    # the kernel (no padded-activation HBM round trip).
    x_nhwc = jnp.transpose(x, (0, 2, 3, 1))
    if cp != c:
        x_nhwc = jnp.pad(x_nhwc, ((0, 0), (0, 0), (0, 0), (0, cp - c)))

    w1m = _prep_weight(w1, c, cp, compute_dtype)
    w2m = _prep_weight(w2, c, cp, compute_dtype)

    kernel = functools.partial(_residual_block_kernel, h=h, w=w, wp=wp, cp=cp,
                               compute_dtype=compute_dtype)
    out = pl.pallas_call(
        kernel,
        out_shape=jax.ShapeDtypeStruct((n, h, w, cp), x.dtype),
        grid=(n,),
        in_specs=[
            pl.BlockSpec((1, h, w, cp), lambda i: (i, 0, 0, 0)),
            # NOTE: pipeline_mode=pl.Buffered(1) on the two constant-index
            # weight specs would reclaim one redundant double-buffer copy of
            # VMEM; skipped here for compile-safety on this jax version.
            pl.BlockSpec((9, cp, cp), lambda i: (0, 0, 0)),
            pl.BlockSpec((9, cp, cp), lambda i: (0, 0, 0)),
        ],
        out_specs=pl.BlockSpec((1, h, w, cp), lambda i: (i, 0, 0, 0)),
        scratch_shapes=[pltpu.VMEM((h + 2, wp, cp), jnp.float32)],
        compiler_params=pltpu.CompilerParams(
            dimension_semantics=("parallel",),
            vmem_limit_bytes=_vmem_limit_bytes()),
    )(x_nhwc, w1m, w2m)

    out = out[..., :c]                               # drop channel padding
    return jnp.transpose(out, (0, 3, 1, 2))          # NHWC -> NCHW


# ------------------------- pure-JAX reference ------------------------------

def _ref_conv_block(x, weight, bias, *, use_act):
    xp = jnp.pad(x, ((0, 0), (0, 0), (1, 1), (1, 1)), mode="reflect")
    y = jax.lax.conv_general_dilated(
        xp, weight, window_strides=(1, 1), padding="VALID",
        dimension_numbers=("NCHW", "OIHW", "NCHW"),
        precision=jax.lax.Precision.HIGHEST)
    y = y + bias.reshape(1, -1, 1, 1)
    mean = jnp.mean(y, axis=(2, 3), keepdims=True)
    var = jnp.mean((y - mean) ** 2, axis=(2, 3), keepdims=True)
    y = (y - mean) * jax.lax.rsqrt(var + EPS)
    if use_act:
        y = jnp.maximum(y, 0.0)
    return y


def _ref_residual_block(x, params):
    w1, b1, w2, b2 = params
    h = _ref_conv_block(x, w1, b1, use_act=True)
    h = _ref_conv_block(h, w2, b2, use_act=False)
    return x + h


# --------------------------------- main ------------------------------------

if __name__ == "__main__":
    N, C, H, W = 2, 4, 16, 16
    key = jax.random.PRNGKey(0)
    kx, kw1, kb1, kw2, kb2 = jax.random.split(key, 5)

    x = jax.random.normal(kx, (N, C, H, W), dtype=jnp.float32)
    # Deterministic parameter init (Conv2d(C, C, 3, 3) + bias, x2 blocks).
    fan_in = C * 3 * 3
    scale = 1.0 / jnp.sqrt(fan_in)
    w1 = jax.random.uniform(kw1, (C, C, 3, 3), jnp.float32, -scale, scale)
    b1 = jax.random.uniform(kb1, (C,), jnp.float32, -scale, scale)
    w2 = jax.random.uniform(kw2, (C, C, 3, 3), jnp.float32, -scale, scale)
    b2 = jax.random.uniform(kb2, (C,), jnp.float32, -scale, scale)
    params = (w1, b1, w2, b2)

    ref = _ref_residual_block(x, params)

    # f32 MXU path: strict correctness check against the PyTorch-semantics ref.
    out_f32 = jax.jit(
        functools.partial(residual_block, compute_dtype=jnp.float32))(x, params)
    out_f32 = jax.block_until_ready(out_f32)
    assert out_f32.shape == (N, C, H, W)
    err_f32 = float(jnp.max(jnp.abs(out_f32 - ref)))
    assert jnp.allclose(out_f32, ref, rtol=1e-3, atol=1e-3), err_f32

    # bf16-operand MXU path (default / performance mode).  Tolerance sized for
    # bf16 rounding (~2^-8) through two convs + two instance-norms; the
    # accumulation and statistics remain f32.
    out_bf16 = jax.jit(residual_block)(x, params)
    out_bf16 = jax.block_until_ready(out_bf16)
    assert out_bf16.shape == (N, C, H, W)
    err_bf16 = float(jnp.max(jnp.abs(out_bf16 - ref)))
    assert jnp.allclose(out_bf16, ref, rtol=5e-2, atol=7.5e-2), err_bf16

    print("KERNEL_OK")
</pallas_src>

<mosaic_0001>
module attributes {stable_mosaic.version = 11 : i64} {
  func.func @_residual_block_kernel(%arg0: i32, %arg1: memref<1x16x16x128xf32, #tpu.memory_space<vmem>>, %arg2: memref<9x128x128xf32, #tpu.memory_space<vmem>>, %arg3: memref<9x128x128xf32, #tpu.memory_space<vmem>>, %arg4: memref<1x16x16x128xf32, #tpu.memory_space<vmem>>, %arg5: memref<18x24x128xf32, #tpu.memory_space<vmem>>) attributes {dimension_semantics = [#tpu.dimension_semantics<parallel>], iteration_bounds = array<i64: 2>, scalar_prefetch = 0 : i64, scratch_operands = 1 : i64, tpu.core_type = #tpu.core_type<tc>, window_params = [{transform_indices = @transform_0, window_bounds = array<i64: 1, 16, 16, 128>}, {pipeline_mode = #tpu.pipeline_mode<synchronous>, transform_indices = @transform_1, window_bounds = array<i64: 9, 128, 128>}, {pipeline_mode = #tpu.pipeline_mode<synchronous>, transform_indices = @transform_2, window_bounds = array<i64: 9, 128, 128>}, {transform_indices = @transform_3, window_bounds = array<i64: 1, 16, 16, 128>}]} {
    %c0 = arith.constant 0 : index
    %c0_0 = arith.constant 0 : index
    %c0_1 = arith.constant 0 : index
    %c0_2 = arith.constant 0 : index
    %0 = vector.load %arg1[%c0, %c0_0, %c0_1, %c0_2] : memref<1x16x16x128xf32, #tpu.memory_space<vmem>>, vector<1x16x16x128xf32>
    %1 = vector.shape_cast %0 : vector<1x16x16x128xf32> to vector<16x16x128xf32>
    %c1 = arith.constant 1 : index
    %c1_3 = arith.constant 1 : index
    %c0_4 = arith.constant 0 : index
    %2 = vector.load %arg5[%c1, %c1_3, %c0_4] : memref<18x24x128xf32, #tpu.memory_space<vmem>>, vector<16x16x128xf32>
    tpu.vector_store %arg5[%c1, %c1_3, %c0_4], %1 {strides = array<i32>} : memref<18x24x128xf32, #tpu.memory_space<vmem>>, vector<16x16x128xf32>,
    %3 = vector.extract_strided_slice %1 {offsets = [0, 1, 0], sizes = [16, 1, 128], strides = [1, 1, 1]} : vector<16x16x128xf32> to vector<16x1x128xf32>
    %c1_5 = arith.constant 1 : index
    %c0_6 = arith.constant 0 : index
    %c0_7 = arith.constant 0 : index
    %4 = vector.load %arg5[%c1_5, %c0_6, %c0_7] : memref<18x24x128xf32, #tpu.memory_space<vmem>>, vector<16x1x128xf32>
    tpu.vector_store %arg5[%c1_5, %c0_6, %c0_7], %3 {strides = array<i32>} : memref<18x24x128xf32, #tpu.memory_space<vmem>>, vector<16x1x128xf32>,
    %5 = vector.extract_strided_slice %1 {offsets = [0, 14, 0], sizes = [16, 1, 128], strides = [1, 1, 1]} : vector<16x16x128xf32> to vector<16x1x128xf32>
    %c1_8 = arith.constant 1 : index
    %c17 = arith.constant 17 : index
    %c0_9 = arith.constant 0 : index
    %6 = vector.load %arg5[%c1_8, %c17, %c0_9] : memref<18x24x128xf32, #tpu.memory_space<vmem>>, vector<16x1x128xf32>
    tpu.vector_store %arg5[%c1_8, %c17, %c0_9], %5 {strides = array<i32>} : memref<18x24x128xf32, #tpu.memory_space<vmem>>, vector<16x1x128xf32>,
    %cst = arith.constant 0.000000e+00 : f32
    %7 = vector.broadcast %cst : f32 to vector<18x6x128xf32>
    %c0_10 = arith.constant 0 : index
    %c18 = arith.constant 18 : index
    %c0_11 = arith.constant 0 : index
    %8 = vector.load %arg5[%c0_10, %c18, %c0_11] : memref<18x24x128xf32, #tpu.memory_space<vmem>>, vector<18x6x128xf32>
    tpu.vector_store %arg5[%c0_10, %c18, %c0_11], %7 {strides = array<i32>} : memref<18x24x128xf32, #tpu.memory_space<vmem>>, vector<18x6x128xf32>,
    %c2 = arith.constant 2 : index
    %c0_12 = arith.constant 0 : index
    %c0_13 = arith.constant 0 : index
    %9 = vector.load %arg5[%c2, %c0_12, %c0_13] : memref<18x24x128xf32, #tpu.memory_space<vmem>>, vector<1x24x128xf32>
    %c0_14 = arith.constant 0 : index
    %c0_15 = arith.constant 0 : index
    %c0_16 = arith.constant 0 : index
    %10 = vector.load %arg5[%c0_14, %c0_15, %c0_16] : memref<18x24x128xf32, #tpu.memory_space<vmem>>, vector<1x24x128xf32>
    tpu.vector_store %arg5[%c0_14, %c0_15, %c0_16], %9 {strides = array<i32>} : memref<18x24x128xf32, #tpu.memory_space<vmem>>, vector<1x24x128xf32>,
    %c15 = arith.constant 15 : index
    %c0_17 = arith.constant 0 : index
    %c0_18 = arith.constant 0 : index
    %11 = vector.load %arg5[%c15, %c0_17, %c0_18] : memref<18x24x128xf32, #tpu.memory_space<vmem>>, vector<1x24x128xf32>
    %c17_19 = arith.constant 17 : index
    %c0_20 = arith.constant 0 : index
    %c0_21 = arith.constant 0 : index
    %12 = vector.load %arg5[%c17_19, %c0_20, %c0_21] : memref<18x24x128xf32, #tpu.memory_space<vmem>>, vector<1x24x128xf32>
    tpu.vector_store %arg5[%c17_19, %c0_20, %c0_21], %11 {strides = array<i32>} : memref<18x24x128xf32, #tpu.memory_space<vmem>>, vector<1x24x128xf32>,
    %c0_22 = arith.constant 0 : index
    %c0_23 = arith.constant 0 : index
    %c0_24 = arith.constant 0 : index
    %13 = vector.load %arg5[%c0_22, %c0_23, %c0_24] : memref<18x24x128xf32, #tpu.memory_space<vmem>>, vector<18x24x128xf32>
    %14 = vector.shape_cast %13 : vector<18x24x128xf32> to vector<432x128xf32>
    %15 = vector.extract_strided_slice %14 {offsets = [0, 0], sizes = [384, 128], strides = [1, 1]} : vector<432x128xf32> to vector<384x128xf32>
    %c0_25 = arith.constant 0 : index
    %c0_26 = arith.constant 0 : index
    %c0_27 = arith.constant 0 : index
    %16 = vector.load %arg2[%c0_25, %c0_26, %c0_27] : memref<9x128x128xf32, #tpu.memory_space<vmem>>, vector<1x128x128xf32>
    %17 = vector.shape_cast %16 : vector<1x128x128xf32> to vector<128x128xf32>
    %cst_28 = arith.constant dense<0.000000e+00> : vector<384x128xf32>
    %18 = tpu.matmul %15, %17, %cst_28 {dimension_numbers = #tpu.dot_dimension_numbers<[1], [0], [0], [1], [0, 0, 1, 1], [], []>} : vector<384x128xf32>, vector<128x128xf32>, vector<384x128xf32> -> vector<384x128xf32>
    %19 = vector.extract_strided_slice %14 {offsets = [24, 0], sizes = [384, 128], strides = [1, 1]} : vector<432x128xf32> to vector<384x128xf32>
    %c3 = arith.constant 3 : index
    %c0_29 = arith.constant 0 : index
    %c0_30 = arith.constant 0 : index
    %20 = vector.load %arg2[%c3, %c0_29, %c0_30] : memref<9x128x128xf32, #tpu.memory_space<vmem>>, vector<1x128x128xf32>
    %21 = vector.shape_cast %20 : vector<1x128x128xf32> to vector<128x128xf32>
    %cst_31 = arith.constant dense<0.000000e+00> : vector<384x128xf32>
    %22 = tpu.matmul %19, %21, %cst_31 {dimension_numbers = #tpu.dot_dimension_numbers<[1], [0], [0], [1], [0, 0, 1, 1], [], []>} : vector<384x128xf32>, vector<128x128xf32>, vector<384x128xf32> -> vector<384x128xf32>
    %23 = arith.addf %18, %22 : vector<384x128xf32>
    %24 = vector.extract_strided_slice %14 {offsets = [48, 0], sizes = [384, 128], strides = [1, 1]} : vector<432x128xf32> to vector<384x128xf32>
    %c6 = arith.constant 6 : index
    %c0_32 = arith.constant 0 : index
    %c0_33 = arith.constant 0 : index
    %25 = vector.load %arg2[%c6, %c0_32, %c0_33] : memref<9x128x128xf32, #tpu.memory_space<vmem>>, vector<1x128x128xf32>
    %26 = vector.shape_cast %25 : vector<1x128x128xf32> to vector<128x128xf32>
    %cst_34 = arith.constant dense<0.000000e+00> : vector<384x128xf32>
    %27 = tpu.matmul %24, %26, %cst_34 {dimension_numbers = #tpu.dot_dimension_numbers<[1], [0], [0], [1], [0, 0, 1, 1], [], []>} : vector<384x128xf32>, vector<128x128xf32>, vector<384x128xf32> -> vector<384x128xf32>
    %28 = arith.addf %23, %27 : vector<384x128xf32>
    %29 = vector.extract_strided_slice %14 {offsets = [0, 0], sizes = [384, 128], strides = [1, 1]} : vector<432x128xf32> to vector<384x128xf32>
    %c1_35 = arith.constant 1 : index
    %c0_36 = arith.constant 0 : index
    %c0_37 = arith.constant 0 : index
    %30 = vector.load %arg2[%c1_35, %c0_36, %c0_37] : memref<9x128x128xf32, #tpu.memory_space<vmem>>, vector<1x128x128xf32>
    %31 = vector.shape_cast %30 : vector<1x128x128xf32> to vector<128x128xf32>
    %cst_38 = arith.constant dense<0.000000e+00> : vector<384x128xf32>
    %32 = tpu.matmul %29, %31, %cst_38 {dimension_numbers = #tpu.dot_dimension_numbers<[1], [0], [0], [1], [0, 0, 1, 1], [], []>} : vector<384x128xf32>, vector<128x128xf32>, vector<384x128xf32> -> vector<384x128xf32>
    %33 = vector.extract_strided_slice %14 {offsets = [24, 0], sizes = [384, 128], strides = [1, 1]} : vector<432x128xf32> to vector<384x128xf32>
    %c4 = arith.constant 4 : index
    %c0_39 = arith.constant 0 : index
    %c0_40 = arith.constant 0 : index
    %34 = vector.load %arg2[%c4, %c0_39, %c0_40] : memref<9x128x128xf32, #tpu.memory_space<vmem>>, vector<1x128x128xf32>
    %35 = vector.shape_cast %34 : vector<1x128x128xf32> to vector<128x128xf32>
    %cst_41 = arith.constant dense<0.000000e+00> : vector<384x128xf32>
    %36 = tpu.matmul %33, %35, %cst_41 {dimension_numbers = #tpu.dot_dimension_numbers<[1], [0], [0], [1], [0, 0, 1, 1], [], []>} : vector<384x128xf32>, vector<128x128xf32>, vector<384x128xf32> -> vector<384x128xf32>
    %37 = arith.addf %32, %36 : vector<384x128xf32>
    %38 = vector.extract_strided_slice %14 {offsets = [48, 0], sizes = [384, 128], strides = [1, 1]} : vector<432x128xf32> to vector<384x128xf32>
    %c7 = arith.constant 7 : index
    %c0_42 = arith.constant 0 : index
    %c0_43 = arith.constant 0 : index
    %39 = vector.load %arg2[%c7, %c0_42, %c0_43] : memref<9x128x128xf32, #tpu.memory_space<vmem>>, vector<1x128x128xf32>
    %40 = vector.shape_cast %39 : vector<1x128x128xf32> to vector<128x128xf32>
    %cst_44 = arith.constant dense<0.000000e+00> : vector<384x128xf32>
    %41 = tpu.matmul %38, %40, %cst_44 {dimension_numbers = #tpu.dot_dimension_numbers<[1], [0], [0], [1], [0, 0, 1, 1], [], []>} : vector<384x128xf32>, vector<128x128xf32>, vector<384x128xf32> -> vector<384x128xf32>
    %42 = arith.addf %37, %41 : vector<384x128xf32>
    %c383_i32 = arith.constant 383 : i32
    %43 = tpu.dynamic_rotate %42 by %c383_i32 dim 0 : vector<384x128xf32>, i32 -> vector<384x128xf32>
    %44 = arith.addf %28, %43 : vector<384x128xf32>
    %45 = vector.extract_strided_slice %14 {offsets = [0, 0], sizes = [384, 128], strides = [1, 1]} : vector<432x128xf32> to vector<384x128xf32>
    %c2_45 = arith.constant 2 : index
    %c0_46 = arith.constant 0 : index
    %c0_47 = arith.constant 0 : index
    %46 = vector.load %arg2[%c2_45, %c0_46, %c0_47] : memref<9x128x128xf32, #tpu.memory_space<vmem>>, vector<1x128x128xf32>
    %47 = vector.shape_cast %46 : vector<1x128x128xf32> to vector<128x128xf32>
    %cst_48 = arith.constant dense<0.000000e+00> : vector<384x128xf32>
    %48 = tpu.matmul %45, %47, %cst_48 {dimension_numbers = #tpu.dot_dimension_numbers<[1], [0], [0], [1], [0, 0, 1, 1], [], []>} : vector<384x128xf32>, vector<128x128xf32>, vector<384x128xf32> -> vector<384x128xf32>
    %49 = vector.extract_strided_slice %14 {offsets = [24, 0], sizes = [384, 128], strides = [1, 1]} : vector<432x128xf32> to vector<384x128xf32>
    %c5 = arith.constant 5 : index
    %c0_49 = arith.constant 0 : index
    %c0_50 = arith.constant 0 : index
    %50 = vector.load %arg2[%c5, %c0_49, %c0_50] : memref<9x128x128xf32, #tpu.memory_space<vmem>>, vector<1x128x128xf32>
    %51 = vector.shape_cast %50 : vector<1x128x128xf32> to vector<128x128xf32>
    %cst_51 = arith.constant dense<0.000000e+00> : vector<384x128xf32>
    %52 = tpu.matmul %49, %51, %cst_51 {dimension_numbers = #tpu.dot_dimension_numbers<[1], [0], [0], [1], [0, 0, 1, 1], [], []>} : vector<384x128xf32>, vector<128x128xf32>, vector<384x128xf32> -> vector<384x128xf32>
    %53 = arith.addf %48, %52 : vector<384x128xf32>
    %54 = vector.extract_strided_slice %14 {offsets = [48, 0], sizes = [384, 128], strides = [1, 1]} : vector<432x128xf32> to vector<384x128xf32>
    %c8 = arith.constant 8 : index
    %c0_52 = arith.constant 0 : index
    %c0_53 = arith.constant 0 : index
    %55 = vector.load %arg2[%c8, %c0_52, %c0_53] : memref<9x128x128xf32, #tpu.memory_space<vmem>>, vector<1x128x128xf32>
    %56 = vector.shape_cast %55 : vector<1x128x128xf32> to vector<128x128xf32>
    %cst_54 = arith.constant dense<0.000000e+00> : vector<384x128xf32>
    %57 = tpu.matmul %54, %56, %cst_54 {dimension_numbers = #tpu.dot_dimension_numbers<[1], [0], [0], [1], [0, 0, 1, 1], [], []>} : vector<384x128xf32>, vector<128x128xf32>, vector<384x128xf32> -> vector<384x128xf32>
    %58 = arith.addf %53, %57 : vector<384x128xf32>
    %c382_i32 = arith.constant 382 : i32
    %59 = tpu.dynamic_rotate %58 by %c382_i32 dim 0 : vector<384x128xf32>, i32 -> vector<384x128xf32>
    %60 = arith.addf %44, %59 : vector<384x128xf32>
    %61 = vector.shape_cast %60 : vector<384x128xf32> to vector<16x24x128xf32>
    %62 = vector.extract_strided_slice %61 {offsets = [0, 0, 0], sizes = [16, 16, 128], strides = [1, 1, 1]} : vector<16x24x128xf32> to vector<16x16x128xf32>
    %cst_55 = arith.constant dense<0.000000e+00> : vector<16x128xf32>
    %63 = vector.multi_reduction <add>, %62, %cst_55 [1] : vector<16x16x128xf32> to vector<16x128xf32>
    %64 = vector.shape_cast %63 : vector<16x128xf32> to vector<16x1x128xf32>
    %cst_56 = arith.constant dense<0.000000e+00> : vector<1x128xf32>
    %65 = vector.multi_reduction <add>, %64, %cst_56 [0] : vector<16x1x128xf32> to vector<1x128xf32>
    %66 = vector.shape_cast %65 : vector<1x128xf32> to vector<1x1x128xf32>
    %67 = arith.mulf %62, %62 : vector<16x16x128xf32>
    %cst_57 = arith.constant dense<0.000000e+00> : vector<16x128xf32>
    %68 = vector.multi_reduction <add>, %67, %cst_57 [1] : vector<16x16x128xf32> to vector<16x128xf32>
    %69 = vector.shape_cast %68 : vector<16x128xf32> to vector<16x1x128xf32>
    %cst_58 = arith.constant dense<0.000000e+00> : vector<1x128xf32>
    %70 = vector.multi_reduction <add>, %69, %cst_58 [0] : vector<16x1x128xf32> to vector<1x128xf32>
    %71 = vector.shape_cast %70 : vector<1x128xf32> to vector<1x1x128xf32>
    %cst_59 = arith.constant 3.906250e-03 : f32
    %72 = vector.broadcast %cst_59 : f32 to vector<1x1x128xf32>
    %73 = arith.mulf %66, %72 : vector<1x1x128xf32>
    %cst_60 = arith.constant 3.906250e-03 : f32
    %74 = vector.broadcast %cst_60 : f32 to vector<1x1x128xf32>
    %75 = arith.mulf %71, %74 : vector<1x1x128xf32>
    %76 = arith.mulf %73, %73 : vector<1x1x128xf32>
    %77 = arith.subf %75, %76 : vector<1x1x128xf32>
    %cst_61 = arith.constant 0.000000e+00 : f32
    %78 = vector.broadcast %cst_61 : f32 to vector<1x1x128xf32>
    %79 = arith.maximumf %77, %78 : vector<1x1x128xf32>
    %80 = vector.broadcast %73 : vector<1x1x128xf32> to vector<16x16x128xf32>
    %81 = arith.subf %62, %80 : vector<16x16x128xf32>
    %cst_62 = arith.constant 9.99999974E-6 : f32
    %82 = vector.broadcast %cst_62 : f32 to vector<1x1x128xf32>
    %83 = arith.addf %79, %82 : vector<1x1x128xf32>
    %84 = math.rsqrt %83 : vector<1x1x128xf32>
    %85 = vector.broadcast %84 : vector<1x1x128xf32> to vector<16x16x128xf32>
    %86 = arith.mulf %81, %85 : vector<16x16x128xf32>
    %cst_63 = arith.constant 0.000000e+00 : f32
    %87 = vector.broadcast %cst_63 : f32 to vector<16x16x128xf32>
    %88 = arith.maximumf %86, %87 : vector<16x16x128xf32>
    %c1_64 = arith.constant 1 : index
    %c1_65 = arith.constant 1 : index
    %c0_66 = arith.constant 0 : index
    %89 = vector.load %arg5[%c1_64, %c1_65, %c0_66] : memref<18x24x128xf32, #tpu.memory_space<vmem>>, vector<16x16x128xf32>
    tpu.vector_store %arg5[%c1_64, %c1_65, %c0_66], %88 {strides = array<i32>} : memref<18x24x128xf32, #tpu.memory_space<vmem>>, vector<16x16x128xf32>,
    %90 = vector.extract_strided_slice %88 {offsets = [0, 1, 0], sizes = [16, 1, 128], strides = [1, 1, 1]} : vector<16x16x128xf32> to vector<16x1x128xf32>
    %c1_67 = arith.constant 1 : index
    %c0_68 = arith.constant 0 : index
    %c0_69 = arith.constant 0 : index
    %91 = vector.load %arg5[%c1_67, %c0_68, %c0_69] : memref<18x24x128xf32, #tpu.memory_space<vmem>>, vector<16x1x128xf32>
    tpu.vector_store %arg5[%c1_67, %c0_68, %c0_69], %90 {strides = array<i32>} : memref<18x24x128xf32, #tpu.memory_space<vmem>>, vector<16x1x128xf32>,
    %92 = vector.extract_strided_slice %88 {offsets = [0, 14, 0], sizes = [16, 1, 128], strides = [1, 1, 1]} : vector<16x16x128xf32> to vector<16x1x128xf32>
    %c1_70 = arith.constant 1 : index
    %c17_71 = arith.constant 17 : index
    %c0_72 = arith.constant 0 : index
    %93 = vector.load %arg5[%c1_70, %c17_71, %c0_72] : memref<18x24x128xf32, #tpu.memory_space<vmem>>, vector<16x1x128xf32>
    tpu.vector_store %arg5[%c1_70, %c17_71, %c0_72], %92 {strides = array<i32>} : memref<18x24x128xf32, #tpu.memory_space<vmem>>, vector<16x1x128xf32>,
    %cst_73 = arith.constant 0.000000e+00 : f32
    %94 = vector.broadcast %cst_73 : f32 to vector<18x6x128xf32>
    %c0_74 = arith.constant 0 : index
    %c18_75 = arith.constant 18 : index
    %c0_76 = arith.constant 0 : index
    %95 = vector.load %arg5[%c0_74, %c18_75, %c0_76] : memref<18x24x128xf32, #tpu.memory_space<vmem>>, vector<18x6x128xf32>
    tpu.vector_store %arg5[%c0_74, %c18_75, %c0_76], %94 {strides = array<i32>} : memref<18x24x128xf32, #tpu.memory_space<vmem>>, vector<18x6x128xf32>,
    %c2_77 = arith.constant 2 : index
    %c0_78 = arith.constant 0 : index
    %c0_79 = arith.constant 0 : index
    %96 = vector.load %arg5[%c2_77, %c0_78, %c0_79] : memref<18x24x128xf32, #tpu.memory_space<vmem>>, vector<1x24x128xf32>
    %c0_80 = arith.constant 0 : index
    %c0_81 = arith.constant 0 : index
    %c0_82 = arith.constant 0 : index
    %97 = vector.load %arg5[%c0_80, %c0_81, %c0_82] : memref<18x24x128xf32, #tpu.memory_space<vmem>>, vector<1x24x128xf32>
    tpu.vector_store %arg5[%c0_80, %c0_81, %c0_82], %96 {strides = array<i32>} : memref<18x24x128xf32, #tpu.memory_space<vmem>>, vector<1x24x128xf32>,
    %c15_83 = arith.constant 15 : index
    %c0_84 = arith.constant 0 : index
    %c0_85 = arith.constant 0 : index
    %98 = vector.load %arg5[%c15_83, %c0_84, %c0_85] : memref<18x24x128xf32, #tpu.memory_space<vmem>>, vector<1x24x128xf32>
    %c17_86 = arith.constant 17 : index
    %c0_87 = arith.constant 0 : index
    %c0_88 = arith.constant 0 : index
    %99 = vector.load %arg5[%c17_86, %c0_87, %c0_88] : memref<18x24x128xf32, #tpu.memory_space<vmem>>, vector<1x24x128xf32>
    tpu.vector_store %arg5[%c17_86, %c0_87, %c0_88], %98 {strides = array<i32>} : memref<18x24x128xf32, #tpu.memory_space<vmem>>, vector<1x24x128xf32>,
    %c0_89 = arith.constant 0 : index
    %c0_90 = arith.constant 0 : index
    %c0_91 = arith.constant 0 : index
    %100 = vector.load %arg5[%c0_89, %c0_90, %c0_91] : memref<18x24x128xf32, #tpu.memory_space<vmem>>, vector<18x24x128xf32>
    %101 = vector.shape_cast %100 : vector<18x24x128xf32> to vector<432x128xf32>
    %102 = vector.extract_strided_slice %101 {offsets = [0, 0], sizes = [384, 128], strides = [1, 1]} : vector<432x128xf32> to vector<384x128xf32>
    %c0_92 = arith.constant 0 : index
    %c0_93 = arith.constant 0 : index
    %c0_94 = arith.constant 0 : index
    %103 = vector.load %arg3[%c0_92, %c0_93, %c0_94] : memref<9x128x128xf32, #tpu.memory_space<vmem>>, vector<1x128x128xf32>
    %104 = vector.shape_cast %103 : vector<1x128x128xf32> to vector<128x128xf32>
    %cst_95 = arith.constant dense<0.000000e+00> : vector<384x128xf32>
    %105 = tpu.matmul %102, %104, %cst_95 {dimension_numbers = #tpu.dot_dimension_numbers<[1], [0], [0], [1], [0, 0, 1, 1], [], []>} : vector<384x128xf32>, vector<128x128xf32>, vector<384x128xf32> -> vector<384x128xf32>
    %106 = vector.extract_strided_slice %101 {offsets = [24, 0], sizes = [384, 128], strides = [1, 1]} : vector<432x128xf32> to vector<384x128xf32>
    %c3_96 = arith.constant 3 : index
    %c0_97 = arith.constant 0 : index
    %c0_98 = arith.constant 0 : index
    %107 = vector.load %arg3[%c3_96, %c0_97, %c0_98] : memref<9x128x128xf32, #tpu.memory_space<vmem>>, vector<1x128x128xf32>
    %108 = vector.shape_cast %107 : vector<1x128x128xf32> to vector<128x128xf32>
    %cst_99 = arith.constant dense<0.000000e+00> : vector<384x128xf32>
    %109 = tpu.matmul %106, %108, %cst_99 {dimension_numbers = #tpu.dot_dimension_numbers<[1], [0], [0], [1], [0, 0, 1, 1], [], []>} : vector<384x128xf32>, vector<128x128xf32>, vector<384x128xf32> -> vector<384x128xf32>
    %110 = arith.addf %105, %109 : vector<384x128xf32>
    %111 = vector.extract_strided_slice %101 {offsets = [48, 0], sizes = [384, 128], strides = [1, 1]} : vector<432x128xf32> to vector<384x128xf32>
    %c6_100 = arith.constant 6 : index
    %c0_101 = arith.constant 0 : index
    %c0_102 = arith.constant 0 : index
    %112 = vector.load %arg3[%c6_100, %c0_101, %c0_102] : memref<9x128x128xf32, #tpu.memory_space<vmem>>, vector<1x128x128xf32>
    %113 = vector.shape_cast %112 : vector<1x128x128xf32> to vector<128x128xf32>
    %cst_103 = arith.constant dense<0.000000e+00> : vector<384x128xf32>
    %114 = tpu.matmul %111, %113, %cst_103 {dimension_numbers = #tpu.dot_dimension_numbers<[1], [0], [0], [1], [0, 0, 1, 1], [], []>} : vector<384x128xf32>, vector<128x128xf32>, vector<384x128xf32> -> vector<384x128xf32>
    %115 = arith.addf %110, %114 : vector<384x128xf32>
    %116 = vector.extract_strided_slice %101 {offsets = [0, 0], sizes = [384, 128], strides = [1, 1]} : vector<432x128xf32> to vector<384x128xf32>
    %c1_104 = arith.constant 1 : index
    %c0_105 = arith.constant 0 : index
    %c0_106 = arith.constant 0 : index
    %117 = vector.load %arg3[%c1_104, %c0_105, %c0_106] : memref<9x128x128xf32, #tpu.memory_space<vmem>>, vector<1x128x128xf32>
    %118 = vector.shape_cast %117 : vector<1x128x128xf32> to vector<128x128xf32>
    %cst_107 = arith.constant dense<0.000000e+00> : vector<384x128xf32>
    %119 = tpu.matmul %116, %118, %cst_107 {dimension_numbers = #tpu.dot_dimension_numbers<[1], [0], [0], [1], [0, 0, 1, 1], [], []>} : vector<384x128xf32>, vector<128x128xf32>, vector<384x128xf32> -> vector<384x128xf32>
    %120 = vector.extract_strided_slice %101 {offsets = [24, 0], sizes = [384, 128], strides = [1, 1]} : vector<432x128xf32> to vector<384x128xf32>
    %c4_108 = arith.constant 4 : index
    %c0_109 = arith.constant 0 : index
    %c0_110 = arith.constant 0 : index
    %121 = vector.load %arg3[%c4_108, %c0_109, %c0_110] : memref<9x128x128xf32, #tpu.memory_space<vmem>>, vector<1x128x128xf32>
    %122 = vector.shape_cast %121 : vector<1x128x128xf32> to vector<128x128xf32>
    %cst_111 = arith.constant dense<0.000000e+00> : vector<384x128xf32>
    %123 = tpu.matmul %120, %122, %cst_111 {dimension_numbers = #tpu.dot_dimension_numbers<[1], [0], [0], [1], [0, 0, 1, 1], [], []>} : vector<384x128xf32>, vector<128x128xf32>, vector<384x128xf32> -> vector<384x128xf32>
    %124 = arith.addf %119, %123 : vector<384x128xf32>
    %125 = vector.extract_strided_slice %101 {offsets = [48, 0], sizes = [384, 128], strides = [1, 1]} : vector<432x128xf32> to vector<384x128xf32>
    %c7_112 = arith.constant 7 : index
    %c0_113 = arith.constant 0 : index
    %c0_114 = arith.constant 0 : index
    %126 = vector.load %arg3[%c7_112, %c0_113, %c0_114] : memref<9x128x128xf32, #tpu.memory_space<vmem>>, vector<1x128x128xf32>
    %127 = vector.shape_cast %126 : vector<1x128x128xf32> to vector<128x128xf32>
    %cst_115 = arith.constant dense<0.000000e+00> : vector<384x128xf32>
    %128 = tpu.matmul %125, %127, %cst_115 {dimension_numbers = #tpu.dot_dimension_numbers<[1], [0], [0], [1], [0, 0, 1, 1], [], []>} : vector<384x128xf32>, vector<128x128xf32>, vector<384x128xf32> -> vector<384x128xf32>
    %129 = arith.addf %124, %128 : vector<384x128xf32>
    %c383_i32_116 = arith.constant 383 : i32
    %130 = tpu.dynamic_rotate %129 by %c383_i32_116 dim 0 : vector<384x128xf32>, i32 -> vector<384x128xf32>
    %131 = arith.addf %115, %130 : vector<384x128xf32>
    %132 = vector.extract_strided_slice %101 {offsets = [0, 0], sizes = [384, 128], strides = [1, 1]} : vector<432x128xf32> to vector<384x128xf32>
    %c2_117 = arith.constant 2 : index
    %c0_118 = arith.constant 0 : index
    %c0_119 = arith.constant 0 : index
    %133 = vector.load %arg3[%c2_117, %c0_118, %c0_119] : memref<9x128x128xf32, #tpu.memory_space<vmem>>, vector<1x128x128xf32>
    %134 = vector.shape_cast %133 : vector<1x128x128xf32> to vector<128x128xf32>
    %cst_120 = arith.constant dense<0.000000e+00> : vector<384x128xf32>
    %135 = tpu.matmul %132, %134, %cst_120 {dimension_numbers = #tpu.dot_dimension_numbers<[1], [0], [0], [1], [0, 0, 1, 1], [], []>} : vector<384x128xf32>, vector<128x128xf32>, vector<384x128xf32> -> vector<384x128xf32>
    %136 = vector.extract_strided_slice %101 {offsets = [24, 0], sizes = [384, 128], strides = [1, 1]} : vector<432x128xf32> to vector<384x128xf32>
    %c5_121 = arith.constant 5 : index
    %c0_122 = arith.constant 0 : index
    %c0_123 = arith.constant 0 : index
    %137 = vector.load %arg3[%c5_121, %c0_122, %c0_123] : memref<9x128x128xf32, #tpu.memory_space<vmem>>, vector<1x128x128xf32>
    %138 = vector.shape_cast %137 : vector<1x128x128xf32> to vector<128x128xf32>
    %cst_124 = arith.constant dense<0.000000e+00> : vector<384x128xf32>
    %139 = tpu.matmul %136, %138, %cst_124 {dimension_numbers = #tpu.dot_dimension_numbers<[1], [0], [0], [1], [0, 0, 1, 1], [], []>} : vector<384x128xf32>, vector<128x128xf32>, vector<384x128xf32> -> vector<384x128xf32>
    %140 = arith.addf %135, %139 : vector<384x128xf32>
    %141 = vector.extract_strided_slice %101 {offsets = [48, 0], sizes = [384, 128], strides = [1, 1]} : vector<432x128xf32> to vector<384x128xf32>
    %c8_125 = arith.constant 8 : index
    %c0_126 = arith.constant 0 : index
    %c0_127 = arith.constant 0 : index
    %142 = vector.load %arg3[%c8_125, %c0_126, %c0_127] : memref<9x128x128xf32, #tpu.memory_space<vmem>>, vector<1x128x128xf32>
    %143 = vector.shape_cast %142 : vector<1x128x128xf32> to vector<128x128xf32>
    %cst_128 = arith.constant dense<0.000000e+00> : vector<384x128xf32>
    %144 = tpu.matmul %141, %143, %cst_128 {dimension_numbers = #tpu.dot_dimension_numbers<[1], [0], [0], [1], [0, 0, 1, 1], [], []>} : vector<384x128xf32>, vector<128x128xf32>, vector<384x128xf32> -> vector<384x128xf32>
    %145 = arith.addf %140, %144 : vector<384x128xf32>
    %c382_i32_129 = arith.constant 382 : i32
    %146 = tpu.dynamic_rotate %145 by %c382_i32_129 dim 0 : vector<384x128xf32>, i32 -> vector<384x128xf32>
    %147 = arith.addf %131, %146 : vector<384x128xf32>
    %148 = vector.shape_cast %147 : vector<384x128xf32> to vector<16x24x128xf32>
    %149 = vector.extract_strided_slice %148 {offsets = [0, 0, 0], sizes = [16, 16, 128], strides = [1, 1, 1]} : vector<16x24x128xf32> to vector<16x16x128xf32>
    %cst_130 = arith.constant dense<0.000000e+00> : vector<16x128xf32>
    %150 = vector.multi_reduction <add>, %149, %cst_130 [1] : vector<16x16x128xf32> to vector<16x128xf32>
    %151 = vector.shape_cast %150 : vector<16x128xf32> to vector<16x1x128xf32>
    %cst_131 = arith.constant dense<0.000000e+00> : vector<1x128xf32>
    %152 = vector.multi_reduction <add>, %151, %cst_131 [0] : vector<16x1x128xf32> to vector<1x128xf32>
    %153 = vector.shape_cast %152 : vector<1x128xf32> to vector<1x1x128xf32>
    %154 = arith.mulf %149, %149 : vector<16x16x128xf32>
    %cst_132 = arith.constant dense<0.000000e+00> : vector<16x128xf32>
    %155 = vector.multi_reduction <add>, %154, %cst_132 [1] : vector<16x16x128xf32> to vector<16x128xf32>
    %156 = vector.shape_cast %155 : vector<16x128xf32> to vector<16x1x128xf32>
    %cst_133 = arith.constant dense<0.000000e+00> : vector<1x128xf32>
    %157 = vector.multi_reduction <add>, %156, %cst_133 [0] : vector<16x1x128xf32> to vector<1x128xf32>
    %158 = vector.shape_cast %157 : vector<1x128xf32> to vector<1x1x128xf32>
    %cst_134 = arith.constant 3.906250e-03 : f32
    %159 = vector.broadcast %cst_134 : f32 to vector<1x1x128xf32>
    %160 = arith.mulf %153, %159 : vector<1x1x128xf32>
    %cst_135 = arith.constant 3.906250e-03 : f32
    %161 = vector.broadcast %cst_135 : f32 to vector<1x1x128xf32>
    %162 = arith.mulf %158, %161 : vector<1x1x128xf32>
    %163 = arith.mulf %160, %160 : vector<1x1x128xf32>
    %164 = arith.subf %162, %163 : vector<1x1x128xf32>
    %cst_136 = arith.constant 0.000000e+00 : f32
    %165 = vector.broadcast %cst_136 : f32 to vector<1x1x128xf32>
    %166 = arith.maximumf %164, %165 : vector<1x1x128xf32>
    %167 = vector.broadcast %160 : vector<1x1x128xf32> to vector<16x16x128xf32>
    %168 = arith.subf %149, %167 : vector<16x16x128xf32>
    %cst_137 = arith.constant 9.99999974E-6 : f32
    %169 = vector.broadcast %cst_137 : f32 to vector<1x1x128xf32>
    %170 = arith.addf %166, %169 : vector<1x1x128xf32>
    %171 = math.rsqrt %170 : vector<1x1x128xf32>
    %172 = vector.broadcast %171 : vector<1x1x128xf32> to vector<16x16x128xf32>
    %173 = arith.mulf %168, %172 : vector<16x16x128xf32>
    %174 = arith.addf %1, %173 : vector<16x16x128xf32>
    %c0_138 = arith.constant 0 : index
    %c0_139 = arith.constant 0 : index
    %c0_140 = arith.constant 0 : index
    %c0_141 = arith.constant 0 : index
    %175 = vector.load %arg4[%c0_138, %c0_139, %c0_140, %c0_141] : memref<1x16x16x128xf32, #tpu.memory_space<vmem>>, vector<1x16x16x128xf32>
    %176 = vector.shape_cast %175 : vector<1x16x16x128xf32> to vector<16x16x128xf32>
    %177 = vector.shape_cast %174 : vector<16x16x128xf32> to vector<1x16x16x128xf32>
    tpu.vector_store %arg4[%c0_138, %c0_139, %c0_140, %c0_141], %177 {strides = array<i32>} : memref<1x16x16x128xf32, #tpu.memory_space<vmem>>, vector<1x16x16x128xf32>,
    return
  }
  func.func @transform_0(%arg0: i32) -> (i32, i32, i32, i32) {
    %c0_i32 = arith.constant 0 : i32
    %c0_i32_0 = arith.constant 0 : i32
    %c0_i32_1 = arith.constant 0 : i32
    %c0_i32_2 = arith.constant 0 : i32
    return %arg0, %c0_i32, %c0_i32_0, %c0_i32_1 : i32, i32, i32, i32
  }
  func.func @transform_1(%arg0: i32) -> (i32, i32, i32) {
    %c0_i32 = arith.constant 0 : i32
    %c0_i32_0 = arith.constant 0 : i32
    %c0_i32_1 = arith.constant 0 : i32
    %c0_i32_2 = arith.constant 0 : i32
    return %c0_i32, %c0_i32_0, %c0_i32_1 : i32, i32, i32
  }
  func.func @transform_2(%arg0: i32) -> (i32, i32, i32) {
    %c0_i32 = arith.constant 0 : i32
    %c0_i32_0 = arith.constant 0 : i32
    %c0_i32_1 = arith.constant 0 : i32
    %c0_i32_2 = arith.constant 0 : i32
    return %c0_i32, %c0_i32_0, %c0_i32_1 : i32, i32, i32
  }
  func.func @transform_3(%arg0: i32) -> (i32, i32, i32, i32) {
    %c0_i32 = arith.constant 0 : i32
    %c0_i32_0 = arith.constant 0 : i32
    %c0_i32_1 = arith.constant 0 : i32
    %c0_i32_2 = arith.constant 0 : i32
    return %arg0, %c0_i32, %c0_i32_0, %c0_i32_1 : i32, i32, i32, i32
  }
}

</mosaic_0001>

<bundles_post_ra>
// kernel: residual_block.1
= control target key start
LH: loop header
LB: loop body
LE: loop exit
PB: predicated region body
PF: predicated region fallthrough
CT: control target
= control target key end

     0   :  { %s5663_s12 = smov 0   ;;  %s9745_s0 = inlined_call_operand.vmem [shape: f32[2,16,16,128], index: 0, kind: input, shape index: {}]   ;;  %s9746_s1 = inlined_call_operand.vmem [shape: f32[9,128,128], index: 1, kind: input, shape index: {}]   ;;  %s9747_s2 = inlined_call_operand.vmem [shape: f32[9,128,128], index: 2, kind: input, shape index: {}]   ;;  %s9748_s3 = inlined_call_operand.vmem [shape: f32[2,16,16,128], index: 3, kind: output, shape index: {}]  }
   0x1 LB: > { %s5200_s13 = sadd.s32 4294967295, %s5640_s12   ;;  %p5204_p0 = scmp.ge.s32.totalorder %s5640_s12, 1  ;;  %s5640_s12 = sphi %s5663_s12, %s13_s12  }
   0x2   : > { %p137_p1 = scmp.lt.s32.totalorder %s5640_s12, 3 }
   0x4   : > { %p138_p2 = pnand %p5204_p0, %p137_p1 }
   0x6   : > { %141 = sbr.rel (%p138_p2) target bundleno = 2594 (0xa22), region = 32 }
   0xb   : > { %v5224_v0 = vld [vmem:[%s9746_s1 + $0x1f8] sm:$0xff]  ;;  %v5223_v2 = vld [vmem:[%s9746_s1 + $0x1f0] sm:$0xff]  ;;  %p161_p3 = scmp.lt.s32.totalorder %s5200_s13, 1  ;;  %v5222_v4 = vld [vmem:[%s9746_s1 + $0x1e8] sm:$0xff]  ;;  %v9749_v12 = vmov 0.0  }
   0xc   : > { %v370_v1 = vld [vmem:[%s9746_s1 + $0x78] sm:$0xff]  ;;  %5469 = vmatpush.msra.mxu2 %v5224_v0  ;;  %v369_v3 = vld [vmem:[%s9746_s1 + $0x70] sm:$0xff]  ;;  %v368_v5 = vld [vmem:[%s9746_s1 + $0x68] sm:$0xff]  ;;  %388 = vmatpush.msra.mxu0 %v5224_v0  ;;  %277 = vst [vmem:[#allocation2 + $0xea] sm:$0x3f] %v9749_v12 }
   0xd   : > { %5485 = vmatpush.msra.mxu3 %v370_v1  ;;  %533 = vmatpush.msra.mxu1 %v370_v1  ;;  %s10296_s13 = smov (!%p161_p3, %s5200_s13), 1  ;;  %v5221_v6 = vld [vmem:[%s9746_s1 + $0x1e0] sm:$0xff]  ;;  %v5220_v8 = vld [vmem:[%s9746_s1 + $0x1d8] sm:$0xff]  ;;  %v5219_v10 = vld [vmem:[%s9746_s1 + $0x1d0] sm:$0xff]  ;;  %268 = vst [vmem:[#allocation2 + $0x12] sm:$0x3f] %v9749_v12 }
   0xe   : > { %5470 = vmatpush.msra.mxu2 %v5223_v2  ;;  %v367_v7 = vld [vmem:[%s9746_s1 + $0x60] sm:$0xff]  ;;  %389 = vmatpush.msra.mxu0 %v5223_v2  ;;  %s5467_s30 = sshll.u32 %s10296_s13, 8  ;;  %v366_v9 = vld [vmem:[%s9746_s1 + $0x58] sm:$0xff]  ;;  %v365_v11 = vld [vmem:[%s9746_s1 + $0x50] sm:$0xff]  ;;  %269 = vst [vmem:[#allocation2 + $0x2a] sm:$0x3f] %v9749_v12 }
   0xf   : > { %5486 = vmatpush.msra.mxu3 %v369_v3  ;;  %534 = vmatpush.msra.mxu1 %v369_v3  ;;  %s5709_s10 = scalar_lea.vmem %s9745_s0, %s5467_s30  ;;  %v5218_v13 = vld [vmem:[%s9746_s1 + $0x1c8] sm:$0xff]  ;;  %v5217_v17 = vld [vmem:[%s9746_s1 + $0x1c0] sm:$0xff]  ;;  %v5216_v20 = vld [vmem:[%s9746_s1 + $0x1b8] sm:$0xff]  ;;  %270 = vst [vmem:[#allocation2 + $0x42] sm:$0x3f] %v9749_v12  ;;  %s9664_s24 = scalar_lea.vmem %s9748_s3, %s5467_s30 }
  0x10   : > { %5471 = vmatpush.msra.mxu2 %v5222_v4  ;;  %390 = vmatpush.msra.mxu0 %v5222_v4  ;;  %v364_v14 = vld [vmem:[%s9746_s1 + $0x48] sm:$0xff]  ;;  %v5726_v15 = vld [vmem:[%s5709_s10 + $0x80] sm:$0xff]  ;;  %v5731_v16 = vld [vmem:[%s5709_s10 + $0x70] sm:$0xff]  ;;  %271 = vst [vmem:[#allocation2 + $0x5a] sm:$0x3f] %v9749_v12 }
  0x11   : > { %5487 = vmatpush.msra.mxu3 %v368_v5  ;;  %535 = vmatpush.msra.mxu1 %v368_v5  ;;  %9842 = vst [vmem:[#allocation3_spill] sm:$0xff] %v5726_v15  ;;  %v363_v18 = vld [vmem:[%s9746_s1 + $0x40] sm:$0xff]  ;;  %v362_v21 = vld [vmem:[%s9746_s1 + $0x38] sm:$0xff]  ;;  %v5752_v22 = vld [vmem:[%s5709_s10 + $0x88] sm:$0xff] }
  0x12   : > { %5472 = vmatpush.msra.mxu2 %v5221_v6  ;;  %391 = vmatpush.msra.mxu0 %v5221_v6  ;;  %220 = vst [vmem:[#allocation2 + $0xd9] sm:$0xff] %v5726_v15  ;;  %v5741_v19 = vld [vmem:[%s5709_s10] sm:$0xff]  ;;  %v5215_v23 = vld [vmem:[%s9746_s1 + $0x1b0] sm:$0xff]  ;;  %v5214_v26 = vld [vmem:[%s9746_s1 + $0x1a8] sm:$0xff] }
  0x13   : > { %5488 = vmatpush.msra.mxu3 %v367_v7  ;;  %536 = vmatpush.msra.mxu1 %v367_v7  ;;  %9843 = vst [vmem:[#allocation4_spill] sm:$0xff] %v5731_v16  ;;  %v361_v24 = vld [vmem:[%s9746_s1 + $0x30] sm:$0xff]  ;;  %v360_v27 = vld [vmem:[%s9746_s1 + $0x28] sm:$0xff]  ;;  %v5774_v28 = vld [vmem:[%s5709_s10 + $0x78] sm:$0xff] }
  0x14   : > { %5473 = vmatpush.msra.mxu2 %v5220_v8  ;;  %392 = vmatpush.msra.mxu0 %v5220_v8  ;;  %244 = vst [vmem:[#allocation2 + $0xd7] sm:$0x2] %v5726_v15  ;;  %v5763_v25 = vld [vmem:[%s5709_s10 + $0x10] sm:$0xff]  ;;  %v5213_v29 = vld [vmem:[%s9746_s1 + $0x1a0] sm:$0xff]  ;;  %v5785_v31 = vld [vmem:[%s5709_s10 + $0x8] sm:$0xff] }
  0x15   : > { %5489 = vmatpush.msra.mxu3 %v366_v9  ;;  %537 = vmatpush.msra.mxu1 %v366_v9  ;;  %9844 = vst [vmem:[#allocation5_spill] sm:$0xff] %v5741_v19  ;;  %v359_v30 = vld [vmem:[%s9746_s1 + $0x20] sm:$0xff]  ;;  %v5212_v32 = vld [vmem:[%s9746_s1 + $0x198] sm:$0xff]  ;;  %v5211_v34 = vld [vmem:[%s9746_s1 + $0x190] sm:$0xff] }
  0x16   : > { %5474 = vmatpush.msra.mxu2 %v5219_v10  ;;  %393 = vmatpush.msra.mxu0 %v5219_v10  ;;  %218 = vst [vmem:[#allocation2 + $0xc1] sm:$0xff] %v5731_v16  ;;  %v358_v33 = vld [vmem:[%s9746_s1 + $0x18] sm:$0xff]  ;;  %v357_v35 = vld [vmem:[%s9746_s1 + $0x10] sm:$0xff]  ;;  %v5210_v36 = vld [vmem:[%s9746_s1 + $0x188] sm:$0xff] }
  0x17   : > { %5490 = vmatpush.msra.mxu3 %v365_v11  ;;  %538 = vmatpush.msra.mxu1 %v365_v11  ;;  %243 = vst [vmem:[#allocation2 + $0xbf] sm:$0x2] %v5731_v16  ;;  %v356_v37 = vld [vmem:[%s9746_s1 + $0x8] sm:$0xff]  ;;  %v5209_v38 = vld [vmem:[%s9746_s1 + $0x180] sm:$0xff]  ;;  %v5240_v42 = vld [vmem:[%s9746_s1 + $0x378] sm:$0xff] }
  0x18   : > { %5475 = vmatpush.msra.mxu2 %v5218_v13  ;;  %394 = vmatpush.msra.mxu0 %v5218_v13  ;;  %9845 = vst [vmem:[#allocation6_spill] sm:$0xff] %v5752_v22  ;;  %v355_v39 = vld [vmem:[%s9746_s1] sm:$0xff]  ;;  %v5272_v43 = vld [vmem:[%s9746_s1 + $0x278] sm:$0xff]  ;;  %v5239_v47 = vld [vmem:[%s9746_s1 + $0x370] sm:$0xff] }
  0x19   : > { %5491 = vmatpush.msra.mxu3 %v364_v14  ;;  %539 = vmatpush.msra.mxu1 %v364_v14  ;;  %204 = vst [vmem:[#allocation2 + $0x19] sm:$0xff] %v5741_v19  ;;  %v5256_v46 = vld [vmem:[%s9746_s1 + $0xf8] sm:$0xff]  ;;  %v5271_v48 = vld [vmem:[%s9746_s1 + $0x270] sm:$0xff]  ;;  %v5238_v50 = vld [vmem:[%s9746_s1 + $0x368] sm:$0xff] }
  0x1a   : > { %5476 = vmatpush.msra.mxu2 %v5217_v17  ;;  %395 = vmatpush.msra.mxu0 %v5217_v17  ;;  %236 = vst [vmem:[#allocation2 + $0x17] sm:$0x2] %v5741_v19  ;;  %v5255_v49 = vld [vmem:[%s9746_s1 + $0xf0] sm:$0xff]  ;;  %v5270_v51 = vld [vmem:[%s9746_s1 + $0x268] sm:$0xff]  ;;  %v5870_v54 = vld [vmem:[%s5709_s10 + $0x18] sm:$0xff] }
  0x1b   : > { %5492 = vmatpush.msra.mxu3 %v363_v18  ;;  %540 = vmatpush.msra.mxu1 %v363_v18  ;;  %9846 = vst [vmem:[#allocation7_spill] sm:$0xff] %v5763_v25  ;;  %v5819_v40 = vld [vmem:[#allocation2 + $0xd8] sm:$0xff]  ;;  %v5254_v55 = vld [vmem:[%s9746_s1 + $0xe8] sm:$0xff]  ;;  %v5237_v56 = vld [vmem:[%s9746_s1 + $0x360] sm:$0xff] }
  0x1c   : > { %5477 = vmatpush.msra.mxu2 %v5216_v20  ;;  %221 = vst [vmem:[#allocation2 + $0xe1] sm:$0xff] %v5752_v22  ;;  %396 = vmatpush.msra.mxu0 %v5216_v20  ;;  %v5269_v58 = vld [vmem:[%s9746_s1 + $0x260] sm:$0xff]  ;;  %v5897_v62 = vld [vmem:[%s5709_s10 + $0x90] sm:$0xff]  ;;  %v5905_v0 = vld [vmem:[%s5709_s10 + $0x98] sm:$0xff] }
  0x1d   : > { %5493 = vmatpush.msra.mxu3 %v362_v21  ;;  %541 = vmatpush.msra.mxu1 %v362_v21  ;;  %260 = vst [vmem:[#allocation2 + $0xe3] sm:$0x40] %v5752_v22  ;;  %v5253_v60 = vld [vmem:[%s9746_s1 + $0xe0] sm:$0xff]  ;;  %v5236_v4 = vld [vmem:[%s9746_s1 + $0x358] sm:$0xff]  ;;  %v5938_v8 = vld [vmem:[%s5709_s10 + $0xa8] sm:$0xff] }
  0x1e   : > { %9847 = vst [vmem:[#allocation8_spill] sm:$0xff] %v5774_v28  ;;  %5478 = vmatpush.msra.mxu2 %v5215_v23  ;;  %397 = vmatpush.msra.mxu0 %v5215_v23  ;;  %v5821_v41 = vld [vmem:[#allocation2 + $0xc0] sm:$0xff]  ;;  %v5268_v5 = vld [vmem:[%s9746_s1 + $0x258] sm:$0xff]  ;;  %v5946_v10 = vld [vmem:[%s5709_s10 + $0x28] sm:$0xff] }
  0x1f   : > { %5494 = vmatpush.msra.mxu3 %v361_v24  ;;  %206 = vst [vmem:[#allocation2 + $0x31] sm:$0xff] %v5763_v25  ;;  %542 = vmatpush.msra.mxu1 %v361_v24  ;;  %v5910_v1 = vld [vmem:[%s5709_s10 + $0xa0] sm:$0xff]  ;;  %v5252_v11 = vld [vmem:[%s9746_s1 + $0xd8] sm:$0xff]  ;;  %v5235_v13 = vld [vmem:[%s9746_s1 + $0x350] sm:$0xff] }
  0x20   : > { %237 = vst [vmem:[#allocation2 + $0x2f] sm:$0x2] %v5763_v25  ;;  %5479 = vmatpush.msra.mxu2 %v5214_v26  ;;  %398 = vmatpush.msra.mxu0 %v5214_v26  ;;  %v5932_v6 = vld [vmem:[%s5709_s10 + $0x20] sm:$0xff]  ;;  %v5267_v14 = vld [vmem:[%s9746_s1 + $0x250] sm:$0xff]  ;;  %v5988_v26 = vld [vmem:[%s5709_s10 + $0xb8] sm:$0xff] }
  0x21   : > { %9848 = vst [vmem:[#allocation9_spill] sm:$0xff] %v5785_v31  ;;  %5495 = vmatpush.msra.mxu3 %v360_v27  ;;  %543 = vmatpush.msra.mxu1 %v360_v27  ;;  %v5834_v44 = vld [vmem:[#allocation2 + $0x18] sm:$0xff]  ;;  %v5965_v18 = vld [vmem:[%s5709_s10 + $0xb0] sm:$0xff]  ;;  %v5234_v27 = vld [vmem:[%s9746_s1 + $0x348] sm:$0xff] }
  0x22   : > { %219 = vst [vmem:[#allocation2 + $0xc9] sm:$0xff] %v5774_v28  ;;  %5480 = vmatpush.msra.mxu2 %v5213_v29  ;;  %399 = vmatpush.msra.mxu0 %v5213_v29  ;;  %v5251_v21 = vld [vmem:[%s9746_s1 + $0xd0] sm:$0xff]  ;;  %v5266_v29 = vld [vmem:[%s9746_s1 + $0x248] sm:$0xff]  ;;  %v5241_v15 = vld [vmem:[%s9746_s1 + $0x80] sm:$0xff] }
  0x23   : > { %259 = vst [vmem:[#allocation2 + $0xcb] sm:$0x40] %v5774_v28  ;;  %5496 = vmatpush.msra.mxu3 %v359_v30  ;;  %544 = vmatpush.msra.mxu1 %v359_v30  ;;  %v5863_v52 = vld [vmem:[#allocation2 + $0xe0] sm:$0xff]  ;;  %v5981_v24 = vld [vmem:[%s5709_s10 + $0x30] sm:$0xff] }
  0x24   : > { %205 = vst [vmem:[#allocation2 + $0x21] sm:$0xff] %v5785_v31  ;;  %5481 = vmatpush.msra.mxu2 %v5212_v32  ;;  %400 = vmatpush.msra.mxu0 %v5212_v32  ;;  %v5878_v57 = vld [vmem:[#allocation2 + $0xe8] sm:$0xff]  ;;  %v6001_v32 = vld [vmem:[%s5709_s10 + $0x38] sm:$0xff] }
  0x25   : > { %252 = vst [vmem:[#allocation2 + $0x23] sm:$0x40] %v5785_v31  ;;  %5497 = vmatpush.msra.mxu3 %v358_v33  ;;  %545 = vmatpush.msra.mxu1 %v358_v33 }
  0x26   : > { %5482 = vmatpush.msra.mxu2 %v5211_v34  ;;  %272 = vst [vmem:[#allocation2 + $0x72] sm:$0x3f] %v9749_v12  ;;  %401 = vmatpush.msra.mxu0 %v5211_v34  ;;  %v5250_v34 = vld [vmem:[%s9746_s1 + $0xc8] sm:$0xff] }
  0x27   : > { %5498 = vmatpush.msra.mxu3 %v357_v35  ;;  %546 = vmatpush.msra.mxu1 %v357_v35  ;;  %273 = vst [vmem:[#allocation2 + $0x8a] sm:$0x3f] %v9749_v12  ;;  %v5836_v45 = vld [vmem:[#allocation2 + $0x30] sm:$0xff]  ;;  %v5233_v35 = vld [vmem:[%s9746_s1 + $0x340] sm:$0xff] }
  0x28   : > { %5483 = vmatpush.msra.mxu2 %v5210_v36  ;;  %274 = vst [vmem:[#allocation2 + $0xa2] sm:$0x3f] %v9749_v12  ;;  %402 = vmatpush.msra.mxu0 %v5210_v36  ;;  %v5265_v36 = vld [vmem:[%s9746_s1 + $0x240] sm:$0xff] }
  0x29   : > { %5499 = vmatpush.msra.mxu3 %v356_v37  ;;  %547 = vmatpush.msra.mxu1 %v356_v37  ;;  %275 = vst [vmem:[#allocation2 + $0xba] sm:$0x3f] %v9749_v12  ;;  %v5865_v53 = vld [vmem:[#allocation2 + $0xc8] sm:$0xff] }
  0x2a   : > { %5484 = vmatpush.msra.mxu2 %v5209_v38  ;;  %276 = vst [vmem:[#allocation2 + $0xd2] sm:$0x3f] %v9749_v12  ;;  %403 = vmatpush.msra.mxu0 %v5209_v38 }
  0x2b   : > { %5500 = vmatpush.msra.mxu3 %v355_v39  ;;  %468 = vmatmul.f32.vlgmr.msra.gmra.mxu2 %v5819_v40  ;;  %278 = vst [vmem:[#allocation2 + $0x102] sm:$0x3f] %v9749_v12  ;;  %v5886_v59 = vld [vmem:[#allocation2 + $0x20] sm:$0xff] }
  0x2c   : > { %613 = vmatmul.f32.vlgmr.msra.gmra.mxu3 %v5821_v41  ;;  %695 = vmatpush.msrb.mxu2 %v5240_v42  ;;  %279 = vst [vmem:[#allocation2 + $0x11a] sm:$0x3f] %v9749_v12  ;;  %v5901_v63 = vld [vmem:[#allocation2 + $0x28] sm:$0xff]  ;;  %v5249_v42 = vld [vmem:[%s9746_s1 + $0xc0] sm:$0xff] }
  0x2d   : > { %906 = vmatpush.msrb.mxu3 %v5272_v43  ;;  %548 = vmatpush.msra.mxu1 %v355_v39  ;;  %280 = vst [vmem:[#allocation2 + $0x132] sm:$0x3f] %v9749_v12 }
  0x2e   : > { %404 = vmatmul.f32.vlgmr.msra.gmra.mxu0 %v5834_v44  ;;  %549 = vmatmul.f32.vlgmr.msra.gmra.mxu1 %v5836_v45  ;;  %281 = vst [vmem:[#allocation2 + $0x14a] sm:$0x3f] %v9749_v12 }
  0x2f   : > { %1067 = vmatpush.msrb.mxu0 %v5256_v46  ;;  %696 = vmatpush.msrb.mxu2 %v5239_v47  ;;  %282 = vst [vmem:[#allocation2 + $0x162] sm:$0x3f] %v9749_v12  ;;  %v6037_v46 = vld [vmem:[%s5709_s10 + $0x40] sm:$0xff]  ;;  %v6044_v47 = vld [vmem:[%s5709_s10 + $0xc8] sm:$0xff] }
  0x30   : > { %907 = vmatpush.msrb.mxu3 %v5271_v48  ;;  %283 = vst [vmem:[#allocation2 + $0x17a] sm:$0x3f] %v9749_v12  ;;  %v5232_v48 = vld [vmem:[%s9746_s1 + $0x338] sm:$0xff] }
  0x31   : > { %284 = vst [vmem:[#allocation2 + $0x192] sm:$0x3f] %v9749_v12  ;;  %1068 = vmatpush.msrb.mxu0 %v5255_v49  ;;  %697 = vmatpush.msrb.mxu2 %v5238_v50  ;;  %v5894_v61 = vld [vmem:[#allocation2 + $0xd0] sm:$0xff]  ;;  %v5264_v49 = vld [vmem:[%s9746_s1 + $0x238] sm:$0xff] }
  0x32   : > { %9849 = vst [vmem:[#allocation10_spill] sm:$0xff] %v5870_v54  ;;  %908 = vmatpush.msrb.mxu3 %v5270_v51  ;;  %v6057_v51 = vld [vmem:[%s5709_s10 + $0x48] sm:$0xff] }
  0x33   : > { %285 = vst [vmem:[#allocation2 + $0x1aa] sm:$0x3f] %v9749_v12  ;;  %471 = vmatmul.f32.gmra.mxu2 %v5863_v52  ;;  %1069 = vmatpush.msrb.mxu0 %v5254_v55  ;;  %v5248_v55 = vld [vmem:[%s9746_s1 + $0xb8] sm:$0xff] }
  0x34   : > { %616 = vmatmul.f32.gmra.mxu3 %v5865_v53  ;;  %2735 = vst [vmem:[#allocation2 + $0xea] sm:$0x3f] %v9749_v12  ;;  %698 = vmatpush.msrb.mxu2 %v5237_v56  ;;  %v5231_v56 = vld [vmem:[%s9746_s1 + $0x330] sm:$0xff] }
  0x35   : > { %207 = vst [vmem:[#allocation2 + $0x39] sm:$0xff] %v5870_v54  ;;  %909 = vmatpush.msrb.mxu3 %v5269_v58  ;;  %1070 = vmatpush.msrb.mxu0 %v5253_v60  ;;  %v5263_v58 = vld [vmem:[%s9746_s1 + $0x230] sm:$0xff] }
  0x36   : > { %253 = vst [vmem:[#allocation2 + $0x3b] sm:$0x40] %v5870_v54  ;;  %407 = vmatmul.f32.gmra.mxu0 %v5886_v59  ;;  %699 = vmatpush.msrb.mxu2 %v5236_v4 }
  0x37   : > { %9850 = vst [vmem:[#allocation11_spill] sm:$0xff] %v5897_v62  ;;  %910 = vmatpush.msrb.mxu3 %v5268_v5  ;;  %1071 = vmatpush.msrb.mxu0 %v5252_v11  ;;  %v5247_v11 = vld [vmem:[%s9746_s1 + $0xb0] sm:$0xff] }
  0x38   : > { %2734 = vst [vmem:[#allocation2 + $0xd2] sm:$0x3f] %v9749_v12  ;;  %700 = vmatpush.msrb.mxu2 %v5235_v13 }
  0x39   : > { %9851 = vst [vmem:[#allocation12_spill] sm:$0xff] %v5901_v63  ;;  %911 = vmatpush.msrb.mxu3 %v5267_v14  ;;  %1072 = vmatpush.msrb.mxu0 %v5251_v21  ;;  %v6093_v14 = vld [vmem:[%s5709_s10 + $0x50] sm:$0xff]  ;;  %v5230_v21 = vld [vmem:[%s9746_s1 + $0x328] sm:$0xff] }
  0x3a   : > { %2727 = vst [vmem:[#allocation2 + $0x2a] sm:$0x3f] %v9749_v12  ;;  %701 = vmatpush.msrb.mxu2 %v5234_v27  ;;  %v5262_v27 = vld [vmem:[%s9746_s1 + $0x228] sm:$0xff] }
  0x3b   : > { %9852 = vst [vmem:[#allocation13_spill] sm:$0xff] %v5905_v0  ;;  %474 = vmatmul.f32.gmra.mxu2 %v5878_v57  ;;  %912 = vmatpush.msrb.mxu3 %v5266_v29 }
  0x3c   : > { %222 = vst [vmem:[#allocation2 + $0xf1] sm:$0xff] %v5897_v62  ;;  %v5914_v2 = vld [vmem:[#allocation2 + $0x38] sm:$0xff]  ;;  %619 = vmatmul.f32.gmra.mxu3 %v5894_v61  ;;  %1073 = vmatpush.msrb.mxu0 %v5250_v34 }
  0x3d   : > { %245 = vst [vmem:[#allocation2 + $0xef] sm:$0x2] %v5897_v62  ;;  %552 = vmatmul.f32.gmra.mxu1 %v5914_v2  ;;  %v5919_v3 = vld [vmem:[#allocation2 + $0x40] sm:$0xff]  ;;  %702 = vmatpush.msrb.mxu2 %v5233_v35  ;;  %v5246_v35 = vld [vmem:[%s9746_s1 + $0xa8] sm:$0xff] }
  0x3e   : > { %9853 = vst [vmem:[#allocation14_spill] sm:$0xff] %v5910_v1  ;;  %410 = vmatmul.f32.gmra.mxu0 %v5901_v63  ;;  %913 = vmatpush.msrb.mxu3 %v5265_v36  ;;  %v5229_v36 = vld [vmem:[%s9746_s1 + $0x320] sm:$0xff] }
  0x3f   : > { %223 = vst [vmem:[#allocation2 + $0xf9] sm:$0xff] %v5905_v0  ;;  %1074 = vmatpush.msrb.mxu0 %v5249_v42  ;;  %703 = vmatpush.msrb.mxu2 %v5232_v48  ;;  %v5257_v62 = vld [vmem:[%s9746_s1 + $0x200] sm:$0xff] }
  0x40   : > { %261 = vst [vmem:[#allocation2 + $0xfb] sm:$0x40] %v5905_v0  ;;  %914 = vmatpush.msrb.mxu3 %v5264_v49 }
  0x41   : > { %9854 = vst [vmem:[#allocation15_spill] sm:$0xff] %v5919_v3  ;;  %1075 = vmatpush.msrb.mxu0 %v5248_v55  ;;  %704 = vmatpush.msrb.mxu2 %v5231_v56  ;;  %v5245_v55 = vld [vmem:[%s9746_s1 + $0xa0] sm:$0xff] }
  0x42   : > { %224 = vst [vmem:[#allocation2 + $0x109] sm:$0xff] %v5910_v1  ;;  %915 = vmatpush.msrb.mxu3 %v5263_v58  ;;  %v6148_v58 = vld [vmem:[%s5709_s10 + $0x60] sm:$0xff] }
  0x43   : > { %292 = vst [vmem:[#allocation2 + $0x10] sm:$0xff] %v5919_v3  ;;  %1076 = vmatpush.msrb.mxu0 %v5247_v11  ;;  %705 = vmatpush.msrb.mxu2 %v5230_v21  ;;  %v5228_v11 = vld [vmem:[%s9746_s1 + $0x318] sm:$0xff] }
  0x44   : > { %2726 = vst [vmem:[#allocation2 + $0x12] sm:$0x3f] %v9749_v12  ;;  %v331_v7 = vld [vmem:[#allocation2 + $0xf0] sm:$0xff]  ;;  %621 = vmatmul.f32.gmra.mxu3 %v5819_v40  ;;  %v6024_v40 = vld [vmem:[%s5709_s10 + $0xc0] sm:$0xff]  ;;  %v5260_v21 = vld [vmem:[%s9746_s1 + $0x218] sm:$0xff] }
  0x45   : > { %9855 = vst [vmem:[#allocation16_spill] sm:$0xff] %v5932_v6  ;;  %476 = vmatmul.f32.gmra.mxu2 %v331_v7  ;;  %555 = vmatmul.f32.gmra.mxu1 %v5919_v3 }
  0x46   : > { %2728 = vst [vmem:[#allocation2 + $0x42] sm:$0x3f] %v9749_v12  ;;  %412 = vmatmul.f32.gmra.mxu0 %v5836_v45  ;;  %v332_v17 = vld [vmem:[#allocation2 + $0xf8] sm:$0xff]  ;;  %916 = vmatpush.msrb.mxu3 %v5262_v27 }
  0x47   : > { %246 = vst [vmem:[#allocation2 + $0x107] sm:$0x2] %v5910_v1  ;;  %v5940_v9 = vld [vmem:[#allocation2 + $0x100] sm:$0xff]  ;;  %1077 = vmatpush.msrb.mxu0 %v5246_v35  ;;  %706 = vmatpush.msrb.mxu2 %v5229_v36  ;;  %v6169_v35 = vld [vmem:[%s5709_s10 + $0x68] sm:$0xff] }
  0x48   : > { %208 = vst [vmem:[#allocation2 + $0x49] sm:$0xff] %v5932_v6 }
  0x49   : > { %9856 = vst [vmem:[#allocation17_spill] sm:$0xff] %v5938_v8  ;;  %1078 = vmatpush.msrb.mxu0 %v5245_v55  ;;  %707 = vmatpush.msrb.mxu2 %v5228_v11  ;;  %v5227_v55 = vld [vmem:[%s9746_s1 + $0x310] sm:$0xff] }
  0x4a   : > { %238 = vst [vmem:[#allocation2 + $0x47] sm:$0x2] %v5932_v6 }
  0x4b   : > { %2736 = vst [vmem:[#allocation2 + $0x102] sm:$0x3f] %v9749_v12  ;;  %708 = vmatpush.msrb.mxu2 %v5227_v55 }
  0x4c   : > { %9857 = vst [vmem:[#allocation18_spill] sm:$0xff] %v5946_v10  ;;  %624 = vmatmul.f32.gmra.mxu3 %v5863_v52 }
  0x4d   : > { %225 = vst [vmem:[#allocation2 + $0x111] sm:$0xff] %v5938_v8  ;;  %479 = vmatmul.f32.gmra.mxu2 %v332_v17  ;;  %557 = vmatmul.f32.gmra.mxu1 %v5834_v44 }
  0x4e   : > { %262 = vst [vmem:[#allocation2 + $0x113] sm:$0x40] %v5938_v8  ;;  %415 = vmatmul.f32.gmra.mxu0 %v5914_v2  ;;  %v334_v30 = vld [vmem:[#allocation2 + $0x108] sm:$0xff] }
  0x4f   : > { %209 = vst [vmem:[#allocation2 + $0x51] sm:$0xff] %v5946_v10 }
  0x50   : > { %254 = vst [vmem:[#allocation2 + $0x53] sm:$0x40] %v5946_v10 }
  0x51   : > { %9858 = vst [vmem:[#allocation19_spill] sm:$0xff] %v5965_v18  ;;  %v6004_v33 = vld [vmem:[#allocation2 + $0x48] sm:$0xff] }
  0x52   : > { %226 = vst [vmem:[#allocation2 + $0x121] sm:$0xff] %v5965_v18 }
  0x53   : > { %247 = vst [vmem:[#allocation2 + $0x11f] sm:$0x2] %v5965_v18  ;;  %v5287_v18 = vld [vmem:[%s9746_s1 + $0x3f0] sm:$0xff] }
  0x54   : > { %9860 = vst [vmem:[#allocation21_spill] sm:$0xff] %v5981_v24  ;;  %627 = vmatmul.f32.gmra.mxu3 %v5878_v57  ;;  %v335_v38 = vld [vmem:[#allocation2 + $0x110] sm:$0xff] }
  0x55   : > { %v5968_v20 = vld [vmem:[#allocation2 + $0x118] sm:$0xff]  ;;  %210 = vst [vmem:[#allocation2 + $0x61] sm:$0xff] %v5981_v24  ;;  %482 = vmatmul.f32.gmra.mxu2 %v5940_v9  ;;  %560 = vmatmul.f32.gmra.mxu1 %v5886_v59 }
  0x56   : > { %2737 = vst [vmem:[#allocation2 + $0x11a] sm:$0x3f] %v9749_v12  ;;  %418 = vmatmul.f32.gmra.mxu0 %v5919_v3  ;;  %v6021_v39 = vld [vmem:[#allocation2 + $0x50] sm:$0xff] }
  0x57   : > { %v5976_v23 = vld [vmem:[#allocation2 + $0x58] sm:$0xff]  ;;  %239 = vst [vmem:[#allocation2 + $0x5f] sm:$0x2] %v5981_v24 }
  0x58   : > { %9859 = vst [vmem:[#allocation20_spill] sm:$0xff] %v5976_v23 }
  0x59   : > { %2729 = vst [vmem:[#allocation2 + $0x5a] sm:$0x3f] %v9749_v12 }
  0x5a   : > { %9861 = vst [vmem:[#allocation22_spill] sm:$0xff] %v5988_v26  ;;  %v337_v50 = vld [vmem:[#allocation2 + $0x120] sm:$0xff] }
  0x5b   : > { %227 = vst [vmem:[#allocation2 + $0x129] sm:$0xff] %v5988_v26 }
  0x5c   : > { %263 = vst [vmem:[#allocation2 + $0x12b] sm:$0x40] %v5988_v26  ;;  %629 = vmatmul.f32.gmra.mxu3 %v331_v7  ;;  %v6080_v7 = vld [vmem:[%s5709_s10 + $0xd0] sm:$0xff] }
  0x5d   : > { %9862 = vst [vmem:[#allocation23_spill] sm:$0xff] %v6001_v32  ;;  %484 = vmatmul.f32.gmra.mxu2 %v334_v30  ;;  %563 = vmatmul.f32.gmra.mxu1 %v5901_v63 }
  0x5e   : > { %211 = vst [vmem:[#allocation2 + $0x69] sm:$0xff] %v6001_v32  ;;  %420 = vmatmul.f32.gmra.mxu0 %v6004_v33  ;;  %v6060_v52 = vld [vmem:[#allocation2 + $0x60] sm:$0xff] }
  0x5f   : > { %255 = vst [vmem:[#allocation2 + $0x6b] sm:$0x40] %v6001_v32 }
  0x60   : > { %9863 = vst [vmem:[#allocation24_spill] sm:$0xff] %v6024_v40 }
  0x61   : > { %228 = vst [vmem:[#allocation2 + $0x139] sm:$0xff] %v6024_v40 }
  0x62   : > { %248 = vst [vmem:[#allocation2 + $0x137] sm:$0x2] %v6024_v40  ;;  %v338_v4 = vld [vmem:[#allocation2 + $0x128] sm:$0xff] }
  0x63   : > { %v6018_v37 = vld [vmem:[#allocation2 + $0x130] sm:$0xff]  ;;  %9865 = vst [vmem:[#allocation26_spill] sm:$0xff] %v6037_v46 }
  0x64   : > { %2738 = vst [vmem:[#allocation2 + $0x132] sm:$0x3f] %v9749_v12  ;;  %632 = vmatmul.f32.gmra.mxu3 %v332_v17  ;;  %v6100_v17 = vld [vmem:[%s5709_s10 + $0xd8] sm:$0xff] }
  0x65   : > { %487 = vmatmul.f32.gmra.mxu2 %v335_v38  ;;  %565 = vmatmul.f32.gmra.mxu1 %v5836_v45  ;;  %212 = vst [vmem:[#allocation2 + $0x79] sm:$0xff] %v6037_v46  ;;  %v6077_v5 = vld [vmem:[#allocation2 + $0x68] sm:$0xff] }
  0x66   : > { %v6030_v43 = vld [vmem:[#allocation2 + $0x70] sm:$0xff]  ;;  %423 = vmatmul.f32.gmra.mxu0 %v6021_v39  ;;  %240 = vst [vmem:[#allocation2 + $0x77] sm:$0x2] %v6037_v46 }
  0x67   : > { %9864 = vst [vmem:[#allocation25_spill] sm:$0xff] %v6030_v43 }
  0x68   : > { %2730 = vst [vmem:[#allocation2 + $0x72] sm:$0x3f] %v9749_v12 }
  0x69   : > { %9866 = vst [vmem:[#allocation27_spill] sm:$0xff] %v6044_v47  ;;  %v340_v29 = vld [vmem:[#allocation2 + $0x138] sm:$0xff] }
  0x6a   : > { %229 = vst [vmem:[#allocation2 + $0x141] sm:$0xff] %v6044_v47 }
  0x6b   : > { %264 = vst [vmem:[#allocation2 + $0x143] sm:$0x40] %v6044_v47  ;;  %v6215_v47 = vld [vmem:[%s5709_s10 + $0xf8] sm:$0xff] }
  0x6c   : > { %635 = vmatmul.f32.gmra.mxu3 %v5940_v9  ;;  %9867 = vst [vmem:[#allocation28_spill] sm:$0xff] %v6057_v51 }
  0x6d   : > { %490 = vmatmul.f32.gmra.mxu2 %v5968_v20  ;;  %568 = vmatmul.f32.gmra.mxu1 %v5914_v2  ;;  %213 = vst [vmem:[#allocation2 + $0x81] sm:$0xff] %v6057_v51  ;;  %v6116_v34 = vld [vmem:[#allocation2 + $0x78] sm:$0xff] }
  0x6e   : > { %426 = vmatmul.f32.gmra.mxu0 %v5976_v23  ;;  %256 = vst [vmem:[#allocation2 + $0x83] sm:$0x40] %v6057_v51 }
  0x6f   : > { %9868 = vst [vmem:[#allocation29_spill] sm:$0xff] %v6080_v7 }
  0x70   : > { %230 = vst [vmem:[#allocation2 + $0x151] sm:$0xff] %v6080_v7 }
  0x71   : > { %249 = vst [vmem:[#allocation2 + $0x14f] sm:$0x2] %v6080_v7  ;;  %v341_v48 = vld [vmem:[#allocation2 + $0x140] sm:$0xff]  ;;  %v9878_v7 = vmov 0.0  }
  0x72   : > { %v6074_v60 = vld [vmem:[#allocation2 + $0x148] sm:$0xff]  ;;  %9870 = vst [vmem:[#allocation31_spill] sm:$0xff] %v6093_v14 }
  0x73   : > { %2739 = vst [vmem:[#allocation2 + $0x14a] sm:$0x3f] %v9749_v12 }
  0x74   : > { %637 = vmatmul.f32.gmra.mxu3 %v334_v30  ;;  %214 = vst [vmem:[#allocation2 + $0x91] sm:$0xff] %v6093_v14  ;;  %v6113_v30 = vld [vmem:[%s5709_s10 + $0x58] sm:$0xff]  ;;  %v6133_v49 = vld [vmem:[#allocation2 + $0x80] sm:$0xff] }
  0x75   : > { %492 = vmatmul.f32.gmra.mxu2 %v337_v50  ;;  %571 = vmatmul.f32.gmra.mxu1 %v5919_v3  ;;  %v6086_v13 = vld [vmem:[#allocation2 + $0x88] sm:$0xff]  ;;  %241 = vst [vmem:[#allocation2 + $0x8f] sm:$0x2] %v6093_v14 }
  0x76   : > { %428 = vmatmul.f32.gmra.mxu0 %v6060_v52  ;;  %9869 = vst [vmem:[#allocation30_spill] sm:$0xff] %v6086_v13 }
  0x77   : > { %2731 = vst [vmem:[#allocation2 + $0x8a] sm:$0x3f] %v9749_v12 }
  0x78   : > { %9871 = vst [vmem:[#allocation32_spill] sm:$0xff] %v6100_v17  ;;  %v343_v27 = vld [vmem:[#allocation2 + $0x150] sm:$0xff] }
  0x79   : > { %231 = vst [vmem:[#allocation2 + $0x159] sm:$0xff] %v6100_v17 }
  0x7a   : > { %265 = vst [vmem:[#allocation2 + $0x15b] sm:$0x40] %v6100_v17 }
  0x7b   : > { %9872 = vst [vmem:[#allocation33_spill] sm:$0xff] %v6113_v30 }
  0x7c   : > { %640 = vmatmul.f32.gmra.mxu3 %v335_v38  ;;  %215 = vst [vmem:[#allocation2 + $0x99] sm:$0xff] %v6113_v30  ;;  %v5261_v38 = vld [vmem:[%s9746_s1 + $0x220] sm:$0xff]  ;;  %v6172_v36 = vld [vmem:[#allocation2 + $0x90] sm:$0xff] }
  0x7d   : > { %495 = vmatmul.f32.gmra.mxu2 %v338_v4  ;;  %573 = vmatmul.f32.gmra.mxu1 %v6004_v33  ;;  %257 = vst [vmem:[#allocation2 + $0x9b] sm:$0x40] %v6113_v30 }
  0x7e   : > { %431 = vmatmul.f32.gmra.mxu0 %v6077_v5  ;;  %917 = vmatpush.msrb.mxu3 %v5261_v38  ;;  %9874 = vst [vmem:[#allocation35_spill] sm:$0xff] %v6148_v58  ;;  %v5244_v38 = vld [vmem:[%s9746_s1 + $0x98] sm:$0xff] }
  0x7f   : > { %216 = vst [vmem:[#allocation2 + $0xa9] sm:$0xff] %v6148_v58  ;;  %1079 = vmatpush.msrb.mxu0 %v5244_v38 }
  0x80   : > { %242 = vst [vmem:[#allocation2 + $0xa7] sm:$0x2] %v6148_v58  ;;  %918 = vmatpush.msrb.mxu3 %v5260_v21  ;;  %v6186_v11 = vld [vmem:[#allocation2 + $0x158] sm:$0xff]  ;;  %v5277_v58 = vld [vmem:[%s9746_s1 + $0x3a0] sm:$0xff] }
  0x81   : > { %v6130_v42 = vld [vmem:[#allocation2 + $0x160] sm:$0xff]  ;;  %9876 = vst [vmem:[#allocation37_spill] sm:$0xff] %v6169_v35 }
  0x82   : > { %2740 = vst [vmem:[#allocation2 + $0x162] sm:$0x3f] %v9749_v12 }
  0x83   : > { %217 = vst [vmem:[#allocation2 + $0xb1] sm:$0xff] %v6169_v35  ;;  %v6191_v38 = vld [vmem:[#allocation2 + $0x98] sm:$0xff] }
  0x84   : > { %643 = vmatmul.f32.gmra.mxu3 %v5968_v20  ;;  %v6145_v56 = vld [vmem:[#allocation2 + $0xa0] sm:$0xff]  ;;  %258 = vst [vmem:[#allocation2 + $0xb3] sm:$0x40] %v6169_v35 }
  0x85   : > { %498 = vmatmul.f32.gmra.mxu2 %v6018_v37  ;;  %576 = vmatmul.f32.gmra.mxu1 %v6021_v39  ;;  %2732 = vst [vmem:[#allocation2 + $0xa2] sm:$0x3f] %v9749_v12  ;;  %v6194_v12 = vld [vmem:[%s5709_s10 + $0xf0] sm:$0xff] }
  0x86   : > { %434 = vmatmul.f32.gmra.mxu0 %v6030_v43  ;;  %9877 = vst [vmem:[#allocation38_spill] sm:$0xff] %v6194_v12 }
  0x87   : > { %234 = vst [vmem:[#allocation2 + $0x181] sm:$0xff] %v6194_v12 }
  0x88   : > { %251 = vst [vmem:[#allocation2 + $0x17f] sm:$0x2] %v6194_v12 }
  0x89   : > { %9879 = vst [vmem:[#allocation39_spill] sm:$0xff] %v6215_v47 }
  0x8a   : > { %235 = vst [vmem:[#allocation2 + $0x189] sm:$0xff] %v6215_v47 }
  0x8b   : > { %v6207_v17 = vld [vmem:[#allocation2 + $0xb8] sm:$0xff]  ;;  %267 = vst [vmem:[#allocation2 + $0x18b] sm:$0x40] %v6215_v47 }
  0x8c   : > { %645 = vmatmul.f32.gmra.mxu3 %v337_v50  ;;  %v6136_v50 = vld [vmem:[%s5709_s10 + $0xe0] sm:$0xff]  ;;  %2733 = vst [vmem:[#allocation2 + $0xba] sm:$0x3f] %v9878_v7 }
  0x8d   : > { %500 = vmatmul.f32.gmra.mxu2 %v340_v29  ;;  %579 = vmatmul.f32.gmra.mxu1 %v5976_v23  ;;  %9873 = vst [vmem:[#allocation34_spill] sm:$0xff] %v6136_v50 }
  0x8e   : > { %436 = vmatmul.f32.gmra.mxu0 %v6116_v34  ;;  %232 = vst [vmem:[#allocation2 + $0x169] sm:$0xff] %v6136_v50 }
  0x8f   : > { %250 = vst [vmem:[#allocation2 + $0x167] sm:$0x2] %v6136_v50  ;;  %v349_v14 = vld [vmem:[#allocation2 + $0x180] sm:$0xff] }
  0x94   : > { %648 = vmatmul.f32.gmra.mxu3 %v338_v4  ;;  %v6155_v4 = vld [vmem:[%s5709_s10 + $0xe8] sm:$0xff] }
  0x95   : > { %503 = vmatmul.f32.gmra.mxu2 %v341_v48  ;;  %581 = vmatmul.f32.gmra.mxu1 %v6060_v52  ;;  %9875 = vst [vmem:[#allocation36_spill] sm:$0xff] %v6155_v4 }
  0x96   : > { %439 = vmatmul.f32.gmra.mxu0 %v6133_v49  ;;  %233 = vst [vmem:[#allocation2 + $0x171] sm:$0xff] %v6155_v4  ;;  %v6235_v1 = vld [vmem:[#allocation2 + $0x168] sm:$0xff] }
  0x97   : > { %266 = vst [vmem:[#allocation2 + $0x173] sm:$0x40] %v6155_v4 }
  0x9c   : > { %651 = vmatmul.f32.gmra.mxu3 %v6018_v37 }
  0x9d   : > { %506 = vmatmul.f32.gmra.mxu2 %v6074_v60  ;;  %584 = vmatmul.f32.gmra.mxu1 %v6077_v5  ;;  %v6265_v22 = vld [vmem:[#allocation2 + $0x170] sm:$0xff] }
  0x9e   : > { %442 = vmatmul.f32.gmra.mxu0 %v6086_v13  ;;  %v348_v28 = vld [vmem:[#allocation2 + $0x178] sm:$0xff] }
  0xa4   : > { %653 = vmatmul.f32.gmra.mxu3 %v340_v29  ;;  %v5259_v29 = vld [vmem:[%s9746_s1 + $0x210] sm:$0xff] }
  0xa5   : > { %508 = vmatmul.f32.gmra.mxu2 %v343_v27  ;;  %587 = vmatmul.f32.gmra.mxu1 %v6030_v43 }
  0xa6   : > { %444 = vmatmul.f32.gmra.mxu0 %v6172_v36  ;;  %919 = vmatpush.msrb.mxu3 %v5259_v29  ;;  %v5243_v29 = vld [vmem:[%s9746_s1 + $0x90] sm:$0xff] }
  0xa7   : > { %1080 = vmatpush.msrb.mxu0 %v5243_v29  ;;  %v5288_v29 = vld [vmem:[%s9746_s1 + $0x3f8] sm:$0xff] }
  0xa8   : > { %1245 = vmatpush.msrb.mxu1 %v5288_v29  ;;  %v5285_v29 = vld [vmem:[%s9746_s1 + $0x3e0] sm:$0xff] }
  0xaa   : > { %1246 = vmatpush.msrb.mxu1 %v5287_v18  ;;  %v5242_v18 = vld [vmem:[%s9746_s1 + $0x88] sm:$0xff] }
  0xab   : > { %v6189_v21 = vpop.f32.mrf.mxu0  ;;  %1081 = vmatpush.msrb.mxu0 %v5242_v18  ;;  %v6270_v18 = vld [vmem:[#allocation2 + $0x190] sm:$0xff] }
  0xac   : > { %656 = vmatmul.f32.gmra.mxu3 %v341_v48  ;;  %v6202_v48 = vpop.f32.mrf.mxu1  ;;  %9880 = vst [vmem:[#allocation40_spill] sm:$0xff] %v6270_v18 }
  0xad   : > { %511 = vmatmul.f32.gmra.mxu2 %v6186_v11  ;;  %589 = vmatmul.f32.gmra.mxu1 %v6116_v34  ;;  %2742 = vst [vmem:[#allocation2 + $0x192] sm:$0x3f] %v9878_v7 }
  0xae   : > { %v469_v4 = vpop.f32.mrf.mxu2  ;;  %447 = vmatmul.f32.gmra.mxu0 %v6191_v38 }
  0xaf   : > { %v614_v50 = vpop.f32.mrf.mxu3  ;;  %1082 = vmatpush.msrb.mxu0 %v5241_v15  ;;  %v5320_v15 = vld [vmem:[%s9746_s1 + $0x2f8] sm:$0xff] }
  0xb0   : > { %v6200_v55 = vadd.f32 %v614_v50, %v469_v4  ;;  %v5226_v50 = vld [vmem:[%s9746_s1 + $0x308] sm:$0xff] }
  0xb1   : > { %v5258_v4 = vld [vmem:[%s9746_s1 + $0x208] sm:$0xff]  ;;  %709 = vmatpush.msrb.mxu2 %v5226_v50 }
  0xb2   : > { %920 = vmatpush.msrb.mxu3 %v5258_v4  ;;  %v5286_v50 = vld [vmem:[%s9746_s1 + $0x3e8] sm:$0xff] }
  0xb3   : > { %v6212_v12 = vpop.f32.mrf.mxu0  ;;  %1247 = vmatpush.msrb.mxu1 %v5286_v50 }
  0xb4   : > { %659 = vmatmul.f32.gmra.mxu3 %v6074_v60 }
  0xb5   : > { %514 = vmatmul.f32.gmra.mxu2 %v6130_v42  ;;  %592 = vmatmul.f32.gmra.mxu1 %v6133_v49 }
  0xb6   : > { %v472_v40 = vpop.f32.mrf.mxu2  ;;  %450 = vmatmul.f32.gmra.mxu0 %v6145_v56  ;;  %1248 = vmatpush.msrb.mxu1 %v5285_v29  ;;  %v5282_v29 = vld [vmem:[%s9746_s1 + $0x3c8] sm:$0xff] }
  0xb7   : > { %v617_v26 = vpop.f32.mrf.mxu3  ;;  %921 = vmatpush.msrb.mxu3 %v5257_v62  ;;  %v5281_v62 = vld [vmem:[%s9746_s1 + $0x3c0] sm:$0xff] }
  0xb8   : > { %v6233_v8 = vadd.f32 %v617_v26, %v472_v40  ;;  %v6246_v26 = vld [vmem:[#allocation2 + $0xa8] sm:$0xff]  ;;  %v5284_v40 = vld [vmem:[%s9746_s1 + $0x3d8] sm:$0xff] }
  0xb9   : > { %1249 = vmatpush.msrb.mxu1 %v5284_v40 }
  0xba   : > { %v6240_v4 = vpop.f32.mrf.mxu1 }
  0xbb   : > { %v411_v47 = vpop.f32.mrf.mxu0 }
  0xbc   : > { %661 = vmatmul.f32.gmra.mxu3 %v343_v27  ;;  %v5283_v47 = vld [vmem:[%s9746_s1 + $0x3d0] sm:$0xff]  ;;  %v5225_v27 = vld [vmem:[%s9746_s1 + $0x300] sm:$0xff] }
  0xbd   : > { %516 = vmatmul.f32.gmra.mxu2 %v6235_v1  ;;  %595 = vmatmul.f32.gmra.mxu1 %v6086_v13 }
  0xbe   : > { %v475_v50 = vpop.f32.mrf.mxu2  ;;  %452 = vmatmul.f32.gmra.mxu0 %v6246_v26  ;;  %710 = vmatpush.msrb.mxu2 %v5225_v27 }
  0xbf   : > { %v620_v0 = vpop.f32.mrf.mxu3  ;;  %1250 = vmatpush.msrb.mxu1 %v5283_v47  ;;  %v6276_v50 = vld [vmem:[#allocation2 + $0xb0] sm:$0xff] }
  0xc0   : > { %1603 = vmatpush.msra.mxu2 %v5320_v15 }
  0xc1   : > { %1251 = vmatpush.msrb.mxu1 %v5282_v29  ;;  %v5279_v29 = vld [vmem:[%s9746_s1 + $0x3b0] sm:$0xff] }
  0xc2   : > { %v556_v0 = vpop.f32.mrf.mxu1 }
  0xc3   : > { %v6274_v40 = vpop.f32.mrf.mxu0  ;;  %1252 = vmatpush.msrb.mxu1 %v5281_v62  ;;  %v5278_v62 = vld [vmem:[%s9746_s1 + $0x3a8] sm:$0xff] }
  0xc4   : > { %664 = vmatmul.f32.gmra.mxu3 %v6186_v11  ;;  %v5280_v11 = vld [vmem:[%s9746_s1 + $0x3b8] sm:$0xff] }
  0xc5   : > { %519 = vmatmul.f32.gmra.mxu2 %v6265_v22  ;;  %597 = vmatmul.f32.gmra.mxu1 %v6172_v36 }
  0xc6   : > { %455 = vmatmul.f32.gmra.mxu0 %v6276_v50  ;;  %1253 = vmatpush.msrb.mxu1 %v5280_v11 }
  0xc7   : > { %v622_v27 = vpop.f32.mrf.mxu3 }
  0xc8   : > { %v477_v47 = vpop.f32.mrf.mxu2  ;;  %1254 = vmatpush.msrb.mxu1 %v5279_v29  ;;  %v5276_v29 = vld [vmem:[%s9746_s1 + $0x398] sm:$0xff] }
  0xc9   : > { %v6287_v0 = vadd.f32 %v622_v27, %v477_v47  ;;  %v5304_v47 = vld [vmem:[%s9746_s1 + $0x178] sm:$0xff] }
  0xca   : > { %v6292_v16 = vpop.f32.mrf.mxu1  ;;  %1764 = vmatpush.msra.mxu3 %v5304_v47  ;;  %1255 = vmatpush.msrb.mxu1 %v5278_v62  ;;  %v5275_v47 = vld [vmem:[%s9746_s1 + $0x390] sm:$0xff]  ;;  %v5336_v62 = vld [vmem:[%s9746_s1 + $0x478] sm:$0xff] }
  0xcb   : > { %v6298_v35 = vpop.f32.mrf.mxu0  ;;  %1942 = vmatpush.msra.mxu0 %v5336_v62 }
  0xcc   : > { %667 = vmatmul.f32.gmra.mxu3 %v6130_v42  ;;  %1256 = vmatpush.msrb.mxu1 %v5277_v58 }
  0xcd   : > { %522 = vmatmul.f32.gmra.mxu2 %v348_v28  ;;  %600 = vmatmul.f32.gmra.mxu1 %v6191_v38 }
  0xce   : > { %458 = vmatmul.f32.gmra.mxu0 %v6207_v17  ;;  %1257 = vmatpush.msrb.mxu1 %v5276_v29 }
  0xcf   : > { %v625_v11 = vpop.f32.mrf.mxu3 }
  0xd0   : > { %v480_v27 = vpop.f32.mrf.mxu2  ;;  %1258 = vmatpush.msrb.mxu1 %v5275_v47 }
  0xd1   : > { %v6314_v30 = vadd.f32 %v625_v11, %v480_v27 }
  0xd2   : > { %v6316_v51 = vpop.f32.mrf.mxu1 }
  0xd3   : > { %9881 = vst [vmem:[#allocation41_spill] sm:$0xff] %v6314_v30  ;;  %v419_v15 = vpop.f32.mrf.mxu0 }
  0xd4   : > { %669 = vmatmul.f32.gmra.mxu3 %v6235_v1  ;;  %v5274_v1 = vld [vmem:[%s9746_s1 + $0x388] sm:$0xff]  ;;  %v5273_v15 = vld [vmem:[%s9746_s1 + $0x380] sm:$0xff] }
  0xd5   : > { %524 = vmatmul.f32.gmra.mxu2 %v349_v14  ;;  %603 = vmatmul.f32.gmra.mxu1 %v6145_v56  ;;  %v350_v14 = vld [vmem:[#allocation2 + $0x188] sm:$0xff] }
  0xd6   : > { %460 = vmatmul.f32.gmra.mxu0 %v5821_v41  ;;  %1259 = vmatpush.msrb.mxu1 %v5274_v1  ;;  %v5303_v1 = vld [vmem:[%s9746_s1 + $0x170] sm:$0xff] }
  0xd7   : > { %v628_v27 = vpop.f32.mrf.mxu3  ;;  %1765 = vmatpush.msra.mxu3 %v5303_v1 }
  0xd8   : > { %v483_v58 = vpop.f32.mrf.mxu2  ;;  %1260 = vmatpush.msrb.mxu1 %v5273_v15 }
  0xda   : > { %v564_v11 = vpop.f32.mrf.mxu1 }
  0xdb   : > { %v6337_v29 = vpop.f32.mrf.mxu0 }
  0xdc   : > { %672 = vmatmul.f32.gmra.mxu3 %v6265_v22  ;;  %v5319_v22 = vld [vmem:[%s9746_s1 + $0x2f0] sm:$0xff] }
  0xdd   : > { %527 = vmatmul.f32.gmra.mxu2 %v350_v14  ;;  %605 = vmatmul.f32.gmra.mxu1 %v6246_v26 }
  0xde   : > { %463 = vmatmul.f32.gmra.mxu0 %v5865_v53  ;;  %1604 = vmatpush.msra.mxu2 %v5319_v22 }
  0xdf   : > { %v630_v62 = vpop.f32.mrf.mxu3 }
  0xe0   : > { %v485_v41 = vpop.f32.mrf.mxu2 }
  0xe1   : > { %v6341_v47 = vadd.f32 %v630_v62, %v485_v41  ;;  %v5335_v41 = vld [vmem:[%s9746_s1 + $0x470] sm:$0xff] }
  0xe2   : > { %v6343_v58 = vpop.f32.mrf.mxu1  ;;  %1943 = vmatpush.msra.mxu0 %v5335_v41 }
  0xe3   : > { %9882 = vst [vmem:[#allocation42_spill] sm:$0xff] %v6341_v47  ;;  %v6346_v27 = vpop.f32.mrf.mxu0 }
  0xe4   : > { %675 = vmatmul.f32.gmra.mxu3 %v348_v28 }
  0xe5   : > { %530 = vmatmul.f32.gmra.mxu2 %v6270_v18  ;;  %608 = vmatmul.f32.gmra.mxu1 %v6276_v50 }
  0xe6   : > { %466 = vmatmul.f32.gmra.mxu0 %v5894_v61 }
  0xe7   : > { %v633_v14 = vpop.f32.mrf.mxu3 }
  0xe8   : > { %v488_v53 = vpop.f32.mrf.mxu2 }
  0xe9   : > { %v6356_v11 = vadd.f32 %v633_v14, %v488_v53 }
  0xea   : > { %v6358_v28 = vpop.f32.mrf.mxu1 }
  0xeb   : > { %9883 = vst [vmem:[#allocation43_spill] sm:$0xff] %v6356_v11  ;;  %v427_v15 = vpop.f32.mrf.mxu0 }
  0xec   : > { %922 = vmatmul.f32.vlgmr.msrb.gmra.mxu3 %v5834_v44 }
  0xed   : > { %711 = vmatmul.f32.vlgmr.msrb.gmra.mxu2 %v5836_v45  ;;  %611 = vmatmul.f32.gmra.mxu1 %v6207_v17 }
  0xee   : > { %1083 = vmatmul.f32.vlgmr.msrb.gmra.mxu0 %v5836_v45 }
  0xef   : > { %v636_v22 = vpop.f32.mrf.mxu3 }
  0xf0   : > { %v491_v62 = vpop.f32.mrf.mxu2  ;;  %v5318_v22 = vld [vmem:[%s9746_s1 + $0x2e8] sm:$0xff] }
  0xf1   : > { %1605 = vmatpush.msra.mxu2 %v5318_v22  ;;  %v5334_v22 = vld [vmem:[%s9746_s1 + $0x468] sm:$0xff] }
  0xf2   : > { %v572_v1 = vpop.f32.mrf.mxu1  ;;  %1944 = vmatpush.msra.mxu0 %v5334_v22 }
  0xf3   : > { %v6369_v53 = vpop.f32.mrf.mxu0  ;;  %v5302_v1 = vld [vmem:[%s9746_s1 + $0x168] sm:$0xff] }
  0xf4   : > { %925 = vmatmul.f32.gmra.mxu3 %v5886_v59 }
  0xf5   : > { %714 = vmatmul.f32.gmra.mxu2 %v5914_v2  ;;  %1261 = vmatmul.f32.vlgmr.msrb.gmra.mxu1 %v5836_v45 }
  0xf6   : > { %1086 = vmatmul.f32.gmra.mxu0 %v5914_v2  ;;  %1766 = vmatpush.msra.mxu3 %v5302_v1 }
  0xf7   : > { %v638_v15 = vpop.f32.mrf.mxu3 }
  0xf8   : > { %v493_v14 = vpop.f32.mrf.mxu2 }
  0xf9   : > { %v6373_v46 = vadd.f32 %v638_v15, %v493_v14 }
  0xfa   : > { %v6375_v41 = vpop.f32.mrf.mxu1 }
  0xfb   : > { %9884 = vst [vmem:[#allocation44_spill] sm:$0xff] %v6373_v46  ;;  %v6379_v62 = vpop.f32.mrf.mxu0 }
  0xfc   : > { %928 = vmatmul.f32.gmra.mxu3 %v5901_v63 }
  0xfd   : > { %717 = vmatmul.f32.gmra.mxu2 %v5919_v3  ;;  %1264 = vmatmul.f32.gmra.mxu1 %v5914_v2 }
  0xfe   : > { %1089 = vmatmul.f32.gmra.mxu0 %v5919_v3 }
  0xff   : > { %v641_v15 = vpop.f32.mrf.mxu3 }
 0x100   : > { %v496_v14 = vpop.f32.mrf.mxu2 }
 0x101   : > { %v6389_v32 = vadd.f32 %v641_v15, %v496_v14 }
 0x102   : > { %v6391_v24 = vpop.f32.mrf.mxu1 }
 0x103   : > { %9885 = vst [vmem:[#allocation45_spill] sm:$0xff] %v6389_v32  ;;  %v435_v10 = vpop.f32.mrf.mxu0 }
 0x104   : > { %931 = vmatmul.f32.gmra.mxu3 %v5836_v45 }
 0x105   : > { %719 = vmatmul.f32.gmra.mxu2 %v6004_v33  ;;  %1267 = vmatmul.f32.gmra.mxu1 %v5919_v3 }
 0x106   : > { %1092 = vmatmul.f32.gmra.mxu0 %v5834_v44 }
 0x107   : > { %v644_v6 = vpop.f32.mrf.mxu3 }
 0x108   : > { %v499_v1 = vpop.f32.mrf.mxu2  ;;  %v5317_v6 = vld [vmem:[%s9746_s1 + $0x2e0] sm:$0xff] }
 0x109   : > { %1606 = vmatpush.msra.mxu2 %v5317_v6  ;;  %v5333_v6 = vld [vmem:[%s9746_s1 + $0x460] sm:$0xff] }
 0x10a   : > { %v580_v14 = vpop.f32.mrf.mxu1  ;;  %1945 = vmatpush.msra.mxu0 %v5333_v6 }
 0x10b   : > { %v6402_v15 = vpop.f32.mrf.mxu0 }
 0x10c   : > { %934 = vmatmul.f32.gmra.mxu3 %v5914_v2 }
 0x10d   : > { %722 = vmatmul.f32.gmra.mxu2 %v6021_v39  ;;  %1270 = vmatmul.f32.gmra.mxu1 %v6004_v33 }
 0x10e   : > { %1095 = vmatmul.f32.gmra.mxu0 %v5886_v59  ;;  %v5301_v59 = vld [vmem:[%s9746_s1 + $0x160] sm:$0xff] }
 0x10f   : > { %v646_v54 = vpop.f32.mrf.mxu3  ;;  %1767 = vmatpush.msra.mxu3 %v5301_v59 }
 0x110   : > { %v501_v10 = vpop.f32.mrf.mxu2 }
 0x111   : > { %v6406_v25 = vadd.f32 %v646_v54, %v501_v10 }
 0x112   : > { %v6408_v22 = vpop.f32.mrf.mxu1 }
 0x113   : > { %9886 = vst [vmem:[#allocation46_spill] sm:$0xff] %v6406_v25  ;;  %v6412_v44 = vpop.f32.mrf.mxu0 }
 0x114   : > { %937 = vmatmul.f32.gmra.mxu3 %v5919_v3 }
 0x115   : > { %725 = vmatmul.f32.gmra.mxu2 %v5976_v23  ;;  %1273 = vmatmul.f32.gmra.mxu1 %v6021_v39 }
 0x116   : > { %1098 = vmatmul.f32.gmra.mxu0 %v5901_v63 }
 0x117   : > { %v649_v1 = vpop.f32.mrf.mxu3 }
 0x118   : > { %v504_v54 = vpop.f32.mrf.mxu2 }
 0x119   : > { %v6422_v14 = vadd.f32 %v649_v1, %v504_v54 }
 0x11a   : > { %v6424_v10 = vpop.f32.mrf.mxu1 }
 0x11b   : > { %9887 = vst [vmem:[#allocation47_spill] sm:$0xff] %v6422_v14  ;;  %v443_v31 = vpop.f32.mrf.mxu0 }
 0x11c   : > { %940 = vmatmul.f32.gmra.mxu3 %v6004_v33 }
 0x11d   : > { %727 = vmatmul.f32.gmra.mxu2 %v6060_v52  ;;  %1276 = vmatmul.f32.gmra.mxu1 %v5976_v23 }
 0x11e   : > { %1101 = vmatmul.f32.gmra.mxu0 %v5836_v45  ;;  %v5316_v45 = vld [vmem:[%s9746_s1 + $0x2d8] sm:$0xff] }
 0x11f   : > { %v652_v19 = vpop.f32.mrf.mxu3  ;;  %1607 = vmatpush.msra.mxu2 %v5316_v45  ;;  %v5332_v45 = vld [vmem:[%s9746_s1 + $0x458] sm:$0xff] }
 0x120   : > { %v507_v59 = vpop.f32.mrf.mxu2  ;;  %1946 = vmatpush.msra.mxu0 %v5332_v45 }
 0x122   : > { %v588_v54 = vpop.f32.mrf.mxu1 }
 0x123   : > { %v6435_v1 = vpop.f32.mrf.mxu0 }
 0x124   : > { %943 = vmatmul.f32.gmra.mxu3 %v6021_v39 }
 0x125   : > { %730 = vmatmul.f32.gmra.mxu2 %v6077_v5  ;;  %1279 = vmatmul.f32.gmra.mxu1 %v6060_v52 }
 0x126   : > { %1104 = vmatmul.f32.gmra.mxu0 %v5914_v2  ;;  %v5300_v2 = vld [vmem:[%s9746_s1 + $0x158] sm:$0xff] }
 0x127   : > { %v654_v14 = vpop.f32.mrf.mxu3  ;;  %1768 = vmatpush.msra.mxu3 %v5300_v2 }
 0x128   : > { %v509_v31 = vpop.f32.mrf.mxu2 }
 0x129   : > { %v6439_v25 = vadd.f32 %v654_v14, %v509_v31 }
 0x12a   : > { %v6441_v6 = vpop.f32.mrf.mxu1 }
 0x12b   : > { %9888 = vst [vmem:[#allocation48_spill] sm:$0xff] %v6439_v25  ;;  %v6445_v19 = vpop.f32.mrf.mxu0 }
 0x12c   : > { %946 = vmatmul.f32.gmra.mxu3 %v5976_v23 }
 0x12d   : > { %733 = vmatmul.f32.gmra.mxu2 %v6030_v43  ;;  %1282 = vmatmul.f32.gmra.mxu1 %v6077_v5 }
 0x12e   : > { %1107 = vmatmul.f32.gmra.mxu0 %v5919_v3 }
 0x12f   : > { %v657_v59 = vpop.f32.mrf.mxu3 }
 0x130   : > { %v512_v14 = vpop.f32.mrf.mxu2 }
 0x131   : > { %v6455_v54 = vadd.f32 %v657_v59, %v512_v14 }
 0x132   : > { %v6457_v31 = vpop.f32.mrf.mxu1 }
 0x133   : > { %9889 = vst [vmem:[#allocation49_spill] sm:$0xff] %v6455_v54  ;;  %v451_v25 = vpop.f32.mrf.mxu0 }
 0x134   : > { %949 = vmatmul.f32.gmra.mxu3 %v6060_v52 }
 0x135   : > { %735 = vmatmul.f32.gmra.mxu2 %v6116_v34  ;;  %1285 = vmatmul.f32.gmra.mxu1 %v6030_v43 }
 0x136   : > { %1110 = vmatmul.f32.gmra.mxu0 %v6004_v33  ;;  %v5315_v33 = vld [vmem:[%s9746_s1 + $0x2d0] sm:$0xff] }
 0x137   : > { %v660_v32 = vpop.f32.mrf.mxu3  ;;  %1608 = vmatpush.msra.mxu2 %v5315_v33  ;;  %v5331_v33 = vld [vmem:[%s9746_s1 + $0x450] sm:$0xff] }
 0x138   : > { %v515_v2 = vpop.f32.mrf.mxu2  ;;  %1947 = vmatpush.msra.mxu0 %v5331_v33 }
 0x13a   : > { %v596_v14 = vpop.f32.mrf.mxu1 }
 0x13b   : > { %v6468_v59 = vpop.f32.mrf.mxu0 }
 0x13c   : > { %952 = vmatmul.f32.gmra.mxu3 %v6077_v5 }
 0x13d   : > { %738 = vmatmul.f32.gmra.mxu2 %v6133_v49  ;;  %1288 = vmatmul.f32.gmra.mxu1 %v6116_v34 }
 0x13e   : > { %1113 = vmatmul.f32.gmra.mxu0 %v6021_v39  ;;  %v5299_v39 = vld [vmem:[%s9746_s1 + $0x150] sm:$0xff] }
 0x13f   : > { %v662_v54 = vpop.f32.mrf.mxu3  ;;  %1769 = vmatpush.msra.mxu3 %v5299_v39 }
 0x140   : > { %v517_v25 = vpop.f32.mrf.mxu2 }
 0x141   : > { %v6472_v3 = vadd.f32 %v662_v54, %v517_v25 }
 0x142   : > { %v6474_v45 = vpop.f32.mrf.mxu1 }
 0x143   : > { %9890 = vst [vmem:[#allocation50_spill] sm:$0xff] %v6472_v3  ;;  %v6478_v32 = vpop.f32.mrf.mxu0 }
 0x144   : > { %955 = vmatmul.f32.gmra.mxu3 %v6030_v43 }
 0x145   : > { %741 = vmatmul.f32.gmra.mxu2 %v6086_v13  ;;  %1291 = vmatmul.f32.gmra.mxu1 %v6133_v49 }
 0x146   : > { %1116 = vmatmul.f32.gmra.mxu0 %v5976_v23 }
 0x147   : > { %v665_v2 = vpop.f32.mrf.mxu3 }
 0x148   : > { %v520_v54 = vpop.f32.mrf.mxu2 }
 0x149   : > { %v6488_v14 = vadd.f32 %v665_v2, %v520_v54 }
 0x14a   : > { %v6490_v25 = vpop.f32.mrf.mxu1 }
 0x14b   : > { %9891 = vst [vmem:[#allocation51_spill] sm:$0xff] %v6488_v14  ;;  %v459_v3 = vpop.f32.mrf.mxu0 }
 0x14c   : > { %958 = vmatmul.f32.gmra.mxu3 %v6116_v34 }
 0x14d   : > { %743 = vmatmul.f32.gmra.mxu2 %v6172_v36  ;;  %1294 = vmatmul.f32.gmra.mxu1 %v6086_v13 }
 0x14e   : > { %1119 = vmatmul.f32.gmra.mxu0 %v6060_v52 }
 0x14f   : > { %v668_v63 = vpop.f32.mrf.mxu3 }
 0x150   : > { %v523_v39 = vpop.f32.mrf.mxu2 }
 0x152   : > { %v604_v54 = vpop.f32.mrf.mxu1 }
 0x153   : > { %v6501_v2 = vpop.f32.mrf.mxu0 }
 0x154   : > { %961 = vmatmul.f32.gmra.mxu3 %v6133_v49 }
 0x155   : > { %746 = vmatmul.f32.gmra.mxu2 %v6191_v38  ;;  %1297 = vmatmul.f32.gmra.mxu1 %v6172_v36 }
 0x156   : > { %1122 = vmatmul.f32.gmra.mxu0 %v6077_v5  ;;  %v5314_v5 = vld [vmem:[%s9746_s1 + $0x2c8] sm:$0xff] }
 0x157   : > { %v670_v14 = vpop.f32.mrf.mxu3  ;;  %1609 = vmatpush.msra.mxu2 %v5314_v5 }
 0x158   : > { %v525_v3 = vpop.f32.mrf.mxu2 }
 0x159   : > { %v6505_v23 = vadd.f32 %v670_v14, %v525_v3  ;;  %v5298_v14 = vld [vmem:[%s9746_s1 + $0x148] sm:$0xff] }
 0x15a   : > { %v6507_v33 = vpop.f32.mrf.mxu1  ;;  %1770 = vmatpush.msra.mxu3 %v5298_v14 }
 0x15b   : > { %9892 = vst [vmem:[#allocation52_spill] sm:$0xff] %v6505_v23  ;;  %v6511_v63 = vpop.f32.mrf.mxu0 }
 0x15c   : > { %964 = vmatmul.f32.gmra.mxu3 %v6086_v13 }
 0x15d   : > { %749 = vmatmul.f32.gmra.mxu2 %v6145_v56  ;;  %1300 = vmatmul.f32.gmra.mxu1 %v6191_v38 }
 0x15e   : > { %1125 = vmatmul.f32.gmra.mxu0 %v6030_v43 }
 0x15f   : > { %v673_v39 = vpop.f32.mrf.mxu3 }
 0x160   : > { %v528_v52 = vpop.f32.mrf.mxu2 }
 0x161   : > { %v6515_v54 = vadd.f32 %v673_v39, %v528_v52 }
 0x162   : > { %v6523_v3 = vpop.f32.mrf.mxu1 }
 0x163   : > { %9893 = vst [vmem:[#allocation53_spill] sm:$0xff] %v6515_v54  ;;  %v467_v23 = vpop.f32.mrf.mxu0  ;;  %v5330_v54 = vld [vmem:[%s9746_s1 + $0x448] sm:$0xff] }
 0x164   : > { %967 = vmatmul.f32.gmra.mxu3 %v6172_v36  ;;  %1948 = vmatpush.msra.mxu0 %v5330_v54  ;;  %v1502_v54 = vlaneseq }
 0x165   : > { %751 = vmatmul.f32.gmra.mxu2 %v6246_v26  ;;  %1303 = vmatmul.f32.gmra.mxu1 %v6145_v56 }
 0x166   : > { %1128 = vmatmul.f32.gmra.mxu0 %v6116_v34 }
 0x167   : > { %v676_v39 = vpop.f32.mrf.mxu3 }
 0x168   : > { %v531_v52 = vpop.f32.mrf.mxu2 }
 0x16a   : > { %v612_v5 = vpop.f32.mrf.mxu1 }
 0x16b   : > { %v1084_v14 = vpop.f32.mrf.mxu0  ;;  %v554_v5 = vadd.f32 %v6240_v4, %v6212_v12 }
 0x16c   : > { %970 = vmatmul.f32.gmra.mxu3 %v6191_v38 }
 0x16d   : > { %754 = vmatmul.f32.gmra.mxu2 %v6276_v50  ;;  %1306 = vmatmul.f32.gmra.mxu1 %v6246_v26 }
 0x16e   : > { %1131 = vmatmul.f32.gmra.mxu0 %v6133_v49  ;;  %v6542_v49 = vshrl.u32 %v1502_v54, 7 }
 0x16f   : > { %v923_v43 = vpop.f32.mrf.mxu3 }
 0x170   : > { %v712_v23 = vpop.f32.mrf.mxu2  ;;  %v1085_v52 = vadd.f32 %v1084_v14, %v923_v43  ;;  %v5313_v43 = vld [vmem:[%s9746_s1 + $0x2c0] sm:$0xff]  ;;  %vm1504_vm0 = vcmp.lt.s32.totalorder %v6542_v49, 7  ;;  %vm2199_vm1 = vcmp.lt.s32.totalorder %v6542_v49, 6 }
 0x171   : > { %v5297_v14 = vld [vmem:[%s9746_s1 + $0x140] sm:$0xff]  ;;  %1610 = vmatpush.msra.mxu2 %v5313_v43 }
 0x172   : > { %v1262_v39 = vpop.f32.mrf.mxu1  ;;  %1771 = vmatpush.msra.mxu3 %v5297_v14  ;;  %v5329_v43 = vld [vmem:[%s9746_s1 + $0x440] sm:$0xff] }
 0x173   : > { %v1087_v34 = vpop.f32.mrf.mxu0  ;;  %v1406_v18 = vadd.f32 %v1262_v39, %v1085_v52  ;;  %1949 = vmatpush.msra.mxu0 %v5329_v43  ;;  %v5312_v43 = vld [vmem:[%s9746_s1 + $0x2b8] sm:$0xff] }
 0x174   : > { %973 = vmatmul.f32.gmra.mxu3 %v6145_v56  ;;  %1611 = vmatpush.msra.mxu2 %v5312_v43 }
 0x175   : > { %757 = vmatmul.f32.gmra.mxu2 %v6207_v17  ;;  %1309 = vmatmul.f32.gmra.mxu1 %v6276_v50 }
 0x176   : > { %1134 = vmatmul.f32.gmra.mxu0 %v6086_v13  ;;  %v551_v13 = vadd.f32 %v6202_v48, %v6189_v21 }
 0x177   : > { %v926_v11 = vpop.f32.mrf.mxu3 }
 0x178   : > { %v715_v46 = vpop.f32.mrf.mxu2  ;;  %v1088_v30 = vadd.f32 %v1087_v34, %v926_v11  ;;  %v1454_v34 = vrot.slane %v1406_v18, 1  ;;  %v840_v52 = vadd.f32 %v712_v23, %v551_v13 }
 0x179   : > { %v841_v47 = vadd.f32 %v715_v46, %v554_v5  ;;  %v6553_v46 = vld [vmem:[#allocation2 + $0xc0] sm:$0xff] }
 0x17a   : > { %v1265_v12 = vpop.f32.mrf.mxu1 }
 0x17b   : > { %v1407_v4 = vadd.f32 %v1265_v12, %v1088_v30  ;;  %v1090_v11 = vpop.f32.mrf.mxu0  ;;  %v6566_v12 = vld [vmem:[#allocation2 + $0xc8] sm:$0xff] }
 0x17c   : > { %976 = vmatmul.f32.gmra.mxu3 %v6246_v26 }
 0x17d   : > { %759 = vmatmul.f32.gmra.mxu2 %v6553_v46  ;;  %v1455_v54 = vrot.slane %v1407_v4, 1  ;;  %1312 = vmatmul.f32.gmra.mxu1 %v6207_v17 }
 0x17e   : > { %1137 = vmatmul.f32.gmra.mxu0 %v6172_v36  ;;  %v559_v36 = vadd.f32 %v6292_v16, %v6274_v40  ;;  %v562_v16 = vadd.f32 %v6316_v51, %v6298_v35  ;;  %v6590_v51 = vld [vmem:[#allocation2 + $0xd8] sm:$0xff] }
 0x17f   : > { %v1536_v30 = vsel %vm1504_vm0, %v1454_v34, %v1455_v54  ;;  %v929_v5 = vpop.f32.mrf.mxu3 }
 0x180   : > { %v718_v39 = vpop.f32.mrf.mxu2  ;;  %v6561_v21 = vadd.f32 %v1536_v30, %v840_v52  ;;  %v1091_v48 = vadd.f32 %v1090_v11, %v929_v5 }
 0x182   : > { %v1268_v18 = vpop.f32.mrf.mxu1 }
 0x183   : > { %v1408_v14 = vadd.f32 %v1268_v18, %v1091_v48  ;;  %v1093_v13 = vpop.f32.mrf.mxu0  ;;  %v5296_v18 = vld [vmem:[%s9746_s1 + $0x138] sm:$0xff] }
 0x184   : > { %979 = vmatmul.f32.gmra.mxu3 %v6276_v50 }
 0x185   : > { %762 = vmatmul.f32.gmra.mxu2 %v6566_v12  ;;  %v1456_v23 = vrot.slane %v1408_v14, 1  ;;  %1315 = vmatmul.f32.gmra.mxu1 %v6553_v46 }
 0x186   : > { %1140 = vmatmul.f32.gmra.mxu0 %v6191_v38  ;;  %1772 = vmatpush.msra.mxu3 %v5296_v18 }
 0x187   : > { %v1535_v4 = vsel %vm1504_vm0, %v1455_v54, %v1456_v23  ;;  %v932_v34 = vpop.f32.mrf.mxu3 }
 0x188   : > { %v720_v11 = vpop.f32.mrf.mxu2  ;;  %v6576_v52 = vadd.f32 %v1535_v4, %v841_v47  ;;  %v1094_v39 = vadd.f32 %v1093_v13, %v932_v34 }
 0x189   : > { %v842_v30 = vadd.f32 %v720_v11, %v559_v36 }
 0x18a   : > { %v1271_v5 = vpop.f32.mrf.mxu1 }
 0x18b   : > { %v1096_v48 = vpop.f32.mrf.mxu0  ;;  %v1409_v14 = vadd.f32 %v1271_v5, %v1094_v39 }
 0x18c   : > { %982 = vmatmul.f32.gmra.mxu3 %v6207_v17 }
 0x18d   : > { %765 = vmatmul.f32.gmra.mxu2 %v5894_v61  ;;  %1318 = vmatmul.f32.gmra.mxu1 %v6566_v12  ;;  %v1457_v36 = vrot.slane %v1409_v14, 1 }
 0x18e   : > { %1143 = vmatmul.f32.gmra.mxu0 %v6145_v56 }
 0x18f   : > { %v935_v54 = vpop.f32.mrf.mxu3 }
 0x190   : > { %v723_v40 = vpop.f32.mrf.mxu2  ;;  %v1097_v47 = vadd.f32 %v1096_v48, %v935_v54 }
 0x191   : > { %v843_v38 = vadd.f32 %v723_v40, %v562_v16  ;;  %v5328_v16 = vld [vmem:[%s9746_s1 + $0x438] sm:$0xff] }
 0x192   : > { %v1274_v13 = vpop.f32.mrf.mxu1  ;;  %1950 = vmatpush.msra.mxu0 %v5328_v16 }
 0x193   : > { %v1410_v23 = vadd.f32 %v1274_v13, %v1097_v47  ;;  %v1099_v35 = vpop.f32.mrf.mxu0  ;;  %v6603_v47 = vld [vmem:[#allocation2 + $0xe0] sm:$0xff] }
 0x194   : > { %985 = vmatmul.f32.gmra.mxu3 %v6553_v46 }
 0x195   : > { %767 = vmatmul.f32.gmra.mxu2 %v6590_v51  ;;  %v1458_v4 = vrot.slane %v1410_v23, 1  ;;  %1321 = vmatmul.f32.gmra.mxu1 %v5894_v61 }
 0x196   : > { %1146 = vmatmul.f32.gmra.mxu0 %v6246_v26  ;;  %v567_v26 = vadd.f32 %v6343_v58, %v6337_v29  ;;  %v570_v29 = vadd.f32 %v6358_v28, %v6346_v27  ;;  %v6627_v27 = vld [vmem:[#allocation2 + $0xf0] sm:$0xff] }
 0x197   : > { %v1534_v11 = vsel %vm1504_vm0, %v1457_v36, %v1458_v4  ;;  %v938_v39 = vpop.f32.mrf.mxu3 }
 0x198   : > { %v726_v34 = vpop.f32.mrf.mxu2  ;;  %v6598_v5 = vadd.f32 %v1534_v11, %v842_v30  ;;  %v1100_v48 = vadd.f32 %v1099_v35, %v938_v39  ;;  %v5311_v39 = vld [vmem:[%s9746_s1 + $0x2b0] sm:$0xff] }
 0x199   : > { %1612 = vmatpush.msra.mxu2 %v5311_v39 }
 0x19a   : > { %v1277_v40 = vpop.f32.mrf.mxu1 }
 0x19b   : > { %v1411_v54 = vadd.f32 %v1277_v40, %v1100_v48  ;;  %v1102_v43 = vpop.f32.mrf.mxu0  ;;  %v5295_v48 = vld [vmem:[%s9746_s1 + $0x130] sm:$0xff] }
 0x19c   : > { %988 = vmatmul.f32.gmra.mxu3 %v6566_v12 }
 0x19d   : > { %770 = vmatmul.f32.gmra.mxu2 %v6603_v47  ;;  %v1459_v18 = vrot.slane %v1411_v54, 1  ;;  %1324 = vmatmul.f32.gmra.mxu1 %v6590_v51 }
 0x19e   : > { %1149 = vmatmul.f32.gmra.mxu0 %v6276_v50  ;;  %1773 = vmatpush.msra.mxu3 %v5295_v48 }
 0x19f   : > { %v1533_v30 = vsel %vm1504_vm0, %v1458_v4, %v1459_v18  ;;  %v941_v13 = vpop.f32.mrf.mxu3 }
 0x1a0   : > { %v728_v14 = vpop.f32.mrf.mxu2  ;;  %v6613_v23 = vadd.f32 %v1533_v30, %v843_v38  ;;  %v1103_v36 = vadd.f32 %v1102_v43, %v941_v13 }
 0x1a1   : > { %v844_v35 = vadd.f32 %v728_v14, %v567_v26 }
 0x1a2   : > { %v1280_v11 = vpop.f32.mrf.mxu1 }
 0x1a3   : > { %v1105_v34 = vpop.f32.mrf.mxu0  ;;  %v1412_v16 = vadd.f32 %v1280_v11, %v1103_v36  ;;  %v5327_v11 = vld [vmem:[%s9746_s1 + $0x430] sm:$0xff] }
 0x1a4   : > { %991 = vmatmul.f32.gmra.mxu3 %v5894_v61  ;;  %1951 = vmatpush.msra.mxu0 %v5327_v11 }
 0x1a5   : > { %773 = vmatmul.f32.gmra.mxu2 %v5878_v57  ;;  %1327 = vmatmul.f32.gmra.mxu1 %v6603_v47  ;;  %v1460_v43 = vrot.slane %v1412_v16, 1 }
 0x1a6   : > { %1152 = vmatmul.f32.gmra.mxu0 %v6207_v17 }
 0x1a7   : > { %v944_v4 = vpop.f32.mrf.mxu3 }
 0x1a8   : > { %v731_v58 = vpop.f32.mrf.mxu2  ;;  %v1106_v38 = vadd.f32 %v1105_v34, %v944_v4 }
 0x1a9   : > { %v845_v50 = vadd.f32 %v731_v58, %v570_v29  ;;  %v6640_v58 = vld [vmem:[#allocation2 + $0xf8] sm:$0xff] }
 0x1aa   : > { %v1283_v40 = vpop.f32.mrf.mxu1 }
 0x1ab   : > { %v1413_v54 = vadd.f32 %v1283_v40, %v1106_v38  ;;  %v1108_v28 = vpop.f32.mrf.mxu0 }
 0x1ac   : > { %994 = vmatmul.f32.gmra.mxu3 %v6590_v51 }
 0x1ad   : > { %775 = vmatmul.f32.gmra.mxu2 %v6627_v27  ;;  %v1461_v18 = vrot.slane %v1413_v54, 1  ;;  %1330 = vmatmul.f32.gmra.mxu1 %v5878_v57 }
 0x1ae   : > { %1155 = vmatmul.f32.gmra.mxu0 %v6553_v46  ;;  %v575_v46 = vadd.f32 %v6375_v41, %v6369_v53  ;;  %v578_v53 = vadd.f32 %v6391_v24, %v6379_v62  ;;  %v6664_v24 = vld [vmem:[#allocation2 + $0x108] sm:$0xff] }
 0x1af   : > { %v1532_v26 = vsel %vm1504_vm0, %v1460_v43, %v1461_v18  ;;  %v947_v14 = vpop.f32.mrf.mxu3 }
 0x1b0   : > { %v734_v30 = vpop.f32.mrf.mxu2  ;;  %v6635_v13 = vadd.f32 %v1532_v26, %v844_v35  ;;  %v1109_v36 = vadd.f32 %v1108_v28, %v947_v14  ;;  %v5310_v26 = vld [vmem:[%s9746_s1 + $0x2a8] sm:$0xff] }
 0x1b1   : > { %v5294_v30 = vld [vmem:[%s9746_s1 + $0x128] sm:$0xff]  ;;  %1613 = vmatpush.msra.mxu2 %v5310_v26 }
 0x1b2   : > { %v1286_v34 = vpop.f32.mrf.mxu1  ;;  %1774 = vmatpush.msra.mxu3 %v5294_v30 }
 0x1b3   : > { %v1414_v29 = vadd.f32 %v1286_v34, %v1109_v36  ;;  %v1111_v4 = vpop.f32.mrf.mxu0 }
 0x1b4   : > { %997 = vmatmul.f32.gmra.mxu3 %v6603_v47 }
 0x1b5   : > { %778 = vmatmul.f32.gmra.mxu2 %v6640_v58  ;;  %v1462_v38 = vrot.slane %v1414_v29, 1  ;;  %1333 = vmatmul.f32.gmra.mxu1 %v6627_v27 }
 0x1b6   : > { %1158 = vmatmul.f32.gmra.mxu0 %v6566_v12 }
 0x1b7   : > { %v1531_v35 = vsel %vm1504_vm0, %v1461_v18, %v1462_v38  ;;  %v950_v48 = vpop.f32.mrf.mxu3 }
 0x1b8   : > { %v736_v39 = vpop.f32.mrf.mxu2  ;;  %v6650_v16 = vadd.f32 %v1531_v35, %v845_v50  ;;  %v1112_v54 = vadd.f32 %v1111_v4, %v950_v48  ;;  %v5326_v48 = vld [vmem:[%s9746_s1 + $0x428] sm:$0xff] }
 0x1b9   : > { %v846_v40 = vadd.f32 %v736_v39, %v575_v46  ;;  %1952 = vmatpush.msra.mxu0 %v5326_v48 }
 0x1ba   : > { %v1289_v28 = vpop.f32.mrf.mxu1 }
 0x1bb   : > { %v1114_v43 = vpop.f32.mrf.mxu0  ;;  %v1415_v14 = vadd.f32 %v1289_v28, %v1112_v54 }
 0x1bc   : > { %1000 = vmatmul.f32.gmra.mxu3 %v5878_v57 }
 0x1bd   : > { %781 = vmatmul.f32.gmra.mxu2 %v5940_v9  ;;  %1336 = vmatmul.f32.gmra.mxu1 %v6640_v58  ;;  %v1463_v34 = vrot.slane %v1415_v14, 1 }
 0x1be   : > { %1161 = vmatmul.f32.gmra.mxu0 %v5894_v61 }
 0x1bf   : > { %v953_v18 = vpop.f32.mrf.mxu3 }
 0x1c0   : > { %v739_v41 = vpop.f32.mrf.mxu2  ;;  %v1115_v50 = vadd.f32 %v1114_v43, %v953_v18  ;;  %v6677_v43 = vld [vmem:[#allocation2 + $0x110] sm:$0xff] }
 0x1c1   : > { %v847_v12 = vadd.f32 %v739_v41, %v578_v53 }
 0x1c2   : > { %v1292_v36 = vpop.f32.mrf.mxu1 }
 0x1c3   : > { %v1416_v11 = vadd.f32 %v1292_v36, %v1115_v50  ;;  %v1117_v62 = vpop.f32.mrf.mxu0 }
 0x1c4   : > { %1003 = vmatmul.f32.gmra.mxu3 %v6627_v27 }
 0x1c5   : > { %783 = vmatmul.f32.gmra.mxu2 %v6664_v24  ;;  %v1464_v29 = vrot.slane %v1416_v11, 1  ;;  %1339 = vmatmul.f32.gmra.mxu1 %v5940_v9 }
 0x1c6   : > { %1164 = vmatmul.f32.gmra.mxu0 %v6590_v51  ;;  %v583_v51 = vadd.f32 %v6408_v22, %v6402_v15  ;;  %v586_v15 = vadd.f32 %v6424_v10, %v6412_v44  ;;  %v6701_v44 = vld [vmem:[#allocation2 + $0x120] sm:$0xff] }
 0x1c7   : > { %v1530_v4 = vsel %vm1504_vm0, %v1463_v34, %v1464_v29  ;;  %v956_v46 = vpop.f32.mrf.mxu3  ;;  %v5309_v34 = vld [vmem:[%s9746_s1 + $0x2a0] sm:$0xff] }
 0x1c8   : > { %v742_v38 = vpop.f32.mrf.mxu2  ;;  %v6672_v35 = vadd.f32 %v1530_v4, %v846_v40  ;;  %v1118_v39 = vadd.f32 %v1117_v62, %v956_v46  ;;  %1614 = vmatpush.msra.mxu2 %v5309_v34 }
 0x1ca   : > { %v1295_v54 = vpop.f32.mrf.mxu1 }
 0x1cb   : > { %v1417_v28 = vadd.f32 %v1295_v54, %v1118_v39  ;;  %v1120_v53 = vpop.f32.mrf.mxu0 }
 0x1cc   : > { %1006 = vmatmul.f32.gmra.mxu3 %v6640_v58 }
 0x1cd   : > { %786 = vmatmul.f32.gmra.mxu2 %v6677_v43  ;;  %v1465_v41 = vrot.slane %v1417_v28, 1  ;;  %1342 = vmatmul.f32.gmra.mxu1 %v6664_v24 }
 0x1ce   : > { %1167 = vmatmul.f32.gmra.mxu0 %v6603_v47 }
 0x1cf   : > { %v1529_v40 = vsel %vm1504_vm0, %v1464_v29, %v1465_v41  ;;  %v959_v50 = vpop.f32.mrf.mxu3  ;;  %v5293_v29 = vld [vmem:[%s9746_s1 + $0x120] sm:$0xff] }
 0x1d0   : > { %v744_v18 = vpop.f32.mrf.mxu2  ;;  %v6687_v26 = vadd.f32 %v1529_v40, %v847_v12  ;;  %v1121_v14 = vadd.f32 %v1120_v53, %v959_v50  ;;  %1775 = vmatpush.msra.mxu3 %v5293_v29  ;;  %v5325_v40 = vld [vmem:[%s9746_s1 + $0x420] sm:$0xff] }
 0x1d1   : > { %v848_v30 = vadd.f32 %v744_v18, %v583_v51  ;;  %1953 = vmatpush.msra.mxu0 %v5325_v40 }
 0x1d2   : > { %v1298_v36 = vpop.f32.mrf.mxu1 }
 0x1d3   : > { %v1123_v11 = vpop.f32.mrf.mxu0  ;;  %v1418_v4 = vadd.f32 %v1298_v36, %v1121_v14  ;;  %v6714_v14 = vld [vmem:[#allocation2 + $0x128] sm:$0xff] }
 0x1d4   : > { %1009 = vmatmul.f32.gmra.mxu3 %v5940_v9 }
 0x1d5   : > { %789 = vmatmul.f32.gmra.mxu2 %v5968_v20  ;;  %1345 = vmatmul.f32.gmra.mxu1 %v6677_v43  ;;  %v1466_v39 = vrot.slane %v1418_v4, 1 }
 0x1d6   : > { %1170 = vmatmul.f32.gmra.mxu0 %v5878_v57 }
 0x1d7   : > { %v962_v62 = vpop.f32.mrf.mxu3 }
 0x1d8   : > { %v747_v22 = vpop.f32.mrf.mxu2  ;;  %v1124_v12 = vadd.f32 %v1123_v11, %v962_v62 }
 0x1d9   : > { %v849_v47 = vadd.f32 %v747_v22, %v586_v15 }
 0x1da   : > { %v1301_v38 = vpop.f32.mrf.mxu1 }
 0x1db   : > { %v1419_v46 = vadd.f32 %v1301_v38, %v1124_v12  ;;  %v1126_v10 = vpop.f32.mrf.mxu0 }
 0x1dc   : > { %1012 = vmatmul.f32.gmra.mxu3 %v6664_v24 }
 0x1dd   : > { %791 = vmatmul.f32.gmra.mxu2 %v6701_v44  ;;  %v1467_v48 = vrot.slane %v1419_v46, 1  ;;  %1348 = vmatmul.f32.gmra.mxu1 %v5968_v20  ;;  %v5308_v46 = vld [vmem:[%s9746_s1 + $0x298] sm:$0xff] }
 0x1de   : > { %1173 = vmatmul.f32.gmra.mxu0 %v6627_v27  ;;  %v591_v27 = vadd.f32 %v6441_v6, %v6435_v1  ;;  %v594_v1 = vadd.f32 %v6457_v31, %v6445_v19  ;;  %1615 = vmatpush.msra.mxu2 %v5308_v46  ;;  %v6738_v19 = vld [vmem:[#allocation2 + $0x138] sm:$0xff] }
 0x1df   : > { %v1528_v54 = vsel %vm1504_vm0, %v1466_v39, %v1467_v48  ;;  %v965_v53 = vpop.f32.mrf.mxu3 }
 0x1e0   : > { %v750_v28 = vpop.f32.mrf.mxu2  ;;  %v6709_v41 = vadd.f32 %v1528_v54, %v848_v30  ;;  %v1127_v51 = vadd.f32 %v1126_v10, %v965_v53  ;;  %v5292_v10 = vld [vmem:[%s9746_s1 + $0x118] sm:$0xff] }
 0x1e1   : > { %1776 = vmatpush.msra.mxu3 %v5292_v10 }
 0x1e2   : > { %v1304_v18 = vpop.f32.mrf.mxu1 }
 0x1e3   : > { %v1420_v50 = vadd.f32 %v1304_v18, %v1127_v51  ;;  %v1129_v36 = vpop.f32.mrf.mxu0 }
 0x1e4   : > { %1015 = vmatmul.f32.gmra.mxu3 %v6677_v43 }
 0x1e5   : > { %794 = vmatmul.f32.gmra.mxu2 %v6714_v14  ;;  %v1468_v11 = vrot.slane %v1420_v50, 1  ;;  %1351 = vmatmul.f32.gmra.mxu1 %v6701_v44 }
 0x1e6   : > { %1176 = vmatmul.f32.gmra.mxu0 %v6640_v58 }
 0x1e7   : > { %v1527_v30 = vsel %vm1504_vm0, %v1467_v48, %v1468_v11  ;;  %v968_v22 = vpop.f32.mrf.mxu3  ;;  %v5324_v11 = vld [vmem:[%s9746_s1 + $0x418] sm:$0xff] }
 0x1e8   : > { %v752_v15 = vpop.f32.mrf.mxu2  ;;  %v6724_v62 = vadd.f32 %v1527_v30, %v849_v47  ;;  %v1130_v34 = vadd.f32 %v1129_v36, %v968_v22  ;;  %1954 = vmatpush.msra.mxu0 %v5324_v11 }
 0x1e9   : > { %v850_v12 = vadd.f32 %v752_v15, %v591_v27  ;;  %v6751_v15 = vld [vmem:[#allocation2 + $0x140] sm:$0xff] }
 0x1ea   : > { %v1307_v29 = vpop.f32.mrf.mxu1 }
 0x1eb   : > { %v1132_v4 = vpop.f32.mrf.mxu0  ;;  %v1421_v39 = vadd.f32 %v1307_v29, %v1130_v34 }
 0x1ec   : > { %1018 = vmatmul.f32.gmra.mxu3 %v5968_v20 }
 0x1ed   : > { %797 = vmatmul.f32.gmra.mxu2 %v6018_v37  ;;  %1354 = vmatmul.f32.gmra.mxu1 %v6714_v14  ;;  %v1469_v28 = vrot.slane %v1421_v39, 1  ;;  %v5307_v39 = vld [vmem:[%s9746_s1 + $0x290] sm:$0xff] }
 0x1ee   : > { %1179 = vmatmul.f32.gmra.mxu0 %v5940_v9  ;;  %1616 = vmatpush.msra.mxu2 %v5307_v39  ;;  %v5306_v39 = vld [vmem:[%s9746_s1 + $0x288] sm:$0xff] }
 0x1ef   : > { %v971_v38 = vpop.f32.mrf.mxu3 }
 0x1f0   : > { %v755_v6 = vpop.f32.mrf.mxu2  ;;  %v1133_v47 = vadd.f32 %v1132_v4, %v971_v38  ;;  %1617 = vmatpush.msra.mxu2 %v5306_v39 }
 0x1f1   : > { %v851_v58 = vadd.f32 %v755_v6, %v594_v1 }
 0x1f2   : > { %v1310_v48 = vpop.f32.mrf.mxu1 }
 0x1f3   : > { %v1422_v54 = vadd.f32 %v1310_v48, %v1133_v47  ;;  %v1135_v31 = vpop.f32.mrf.mxu0  ;;  %v5291_v48 = vld [vmem:[%s9746_s1 + $0x110] sm:$0xff] }
 0x1f4   : > { %1021 = vmatmul.f32.gmra.mxu3 %v6701_v44 }
 0x1f5   : > { %799 = vmatmul.f32.gmra.mxu2 %v6738_v19  ;;  %v1470_v53 = vrot.slane %v1422_v54, 1  ;;  %1357 = vmatmul.f32.gmra.mxu1 %v6018_v37 }
 0x1f6   : > { %1182 = vmatmul.f32.gmra.mxu0 %v6664_v24  ;;  %v599_v24 = vadd.f32 %v6474_v45, %v6468_v59  ;;  %v602_v59 = vadd.f32 %v6490_v25, %v6478_v32  ;;  %1777 = vmatpush.msra.mxu3 %v5291_v48  ;;  %v6775_v32 = vld [vmem:[#allocation2 + $0x150] sm:$0xff]  ;;  %v5290_v48 = vld [vmem:[%s9746_s1 + $0x108] sm:$0xff] }
 0x1f7   : > { %v1526_v51 = vsel %vm1504_vm0, %v1469_v28, %v1470_v53  ;;  %v974_v18 = vpop.f32.mrf.mxu3 }
 0x1f8   : > { %v758_v40 = vpop.f32.mrf.mxu2  ;;  %v6746_v50 = vadd.f32 %v1526_v51, %v850_v12  ;;  %v1136_v36 = vadd.f32 %v1135_v31, %v974_v18  ;;  %1778 = vmatpush.msra.mxu3 %v5290_v48 }
 0x1fa   : > { %v1313_v27 = vpop.f32.mrf.mxu1 }
 0x1fb   : > { %v1423_v30 = vadd.f32 %v1313_v27, %v1136_v36  ;;  %v1138_v22 = vpop.f32.mrf.mxu0 }
 0x1fc   : > { %1024 = vmatmul.f32.gmra.mxu3 %v6714_v14 }
 0x1fd   : > { %802 = vmatmul.f32.gmra.mxu2 %v6751_v15  ;;  %v1471_v34 = vrot.slane %v1423_v30, 1  ;;  %1360 = vmatmul.f32.gmra.mxu1 %v6738_v19  ;;  %v5323_v30 = vld [vmem:[%s9746_s1 + $0x410] sm:$0xff] }
 0x1fe   : > { %1185 = vmatmul.f32.gmra.mxu0 %v6677_v43 }
 0x1ff   : > { %v1525_v12 = vsel %vm1504_vm0, %v1470_v53, %v1471_v34  ;;  %v977_v4 = vpop.f32.mrf.mxu3  ;;  %1955 = vmatpush.msra.mxu0 %v5323_v30  ;;  %v5322_v30 = vld [vmem:[%s9746_s1 + $0x408] sm:$0xff] }
 0x200   : > { %v760_v29 = vpop.f32.mrf.mxu2  ;;  %v6761_v1 = vadd.f32 %v1525_v12, %v851_v58  ;;  %v1139_v38 = vadd.f32 %v1138_v22, %v977_v4 }
 0x201   : > { %v852_v6 = vadd.f32 %v760_v29, %v599_v24  ;;  %v6788_v24 = vld [vmem:[#allocation2 + $0x158] sm:$0xff]  ;;  %1956 = vmatpush.msra.mxu0 %v5322_v30 }
 0x202   : > { %v1316_v47 = vpop.f32.mrf.mxu1 }
 0x203   : > { %v1141_v46 = vpop.f32.mrf.mxu0  ;;  %v1424_v54 = vadd.f32 %v1316_v47, %v1139_v38 }
 0x204   : > { %1027 = vmatmul.f32.gmra.mxu3 %v6018_v37 }
 0x205   : > { %805 = vmatmul.f32.gmra.mxu2 %v6074_v60  ;;  %1363 = vmatmul.f32.gmra.mxu1 %v6751_v15  ;;  %v1472_v53 = vrot.slane %v1424_v54, 1 }
 0x206   : > { %1188 = vmatmul.f32.gmra.mxu0 %v5968_v20 }
 0x207   : > { %v980_v10 = vpop.f32.mrf.mxu3 }
 0x208   : > { %v763_v45 = vpop.f32.mrf.mxu2  ;;  %v1142_v58 = vadd.f32 %v1141_v46, %v980_v10 }
 0x209   : > { %v853_v43 = vadd.f32 %v763_v45, %v602_v59 }
 0x20a   : > { %v1319_v31 = vpop.f32.mrf.mxu1 }
 0x20b   : > { %v1425_v28 = vadd.f32 %v1319_v31, %v1142_v58  ;;  %v1144_v25 = vpop.f32.mrf.mxu0 }
 0x20c   : > { %1030 = vmatmul.f32.gmra.mxu3 %v6738_v19 }
 0x20d   : > { %807 = vmatmul.f32.gmra.mxu2 %v6775_v32  ;;  %v1473_v51 = vrot.slane %v1425_v28, 1  ;;  %1366 = vmatmul.f32.gmra.mxu1 %v6074_v60 }
 0x20e   : > { %1191 = vmatmul.f32.gmra.mxu0 %v6701_v44  ;;  %v607_v44 = vadd.f32 %v6507_v33, %v6501_v2  ;;  %v610_v2 = vadd.f32 %v6523_v3, %v6511_v63  ;;  %v6812_v63 = vld [vmem:[#allocation2 + $0x168] sm:$0xff] }
 0x20f   : > { %v1524_v40 = vsel %vm1504_vm0, %v1472_v53, %v1473_v51  ;;  %v983_v36 = vpop.f32.mrf.mxu3 }
 0x210   : > { %v766_v18 = vpop.f32.mrf.mxu2  ;;  %v6783_v11 = vadd.f32 %v1524_v40, %v852_v6  ;;  %v1145_v27 = vadd.f32 %v1144_v25, %v983_v36 }
 0x212   : > { %v1322_v22 = vpop.f32.mrf.mxu1 }
 0x213   : > { %v1426_v34 = vadd.f32 %v1322_v22, %v1145_v27  ;;  %v1147_v12 = vpop.f32.mrf.mxu0 }
 0x214   : > { %1033 = vmatmul.f32.gmra.mxu3 %v6751_v15 }
 0x215   : > { %810 = vmatmul.f32.gmra.mxu2 %v6788_v24  ;;  %v1474_v29 = vrot.slane %v1426_v34, 1  ;;  %1369 = vmatmul.f32.gmra.mxu1 %v6775_v32 }
 0x216   : > { %1194 = vmatmul.f32.gmra.mxu0 %v6714_v14 }
 0x217   : > { %v1523_v4 = vsel %vm1504_vm0, %v1473_v51, %v1474_v29  ;;  %v986_v38 = vpop.f32.mrf.mxu3 }
 0x218   : > { %v768_v6 = vpop.f32.mrf.mxu2  ;;  %v6798_v47 = vadd.f32 %v1523_v4, %v853_v43  ;;  %v1148_v59 = vadd.f32 %v1147_v12, %v986_v38  ;;  %v6825_v12 = vld [vmem:[#allocation2 + $0x170] sm:$0xff] }
 0x219   : > { %v854_v46 = vadd.f32 %v768_v6, %v607_v44 }
 0x21a   : > { %v1325_v45 = vpop.f32.mrf.mxu1 }
 0x21b   : > { %v1150_v10 = vpop.f32.mrf.mxu0  ;;  %v1427_v54 = vadd.f32 %v1325_v45, %v1148_v59 }
 0x21c   : > { %1036 = vmatmul.f32.gmra.mxu3 %v6074_v60 }
 0x21d   : > { %813 = vmatmul.f32.gmra.mxu2 %v6130_v42  ;;  %1372 = vmatmul.f32.gmra.mxu1 %v6788_v24  ;;  %v1475_v25 = vrot.slane %v1427_v54, 1 }
 0x21e   : > { %1197 = vmatmul.f32.gmra.mxu0 %v6018_v37 }
 0x21f   : > { %v989_v58 = vpop.f32.mrf.mxu3 }
 0x220   : > { %v771_v33 = vpop.f32.mrf.mxu2  ;;  %v1151_v43 = vadd.f32 %v1150_v10, %v989_v58  ;;  %v6836_v10 = vld [vmem:[#allocation2 + $0x178] sm:$0xff] }
 0x221   : > { %v855_v14 = vadd.f32 %v771_v33, %v610_v2 }
 0x222   : > { %v1328_v31 = vpop.f32.mrf.mxu1 }
 0x223   : > { %v1428_v28 = vadd.f32 %v1328_v31, %v1151_v43  ;;  %v1153_v3 = vpop.f32.mrf.mxu0  ;;  %v5289_v43 = vld [vmem:[%s9746_s1 + $0x100] sm:$0xff] }
 0x224   : > { %1039 = vmatmul.f32.gmra.mxu3 %v6775_v32  ;;  %v5531_v31 = vld [vmem:[#allocation2 + $0x180] sm:$0xff] }
 0x225   : > { %815 = vmatmul.f32.gmra.mxu2 %v6812_v63  ;;  %v1476_v53 = vrot.slane %v1428_v28, 1  ;;  %1375 = vmatmul.f32.gmra.mxu1 %v6130_v42 }
 0x226   : > { %1200 = vmatmul.f32.gmra.mxu0 %v6738_v19  ;;  %1779 = vmatpush.msra.mxu3 %v5289_v43  ;;  %v9895_v43 = vld [vmem:[#allocation41_spill] sm:$0xff] }
 0x227   : > { %v1522_v51 = vsel %vm1504_vm0, %v1475_v25, %v1476_v53  ;;  %v992_v18 = vpop.f32.mrf.mxu3 }
 0x228   : > { %v774_v40 = vpop.f32.mrf.mxu2  ;;  %v6820_v36 = vadd.f32 %v1522_v51, %v854_v46  ;;  %v1154_v27 = vadd.f32 %v1153_v3, %v992_v18 }
 0x22a   : > { %v1331_v22 = vpop.f32.mrf.mxu1 }
 0x22b   : > { %v1429_v34 = vadd.f32 %v1331_v22, %v1154_v27  ;;  %v1156_v29 = vpop.f32.mrf.mxu0  ;;  %v5321_v27 = vld [vmem:[%s9746_s1 + $0x400] sm:$0xff] }
 0x22c   : > { %1042 = vmatmul.f32.gmra.mxu3 %v6788_v24  ;;  %1957 = vmatpush.msra.mxu0 %v5321_v27  ;;  %v295_v27 = vld [vmem:[#allocation2 + $0x170] sm:$0xff] }
 0x22d   : > { %818 = vmatmul.f32.gmra.mxu2 %v6825_v12  ;;  %v1477_v44 = vrot.slane %v1429_v34, 1  ;;  %1378 = vmatmul.f32.gmra.mxu1 %v6812_v63  ;;  %v5532_v34 = vld [vmem:[#allocation2 + $0x188] sm:$0xff] }
 0x22e   : > { %1203 = vmatmul.f32.gmra.mxu0 %v6751_v15 }
 0x22f   : > { %v1521_v19 = vsel %vm1504_vm0, %v1476_v53, %v1477_v44  ;;  %v995_v6 = vpop.f32.mrf.mxu3  ;;  %v6860_v44 = vld [vmem:[#allocation2 + $0x178] sm:$0xff] }
 0x230   : > { %v776_v4 = vpop.f32.mrf.mxu2  ;;  %v6833_v38 = vadd.f32 %v1521_v19, %v855_v14  ;;  %v1157_v59 = vadd.f32 %v1156_v29, %v995_v6  ;;  %300 = vst [vmem:[#allocation2 + $0x1a8] sm:$0xff] %v6860_v44 }
 0x231   : > { %v856_v46 = vadd.f32 %v776_v4, %v6200_v55  ;;  %v5305_v55 = vld [vmem:[%s9746_s1 + $0x280] sm:$0xff]  ;;  %2741 = vst [vmem:[#allocation2 + $0x17a] sm:$0x3f] %v9878_v7 }
 0x232   : > { %v1334_v45 = vpop.f32.mrf.mxu1  ;;  %1618 = vmatpush.msra.mxu2 %v5305_v55  ;;  %2743 = vst [vmem:[#allocation2 + $0x1aa] sm:$0x3f] %v9878_v7 }
 0x233   : > { %v1159_v2 = vpop.f32.mrf.mxu0  ;;  %v1430_v39 = vadd.f32 %v1334_v45, %v1157_v59 }
 0x234   : > { %1045 = vmatmul.f32.gmra.mxu3 %v6130_v42 }
 0x235   : > { %821 = vmatmul.f32.gmra.mxu2 %v6836_v10  ;;  %1381 = vmatmul.f32.gmra.mxu1 %v6825_v12 }
 0x236   : > { %1206 = vmatmul.f32.gmra.mxu0 %v6074_v60 }
 0x237   : > { %v998_v58 = vpop.f32.mrf.mxu3 }
 0x238   : > { %v779_v33 = vpop.f32.mrf.mxu2  ;;  %v1160_v14 = vadd.f32 %v1159_v2, %v998_v58 }
 0x239   : > { %v857_v15 = vadd.f32 %v779_v33, %v6233_v8  ;;  %v1478_v8 = vrot.slane %v1430_v39, 1  ;;  %v9894_v33 = vld [vmem:[#allocation40_spill] sm:$0xff] }
 0x23a   : > { %v1337_v48 = vpop.f32.mrf.mxu1 }
 0x23b   : > { %v1431_v54 = vadd.f32 %v1337_v48, %v1160_v14  ;;  %v1162_v28 = vpop.f32.mrf.mxu0 }
 0x23c   : > { %1048 = vmatmul.f32.gmra.mxu3 %v6812_v63 }
 0x23d   : > { %823 = vmatmul.f32.gmra.mxu2 %v5531_v31  ;;  %v1479_v3 = vrot.slane %v1431_v54, 1  ;;  %1384 = vmatmul.f32.gmra.mxu1 %v6836_v10 }
 0x23e   : > { %1209 = vmatmul.f32.gmra.mxu0 %v6775_v32 }
 0x23f   : > { %v1520_v25 = vsel %vm1504_vm0, %v1478_v8, %v1479_v3  ;;  %v1001_v51 = vpop.f32.mrf.mxu3 }
 0x240   : > { %v782_v53 = vpop.f32.mrf.mxu2  ;;  %v6854_v40 = vadd.f32 %v1520_v25, %v856_v46  ;;  %v1163_v18 = vadd.f32 %v1162_v28, %v1001_v51 }
 0x242   : > { %v1340_v30 = vpop.f32.mrf.mxu1 }
 0x243   : > { %v1432_v22 = vadd.f32 %v1340_v30, %v1163_v18  ;;  %v1165_v29 = vpop.f32.mrf.mxu0 }
 0x244   : > { %1051 = vmatmul.f32.gmra.mxu3 %v6825_v12 }
 0x245   : > { %826 = vmatmul.f32.gmra.mxu2 %v5532_v34  ;;  %v1480_v19 = vrot.slane %v1432_v22, 1  ;;  %1387 = vmatmul.f32.gmra.mxu1 %v5531_v31 }
 0x246   : > { %1212 = vmatmul.f32.gmra.mxu0 %v6788_v24 }
 0x247   : > { %v1519_v32 = vsel %vm1504_vm0, %v1479_v3, %v1480_v19  ;;  %v1004_v6 = vpop.f32.mrf.mxu3 }
 0x248   : > { %v784_v4 = vpop.f32.mrf.mxu2  ;;  %v6868_v46 = vadd.f32 %v1519_v32, %v857_v15  ;;  %v1166_v45 = vadd.f32 %v1165_v29, %v1004_v6  ;;  %v294_v15 = vld [vmem:[#allocation2 + $0x168] sm:$0xff] }
 0x249   : > { %v858_v59 = vadd.f32 %v784_v4, %v6287_v0 }
 0x24a   : > { %v1343_v2 = vpop.f32.mrf.mxu1 }
 0x24b   : > { %v1168_v58 = vpop.f32.mrf.mxu0  ;;  %v1433_v7 = vadd.f32 %v1343_v2, %v1166_v45 }
 0x24c   : > { %1054 = vmatmul.f32.gmra.mxu3 %v6836_v10 }
 0x24d   : > { %829 = vmatmul.f32.gmra.mxu2 %v9894_v33  ;;  %1390 = vmatmul.f32.gmra.mxu1 %v5532_v34  ;;  %v1481_v28 = vrot.slane %v1433_v7, 1 }
 0x24e   : > { %1215 = vmatmul.f32.gmra.mxu0 %v6130_v42 }
 0x24f   : > { %v1007_v55 = vpop.f32.mrf.mxu3 }
 0x250   : > { %v787_v14 = vpop.f32.mrf.mxu2  ;;  %v1169_v39 = vadd.f32 %v1168_v58, %v1007_v55  ;;  %v9899_v55 = vld [vmem:[#allocation43_spill] sm:$0xff] }
 0x251   : > { %v859_v24 = vadd.f32 %v787_v14, %v9895_v43 }
 0x252   : > { %v1346_v48 = vpop.f32.mrf.mxu1 }
 0x253   : > { %v1434_v54 = vadd.f32 %v1346_v48, %v1169_v39  ;;  %v1171_v0 = vpop.f32.mrf.mxu0  ;;  %v6891_v48 = vld [vmem:[#allocation2 + $0x30] sm:$0xff] }
 0x254   : > { %1057 = vmatmul.f32.gmra.mxu3 %v5531_v31 }
 0x255   : > { %831 = vmatmul.f32.gmra.mxu2 %v294_v15  ;;  %v1482_v8 = vrot.slane %v1434_v54, 1  ;;  %1393 = vmatmul.f32.gmra.mxu1 %v9894_v33 }
 0x256   : > { %1218 = vmatmul.f32.gmra.mxu0 %v6812_v63  ;;  %v9898_v63 = vld [vmem:[#allocation42_spill] sm:$0xff] }
 0x257   : > { %v1518_v3 = vsel %vm1504_vm0, %v1481_v28, %v1482_v8  ;;  %v1010_v53 = vpop.f32.mrf.mxu3 }
 0x258   : > { %v790_v25 = vpop.f32.mrf.mxu2  ;;  %v6879_v51 = vadd.f32 %v1518_v3, %v858_v59  ;;  %v1172_v18 = vadd.f32 %v1171_v0, %v1010_v53 }
 0x25a   : > { %9896 = vst [vmem:[#allocation40_spill] sm:$0xff] %v6879_v51  ;;  %v1349_v30 = vpop.f32.mrf.mxu1 }
 0x25b   : > { %v1435_v22 = vadd.f32 %v1349_v30, %v1172_v18  ;;  %v1174_v31 = vpop.f32.mrf.mxu0 }
 0x25c   : > { %1060 = vmatmul.f32.gmra.mxu3 %v5532_v34 }
 0x25d   : > { %834 = vmatmul.f32.gmra.mxu2 %v295_v27  ;;  %v1483_v29 = vrot.slane %v1435_v22, 1  ;;  %1396 = vmatmul.f32.gmra.mxu1 %v294_v15  ;;  %v5533_v15 = vld [vmem:[#allocation2 + $0x18] sm:$0xff]  ;;  %v5535_v22 = vld [vmem:[#allocation2 + $0x20] sm:$0xff] }
 0x25e   : > { %1221 = vmatmul.f32.gmra.mxu0 %v6825_v12 }
 0x25f   : > { %v1517_v19 = vsel %vm1504_vm0, %v1482_v8, %v1483_v29  ;;  %v1013_v4 = vpop.f32.mrf.mxu3 }
 0x260   : > { %v792_v32 = vpop.f32.mrf.mxu2  ;;  %v6884_v6 = vadd.f32 %v1517_v19, %v859_v24  ;;  %v1175_v45 = vadd.f32 %v1174_v31, %v1013_v4  ;;  %v6900_v31 = vld [vmem:[#allocation2 + $0x38] sm:$0xff] }
 0x261   : > { %v860_v59 = vadd.f32 %v792_v32, %v9898_v63 }
 0x262   : > { %9897 = vst [vmem:[#allocation41_spill] sm:$0xff] %v6884_v6  ;;  %v1352_v2 = vpop.f32.mrf.mxu1 }
 0x263   : > { %v1177_v34 = vpop.f32.mrf.mxu0  ;;  %v1436_v12 = vadd.f32 %v1352_v2, %v1175_v45  ;;  %v9902_v45 = vld [vmem:[#allocation44_spill] sm:$0xff] }
 0x264   : > { %1063 = vmatmul.f32.gmra.mxu3 %v9894_v33 }
 0x265   : > { %837 = vmatmul.f32.gmra.mxu2 %v6860_v44  ;;  %1399 = vmatmul.f32.gmra.mxu1 %v295_v27  ;;  %v1484_v0 = vrot.slane %v1436_v12, 1 }
 0x266   : > { %1224 = vmatmul.f32.gmra.mxu0 %v6836_v10 }
 0x267   : > { %v1016_v14 = vpop.f32.mrf.mxu3 }
 0x268   : > { %v795_v58 = vpop.f32.mrf.mxu2  ;;  %v1178_v39 = vadd.f32 %v1177_v34, %v1016_v14  ;;  %v9903_v14 = vld [vmem:[#allocation12_spill] sm:$0xff] }
 0x269   : > { %v861_v43 = vadd.f32 %v795_v58, %v9899_v55  ;;  %v9904_v55 = vld [vmem:[#allocation15_spill] sm:$0xff] }
 0x26a   : > { %v1355_v24 = vpop.f32.mrf.mxu1 }
 0x26b   : > { %v1437_v7 = vadd.f32 %v1355_v24, %v1178_v39  ;;  %v1180_v54 = vpop.f32.mrf.mxu0 }
 0x26c   : > { %1780 = vmatmul.f32.vlgmr.msra.gmra.mxu3 %v6891_v48 }
 0x26d   : > { %1619 = vmatmul.f32.vlgmr.msra.gmra.mxu2 %v5533_v15  ;;  %v1485_v28 = vrot.slane %v1437_v7, 1  ;;  %1402 = vmatmul.f32.gmra.mxu1 %v6860_v44  ;;  %v9905_v7 = vld [vmem:[#allocation45_spill] sm:$0xff] }
 0x26e   : > { %1958 = vmatmul.f32.vlgmr.msra.gmra.mxu0 %v6891_v48 }
 0x26f   : > { %v1516_v8 = vsel %vm1504_vm0, %v1484_v0, %v1485_v28  ;;  %v1019_v25 = vpop.f32.mrf.mxu3 }
 0x270   : > { %v798_v3 = vpop.f32.mrf.mxu2  ;;  %v6898_v53 = vadd.f32 %v1516_v8, %v860_v59  ;;  %v1181_v18 = vadd.f32 %v1180_v54, %v1019_v25 }
 0x272   : > { %9900 = vst [vmem:[#allocation42_spill] sm:$0xff] %v6898_v53  ;;  %v1358_v27 = vpop.f32.mrf.mxu1 }
 0x273   : > { %v1438_v30 = vadd.f32 %v1358_v27, %v1181_v18  ;;  %v1183_v29 = vpop.f32.mrf.mxu0 }
 0x274   : > { %1783 = vmatmul.f32.gmra.mxu3 %v6900_v31 }
 0x275   : > { %1622 = vmatmul.f32.gmra.mxu2 %v5535_v22  ;;  %v1486_v19 = vrot.slane %v1438_v30, 1 }
 0x276   : > { %1961 = vmatmul.f32.gmra.mxu0 %v6900_v31 }
 0x277   : > { %v1515_v32 = vsel %vm1504_vm0, %v1485_v28, %v1486_v19  ;;  %v1022_v63 = vpop.f32.mrf.mxu3  ;;  %v6916_v19 = vld [vmem:[#allocation2 + $0x48] sm:$0xff] }
 0x278   : > { %v800_v4 = vpop.f32.mrf.mxu2  ;;  %v6906_v59 = vadd.f32 %v1515_v32, %v861_v43  ;;  %v1184_v34 = vadd.f32 %v1183_v29, %v1022_v63 }
 0x279   : > { %v862_v2 = vadd.f32 %v800_v4, %v9902_v45 }
 0x27a   : > { %9901 = vst [vmem:[#allocation43_spill] sm:$0xff] %v6906_v59  ;;  %v1361_v58 = vpop.f32.mrf.mxu1 }
 0x27b   : > { %v1186_v39 = vpop.f32.mrf.mxu0  ;;  %v1439_v28 = vadd.f32 %v1361_v58, %v1184_v34 }
 0x27c   : > { %1786 = vmatmul.f32.gmra.mxu3 %v9904_v55 }
 0x27d   : > { %1625 = vmatmul.f32.gmra.mxu2 %v9903_v14  ;;  %v1487_v25 = vrot.slane %v1439_v28, 1 }
 0x27e   : > { %1964 = vmatmul.f32.gmra.mxu0 %v9904_v55 }
 0x27f   : > { %v1025_v24 = vpop.f32.mrf.mxu3 }
 0x280   : > { %v803_v12 = vpop.f32.mrf.mxu2  ;;  %v1187_v0 = vadd.f32 %v1186_v39, %v1025_v24  ;;  %v6924_v24 = vld [vmem:[#allocation2 + $0x50] sm:$0xff] }
 0x281   : > { %v863_v54 = vadd.f32 %v803_v12, %v9905_v7 }
 0x282   : > { %v1364_v8 = vpop.f32.mrf.mxu1 }
 0x283   : > { %v1440_v43 = vadd.f32 %v1364_v8, %v1187_v0  ;;  %v1189_v3 = vpop.f32.mrf.mxu0 }
 0x284   : > { %1789 = vmatmul.f32.gmra.mxu3 %v5533_v15 }
 0x285   : > { %1628 = vmatmul.f32.gmra.mxu2 %v6891_v48  ;;  %v1488_v18 = vrot.slane %v1440_v43, 1 }
 0x286   : > { %1967 = vmatmul.f32.gmra.mxu0 %v6916_v19 }
 0x287   : > { %v1514_v27 = vsel %vm1504_vm0, %v1487_v25, %v1488_v18  ;;  %v1028_v29 = vpop.f32.mrf.mxu3  ;;  %v9909_v25 = vld [vmem:[#allocation20_spill] sm:$0xff] }
 0x288   : > { %v806_v30 = vpop.f32.mrf.mxu2  ;;  %v6919_v32 = vadd.f32 %v1514_v27, %v862_v2  ;;  %v1190_v4 = vadd.f32 %v1189_v3, %v1028_v29  ;;  %v9908_v2 = vld [vmem:[#allocation46_spill] sm:$0xff] }
 0x28a   : > { %9906 = vst [vmem:[#allocation44_spill] sm:$0xff] %v6919_v32  ;;  %v1367_v63 = vpop.f32.mrf.mxu1 }
 0x28b   : > { %v1441_v45 = vadd.f32 %v1367_v63, %v1190_v4  ;;  %v1192_v15 = vpop.f32.mrf.mxu0 }
 0x28c   : > { %1792 = vmatmul.f32.gmra.mxu3 %v5535_v22 }
 0x28d   : > { %1631 = vmatmul.f32.gmra.mxu2 %v6900_v31  ;;  %v1489_v34 = vrot.slane %v1441_v45, 1 }
 0x28e   : > { %1970 = vmatmul.f32.gmra.mxu0 %v6924_v24 }
 0x28f   : > { %v1513_v58 = vsel %vm1504_vm0, %v1488_v18, %v1489_v34  ;;  %v1031_v12 = vpop.f32.mrf.mxu3  ;;  %v9910_v18 = vld [vmem:[#allocation47_spill] sm:$0xff] }
 0x290   : > { %v808_v39 = vpop.f32.mrf.mxu2  ;;  %v6927_v7 = vadd.f32 %v1513_v58, %v863_v54  ;;  %v1193_v28 = vadd.f32 %v1192_v15, %v1031_v12 }
 0x291   : > { %v864_v0 = vadd.f32 %v808_v39, %v9908_v2  ;;  %v6938_v39 = vld [vmem:[#allocation2 + $0x60] sm:$0xff] }
 0x292   : > { %9907 = vst [vmem:[#allocation12_spill] sm:$0xff] %v6927_v7  ;;  %v1370_v8 = vpop.f32.mrf.mxu1 }
 0x293   : > { %v1195_v22 = vpop.f32.mrf.mxu0  ;;  %v1442_v29 = vadd.f32 %v1370_v8, %v1193_v28 }
 0x294   : > { %1795 = vmatmul.f32.gmra.mxu3 %v9903_v14 }
 0x295   : > { %1634 = vmatmul.f32.gmra.mxu2 %v9904_v55  ;;  %v1490_v45 = vrot.slane %v1442_v29, 1  ;;  %v9913_v29 = vld [vmem:[#allocation48_spill] sm:$0xff] }
 0x296   : > { %1973 = vmatmul.f32.gmra.mxu0 %v9909_v25 }
 0x297   : > { %v1034_v3 = vpop.f32.mrf.mxu3 }
 0x298   : > { %v811_v43 = vpop.f32.mrf.mxu2  ;;  %v1196_v30 = vadd.f32 %v1195_v22, %v1034_v3 }
 0x299   : > { %v865_v27 = vadd.f32 %v811_v43, %v9910_v18 }
 0x29a   : > { %v1373_v4 = vpop.f32.mrf.mxu1 }
 0x29b   : > { %v1443_v54 = vadd.f32 %v1373_v4, %v1196_v30  ;;  %v1198_v63 = vpop.f32.mrf.mxu0  ;;  %v6947_v30 = vld [vmem:[#allocation2 + $0x68] sm:$0xff] }
 0x29c   : > { %1798 = vmatmul.f32.gmra.mxu3 %v6891_v48 }
 0x29d   : > { %1637 = vmatmul.f32.gmra.mxu2 %v6916_v19  ;;  %v1491_v15 = vrot.slane %v1443_v54, 1 }
 0x29e   : > { %1976 = vmatmul.f32.gmra.mxu0 %v6938_v39 }
 0x29f   : > { %v1512_v14 = vsel %vm1504_vm0, %v1490_v45, %v1491_v15  ;;  %v1037_v58 = vpop.f32.mrf.mxu3 }
 0x2a0   : > { %v814_v34 = vpop.f32.mrf.mxu2  ;;  %v6941_v12 = vadd.f32 %v1512_v14, %v864_v0  ;;  %v1199_v2 = vadd.f32 %v1198_v63, %v1037_v58 }
 0x2a1   : > { %v9915_v34 = vld [vmem:[#allocation49_spill] sm:$0xff] }
 0x2a2   : > { %9911 = vst [vmem:[#allocation15_spill] sm:$0xff] %v6941_v12  ;;  %v1376_v28 = vpop.f32.mrf.mxu1  ;;  %v7007_v12 = vld [vmem:[#allocation2 + $0xa8] sm:$0xff] }
 0x2a3   : > { %v1444_v8 = vadd.f32 %v1376_v28, %v1199_v2  ;;  %v1201_v48 = vpop.f32.mrf.mxu0 }
 0x2a4   : > { %1801 = vmatmul.f32.gmra.mxu3 %v6900_v31 }
 0x2a5   : > { %1640 = vmatmul.f32.gmra.mxu2 %v6924_v24  ;;  %v1492_v22 = vrot.slane %v1444_v8, 1 }
 0x2a6   : > { %1979 = vmatmul.f32.gmra.mxu0 %v6947_v30 }
 0x2a7   : > { %v1511_v43 = vsel %vm1504_vm0, %v1491_v15, %v1492_v22  ;;  %v1040_v18 = vpop.f32.mrf.mxu3  ;;  %v9914_v15 = vld [vmem:[#allocation25_spill] sm:$0xff] }
 0x2a8   : > { %v816_v3 = vpop.f32.mrf.mxu2  ;;  %v6950_v0 = vadd.f32 %v1511_v43, %v865_v27  ;;  %v1202_v54 = vadd.f32 %v1201_v48, %v1040_v18 }
 0x2a9   : > { %v866_v4 = vadd.f32 %v816_v3, %v9913_v29  ;;  %v6961_v29 = vld [vmem:[#allocation2 + $0x78] sm:$0xff] }
 0x2aa   : > { %9912 = vst [vmem:[#allocation45_spill] sm:$0xff] %v6950_v0  ;;  %v1379_v63 = vpop.f32.mrf.mxu1 }
 0x2ab   : > { %v1204_v31 = vpop.f32.mrf.mxu0  ;;  %v1445_v28 = vadd.f32 %v1379_v63, %v1202_v54 }
 0x2ac   : > { %1804 = vmatmul.f32.gmra.mxu3 %v9904_v55 }
 0x2ad   : > { %1643 = vmatmul.f32.gmra.mxu2 %v9909_v25  ;;  %v1493_v22 = vrot.slane %v1445_v28, 1 }
 0x2ae   : > { %1982 = vmatmul.f32.gmra.mxu0 %v9914_v15 }
 0x2af   : > { %v1043_v14 = vpop.f32.mrf.mxu3 }
 0x2b0   : > { %v819_v45 = vpop.f32.mrf.mxu2  ;;  %v1205_v2 = vadd.f32 %v1204_v31, %v1043_v14 }
 0x2b1   : > { %v867_v58 = vadd.f32 %v819_v45, %v9915_v34 }
 0x2b2   : > { %v1382_v8 = vpop.f32.mrf.mxu1 }
 0x2b3   : > { %v1446_v27 = vadd.f32 %v1382_v8, %v1205_v2  ;;  %v1207_v48 = vpop.f32.mrf.mxu0  ;;  %v6970_v8 = vld [vmem:[#allocation2 + $0x80] sm:$0xff] }
 0x2b4   : > { %1807 = vmatmul.f32.gmra.mxu3 %v6916_v19 }
 0x2b5   : > { %1646 = vmatmul.f32.gmra.mxu2 %v6938_v39  ;;  %v1494_v43 = vrot.slane %v1446_v27, 1  ;;  %v9918_v27 = vld [vmem:[#allocation50_spill] sm:$0xff] }
 0x2b6   : > { %1985 = vmatmul.f32.gmra.mxu0 %v6961_v29 }
 0x2b7   : > { %v1510_v55 = vsel %vm1504_vm0, %v1493_v22, %v1494_v43  ;;  %v1046_v18 = vpop.f32.mrf.mxu3 }
 0x2b8   : > { %v822_v3 = vpop.f32.mrf.mxu2  ;;  %v6964_v31 = vadd.f32 %v1510_v55, %v866_v4  ;;  %v1208_v54 = vadd.f32 %v1207_v48, %v1046_v18 }
 0x2ba   : > { %9916 = vst [vmem:[#allocation46_spill] sm:$0xff] %v6964_v31  ;;  %v1385_v63 = vpop.f32.mrf.mxu1 }
 0x2bb   : > { %v1447_v45 = vadd.f32 %v1385_v63, %v1208_v54  ;;  %v1210_v19 = vpop.f32.mrf.mxu0  ;;  %v9920_v54 = vld [vmem:[#allocation51_spill] sm:$0xff] }
 0x2bc   : > { %1810 = vmatmul.f32.gmra.mxu3 %v6924_v24 }
 0x2bd   : > { %1649 = vmatmul.f32.gmra.mxu2 %v6947_v30  ;;  %v1495_v14 = vrot.slane %v1447_v45, 1 }
 0x2be   : > { %1988 = vmatmul.f32.gmra.mxu0 %v6970_v8 }
 0x2bf   : > { %v1509_v34 = vsel %vm1504_vm0, %v1494_v43, %v1495_v14  ;;  %v1049_v28 = vpop.f32.mrf.mxu3  ;;  %v9919_v43 = vld [vmem:[#allocation30_spill] sm:$0xff] }
 0x2c0   : > { %v824_v2 = vpop.f32.mrf.mxu2  ;;  %v6973_v4 = vadd.f32 %v1509_v34, %v867_v58  ;;  %v1211_v22 = vadd.f32 %v1210_v19, %v1049_v28 }
 0x2c1   : > { %v868_v48 = vadd.f32 %v824_v2, %v9918_v27 }
 0x2c2   : > { %9917 = vst [vmem:[#allocation20_spill] sm:$0xff] %v6973_v4  ;;  %v1388_v55 = vpop.f32.mrf.mxu1  ;;  %v6984_v4 = vld [vmem:[#allocation2 + $0x90] sm:$0xff] }
 0x2c3   : > { %v1213_v24 = vpop.f32.mrf.mxu0  ;;  %v1448_v14 = vadd.f32 %v1388_v55, %v1211_v22 }
 0x2c4   : > { %1813 = vmatmul.f32.gmra.mxu3 %v9909_v25 }
 0x2c5   : > { %1652 = vmatmul.f32.gmra.mxu2 %v9914_v15  ;;  %v1496_v34 = vrot.slane %v1448_v14, 1  ;;  %v6993_v14 = vld [vmem:[#allocation2 + $0x98] sm:$0xff] }
 0x2c6   : > { %1991 = vmatmul.f32.gmra.mxu0 %v9919_v43 }
 0x2c7   : > { %v1052_v18 = vpop.f32.mrf.mxu3 }
 0x2c8   : > { %v827_v3 = vpop.f32.mrf.mxu2  ;;  %v1214_v45 = vadd.f32 %v1213_v24, %v1052_v18 }
 0x2c9   : > { %v869_v63 = vadd.f32 %v827_v3, %v9920_v54 }
 0x2ca   : > { %v1391_v31 = vpop.f32.mrf.mxu1 }
 0x2cb   : > { %v1449_v58 = vadd.f32 %v1391_v31, %v1214_v45  ;;  %v1216_v19 = vpop.f32.mrf.mxu0 }
 0x2cc   : > { %1816 = vmatmul.f32.gmra.mxu3 %v6938_v39 }
 0x2cd   : > { %1655 = vmatmul.f32.gmra.mxu2 %v6961_v29  ;;  %v1497_v2 = vrot.slane %v1449_v58, 1  ;;  %v9923_v58 = vld [vmem:[#allocation52_spill] sm:$0xff] }
 0x2ce   : > { %1994 = vmatmul.f32.gmra.mxu0 %v6984_v4 }
 0x2cf   : > { %v1508_v25 = vsel %vm1504_vm0, %v1496_v34, %v1497_v2  ;;  %v1055_v27 = vpop.f32.mrf.mxu3 }
 0x2d0   : > { %v830_v28 = vpop.f32.mrf.mxu2  ;;  %v6987_v24 = vadd.f32 %v1508_v25, %v868_v48  ;;  %v1217_v22 = vadd.f32 %v1216_v19, %v1055_v27 }
 0x2d2   : > { %9921 = vst [vmem:[#allocation47_spill] sm:$0xff] %v6987_v24  ;;  %v1394_v31 = vpop.f32.mrf.mxu1 }
 0x2d3   : > { %v1450_v55 = vadd.f32 %v1394_v31, %v1217_v22  ;;  %v1219_v39 = vpop.f32.mrf.mxu0 }
 0x2d4   : > { %1819 = vmatmul.f32.gmra.mxu3 %v6947_v30 }
 0x2d5   : > { %1658 = vmatmul.f32.gmra.mxu2 %v6970_v8  ;;  %v1498_v3 = vrot.slane %v1450_v55, 1 }
 0x2d6   : > { %1997 = vmatmul.f32.gmra.mxu0 %v6993_v14 }
 0x2d7   : > { %v1507_v18 = vsel %vm1504_vm0, %v1497_v2, %v1498_v3  ;;  %v1058_v45 = vpop.f32.mrf.mxu3  ;;  %v9924_v2 = vld [vmem:[#allocation53_spill] sm:$0xff] }
 0x2d8   : > { %v832_v54 = vpop.f32.mrf.mxu2  ;;  %v6996_v48 = vadd.f32 %v1507_v18, %v869_v63  ;;  %v1220_v34 = vadd.f32 %v1219_v39, %v1058_v45 }
 0x2d9   : > { %v870_v19 = vadd.f32 %v832_v54, %v9923_v58 }
 0x2da   : > { %9922 = vst [vmem:[#allocation48_spill] sm:$0xff] %v6996_v48  ;;  %v1397_v25 = vpop.f32.mrf.mxu1 }
 0x2db   : > { %v1222_v30 = vpop.f32.mrf.mxu0  ;;  %v1451_v55 = vadd.f32 %v1397_v25, %v1220_v34 }
 0x2dc   : > { %1822 = vmatmul.f32.gmra.mxu3 %v9914_v15 }
 0x2dd   : > { %1661 = vmatmul.f32.gmra.mxu2 %v9919_v43  ;;  %v1499_v18 = vrot.slane %v1451_v55, 1 }
 0x2de   : > { %2000 = vmatmul.f32.gmra.mxu0 %v6145_v56 }
 0x2df   : > { %v1061_v27 = vpop.f32.mrf.mxu3 }
 0x2e0   : > { %v835_v28 = vpop.f32.mrf.mxu2  ;;  %v1223_v31 = vadd.f32 %v1222_v30, %v1061_v27 }
 0x2e1   : > { %v871_v22 = vadd.f32 %v835_v28, %v9924_v2 }
 0x2e2   : > { %v1400_v3 = vpop.f32.mrf.mxu1 }
 0x2e3   : > { %v1452_v63 = vadd.f32 %v1400_v3, %v1223_v31  ;;  %v1225_v39 = vpop.f32.mrf.mxu0  ;;  %v7016_v3 = vld [vmem:[#allocation2 + $0xb0] sm:$0xff] }
 0x2e4   : > { %1825 = vmatmul.f32.gmra.mxu3 %v6961_v29 }
 0x2e5   : > { %1664 = vmatmul.f32.gmra.mxu2 %v6984_v4  ;;  %v1500_v54 = vrot.slane %v1452_v63, 1 }
 0x2e6   : > { %2003 = vmatmul.f32.gmra.mxu0 %v7007_v12 }
 0x2e7   : > { %v1506_v15 = vsel %vm1504_vm0, %v1499_v18, %v1500_v54  ;;  %v1064_v58 = vpop.f32.mrf.mxu3 }
 0x2e8   : > { %v838_v45 = vpop.f32.mrf.mxu2  ;;  %v7010_v30 = vadd.f32 %v1506_v15, %v870_v19  ;;  %v1226_v34 = vadd.f32 %v1225_v39, %v1064_v58 }
 0x2ea   : > { %9925 = vst [vmem:[#allocation25_spill] sm:$0xff] %v7010_v30  ;;  %v1403_v25 = vpop.f32.mrf.mxu1 }
 0x2eb   : > { %v1453_v28 = vadd.f32 %v1403_v25, %v1226_v34  ;;  %v1959_v29 = vpop.f32.mrf.mxu0 }
 0x2ec   : > { %1828 = vmatmul.f32.gmra.mxu3 %v6970_v8 }
 0x2ed   : > { %1667 = vmatmul.f32.gmra.mxu2 %v6993_v14  ;;  %v1501_v27 = vrot.slane %v1453_v28, 1 }
 0x2ee   : > { %2006 = vmatmul.f32.gmra.mxu0 %v7016_v3 }
 0x2ef   : > { %v1505_v2 = vsel %vm1504_vm0, %v1500_v54, %v1501_v27  ;;  %v1781_v55 = vpop.f32.mrf.mxu3  ;;  %v7032_v27 = vld [vmem:[#allocation2 + $0xc0] sm:$0xff] }
 0x2f0   : > { %v1620_v31 = vpop.f32.mrf.mxu2  ;;  %v7019_v19 = vadd.f32 %v1505_v2, %v871_v22 }
 0x2f1   : > { %v1782_v63 = vadd.f32 %v1781_v55, %v1620_v31 }
 0x2f2   : > { %9926 = vst [vmem:[#allocation49_spill] sm:$0xff] %v7019_v19 }
 0x2f3   : > { %v2103_v39 = vadd.f32 %v1959_v29, %v1782_v63  ;;  %v1962_v8 = vpop.f32.mrf.mxu0 }
 0x2f4   : > { %1831 = vmatmul.f32.gmra.mxu3 %v9919_v43 }
 0x2f5   : > { %1670 = vmatmul.f32.gmra.mxu2 %v6145_v56  ;;  %v2151_v58 = vrot.slane %v2103_v39, 2 }
 0x2f6   : > { %2009 = vmatmul.f32.gmra.mxu0 %v6207_v17 }
 0x2f7   : > { %v1784_v15 = vpop.f32.mrf.mxu3 }
 0x2f8   : > { %v1623_v18 = vpop.f32.mrf.mxu2 }
 0x2f9   : > { %v1785_v54 = vadd.f32 %v1784_v15, %v1623_v18  ;;  %v7042_v18 = vld [vmem:[#allocation2 + $0xc8] sm:$0xff] }
 0x2fb   : > { %v2104_v45 = vadd.f32 %v1962_v8, %v1785_v54  ;;  %v1965_v22 = vpop.f32.mrf.mxu0 }
 0x2fc   : > { %1834 = vmatmul.f32.gmra.mxu3 %v6984_v4 }
 0x2fd   : > { %v2152_v34 = vrot.slane %v2104_v45, 2  ;;  %1673 = vmatmul.f32.gmra.mxu2 %v7007_v12 }
 0x2fe   : > { %2012 = vmatmul.f32.gmra.mxu0 %v7032_v27 }
 0x2ff   : > { %v2231_v25 = vsel %vm2199_vm1, %v2151_v58, %v2152_v34  ;;  %v1787_v29 = vpop.f32.mrf.mxu3 }
 0x300   : > { %v7030_v43 = vadd.f32 %v2231_v25, %v6561_v21  ;;  %v1626_v28 = vpop.f32.mrf.mxu2 }
 0x301   : > { %v1788_v2 = vadd.f32 %v1787_v29, %v1626_v28 }
 0x302   : > { %9927 = vst [vmem:[#allocation50_spill] sm:$0xff] %v7030_v43 }
 0x303   : > { %v2105_v31 = vadd.f32 %v1965_v22, %v1788_v2  ;;  %v1968_v4 = vpop.f32.mrf.mxu0 }
 0x304   : > { %1837 = vmatmul.f32.gmra.mxu3 %v6993_v14 }
 0x305   : > { %v2153_v55 = vrot.slane %v2105_v31, 2  ;;  %1676 = vmatmul.f32.gmra.mxu2 %v7016_v3 }
 0x306   : > { %2015 = vmatmul.f32.gmra.mxu0 %v7042_v18 }
 0x307   : > { %v2230_v63 = vsel %vm2199_vm1, %v2152_v34, %v2153_v55  ;;  %v1790_v8 = vpop.f32.mrf.mxu3 }
 0x308   : > { %v7040_v21 = vadd.f32 %v2230_v63, %v6576_v52  ;;  %v1629_v39 = vpop.f32.mrf.mxu2  ;;  %v5352_v52 = vld [vmem:[%s9747_s2 + $0x1f8] sm:$0xff] }
 0x309   : > { %v1791_v15 = vadd.f32 %v1790_v8, %v1629_v39  ;;  %2843 = vmatpush.msra.mxu1 %v5352_v52 }
 0x30a   : > { %9928 = vst [vmem:[#allocation30_spill] sm:$0xff] %v7040_v21  ;;  %v2264_v0 = vadd.f32 %v7040_v21, %v7030_v43  ;;  %v2392_v32 = vmul.f32 %v7040_v21, %v7040_v21 }
 0x30b   : > { %v2106_v54 = vadd.f32 %v1968_v4, %v1791_v15  ;;  %v1971_v14 = vpop.f32.mrf.mxu0  ;;  %v7058_v4 = vld [vmem:[#allocation2 + $0xd8] sm:$0xff] }
 0x30c   : > { %1840 = vmatmul.f32.gmra.mxu3 %v6145_v56  ;;  %v2265_v59 = vrot.slane %v2264_v0, 4 }
 0x30d   : > { %1679 = vmatmul.f32.gmra.mxu2 %v6207_v17  ;;  %v2154_v25 = vrot.slane %v2106_v54, 2 }
 0x30e   : > { %2018 = vmatmul.f32.gmra.mxu0 %v5894_v61 }
 0x30f   : > { %v1793_v58 = vpop.f32.mrf.mxu3 }
 0x310   : > { %v1632_v45 = vpop.f32.mrf.mxu2 }
 0x311   : > { %v1794_v34 = vadd.f32 %v1793_v58, %v1632_v45  ;;  %v7068_v45 = vld [vmem:[#allocation2 + $0xe0] sm:$0xff] }
 0x313   : > { %v2107_v22 = vadd.f32 %v1971_v14, %v1794_v34  ;;  %v1974_v29 = vpop.f32.mrf.mxu0 }
 0x314   : > { %1843 = vmatmul.f32.gmra.mxu3 %v7007_v12 }
 0x315   : > { %v2155_v28 = vrot.slane %v2107_v22, 2  ;;  %1682 = vmatmul.f32.gmra.mxu2 %v7032_v27 }
 0x316   : > { %2021 = vmatmul.f32.gmra.mxu0 %v7058_v4 }
 0x317   : > { %v2229_v56 = vsel %vm2199_vm1, %v2154_v25, %v2155_v28  ;;  %v1796_v55 = vpop.f32.mrf.mxu3 }
 0x318   : > { %v7056_v2 = vadd.f32 %v2229_v56, %v6598_v5  ;;  %v1635_v31 = vpop.f32.mrf.mxu2 }
 0x319   : > { %v1797_v63 = vadd.f32 %v1796_v55, %v1635_v31 }
 0x31a   : > { %9929 = vst [vmem:[#allocation51_spill] sm:$0xff] %v7056_v2  ;;  %v2393_v21 = vmul.f32 %v7056_v2, %v7056_v2 }
 0x31b   : > { %v2108_v39 = vadd.f32 %v1974_v29, %v1797_v63  ;;  %v1977_v12 = vpop.f32.mrf.mxu0 }
 0x31c   : > { %1846 = vmatmul.f32.gmra.mxu3 %v7016_v3 }
 0x31d   : > { %v2156_v8 = vrot.slane %v2108_v39, 2  ;;  %1685 = vmatmul.f32.gmra.mxu2 %v7042_v18 }
 0x31e   : > { %2024 = vmatmul.f32.gmra.mxu0 %v7068_v45 }
 0x31f   : > { %v2228_v15 = vsel %vm2199_vm1, %v2155_v28, %v2156_v8  ;;  %v1799_v14 = vpop.f32.mrf.mxu3  ;;  %v7084_v8 = vld [vmem:[#allocation2 + $0xf0] sm:$0xff] }
 0x320   : > { %v7066_v5 = vadd.f32 %v2228_v15, %v6613_v23  ;;  %v1638_v54 = vpop.f32.mrf.mxu2  ;;  %v5351_v23 = vld [vmem:[%s9747_s2 + $0x1f0] sm:$0xff] }
 0x321   : > { %v1800_v58 = vadd.f32 %v1799_v14, %v1638_v54  ;;  %2844 = vmatpush.msra.mxu1 %v5351_v23 }
 0x322   : > { %9930 = vst [vmem:[#allocation52_spill] sm:$0xff] %v7066_v5  ;;  %v2271_v51 = vadd.f32 %v7066_v5, %v7056_v2 }
 0x323   : > { %v2109_v34 = vadd.f32 %v1977_v12, %v1800_v58  ;;  %v1980_v3 = vpop.f32.mrf.mxu0 }
 0x324   : > { %1849 = vmatmul.f32.gmra.mxu3 %v6207_v17 }
 0x325   : > { %1688 = vmatmul.f32.gmra.mxu2 %v5894_v61  ;;  %v2157_v29 = vrot.slane %v2109_v34, 2 }
 0x326   : > { %2027 = vmatmul.f32.gmra.mxu0 %v5878_v57 }
 0x327   : > { %v1802_v22 = vpop.f32.mrf.mxu3 }
 0x328   : > { %v1641_v52 = vpop.f32.mrf.mxu2 }
 0x329   : > { %v1803_v25 = vadd.f32 %v1802_v22, %v1641_v52 }
 0x32b   : > { %v2110_v28 = vadd.f32 %v1980_v3, %v1803_v25  ;;  %v1983_v31 = vpop.f32.mrf.mxu0  ;;  %v7094_v3 = vld [vmem:[#allocation2 + $0xf8] sm:$0xff] }
 0x32c   : > { %1852 = vmatmul.f32.gmra.mxu3 %v7032_v27 }
 0x32d   : > { %v2158_v56 = vrot.slane %v2110_v28, 2  ;;  %1691 = vmatmul.f32.gmra.mxu2 %v7058_v4 }
 0x32e   : > { %2030 = vmatmul.f32.gmra.mxu0 %v7084_v8 }
 0x32f   : > { %v2227_v17 = vsel %vm2199_vm1, %v2157_v29, %v2158_v56  ;;  %v1805_v39 = vpop.f32.mrf.mxu3 }
 0x330   : > { %v7082_v55 = vadd.f32 %v2227_v17, %v6635_v13  ;;  %v1644_v63 = vpop.f32.mrf.mxu2 }
 0x331   : > { %v1806_v12 = vadd.f32 %v1805_v39, %v1644_v63 }
 0x332   : > { %9931 = vst [vmem:[#allocation53_spill] sm:$0xff] %v7082_v55  ;;  %v2395_v2 = vmul.f32 %v7082_v55, %v7082_v55 }
 0x333   : > { %v2111_v15 = vadd.f32 %v1983_v31, %v1806_v12  ;;  %v1986_v27 = vpop.f32.mrf.mxu0 }
 0x334   : > { %1855 = vmatmul.f32.gmra.mxu3 %v7042_v18 }
 0x335   : > { %v2159_v54 = vrot.slane %v2111_v15, 2  ;;  %1694 = vmatmul.f32.gmra.mxu2 %v7068_v45  ;;  %v7110_v15 = vld [vmem:[#allocation2 + $0x108] sm:$0xff] }
 0x336   : > { %2033 = vmatmul.f32.gmra.mxu0 %v7094_v3 }
 0x337   : > { %v2226_v14 = vsel %vm2199_vm1, %v2158_v56, %v2159_v54  ;;  %v1808_v34 = vpop.f32.mrf.mxu3 }
 0x338   : > { %v7092_v13 = vadd.f32 %v2226_v14, %v6650_v16  ;;  %v1647_v58 = vpop.f32.mrf.mxu2  ;;  %v5350_v16 = vld [vmem:[%s9747_s2 + $0x1e8] sm:$0xff] }
 0x339   : > { %v1809_v52 = vadd.f32 %v1808_v34, %v1647_v58  ;;  %2845 = vmatpush.msra.mxu1 %v5350_v16 }
 0x33a   : > { %9932 = vst [vmem:[#allocation54_spill] sm:$0xff] %v7092_v13 }
 0x33b   : > { %v2112_v22 = vadd.f32 %v1986_v27, %v1809_v52  ;;  %v1989_v18 = vpop.f32.mrf.mxu0 }
 0x33c   : > { %1858 = vmatmul.f32.gmra.mxu3 %v5894_v61 }
 0x33d   : > { %1697 = vmatmul.f32.gmra.mxu2 %v5878_v57  ;;  %v2160_v56 = vrot.slane %v2112_v22, 2  ;;  %v7120_v22 = vld [vmem:[#allocation2 + $0x110] sm:$0xff] }
 0x33e   : > { %2036 = vmatmul.f32.gmra.mxu0 %v5940_v9 }
 0x33f   : > { %v1811_v23 = vpop.f32.mrf.mxu3 }
 0x340   : > { %v1650_v25 = vpop.f32.mrf.mxu2 }
 0x341   : > { %v1812_v28 = vadd.f32 %v1811_v23, %v1650_v25 }
 0x343   : > { %v2113_v29 = vadd.f32 %v1989_v18, %v1812_v28  ;;  %v1992_v17 = vpop.f32.mrf.mxu0 }
 0x344   : > { %1861 = vmatmul.f32.gmra.mxu3 %v7058_v4 }
 0x345   : > { %v2161_v31 = vrot.slane %v2113_v29, 2  ;;  %1700 = vmatmul.f32.gmra.mxu2 %v7084_v8 }
 0x346   : > { %2039 = vmatmul.f32.gmra.mxu0 %v7110_v15 }
 0x347   : > { %v2225_v61 = vsel %vm2199_vm1, %v2160_v56, %v2161_v31  ;;  %v1814_v12 = vpop.f32.mrf.mxu3 }
 0x348   : > { %v7108_v63 = vadd.f32 %v2225_v61, %v6672_v35  ;;  %v1653_v39 = vpop.f32.mrf.mxu2 }
 0x349   : > { %v1815_v54 = vadd.f32 %v1814_v12, %v1653_v39 }
 0x34a   : > { %9933 = vst [vmem:[#allocation55_spill] sm:$0xff] %v7108_v63 }
 0x34b   : > { %v2114_v27 = vadd.f32 %v1992_v17, %v1815_v54  ;;  %v1995_v4 = vpop.f32.mrf.mxu0  ;;  %v7136_v54 = vld [vmem:[#allocation2 + $0x120] sm:$0xff] }
 0x34c   : > { %1864 = vmatmul.f32.gmra.mxu3 %v7068_v45 }
 0x34d   : > { %v2162_v14 = vrot.slane %v2114_v27, 2  ;;  %1703 = vmatmul.f32.gmra.mxu2 %v7094_v3 }
 0x34e   : > { %2042 = vmatmul.f32.gmra.mxu0 %v7120_v22 }
 0x34f   : > { %v2224_v58 = vsel %vm2199_vm1, %v2161_v31, %v2162_v14  ;;  %v1817_v52 = vpop.f32.mrf.mxu3 }
 0x350   : > { %v7118_v35 = vadd.f32 %v2224_v58, %v6687_v26  ;;  %v1656_v34 = vpop.f32.mrf.mxu2  ;;  %v5349_v26 = vld [vmem:[%s9747_s2 + $0x1e0] sm:$0xff] }
 0x351   : > { %v1818_v18 = vadd.f32 %v1817_v52, %v1656_v34  ;;  %2846 = vmatpush.msra.mxu1 %v5349_v26 }
 0x352   : > { %9934 = vst [vmem:[#allocation56_spill] sm:$0xff] %v7118_v35 }
 0x353   : > { %v2115_v25 = vadd.f32 %v1995_v4, %v1818_v18  ;;  %v1998_v45 = vpop.f32.mrf.mxu0  ;;  %v7146_v18 = vld [vmem:[#allocation2 + $0x128] sm:$0xff] }
 0x354   : > { %1867 = vmatmul.f32.gmra.mxu3 %v5878_v57 }
 0x355   : > { %1706 = vmatmul.f32.gmra.mxu2 %v5940_v9  ;;  %v2163_v56 = vrot.slane %v2115_v25, 2 }
 0x356   : > { %2045 = vmatmul.f32.gmra.mxu0 %v5968_v20 }
 0x357   : > { %v1820_v28 = vpop.f32.mrf.mxu3 }
 0x358   : > { %v1659_v23 = vpop.f32.mrf.mxu2 }
 0x359   : > { %v1821_v16 = vadd.f32 %v1820_v28, %v1659_v23 }
 0x35b   : > { %v2116_v29 = vadd.f32 %v1998_v45, %v1821_v16  ;;  %v2001_v17 = vpop.f32.mrf.mxu0 }
 0x35c   : > { %1870 = vmatmul.f32.gmra.mxu3 %v7084_v8 }
 0x35d   : > { %v2164_v31 = vrot.slane %v2116_v29, 2  ;;  %1709 = vmatmul.f32.gmra.mxu2 %v7110_v15 }
 0x35e   : > { %2048 = vmatmul.f32.gmra.mxu0 %v7136_v54 }
 0x35f   : > { %v2223_v57 = vsel %vm2199_vm1, %v2163_v56, %v2164_v31  ;;  %v1823_v12 = vpop.f32.mrf.mxu3 }
 0x360   : > { %v7134_v61 = vadd.f32 %v2223_v57, %v6709_v41  ;;  %v1662_v39 = vpop.f32.mrf.mxu2 }
 0x361   : > { %v1824_v27 = vadd.f32 %v1823_v12, %v1662_v39  ;;  %v7162_v12 = vld [vmem:[#allocation2 + $0x138] sm:$0xff] }
 0x362   : > { %9935 = vst [vmem:[#allocation57_spill] sm:$0xff] %v7134_v61 }
 0x363   : > { %v2117_v14 = vadd.f32 %v2001_v17, %v1824_v27  ;;  %v2004_v8 = vpop.f32.mrf.mxu0 }
 0x364   : > { %1873 = vmatmul.f32.gmra.mxu3 %v7094_v3 }
 0x365   : > { %v2165_v4 = vrot.slane %v2117_v14, 2  ;;  %1712 = vmatmul.f32.gmra.mxu2 %v7120_v22 }
 0x366   : > { %2051 = vmatmul.f32.gmra.mxu0 %v7146_v18 }
 0x367   : > { %v2222_v58 = vsel %vm2199_vm1, %v2164_v31, %v2165_v4  ;;  %v1826_v52 = vpop.f32.mrf.mxu3 }
 0x368   : > { %v7144_v41 = vadd.f32 %v2222_v58, %v6724_v62  ;;  %v1665_v34 = vpop.f32.mrf.mxu2  ;;  %v5348_v62 = vld [vmem:[%s9747_s2 + $0x1d8] sm:$0xff] }
 0x369   : > { %v1827_v25 = vadd.f32 %v1826_v52, %v1665_v34  ;;  %2847 = vmatpush.msra.mxu1 %v5348_v62  ;;  %v7172_v52 = vld [vmem:[#allocation2 + $0x140] sm:$0xff] }
 0x36a   : > { %9936 = vst [vmem:[#allocation58_spill] sm:$0xff] %v7144_v41 }
 0x36b   : > { %v2118_v45 = vadd.f32 %v2004_v8, %v1827_v25  ;;  %v2007_v3 = vpop.f32.mrf.mxu0 }
 0x36c   : > { %1876 = vmatmul.f32.gmra.mxu3 %v5940_v9 }
 0x36d   : > { %1715 = vmatmul.f32.gmra.mxu2 %v5968_v20  ;;  %v2166_v29 = vrot.slane %v2118_v45, 2 }
 0x36e   : > { %2054 = vmatmul.f32.gmra.mxu0 %v6018_v37 }
 0x36f   : > { %v1829_v28 = vpop.f32.mrf.mxu3 }
 0x370   : > { %v1668_v23 = vpop.f32.mrf.mxu2 }
 0x371   : > { %v1830_v16 = vadd.f32 %v1829_v28, %v1668_v23 }
 0x373   : > { %v2119_v26 = vadd.f32 %v2007_v3, %v1830_v16  ;;  %v2010_v31 = vpop.f32.mrf.mxu0 }
 0x374   : > { %1879 = vmatmul.f32.gmra.mxu3 %v7110_v15 }
 0x375   : > { %v2167_v56 = vrot.slane %v2119_v26, 2  ;;  %1718 = vmatmul.f32.gmra.mxu2 %v7136_v54 }
 0x376   : > { %2057 = vmatmul.f32.gmra.mxu0 %v7162_v12 }
 0x377   : > { %v2221_v9 = vsel %vm2199_vm1, %v2166_v29, %v2167_v56  ;;  %v1832_v39 = vpop.f32.mrf.mxu3 }
 0x378   : > { %v7160_v17 = vadd.f32 %v2221_v9, %v6746_v50  ;;  %v1671_v57 = vpop.f32.mrf.mxu2 }
 0x379   : > { %v1833_v27 = vadd.f32 %v1832_v39, %v1671_v57  ;;  %v5559_v57 = vld [vmem:[#allocation2 + $0x150] sm:$0xff] }
 0x37a   : > { %9937 = vst [vmem:[#allocation59_spill] sm:$0xff] %v7160_v17 }
 0x37b   : > { %v2120_v14 = vadd.f32 %v2010_v31, %v1833_v27  ;;  %v2013_v15 = vpop.f32.mrf.mxu0 }
 0x37c   : > { %1882 = vmatmul.f32.gmra.mxu3 %v7120_v22 }
 0x37d   : > { %v2168_v4 = vrot.slane %v2120_v14, 2  ;;  %1721 = vmatmul.f32.gmra.mxu2 %v7146_v18 }
 0x37e   : > { %2060 = vmatmul.f32.gmra.mxu0 %v7172_v52 }
 0x37f   : > { %v2220_v8 = vsel %vm2199_vm1, %v2167_v56, %v2168_v4  ;;  %v1835_v34 = vpop.f32.mrf.mxu3 }
 0x380   : > { %v7170_v50 = vadd.f32 %v2220_v8, %v6761_v1  ;;  %v1674_v58 = vpop.f32.mrf.mxu2  ;;  %v5347_v1 = vld [vmem:[%s9747_s2 + $0x1d0] sm:$0xff] }
 0x381   : > { %v1836_v25 = vadd.f32 %v1835_v34, %v1674_v58  ;;  %2848 = vmatpush.msra.mxu1 %v5347_v1  ;;  %v5560_v58 = vld [vmem:[#allocation2 + $0x158] sm:$0xff] }
 0x382   : > { %9938 = vst [vmem:[#allocation60_spill] sm:$0xff] %v7170_v50 }
 0x383   : > { %v2121_v45 = vadd.f32 %v2013_v15, %v1836_v25  ;;  %v2016_v22 = vpop.f32.mrf.mxu0 }
 0x384   : > { %1885 = vmatmul.f32.gmra.mxu3 %v5968_v20 }
 0x385   : > { %1724 = vmatmul.f32.gmra.mxu2 %v6018_v37  ;;  %v2169_v62 = vrot.slane %v2121_v45, 2 }
 0x386   : > { %2063 = vmatmul.f32.gmra.mxu0 %v6074_v60 }
 0x387   : > { %v1838_v23 = vpop.f32.mrf.mxu3 }
 0x388   : > { %v1677_v3 = vpop.f32.mrf.mxu2 }
 0x389   : > { %v1839_v28 = vadd.f32 %v1838_v23, %v1677_v3 }
 0x38b   : > { %v2122_v16 = vadd.f32 %v2016_v22, %v1839_v28  ;;  %v2019_v29 = vpop.f32.mrf.mxu0 }
 0x38c   : > { %1888 = vmatmul.f32.gmra.mxu3 %v7136_v54 }
 0x38d   : > { %v2170_v26 = vrot.slane %v2122_v16, 2  ;;  %1727 = vmatmul.f32.gmra.mxu2 %v7162_v12 }
 0x38e   : > { %2066 = vmatmul.f32.gmra.mxu0 %v5559_v57 }
 0x38f   : > { %v2219_v20 = vsel %vm2199_vm1, %v2169_v62, %v2170_v26  ;;  %v1841_v9 = vpop.f32.mrf.mxu3 }
 0x390   : > { %v7186_v56 = vadd.f32 %v2219_v20, %v6783_v11  ;;  %v1680_v31 = vpop.f32.mrf.mxu2  ;;  %v5561_v20 = vld [vmem:[#allocation2 + $0x168] sm:$0xff] }
 0x391   : > { %v1842_v39 = vadd.f32 %v1841_v9, %v1680_v31 }
 0x393   : > { %v2123_v27 = vadd.f32 %v2019_v29, %v1842_v39  ;;  %v2022_v4 = vpop.f32.mrf.mxu0 }
 0x394   : > { %1891 = vmatmul.f32.gmra.mxu3 %v7146_v18 }
 0x395   : > { %v2171_v14 = vrot.slane %v2123_v27, 2  ;;  %1730 = vmatmul.f32.gmra.mxu2 %v7172_v52 }
 0x396   : > { %2069 = vmatmul.f32.gmra.mxu0 %v5560_v58 }
 0x397   : > { %v2218_v54 = vsel %vm2199_vm1, %v2170_v26, %v2171_v14  ;;  %v1844_v8 = vpop.f32.mrf.mxu3 }
 0x398   : > { %v7193_v15 = vadd.f32 %v2218_v54, %v6798_v47  ;;  %v1683_v11 = vpop.f32.mrf.mxu2  ;;  %v5346_v47 = vld [vmem:[%s9747_s2 + $0x1c8] sm:$0xff]  ;;  %v5562_v54 = vld [vmem:[#allocation2 + $0x170] sm:$0xff] }
 0x399   : > { %v1845_v34 = vadd.f32 %v1844_v8, %v1683_v11  ;;  %2849 = vmatpush.msra.mxu1 %v5346_v47  ;;  %v5564_v47 = vld [vmem:[#allocation2 + $0x188] sm:$0xff] }
 0x39a   : > { %9939 = vst [vmem:[#allocation61_spill] sm:$0xff] %v7193_v15 }
 0x39b   : > { %v2124_v25 = vadd.f32 %v2022_v4, %v1845_v34  ;;  %v2025_v45 = vpop.f32.mrf.mxu0 }
 0x39c   : > { %1894 = vmatmul.f32.gmra.mxu3 %v6018_v37 }
 0x39d   : > { %1733 = vmatmul.f32.gmra.mxu2 %v6074_v60  ;;  %v2172_v28 = vrot.slane %v2124_v25, 2 }
 0x39e   : > { %2072 = vmatmul.f32.gmra.mxu0 %v6130_v42 }
 0x39f   : > { %v1847_v18 = vpop.f32.mrf.mxu3 }
 0x3a0   : > { %v1686_v22 = vpop.f32.mrf.mxu2 }
 0x3a1   : > { %v1848_v3 = vadd.f32 %v1847_v18, %v1686_v22 }
 0x3a3   : > { %v2125_v23 = vadd.f32 %v2025_v45, %v1848_v3  ;;  %v2028_v16 = vpop.f32.mrf.mxu0  ;;  %v5563_v45 = vld [vmem:[#allocation2 + $0x180] sm:$0xff] }
 0x3a4   : > { %1897 = vmatmul.f32.gmra.mxu3 %v7162_v12 }
 0x3a5   : > { %v2173_v1 = vrot.slane %v2125_v23, 2  ;;  %1736 = vmatmul.f32.gmra.mxu2 %v5559_v57 }
 0x3a6   : > { %2075 = vmatmul.f32.gmra.mxu0 %v5561_v20 }
 0x3a7   : > { %v2217_v37 = vsel %vm2199_vm1, %v2172_v28, %v2173_v1  ;;  %v1850_v29 = vpop.f32.mrf.mxu3 }
 0x3a8   : > { %v7205_v62 = vadd.f32 %v2217_v37, %v6820_v36  ;;  %v1689_v26 = vpop.f32.mrf.mxu2  ;;  %v5565_v37 = vld [vmem:[#allocation2 + $0x168] sm:$0xff] }
 0x3a9   : > { %v1851_v31 = vadd.f32 %v1850_v29, %v1689_v26 }
 0x3ab   : > { %v2126_v9 = vadd.f32 %v2028_v16, %v1851_v31  ;;  %v7208_v27 = vpop.f32.mrf.mxu0 }
 0x3ac   : > { %1900 = vmatmul.f32.gmra.mxu3 %v7172_v52 }
 0x3ad   : > { %v2174_v39 = vrot.slane %v2126_v9, 2  ;;  %1739 = vmatmul.f32.gmra.mxu2 %v5560_v58  ;;  %v5566_v9 = vld [vmem:[#allocation2 + $0x170] sm:$0xff] }
 0x3ae   : > { %2078 = vmatmul.f32.gmra.mxu0 %v5562_v54 }
 0x3af   : > { %v2216_v12 = vsel %vm2199_vm1, %v2173_v1, %v2174_v39  ;;  %v7217_v4 = vpop.f32.mrf.mxu3 }
 0x3b0   : > { %v7213_v14 = vadd.f32 %v2216_v12, %v6833_v38  ;;  %v7215_v36 = vpop.f32.mrf.mxu2  ;;  %v5345_v38 = vld [vmem:[%s9747_s2 + $0x1c0] sm:$0xff] }
 0x3b1   : > { %2850 = vmatpush.msra.mxu1 %v5345_v38 }
 0x3b3   : > { %v7221_v11 = vpop.f32.mrf.mxu0 }
 0x3b4   : > { %1903 = vmatmul.f32.gmra.mxu3 %v6074_v60 }
 0x3b5   : > { %1742 = vmatmul.f32.gmra.mxu2 %v6130_v42 }
 0x3b6   : > { %2081 = vmatmul.f32.gmra.mxu0 %v6836_v10 }
 0x3b7   : > { %v7225_v8 = vpop.f32.mrf.mxu3 }
 0x3b8   : > { %v7223_v52 = vpop.f32.mrf.mxu2 }
 0x3bb   : > { %v7231_v34 = vpop.f32.mrf.mxu0 }
 0x3bc   : > { %1906 = vmatmul.f32.gmra.mxu3 %v5559_v57 }
 0x3bd   : > { %1745 = vmatmul.f32.gmra.mxu2 %v5561_v20 }
 0x3be   : > { %2084 = vmatmul.f32.gmra.mxu0 %v5563_v45 }
 0x3bf   : > { %v7235_v60 = vpop.f32.mrf.mxu3 }
 0x3c0   : > { %v7233_v25 = vpop.f32.mrf.mxu2 }
 0x3c3   : > { %v7237_v22 = vpop.f32.mrf.mxu0 }
 0x3c4   : > { %1909 = vmatmul.f32.gmra.mxu3 %v5560_v58  ;;  %v5344_v58 = vld [vmem:[%s9747_s2 + $0x1b8] sm:$0xff] }
 0x3c5   : > { %1748 = vmatmul.f32.gmra.mxu2 %v5562_v54  ;;  %2851 = vmatpush.msra.mxu1 %v5344_v58 }
 0x3c6   : > { %2087 = vmatmul.f32.gmra.mxu0 %v5564_v47 }
 0x3c7   : > { %v7241_v3 = vpop.f32.mrf.mxu3 }
 0x3c8   : > { %v7239_v18 = vpop.f32.mrf.mxu2 }
 0x3cb   : > { %v7245_v57 = vpop.f32.mrf.mxu0 }
 0x3cc   : > { %1912 = vmatmul.f32.gmra.mxu3 %v6130_v42 }
 0x3cd   : > { %1751 = vmatmul.f32.gmra.mxu2 %v6836_v10 }
 0x3ce   : > { %2090 = vmatmul.f32.gmra.mxu0 %v9894_v33 }
 0x3cf   : > { %v7249_v28 = vpop.f32.mrf.mxu3 }
 0x3d0   : > { %v7247_v23 = vpop.f32.mrf.mxu2 }
 0x3d3   : > { %v7255_v1 = vpop.f32.mrf.mxu0 }
 0x3d4   : > { %1915 = vmatmul.f32.gmra.mxu3 %v5561_v20 }
 0x3d5   : > { %1754 = vmatmul.f32.gmra.mxu2 %v5563_v45 }
 0x3d6   : > { %2093 = vmatmul.f32.gmra.mxu0 %v5565_v37 }
 0x3d7   : > { %v7259_v42 = vpop.f32.mrf.mxu3 }
 0x3d8   : > { %v7257_v16 = vpop.f32.mrf.mxu2 }
 0x3db   : > { %v7261_v26 = vpop.f32.mrf.mxu0 }
 0x3dc   : > { %1918 = vmatmul.f32.gmra.mxu3 %v5562_v54  ;;  %9940 = vst [vmem:[#allocation62_spill] sm:$0xff] %v7261_v26  ;;  %v5343_v54 = vld [vmem:[%s9747_s2 + $0x1b0] sm:$0xff] }
 0x3dd   : > { %1757 = vmatmul.f32.gmra.mxu2 %v5564_v47  ;;  %2852 = vmatpush.msra.mxu1 %v5343_v54  ;;  %v5342_v54 = vld [vmem:[%s9747_s2 + $0x1a8] sm:$0xff] }
 0x3de   : > { %2096 = vmatmul.f32.gmra.mxu0 %v5566_v9 }
 0x3df   : > { %v7265_v31 = vpop.f32.mrf.mxu3  ;;  %2853 = vmatpush.msra.mxu1 %v5342_v54  ;;  %v2391_v54 = vmul.f32 %v7030_v43, %v7030_v43 }
 0x3e0   : > { %v7263_v29 = vpop.f32.mrf.mxu2  ;;  %9942 = vst [vmem:[#allocation64_spill] sm:$0xff] %v7265_v31 }
 0x3e1   : > { %9941 = vst [vmem:[#allocation63_spill] sm:$0xff] %v7263_v29  ;;  %v2423_v6 = vadd.f32 %v2392_v32, %v2391_v54  ;;  %v5341_v54 = vld [vmem:[%s9747_s2 + $0x1a0] sm:$0xff] }
 0x3e2   : > { %2854 = vmatpush.msra.mxu1 %v5341_v54  ;;  %v2400_v54 = vmul.f32 %v7144_v41, %v7144_v41 }
 0x3e3   : > { %v7269_v20 = vpop.f32.mrf.mxu0 }
 0x3e4   : > { %1921 = vmatmul.f32.gmra.mxu3 %v6836_v10  ;;  %9943 = vst [vmem:[#allocation65_spill] sm:$0xff] %v7269_v20 }
 0x3e5   : > { %1760 = vmatmul.f32.gmra.mxu2 %v9894_v33 }
 0x3e6   : > { %2099 = vmatmul.f32.gmra.mxu0 %v6860_v44 }
 0x3e7   : > { %v7273_v12 = vpop.f32.mrf.mxu3 }
 0x3e8   : > { %v7271_v39 = vpop.f32.mrf.mxu2 }
 0x3eb   : > { %v7279_v38 = vpop.f32.mrf.mxu0 }
 0x3ec   : > { %9944 = vst [vmem:[#allocation66_spill] sm:$0xff] %v7279_v38 }
 0x3ef   : > { %v7283_v33 = vpop.f32.mrf.mxu3 }
 0x3f0   : > { %v7281_v45 = vpop.f32.mrf.mxu2 }
 0x3f3   : > { %v7285_v10 = vpop.f32.mrf.mxu0 }
 0x3f4   : > { %9945 = vst [vmem:[#allocation67_spill] sm:$0xff] %v7285_v10  ;;  %v2266_v10 = vadd.f32 %v2265_v59, %v2264_v0  ;;  %v2278_v59 = vadd.f32 %v7092_v13, %v7082_v55  ;;  %v2396_v0 = vmul.f32 %v7092_v13, %v7092_v13  ;;  %v2397_v13 = vmul.f32 %v7108_v63, %v7108_v63 }
 0x3f6   : > { %v2267_v43 = vrot.slane %v2266_v10, 2  ;;  %v2437_v26 = vadd.f32 %v2396_v0, %v2395_v2  ;;  %v2399_v0 = vmul.f32 %v7134_v61, %v7134_v61 }
 0x3f7   : > { %v7289_v58 = vpop.f32.mrf.mxu3 }
 0x3f8   : > { %v7287_v47 = vpop.f32.mrf.mxu2  ;;  %9947 = vst [vmem:[#allocation69_spill] sm:$0xff] %v7289_v58  ;;  %v2272_v58 = vrot.slane %v2271_v51, 4  ;;  %v2438_v2 = vrot.slane %v2437_v26, 4 }
 0x3f9   : > { %9946 = vst [vmem:[#allocation68_spill] sm:$0xff] %v7287_v47  ;;  %v2279_v47 = vrot.slane %v2278_v59, 4 }
 0x3fb   : > { %v7291_v37 = vpop.f32.mrf.mxu0 }
 0x3fc   : > { %9948 = vst [vmem:[#allocation70_spill] sm:$0xff] %v7291_v37  ;;  %v2394_v37 = vmul.f32 %v7066_v5, %v7066_v5 }
 0x3fe   : > { %v2430_v32 = vadd.f32 %v2394_v37, %v2393_v21  ;;  %v2273_v21 = vadd.f32 %v2272_v58, %v2271_v51 }
 0x3ff   : > { %v7295_v9 = vpop.f32.mrf.mxu3 }
 0x400   : > { %v7293_v44 = vpop.f32.mrf.mxu2  ;;  %9950 = vst [vmem:[#allocation72_spill] sm:$0xff] %v7295_v9  ;;  %v2431_v37 = vrot.slane %v2430_v32, 4  ;;  %v2402_v9 = vmul.f32 %v7170_v50, %v7170_v50 }
 0x401   : > { %9949 = vst [vmem:[#allocation71_spill] sm:$0xff] %v7293_v44 }
 0x402   : > { %v2432_v58 = vadd.f32 %v2431_v37, %v2430_v32  ;;  %v2404_v37 = vmul.f32 %v7193_v15, %v7193_v15 }
 0x403   : > { %v7300_v19 = vpop.f32.mrf.mxu0 }
 0x404   : > { %9951 = vst [vmem:[#allocation73_spill] sm:$0xff] %v7300_v19  ;;  %v2424_v19 = vrot.slane %v2423_v6, 4 }
 0x406   : > { %v2425_v5 = vadd.f32 %v2424_v19, %v2423_v6  ;;  %v2285_v6 = vadd.f32 %v7118_v35, %v7108_v63 }
 0x407   : > { %v7304_v48 = vpop.f32.mrf.mxu3 }
 0x408   : > { %v7302_v30 = vpop.f32.mrf.mxu2  ;;  %9953 = vst [vmem:[#allocation75_spill] sm:$0xff] %v7304_v48  ;;  %v2426_v20 = vrot.slane %v2425_v5, 2  ;;  %v2439_v48 = vadd.f32 %v2438_v2, %v2437_v26  ;;  %v2306_v26 = vadd.f32 %v7193_v15, %v7186_v56 }
 0x409   : > { %9952 = vst [vmem:[#allocation74_spill] sm:$0xff] %v7302_v30 }
 0x40a   : > { %v2440_v31 = vrot.slane %v2439_v48, 2 }
 0x40b   : > { %v7308_v24 = vpop.f32.mrf.mxu0 }
 0x40c   : > { %9954 = vst [vmem:[#allocation76_spill] sm:$0xff] %v7308_v24 }
 0x40f   : > { %v7314_v53 = vpop.f32.mrf.mxu3 }
 0x410   : > { %v7312_v7 = vpop.f32.mrf.mxu2  ;;  %9956 = vst [vmem:[#allocation78_spill] sm:$0xff] %v7314_v53 }
 0x411   : > { %9955 = vst [vmem:[#allocation77_spill] sm:$0xff] %v7312_v7 }
 0x413   : > { %v7322_v24 = vpop.f32.mrf.mxu0 }
 0x414   : > { %9957 = vst [vmem:[#allocation79_spill] sm:$0xff] %v7322_v24  ;;  %v2398_v24 = vmul.f32 %v7118_v35, %v7118_v35  ;;  %v2427_v35 = vadd.f32 %v2426_v20, %v2425_v5  ;;  %v2433_v5 = vrot.slane %v2432_v58, 2 }
 0x416   : > { %v2444_v19 = vadd.f32 %v2398_v24, %v2397_v13  ;;  %v2286_v24 = vrot.slane %v2285_v6, 4  ;;  %v2292_v13 = vadd.f32 %v7144_v41, %v7134_v61  ;;  %v2428_v61 = vrot.slane %v2427_v35, 1 }
 0x417   : > { %v7328_v53 = vpop.f32.mrf.mxu3  ;;  %v2434_v2 = vadd.f32 %v2433_v5, %v2432_v58 }
 0x418   : > { %v7326_v7 = vpop.f32.mrf.mxu2  ;;  %9959 = vst [vmem:[#allocation81_spill] sm:$0xff] %v7328_v53  ;;  %v2268_v53 = vadd.f32 %v2267_v43, %v2266_v10  ;;  %v2274_v10 = vrot.slane %v2273_v21, 2  ;;  %v2445_v63 = vrot.slane %v2444_v19, 4 }
 0x419   : > { %9958 = vst [vmem:[#allocation80_spill] sm:$0xff] %v7326_v7 }
 0x41a   : > { %v2269_v51 = vrot.slane %v2268_v53, 1 }
 0x41b   : > { %v7341_v7 = vpop.f32.mrf.mxu0 }
 0x41c   : > { %9960 = vst [vmem:[#allocation82_spill] sm:$0xff] %v7341_v7  ;;  %v2280_v7 = vadd.f32 %v2279_v47, %v2278_v59  ;;  %v2299_v47 = vadd.f32 %v7170_v50, %v7160_v17  ;;  %v7363_v32 = vadd.f32 %v2269_v51, %v2268_v53  ;;  %v2275_v59 = vadd.f32 %v2274_v10, %v2273_v21 }
 0x41d   : > { %v1860_v50 = vadd.f32 %v7235_v60, %v7233_v25  ;;  %v2287_v53 = vadd.f32 %v2286_v24, %v2285_v6  ;;  %v2446_v51 = vadd.f32 %v2445_v63, %v2444_v19  ;;  %v2429_v60 = vadd.f32 %v2428_v61, %v2427_v35 }
 0x41e   : > { %v2281_v20 = vrot.slane %v2280_v7, 2  ;;  %v2300_v10 = vrot.slane %v2299_v47, 4  ;;  %v1854_v6 = vadd.f32 %v7217_v4, %v7215_v36  ;;  %v2441_v35 = vadd.f32 %v2440_v31, %v2439_v48 }
 0x41f   : > { %v7351_v43 = vpop.f32.mrf.mxu3  ;;  %v2129_v19 = vadd.f32 %v7231_v34, %v1860_v50  ;;  %v2288_v24 = vrot.slane %v2287_v53, 2  ;;  %v2406_v36 = vmul.f32 %v7213_v14, %v7213_v14  ;;  %v2405_v48 = vmul.f32 %v7205_v62, %v7205_v62 }
 0x420   : > { %v7349_v55 = vpop.f32.mrf.mxu2  ;;  %9962 = vst [vmem:[#allocation84_spill] sm:$0xff] %v7351_v43  ;;  %v2401_v43 = vmul.f32 %v7160_v17, %v7160_v17  ;;  %v2282_v38 = vadd.f32 %v2281_v20, %v2280_v7  ;;  %v2301_v29 = vadd.f32 %v2300_v10, %v2299_v47  ;;  %v2435_v7 = vrot.slane %v2434_v2, 1 }
 0x421   : > { %9961 = vst [vmem:[#allocation83_spill] sm:$0xff] %v7349_v55  ;;  %v2451_v55 = vadd.f32 %v2400_v54, %v2399_v0  ;;  %v2293_v54 = vrot.slane %v2292_v13, 4  ;;  %v2403_v0 = vmul.f32 %v7186_v56, %v7186_v56  ;;  %v2127_v50 = vadd.f32 %v7208_v27, %v1854_v6 }
 0x422   : > { %v2458_v41 = vadd.f32 %v2402_v9, %v2401_v43  ;;  %v1857_v43 = vadd.f32 %v7225_v8, %v7223_v52  ;;  %v2283_v58 = vrot.slane %v2282_v38, 1  ;;  %v2177_v4 = vrot.slane %v2129_v19, 2 }
 0x423   : > { %v7367_v44 = vpop.f32.mrf.mxu0  ;;  %v2452_v21 = vrot.slane %v2451_v55, 4  ;;  %v2465_v9 = vadd.f32 %v2404_v37, %v2403_v0  ;;  %v2294_v63 = vadd.f32 %v2293_v54, %v2292_v13  ;;  %v2307_v37 = vrot.slane %v2306_v26, 4 }
 0x424   : > { %9963 = vst [vmem:[#allocation85_spill] sm:$0xff] %v7367_v44  ;;  %v2276_v44 = vrot.slane %v2275_v59, 1  ;;  %v2459_v25 = vrot.slane %v2458_v41, 4  ;;  %v2128_v52 = vadd.f32 %v7221_v11, %v1857_v43  ;;  %v2302_v47 = vrot.slane %v2301_v29, 2 }
 0x425   : > { %v2466_v0 = vrot.slane %v2465_v9, 4  ;;  %v2295_v13 = vrot.slane %v2294_v63, 2  ;;  %v2308_v5 = vadd.f32 %v2307_v37, %v2306_v26  ;;  %v2436_v31 = vadd.f32 %v2435_v7, %v2434_v2 }
 0x426   : > { %v2277_v15 = vadd.f32 %v2276_v44, %v2275_v59  ;;  %v2460_v61 = vadd.f32 %v2459_v25, %v2458_v41  ;;  %v2176_v41 = vrot.slane %v2128_v52, 2  ;;  %v2442_v54 = vrot.slane %v2441_v35, 1 }
 0x427   : > { %v7375_v30 = vpop.f32.mrf.mxu3  ;;  %v2467_v20 = vadd.f32 %v2466_v0, %v2465_v9  ;;  %v2313_v27 = vadd.f32 %v7213_v14, %v7205_v62  ;;  %v2175_v10 = vrot.slane %v2127_v50, 2  ;;  %v2284_v9 = vadd.f32 %v2283_v58, %v2282_v38 }
 0x428   : > { %v7373_v17 = vpop.f32.mrf.mxu2  ;;  %9965 = vst [vmem:[#allocation87_spill] sm:$0xff] %v7375_v30  ;;  %v2447_v30 = vrot.slane %v2446_v51, 2  ;;  %v2214_v26 = vsel %vm2199_vm1, %v2176_v41, %v2177_v4  ;;  %v2303_v6 = vadd.f32 %v2302_v47, %v2301_v29  ;;  %v2309_v19 = vrot.slane %v2308_v5, 2 }
 0x429   : > { %9964 = vst [vmem:[#allocation86_spill] sm:$0xff] %v7373_v17  ;;  %v2453_v17 = vadd.f32 %v2452_v21, %v2451_v55  ;;  %v2289_v55 = vadd.f32 %v2288_v24, %v2287_v53  ;;  %v2461_v21 = vrot.slane %v2460_v61, 2  ;;  %v2296_v53 = vadd.f32 %v2295_v13, %v2294_v63 }
 0x42a   : > { %v2448_v34 = vadd.f32 %v2447_v30, %v2446_v51  ;;  %v5340_v30 = vld [vmem:[%s9747_s2 + $0x198] sm:$0xff]  ;;  %v2472_v51 = vadd.f32 %v2406_v36, %v2405_v48  ;;  %v2468_v24 = vrot.slane %v2467_v20, 2  ;;  %v2215_v37 = vsel %vm2199_vm1, %v2175_v10, %v2176_v41 }
 0x42b   : > { %v7385_v8 = vpop.f32.mrf.mxu0  ;;  %v2454_v44 = vrot.slane %v2453_v17, 2  ;;  %2855 = vmatpush.msra.mxu1 %v5340_v30  ;;  %v2290_v43 = vrot.slane %v2289_v55, 1  ;;  %v2443_v52 = vadd.f32 %v2442_v54, %v2441_v35  ;;  %v2462_v63 = vadd.f32 %v2461_v21, %v2460_v61 }
 0x42c   : > { %v2449_v25 = vrot.slane %v2448_v34, 1  ;;  %v2314_v7 = vrot.slane %v2313_v27, 4  ;;  %v7408_v13 = vadd.f32 %v2214_v26, %v6868_v46  ;;  %v2376_v36 = vadd.f32 %v2277_v15, %v7363_v32 }
 0x42d   : > { %v2455_v2 = vadd.f32 %v2454_v44, %v2453_v17  ;;  %v2535_v38 = vadd.f32 %v2436_v31, %v2429_v60  ;;  %v2297_v58 = vrot.slane %v2296_v53, 1  ;;  %v2473_v50 = vrot.slane %v2472_v51, 4 }
 0x42e   : > { %v2291_v17 = vadd.f32 %v2290_v43, %v2289_v55  ;;  %v2450_v29 = vadd.f32 %v2449_v25, %v2448_v34  ;;  %v7412_v44 = vadd.f32 %v2215_v37, %v6854_v40  ;;  %v2377_v35 = vadd.f32 %v2376_v36, %v2284_v9 }
 0x42f   : > { %v7392_v11 = vpop.f32.mrf.mxu3  ;;  %v2456_v4 = vrot.slane %v2455_v2, 1  ;;  %v2304_v61 = vrot.slane %v2303_v6, 1  ;;  %v2310_v41 = vadd.f32 %v2309_v19, %v2308_v5  ;;  %v2469_v46 = vadd.f32 %v2468_v24, %v2467_v20 }
 0x430   : > { %v7390_v59 = vpop.f32.mrf.mxu2  ;;  %v2536_v54 = vadd.f32 %v2535_v38, %v2443_v52  ;;  %v2463_v21 = vrot.slane %v2462_v63, 1  ;;  %v2315_v15 = vadd.f32 %v2314_v7, %v2313_v27  ;;  %v2320_v32 = vadd.f32 %v7408_v13, %v7412_v44 }
 0x431   : > { %v2298_v60 = vadd.f32 %v2297_v58, %v2296_v53  ;;  %v2474_v55 = vadd.f32 %v2473_v50, %v2472_v51  ;;  %v2408_v40 = vmul.f32 %v7408_v13, %v7408_v13  ;;  %v2378_v34 = vadd.f32 %v2377_v35, %v2291_v17  ;;  %v9967_v35 = vld [vmem:[#allocation64_spill] sm:$0xff] }
 0x432   : > { %v2537_v31 = vadd.f32 %v2536_v54, %v2450_v29  ;;  %v2457_v30 = vadd.f32 %v2456_v4, %v2455_v2  ;;  %v1866_v10 = vadd.f32 %v7249_v28, %v7247_v23  ;;  %v2305_v26 = vadd.f32 %v2304_v61, %v2303_v6  ;;  %v9966_v4 = vld [vmem:[#allocation63_spill] sm:$0xff]  ;;  %v9969_v54 = vld [vmem:[#allocation74_spill] sm:$0xff] }
 0x433   : > { %v7405_v0 = vpop.f32.mrf.mxu0  ;;  %v2311_v5 = vrot.slane %v2310_v41, 1  ;;  %v2470_v20 = vrot.slane %v2469_v46, 1  ;;  %v2407_v27 = vmul.f32 %v7412_v44, %v7412_v44  ;;  %v2464_v43 = vadd.f32 %v2463_v21, %v2462_v63 }
 0x434   : > { %v2316_v53 = vrot.slane %v2315_v15, 2  ;;  %v2321_v51 = vrot.slane %v2320_v32, 4  ;;  %v1863_v25 = vadd.f32 %v7241_v3, %v7239_v18  ;;  %v2379_v19 = vadd.f32 %v2378_v34, %v2298_v60 }
 0x435   : > { %v2475_v24 = vrot.slane %v2474_v55, 2  ;;  %v2479_v2 = vadd.f32 %v2408_v40, %v2407_v27  ;;  %v1869_v23 = vadd.f32 %v7259_v42, %v7257_v16  ;;  %v2538_v28 = vadd.f32 %v2537_v31, %v2457_v30  ;;  %v9973_v30 = vld [vmem:[#allocation65_spill] sm:$0xff]  ;;  %v9975_v27 = vld [vmem:[#allocation68_spill] sm:$0xff] }
 0x436   : > { %v2131_v6 = vadd.f32 %v7245_v57, %v1866_v10  ;;  %v2380_v7 = vadd.f32 %v2379_v19, %v2305_v26  ;;  %v2312_v36 = vadd.f32 %v2311_v5, %v2310_v41  ;;  %v2471_v38 = vadd.f32 %v2470_v20, %v2469_v46  ;;  %v9974_v5 = vld [vmem:[#allocation62_spill] sm:$0xff] }
 0x437   : > { %v7416_v48 = vpop.f32.mrf.mxu3  ;;  %v1878_v63 = vadd.f32 %v7283_v33, %v7281_v45  ;;  %v2539_v58 = vadd.f32 %v2538_v28, %v2464_v43  ;;  %v7435_v50 = vadd.f32 %v2316_v53, %v2315_v15  ;;  %v2322_v18 = vadd.f32 %v2321_v51, %v2320_v32  ;;  %v9968_v33 = vld [vmem:[#allocation66_spill] sm:$0xff]  ;;  %v9976_v43 = vld [vmem:[#allocation69_spill] sm:$0xff]  ;;  %v9977_v51 = vld [vmem:[#allocation83_spill] sm:$0xff] }
 0x438   : > { %v7414_v47 = vpop.f32.mrf.mxu2  ;;  %v2130_v3 = vadd.f32 %v7237_v22, %v1863_v25  ;;  %v7438_v17 = vadd.f32 %v2475_v24, %v2474_v55  ;;  %v2480_v16 = vrot.slane %v2479_v2, 4  ;;  %v2132_v42 = vadd.f32 %v7255_v1, %v1869_v23  ;;  %v9970_v22 = vld [vmem:[#allocation75_spill] sm:$0xff]  ;;  %v9978_v25 = vld [vmem:[#allocation84_spill] sm:$0xff] }
 0x439   : > { %v1875_v57 = vadd.f32 %v7273_v12, %v7271_v39  ;;  %v2179_v29 = vrot.slane %v2131_v6, 2  ;;  %v1872_v61 = vadd.f32 %v9967_v35, %v9966_v4  ;;  %v7445_v41 = vadd.f32 %v2380_v7, %v2312_v36  ;;  %v9971_v55 = vld [vmem:[#allocation71_spill] sm:$0xff]  ;;  %v9972_v39 = vld [vmem:[#allocation72_spill] sm:$0xff]  ;;  %v9979_v6 = vld [vmem:[#allocation73_spill] sm:$0xff] }
 0x43a   : > { %v7447_v45 = vadd.f32 %v2539_v58, %v2471_v38  ;;  %v2135_v46 = vadd.f32 %v9968_v33, %v1878_v63  ;;  %v1887_v21 = vadd.f32 %v9970_v22, %v9969_v54  ;;  %v2318_v32 = vrot.slane %v7435_v50, 1  ;;  %v9980_v63 = vld [vmem:[#allocation70_spill] sm:$0xff]  ;;  %v5339_v4 = vld [vmem:[%s9747_s2 + $0x190] sm:$0xff]  ;;  %v9983_v35 = vld [vmem:[#allocation40_spill] sm:$0xff] }
 0x43b   : > { %v7426_v9 = vpop.f32.mrf.mxu0  ;;  %v2323_v1 = vrot.slane %v2322_v18, 2  ;;  %v2178_v60 = vrot.slane %v2130_v3, 2  ;;  %v1884_v12 = vadd.f32 %v9972_v39, %v9971_v55  ;;  %v2477_v40 = vrot.slane %v7438_v17, 1  ;;  %v9981_v3 = vld [vmem:[#allocation80_spill] sm:$0xff]  ;;  %2856 = vmatpush.msra.mxu1 %v5339_v4  ;;  %v9984_v33 = vld [vmem:[#allocation67_spill] sm:$0xff]  ;;  %v9985_v54 = vld [vmem:[#allocation77_spill] sm:$0xff] }
 0x43c   : > { %v7456_v34 = vadd.f32 %v2480_v16, %v2479_v2  ;;  %v2180_v31 = vrot.slane %v2132_v42, 2  ;;  %v2134_v10 = vadd.f32 %v9973_v30, %v1875_v57  ;;  %v2133_v20 = vadd.f32 %v9974_v5, %v1872_v61  ;;  %v9982_v16 = vld [vmem:[#allocation81_spill] sm:$0xff]  ;;  %v9986_v22 = vld [vmem:[#allocation78_spill] sm:$0xff] }
 0x43d   : > { %v2213_v26 = vsel %vm2199_vm1, %v2178_v60, %v2179_v29  ;;  %v1881_v53 = vadd.f32 %v9976_v43, %v9975_v27  ;;  %v1896_v19 = vadd.f32 %v9978_v25, %v9977_v51  ;;  %v2183_v28 = vrot.slane %v2135_v46, 2  ;;  %v9992_v51 = vld [vmem:[#allocation76_spill] sm:$0xff] }
 0x43e   : > { %v2138_v2 = vadd.f32 %v9979_v6, %v1887_v21  ;;  %v7467_v38 = vadd.f32 %v2323_v1, %v2322_v18  ;;  %v2137_v58 = vadd.f32 %v9980_v63, %v1884_v12  ;;  %v1893_v42 = vadd.f32 %v9982_v16, %v9981_v3  ;;  %v9987_v1 = vld [vmem:[#allocation82_spill] sm:$0xff]  ;;  %v9993_v6 = vld [vmem:[#allocation43_spill] sm:$0xff]  ;;  %v9994_v3 = vld [vmem:[#allocation85_spill] sm:$0xff] }
 0x43f   : > { %v1907_v52 = vpop.f32.mrf.mxu3  ;;  %v1905_v57 = vadd.f32 %v7416_v48, %v7414_v47  ;;  %v7478_v61 = vadd.f32 %v2213_v26, %v9983_v35  ;;  %v2136_v46 = vadd.f32 %v9984_v33, %v1881_v53  ;;  %v1890_v21 = vadd.f32 %v9986_v22, %v9985_v54  ;;  %v9990_v26 = vld [vmem:[#allocation87_spill] sm:$0xff] }
 0x440   : > { %v1746_v37 = vpop.f32.mrf.mxu2  ;;  %v2141_v47 = vadd.f32 %v9987_v1, %v1896_v19  ;;  %v1902_v48 = vadd.f32 %v7392_v11, %v7390_v59  ;;  %v2181_v60 = vrot.slane %v2133_v20, 2  ;;  %v2186_v39 = vrot.slane %v2138_v2, 2  ;;  %v9991_v59 = vld [vmem:[#allocation41_spill] sm:$0xff]  ;;  %v9997_v1 = vld [vmem:[#allocation44_spill] sm:$0xff] }
 0x441   : > { %v1908_v7 = vadd.f32 %v1907_v52, %v1746_v37  ;;  %v2212_v37 = vsel %vm2199_vm1, %v2179_v29, %v2180_v31  ;;  %v2182_v52 = vrot.slane %v2134_v10, 2  ;;  %v9988_v31 = vld [vmem:[#allocation79_spill] sm:$0xff]  ;;  %v9989_v10 = vld [vmem:[#allocation86_spill] sm:$0xff]  ;;  %v2144_v27 = vadd.f32 %v7405_v0, %v1905_v57 }
 0x442   : > { %v2140_v30 = vadd.f32 %v9988_v31, %v1893_v42  ;;  %v1899_v5 = vadd.f32 %v9990_v26, %v9989_v10  ;;  %v2409_v43 = vmul.f32 %v7478_v61, %v7478_v61  ;;  %v7498_v11 = vadd.f32 %v2212_v37, %v9991_v59  ;;  %v9995_v57 = vld [vmem:[#allocation42_spill] sm:$0xff]  ;;  %v9999_v10 = vld [vmem:[#allocation45_spill] sm:$0xff] }
 0x443   : > { %v2088_v15 = vpop.f32.mrf.mxu0  ;;  %v2210_v55 = vsel %vm2199_vm1, %v2182_v52, %v2183_v28  ;;  %v2145_v29 = vadd.f32 %v7426_v9, %v1908_v7  ;;  %v2211_v20 = vsel %vm2199_vm1, %v2181_v60, %v2182_v52  ;;  %v2184_v9 = vrot.slane %v2136_v46, 2  ;;  %v9996_v52 = vld [vmem:[#allocation12_spill] sm:$0xff] }
 0x444   : > { %v2139_v25 = vadd.f32 %v9992_v51, %v1890_v21  ;;  %v2189_v19 = vrot.slane %v2141_v47, 2  ;;  %v7505_v0 = vadd.f32 %v2210_v55, %v9993_v6  ;;  %v2142_v16 = vadd.f32 %v9994_v3, %v1899_v5 }
 0x445   : > { %v2193_v7 = vrot.slane %v2145_v29, 2  ;;  %v2192_v42 = vrot.slane %v2144_v27, 2  ;;  %v7515_v4 = vadd.f32 %v2211_v20, %v9995_v57  ;;  %v2327_v22 = vadd.f32 %v7498_v11, %v7478_v61 }
 0x446   : > { %v2187_v33 = vrot.slane %v2139_v25, 2  ;;  %v2412_v21 = vmul.f32 %v7505_v0, %v7505_v0  ;;  %v2482_v57 = vrot.slane %v7456_v34, 2 }
 0x447   : > { %v1910_v23 = vpop.f32.mrf.mxu3  ;;  %v2334_v27 = vadd.f32 %v7505_v0, %v7515_v4 }
 0x448   : > { %v1749_v24 = vpop.f32.mrf.mxu2 }
 0x449   : > { %v1911_v36 = vadd.f32 %v1910_v23, %v1749_v24  ;;  %v2143_v24 = vadd.f32 %v7385_v8, %v1902_v48  ;;  %v2410_v8 = vmul.f32 %v7498_v11, %v7498_v11 }
 0x44b   : > { %v2146_v18 = vadd.f32 %v2088_v15, %v1911_v36  ;;  %v2091_v12 = vpop.f32.mrf.mxu0  ;;  %v2185_v15 = vrot.slane %v2137_v58, 2  ;;  %v2188_v58 = vrot.slane %v2140_v30, 2  ;;  %v2191_v54 = vrot.slane %v2143_v24, 2 }
 0x44c   : > { %v2486_v31 = vadd.f32 %v2410_v8, %v2409_v43  ;;  %v2411_v30 = vmul.f32 %v7515_v4, %v7515_v4 }
 0x44d   : > { %v2194_v53 = vrot.slane %v2146_v18, 2  ;;  %v2208_v2 = vsel %vm2199_vm1, %v2185_v15, %v2186_v39  ;;  %v2209_v63 = vsel %vm2199_vm1, %v2184_v9, %v2185_v15  ;;  %v2206_v46 = vsel %vm2199_vm1, %v2188_v58, %v2189_v19  ;;  %v10000_v9 = vld [vmem:[#allocation48_spill] sm:$0xff] }
 0x44e   : > { %v7520_v18 = vadd.f32 %v2208_v2, %v9996_v52  ;;  %v7529_v47 = vadd.f32 %v2209_v63, %v9997_v1  ;;  %v2207_v55 = vsel %vm2199_vm1, %v2187_v33, %v2188_v58  ;;  %v2190_v39 = vrot.slane %v2142_v16, 2 }
 0x44f   : > { %v1913_v28 = vpop.f32.mrf.mxu3  ;;  %v2203_v35 = vsel %vm2199_vm1, %v2193_v7, %v2194_v53  ;;  %v2204_v29 = vsel %vm2199_vm1, %v2191_v54, %v2192_v42  ;;  %v7543_v26 = vadd.f32 %v2206_v46, %v9999_v10  ;;  %v2328_v19 = vrot.slane %v2327_v22, 4  ;;  %v10004_v42 = vld [vmem:[#allocation46_spill] sm:$0xff] }
 0x450   : > { %v1752_v23 = vpop.f32.mrf.mxu2  ;;  %v2414_v59 = vmul.f32 %v7520_v18, %v7520_v18  ;;  %v2205_v20 = vsel %vm2199_vm1, %v2190_v39, %v2191_v54  ;;  %v2493_v24 = vadd.f32 %v2412_v21, %v2411_v30  ;;  %v2413_v2 = vmul.f32 %v7529_v47, %v7529_v47 }
 0x451   : > { %v1914_v36 = vadd.f32 %v1913_v28, %v1752_v23  ;;  %v10001_v23 = vld [vmem:[#allocation15_spill] sm:$0xff]  ;;  %v2487_v58 = vrot.slane %v2486_v31, 4  ;;  %v2341_v3 = vadd.f32 %v7520_v18, %v7529_v47  ;;  %v2416_v16 = vmul.f32 %v7543_v26, %v7543_v26 }
 0x452   : > { %v7557_v28 = vadd.f32 %v2207_v55, %v10001_v23  ;;  %v7577_v8 = vadd.f32 %v2205_v20, %v10004_v42  ;;  %v2319_v33 = vadd.f32 %v2318_v32, %v7435_v50  ;;  %v2325_v55 = vrot.slane %v7467_v38, 1 }
 0x453   : > { %v2147_v37 = vadd.f32 %v2091_v12, %v1914_v36  ;;  %v7531_v60 = vpop.f32.mrf.mxu0  ;;  %v9998_v12 = vld [vmem:[#allocation47_spill] sm:$0xff]  ;;  %v2329_v39 = vadd.f32 %v2328_v19, %v2327_v22  ;;  %v2342_v50 = vrot.slane %v2341_v3, 4  ;;  %v2483_v10 = vadd.f32 %v2482_v57, %v7456_v34 }
 0x454   : > { %v7538_v15 = vadd.f32 %v2203_v35, %v9998_v12  ;;  %v2335_v35 = vrot.slane %v2334_v27, 4  ;;  %v2415_v46 = vmul.f32 %v7557_v28, %v7557_v28  ;;  %v2348_v54 = vadd.f32 %v7543_v26, %v7557_v28 }
 0x455   : > { %v2195_v48 = vrot.slane %v2147_v37, 2  ;;  %v2500_v37 = vadd.f32 %v2414_v59, %v2413_v2  ;;  %v2488_v12 = vadd.f32 %v2487_v58, %v2486_v31  ;;  %v2417_v30 = vmul.f32 %v7577_v8, %v7577_v8 }
 0x456   : > { %v2419_v7 = vmul.f32 %v7538_v15, %v7538_v15  ;;  %v2507_v32 = vadd.f32 %v2416_v16, %v2415_v46  ;;  %v2382_v31 = vadd.f32 %v7445_v41, %v2319_v33  ;;  %v2326_v19 = vadd.f32 %v2325_v55, %v7467_v38 }
 0x457   : > { %v2202_v5 = vsel %vm2199_vm1, %v2194_v53, %v2195_v48  ;;  %v1916_v25 = vpop.f32.mrf.mxu3  ;;  %v10002_v53 = vld [vmem:[#allocation20_spill] sm:$0xff]  ;;  %v2478_v48 = vadd.f32 %v2477_v40, %v7438_v17  ;;  %v2501_v59 = vrot.slane %v2500_v37, 4  ;;  %v2349_v17 = vrot.slane %v2348_v54, 4 }
 0x458   : > { %v7554_v43 = vadd.f32 %v2202_v5, %v10000_v9  ;;  %v1755_v51 = vpop.f32.mrf.mxu2  ;;  %v7560_v6 = vadd.f32 %v2204_v29, %v10002_v53  ;;  %v2494_v29 = vrot.slane %v2493_v24, 4  ;;  %v2336_v5 = vadd.f32 %v2335_v35, %v2334_v27 }
 0x459   : > { %v1917_v53 = vadd.f32 %v1916_v25, %v1755_v51  ;;  %v2330_v2 = vrot.slane %v2329_v39, 2  ;;  %v2343_v58 = vadd.f32 %v2342_v50, %v2341_v3  ;;  %v2508_v34 = vrot.slane %v2507_v32, 4 }
 0x45a   : > { %10003 = vst [vmem:[#allocation63_spill] sm:$0xff] %v7560_v6  ;;  %v7568_v36 = vadd.f32 %v7554_v43, %v7538_v15  ;;  %v2420_v63 = vmul.f32 %v7554_v43, %v7554_v43  ;;  %v2418_v21 = vmul.f32 %v7560_v6, %v7560_v6  ;;  %v2355_v20 = vadd.f32 %v7560_v6, %v7577_v8 }
 0x45b   : > { %v2097_v1 = vpop.f32.mrf.mxu0  ;;  %v2541_v16 = vadd.f32 %v7447_v45, %v2478_v48  ;;  %v2337_v42 = vrot.slane %v2336_v5, 2  ;;  %v2502_v57 = vadd.f32 %v2501_v59, %v2500_v37  ;;  %v2484_v46 = vrot.slane %v2483_v10, 1 }
 0x45c   : > { %v7580_v52 = vadd.f32 %v2420_v63, %v2419_v7  ;;  %v2514_v40 = vadd.f32 %v2418_v21, %v2417_v30  ;;  %v2495_v7 = vadd.f32 %v2494_v29, %v2493_v24  ;;  %v2489_v63 = vrot.slane %v2488_v12, 2 }
 0x45d   : > { %v2356_v35 = vrot.slane %v2355_v20, 4  ;;  %v2350_v6 = vadd.f32 %v2349_v17, %v2348_v54  ;;  %v2148_v51 = vadd.f32 %v7531_v60, %v1917_v53  ;;  %v2383_v25 = vadd.f32 %v2382_v31, %v2326_v19 }
 0x45e   : > { %v2515_v21 = vrot.slane %v2514_v40, 4  ;;  %v2331_v41 = vadd.f32 %v2330_v2, %v2329_v39  ;;  %v2496_v33 = vrot.slane %v2495_v7, 2  ;;  %v2363_v38 = vrot.slane %v7568_v36, 4 }
 0x45f   : > { %v1919_v23 = vpop.f32.mrf.mxu3  ;;  %v2490_v24 = vadd.f32 %v2489_v63, %v2488_v12  ;;  %v2344_v55 = vrot.slane %v2343_v58, 2  ;;  %v2509_v3 = vadd.f32 %v2508_v34, %v2507_v32  ;;  %v2338_v50 = vadd.f32 %v2337_v42, %v2336_v5 }
 0x460   : > { %v1758_v9 = vpop.f32.mrf.mxu2  ;;  %v2503_v45 = vrot.slane %v2502_v57, 2  ;;  %v2357_v48 = vadd.f32 %v2356_v35, %v2355_v20  ;;  %v2522_v37 = vrot.slane %v7580_v52, 4  ;;  %v2351_v59 = vrot.slane %v2350_v6, 2 }
 0x461   : > { %v1920_v22 = vadd.f32 %v1919_v23, %v1758_v9  ;;  %v2516_v9 = vadd.f32 %v2515_v21, %v2514_v40  ;;  %v2196_v60 = vrot.slane %v2148_v51, 2  ;;  %v2485_v39 = vadd.f32 %v2484_v46, %v2483_v10  ;;  %v10005_v46 = vld [vmem:[#allocation25_spill] sm:$0xff] }
 0x462   : > { %v2332_v17 = vrot.slane %v2331_v41, 1  ;;  %v2497_v53 = vadd.f32 %v2496_v33, %v2495_v7  ;;  %v2364_v12 = vadd.f32 %v2363_v38, %v7568_v36  ;;  %v2510_v32 = vrot.slane %v2509_v3, 2 }
 0x463   : > { %v2149_v27 = vadd.f32 %v2097_v1, %v1920_v22  ;;  %v2100_v1 = vpop.f32.mrf.mxu0  ;;  %v2345_v22 = vadd.f32 %v2344_v55, %v2343_v58  ;;  %v2491_v20 = vrot.slane %v2490_v24, 1  ;;  %v2339_v19 = vrot.slane %v2338_v50, 1 }
 0x464   : > { %v2358_v2 = vrot.slane %v2357_v48, 2  ;;  %v2523_v63 = vadd.f32 %v2522_v37, %v7580_v52  ;;  %v2504_v34 = vadd.f32 %v2503_v45, %v2502_v57  ;;  %v2352_v40 = vadd.f32 %v2351_v59, %v2350_v6  ;;  %v10006_v52 = vld [vmem:[#allocation49_spill] sm:$0xff] }
 0x465   : > { %v2197_v29 = vrot.slane %v2149_v27, 2  ;;  %v2517_v27 = vrot.slane %v2516_v9, 2  ;;  %v2542_v10 = vadd.f32 %v2541_v16, %v2485_v39  ;;  %v2333_v35 = vadd.f32 %v2332_v17, %v2331_v41 }
 0x466   : > { %v2365_v7 = vrot.slane %v2364_v12, 2  ;;  %v2498_v58 = vrot.slane %v2497_v53, 1  ;;  %v2346_v21 = vrot.slane %v2345_v22, 1  ;;  %v2511_v51 = vadd.f32 %v2510_v32, %v2509_v3 }
 0x467   : > { %v1922_v54 = vpop.f32.mrf.mxu3  ;;  %v2201_v5 = vsel %vm2199_vm1, %v2196_v60, %v2197_v29  ;;  %v2492_v38 = vadd.f32 %v2491_v20, %v2490_v24  ;;  %v2359_v55 = vadd.f32 %v2358_v2, %v2357_v48  ;;  %v2340_v6 = vadd.f32 %v2339_v19, %v2338_v50 }
 0x468   : > { %v1761_v30 = vpop.f32.mrf.mxu2  ;;  %v7611_v36 = vadd.f32 %v2201_v5, %v10005_v46  ;;  %v2505_v45 = vrot.slane %v2504_v34, 1  ;;  %v2353_v16 = vrot.slane %v2352_v40, 1  ;;  %v2518_v41 = vadd.f32 %v2517_v27, %v2516_v9 }
 0x469   : > { %v1923_v23 = vadd.f32 %v1922_v54, %v1761_v30  ;;  %v2366_v37 = vadd.f32 %v2365_v7, %v2364_v12  ;;  %v2384_v24 = vadd.f32 %v2383_v25, %v2333_v35  ;;  %v2499_v48 = vadd.f32 %v2498_v58, %v2497_v53 }
 0x46a   : > { %v2421_v30 = vmul.f32 %v7611_v36, %v7611_v36  ;;  %v2347_v54 = vadd.f32 %v2346_v21, %v2345_v22  ;;  %v2512_v59 = vrot.slane %v2511_v51, 1  ;;  %v2360_v60 = vrot.slane %v2359_v55, 1 }
 0x46b   : > { %v2150_v31 = vadd.f32 %v2100_v1, %v1923_v23  ;;  %v2524_v1 = vrot.slane %v2523_v63, 2  ;;  %v2543_v17 = vadd.f32 %v2542_v10, %v2492_v38  ;;  %v2385_v9 = vadd.f32 %v2384_v24, %v2340_v6 }
 0x46c   : > { %v2506_v12 = vadd.f32 %v2505_v45, %v2504_v34  ;;  %v2354_v32 = vadd.f32 %v2353_v16, %v2352_v40  ;;  %v2519_v5 = vrot.slane %v2518_v41, 1  ;;  %v2361_v7 = vadd.f32 %v2360_v60, %v2359_v55 }
 0x46d   : > { %v2198_v42 = vrot.slane %v2150_v31, 2  ;;  %v2525_v23 = vadd.f32 %v2524_v1, %v2523_v63  ;;  %v2367_v31 = vrot.slane %v2366_v37, 1  ;;  %v2544_v2 = vadd.f32 %v2543_v17, %v2499_v48 }
 0x46e   : > { %v2386_v27 = vadd.f32 %v2385_v9, %v2347_v54  ;;  %v2520_v63 = vadd.f32 %v2519_v5, %v2518_v41 }
 0x46f   : > { %v2200_v33 = vsel %vm2199_vm1, %v2197_v29, %v2198_v42  ;;  %v2513_v42 = vadd.f32 %v2512_v59, %v2511_v51  ;;  %v2526_v25 = vrot.slane %v2525_v23, 1  ;;  %v2545_v35 = vadd.f32 %v2544_v2, %v2506_v12  ;;  %v10007_v12 = vld [vmem:[#allocation50_spill] sm:$0xff] }
 0x470   : > { %v7616_v57 = vadd.f32 %v2200_v33, %v10006_v52  ;;  %v2387_v46 = vadd.f32 %v2386_v27, %v2354_v32  ;;  %v2368_v58 = vadd.f32 %v2367_v31, %v2366_v37  ;;  %v10009_v31 = vld [vmem:[#allocation51_spill] sm:$0xff]  ;;  %v10011_v27 = vld [vmem:[#allocation53_spill] sm:$0xff] }
 0x471   : > { %v2546_v33 = vadd.f32 %v2545_v35, %v2513_v42  ;;  %v2527_v40 = vadd.f32 %v2526_v25, %v2525_v23 }
 0x472   : > { %v2369_v3 = vadd.f32 %v7616_v57, %v7611_v36  ;;  %v2422_v29 = vmul.f32 %v7616_v57, %v7616_v57  ;;  %v2388_v34 = vadd.f32 %v2387_v46, %v2361_v7  ;;  %v10012_v7 = vld [vmem:[#allocation54_spill] sm:$0xff]  ;;  %v10014_v46 = vld [vmem:[#allocation56_spill] sm:$0xff] }
 0x473   : > { %v2547_v52 = vadd.f32 %v2546_v33, %v2520_v63 }
 0x474   : > { %v2370_v50 = vrot.slane %v2369_v3, 4  ;;  %v2528_v39 = vadd.f32 %v2422_v29, %v2421_v30  ;;  %v2389_v6 = vadd.f32 %v2388_v34, %v2368_v58  ;;  %v10015_v58 = vld [vmem:[#allocation57_spill] sm:$0xff]  ;;  %v10017_v34 = vld [vmem:[#allocation59_spill] sm:$0xff] }
 0x475   : > { %v2548_v51 = vadd.f32 %v2547_v52, %v2527_v40 }
 0x476   : > { %v2371_v20 = vadd.f32 %v2370_v50, %v2369_v3  ;;  %v2529_v19 = vrot.slane %v2528_v39, 4 }
 0x478   : > { %v2372_v53 = vrot.slane %v2371_v20, 2  ;;  %v2530_v22 = vadd.f32 %v2529_v19, %v2528_v39  ;;  %v10010_v19 = vld [vmem:[#allocation52_spill] sm:$0xff] }
 0x47a   : > { %v2373_v21 = vadd.f32 %v2372_v53, %v2371_v20  ;;  %v2531_v10 = vrot.slane %v2530_v22, 2 }
 0x47c   : > { %v2374_v38 = vrot.slane %v2373_v21, 1  ;;  %v2532_v1 = vadd.f32 %v2531_v10, %v2530_v22  ;;  %v10013_v22 = vld [vmem:[#allocation55_spill] sm:$0xff]  ;;  %v10016_v10 = vld [vmem:[#allocation58_spill] sm:$0xff] }
 0x47e   : > { %v2375_v45 = vadd.f32 %v2374_v38, %v2373_v21  ;;  %v2533_v16 = vrot.slane %v2532_v1, 1  ;;  %v10018_v38 = vld [vmem:[#allocation60_spill] sm:$0xff] }
 0x480   : > { %v2390_v55 = vadd.f32 %v2389_v6, %v2375_v45  ;;  %v2534_v30 = vadd.f32 %v2533_v16, %v2532_v1  ;;  %v10019_v45 = vld [vmem:[#allocation61_spill] sm:$0xff] }
 0x482   : > { %v2549_v3 = vadd.f32 %v2548_v51, %v2534_v30  ;;  %v7624_v29 = vmul.f32 0.00390625, %v2390_v55 }
 0x484   : > { %v2551_v24 = vmul.f32 0.00390625, %v2549_v3  ;;  %v2552_v41 = vmul.f32 %v7624_v29, %v7624_v29  ;;  %v2586_v37 = vsub.f32 %v7616_v57, %v7624_v29  ;;  %v2583_v60 = vsub.f32 %v7538_v15, %v7624_v29  ;;  %v10008_v57 = vld [vmem:[#allocation30_spill] sm:$0xff] }
 0x485   : > { %v2584_v23 = vsub.f32 %v7554_v43, %v7624_v29  ;;  %v2585_v50 = vsub.f32 %v7611_v36, %v7624_v29  ;;  %v2555_v32 = vsub.f32 %v10007_v12, %v7624_v29  ;;  %v2556_v5 = vsub.f32 %v10008_v57, %v7624_v29 }
 0x486   : > { %v2553_v48 = vsub.f32 %v2551_v24, %v2552_v41  ;;  %v2557_v20 = vsub.f32 %v10009_v31, %v7624_v29  ;;  %v2558_v2 = vsub.f32 %v10010_v19, %v7624_v29  ;;  %v2559_v42 = vsub.f32 %v10011_v27, %v7624_v29 }
 0x487   : > { %v2560_v25 = vsub.f32 %v10012_v7, %v7624_v29  ;;  %v2561_v35 = vsub.f32 %v10013_v22, %v7624_v29  ;;  %v2562_v63 = vsub.f32 %v10014_v46, %v7624_v29  ;;  %v2563_v21 = vsub.f32 %v10015_v58, %v7624_v29 }
 0x488   : > { %v2554_v54 = vmax.f32 %v2553_v48, 0.0  ;;  %v2564_v33 = vsub.f32 %v10016_v10, %v7624_v29  ;;  %v2565_v40 = vsub.f32 %v10017_v34, %v7624_v29  ;;  %v2566_v1 = vsub.f32 %v10018_v38, %v7624_v29 }
 0x489   : > { %v2567_v52 = vsub.f32 %v7186_v56, %v7624_v29  ;;  %v2568_v16 = vsub.f32 %v10019_v45, %v7624_v29  ;;  %v2569_v51 = vsub.f32 %v7205_v62, %v7624_v29  ;;  %v2570_v55 = vsub.f32 %v7213_v14, %v7624_v29 }
 0x48a   : > { %v2587_v59 = vadd.f32 1e-05, %v2554_v54  ;;  %v2571_v30 = vsub.f32 %v7412_v44, %v7624_v29  ;;  %v2572_v3 = vsub.f32 %v7408_v13, %v7624_v29  ;;  %v2573_v56 = vsub.f32 %v7478_v61, %v7624_v29  ;;  %v10020_v54 = vld [vmem:[#allocation63_spill] sm:$0xff] }
 0x48b   : > { %v2574_v41 = vsub.f32 %v7498_v11, %v7624_v29  ;;  %v2575_v62 = vsub.f32 %v7515_v4, %v7624_v29  ;;  %v2576_v14 = vsub.f32 %v7505_v0, %v7624_v29  ;;  %v2577_v44 = vsub.f32 %v7529_v47, %v7624_v29 }
 0x48c   : > { %5510 = vrsqrt.f32 %v2587_v59  ;;  %vm2594_vm3 = vweird.f32 %v2587_v59  ;;  %v2578_v13 = vsub.f32 %v7520_v18, %v7624_v29  ;;  %v2579_v61 = vsub.f32 %v7557_v28, %v7624_v29 }
 0x48d   : > { %v2580_v11 = vsub.f32 %v7543_v26, %v7624_v29  ;;  %v2581_v4 = vsub.f32 %v7577_v8, %v7624_v29 }
 0x492   : > { %v5511_v39 = vpop.eup %5510 }
 0x493   : > { %v2589_v17 = vmul.f32 %v5511_v39, %v2587_v59  ;;  %vm2595_vm2 = vweird.f32 %v5511_v39  ;;  %v2582_v59 = vsub.f32 %v10020_v54, %v7624_v29 }
 0x494   : > { %vm2596_vm4 = vmor %vm2594_vm3, %vm2595_vm2 }
 0x495   : > { %v2590_v9 = vmul.f32 %v5511_v39, %v2589_v17 }
 0x497   : > { %v2591_v53 = vmul.f32 0.5, %v2590_v9 }
 0x499   : > { %v2592_v6 = vsub.f32 1.5, %v2591_v53 }
 0x49b   : > { %v2593_v24 = vmul.f32 %v5511_v39, %v2592_v6  ;;  %v5368_v6 = vld [vmem:[%s9747_s2 + $0x378] sm:$0xff] }
 0x49c   : > { %3150 = vmatpush.msrb.mxu3 %v5368_v6  ;;  %v2821_v6 = vld [vmem:[%s9747_s2 + $0x58] sm:$0xff] }
 0x49d   : > { %v2597_v48 = vsel %vm2596_vm4, %v5511_v39, %v2593_v24 }
 0x49e   : > { %v2629_v0 = vmul.f32 %v2597_v48, %v2586_v37  ;;  %v7692_v17 = vmul.f32 %v2597_v48, %v2555_v32  ;;  %v7694_v47 = vmul.f32 %v2597_v48, %v2556_v5  ;;  %v7696_v9 = vmul.f32 %v2597_v48, %v2557_v20 }
 0x49f   : > { %v7698_v18 = vmul.f32 %v2597_v48, %v2558_v2  ;;  %v7700_v28 = vmul.f32 %v2597_v48, %v2559_v42  ;;  %v7702_v39 = vmul.f32 %v2597_v48, %v2560_v25  ;;  %v7704_v26 = vmul.f32 %v2597_v48, %v2561_v35 }
 0x4a0   : > { %v2661_v12 = vmax.f32 %v2629_v0, 0.0  ;;  %v7706_v8 = vmul.f32 %v2597_v48, %v2562_v63  ;;  %v7708_v57 = vmul.f32 %v2597_v48, %v2563_v21  ;;  %v7710_v37 = vmul.f32 %v2597_v48, %v2564_v33  ;;  %v5364_v0 = vld [vmem:[%s9747_s2 + $0x358] sm:$0xff] }
 0x4a1   : > { %v7712_v32 = vmul.f32 %v2597_v48, %v2565_v40  ;;  %v7714_v5 = vmul.f32 %v2597_v48, %v2566_v1  ;;  %v7716_v31 = vmul.f32 %v2597_v48, %v2567_v52  ;;  %v7718_v20 = vmul.f32 %v2597_v48, %v2568_v16  ;;  %v5400_v16 = vld [vmem:[%s9747_s2 + $0x278] sm:$0xff] }
 0x4a2   : > { %2693 = vst [vmem:[#allocation2 + $0x189] sm:$0xff] %v2661_v12  ;;  %v7720_v19 = vmul.f32 %v2597_v48, %v2569_v51  ;;  %v7722_v2 = vmul.f32 %v2597_v48, %v2570_v55  ;;  %v7724_v27 = vmul.f32 %v2597_v48, %v2571_v30  ;;  %v7726_v42 = vmul.f32 %v2597_v48, %v2572_v3  ;;  %v2825_v51 = vld [vmem:[%s9747_s2 + $0x78] sm:$0xff]  ;;  %v5367_v30 = vld [vmem:[%s9747_s2 + $0x370] sm:$0xff] }
 0x4a3   : > { %2725 = vst [vmem:[#allocation2 + $0x18b] sm:$0x40] %v2661_v12  ;;  %v7728_v7 = vmul.f32 %v2597_v48, %v2573_v56  ;;  %v7730_v25 = vmul.f32 %v2597_v48, %v2574_v41  ;;  %v7732_v53 = vmul.f32 %v2597_v48, %v2575_v62  ;;  %v7734_v22 = vmul.f32 %v2597_v48, %v2576_v14  ;;  %v5399_v3 = vld [vmem:[%s9747_s2 + $0x270] sm:$0xff]  ;;  %v5366_v62 = vld [vmem:[%s9747_s2 + $0x368] sm:$0xff]  ;;  %v5396_v12 = vld [vmem:[%s9747_s2 + $0x258] sm:$0xff] }
 0x4a4   : > { %v7736_v35 = vmul.f32 %v2597_v48, %v2577_v44  ;;  %v7738_v46 = vmul.f32 %v2597_v48, %v2578_v13  ;;  %v7740_v63 = vmul.f32 %v2597_v48, %v2579_v61  ;;  %v7742_v58 = vmul.f32 %v2597_v48, %v2580_v11  ;;  %3361 = vmatpush.msrb.mxu0 %v5400_v16  ;;  %v2824_v56 = vld [vmem:[%s9747_s2 + $0x70] sm:$0xff]  ;;  %v5398_v14 = vld [vmem:[%s9747_s2 + $0x268] sm:$0xff]  ;;  %v5397_v11 = vld [vmem:[%s9747_s2 + $0x260] sm:$0xff] }
 0x4a5   : > { %v7744_v21 = vmul.f32 %v2597_v48, %v2581_v4  ;;  %v7746_v10 = vmul.f32 %v2597_v48, %v2582_v59  ;;  %v7751_v33 = vmul.f32 %v2597_v48, %v2583_v60  ;;  %v7756_v34 = vmul.f32 %v2597_v48, %v2584_v23  ;;  %2988 = vmatpush.msrb.mxu2 %v2825_v51  ;;  %v2823_v44 = vld [vmem:[%s9747_s2 + $0x68] sm:$0xff]  ;;  %v2822_v4 = vld [vmem:[%s9747_s2 + $0x60] sm:$0xff] }
 0x4a6   : > { %v7761_v40 = vmul.f32 %v2597_v48, %v2585_v50  ;;  %v2630_v38 = vmax.f32 %v7692_v17, 0.0  ;;  %v2631_v1 = vmax.f32 %v7694_v47, 0.0  ;;  %v2632_v52 = vmax.f32 %v7696_v9, 0.0  ;;  %3151 = vmatpush.msrb.mxu3 %v5367_v30  ;;  %3362 = vmatpush.msrb.mxu0 %v5399_v3  ;;  %v5365_v48 = vld [vmem:[%s9747_s2 + $0x360] sm:$0xff]  ;;  %v5363_v30 = vld [vmem:[%s9747_s2 + $0x350] sm:$0xff]  ;;  %v2813_v17 = vld [vmem:[%s9747_s2 + $0x18] sm:$0xff] }
 0x4a7   : > { %v2633_v15 = vmax.f32 %v7698_v18, 0.0  ;;  %v2634_v60 = vmax.f32 %v7700_v28, 0.0  ;;  %v2635_v43 = vmax.f32 %v7702_v39, 0.0  ;;  %v2636_v36 = vmax.f32 %v7704_v26, 0.0  ;;  %2989 = vmatpush.msrb.mxu2 %v2824_v56  ;;  %v5395_v3 = vld [vmem:[%s9747_s2 + $0x250] sm:$0xff]  ;;  %v5353_v9 = vld [vmem:[%s9747_s2 + $0x300] sm:$0xff] }
 0x4a8   : > { %2662 = vst [vmem:[#allocation2 + $0x19] sm:$0xff] %v2630_v38  ;;  %v2637_v29 = vmax.f32 %v7706_v8, 0.0  ;;  %v2638_v23 = vmax.f32 %v7708_v57, 0.0  ;;  %v2639_v50 = vmax.f32 %v7710_v37, 0.0  ;;  %v2640_v45 = vmax.f32 %v7712_v32, 0.0  ;;  %3152 = vmatpush.msrb.mxu3 %v5366_v62  ;;  %3363 = vmatpush.msrb.mxu0 %v5398_v14  ;;  %v2820_v56 = vld [vmem:[%s9747_s2 + $0x50] sm:$0xff] }
 0x4a9   : > { %2663 = vst [vmem:[#allocation2 + $0x21] sm:$0xff] %v2631_v1  ;;  %v2641_v55 = vmax.f32 %v7714_v5, 0.0  ;;  %v2642_v24 = vmax.f32 %v7716_v31, 0.0  ;;  %v2643_v41 = vmax.f32 %v7718_v20, 0.0  ;;  %v2644_v13 = vmax.f32 %v7720_v19, 0.0  ;;  %2990 = vmatpush.msrb.mxu2 %v2823_v44  ;;  %v5362_v44 = vld [vmem:[%s9747_s2 + $0x348] sm:$0xff] }
 0x4aa   : > { %2664 = vst [vmem:[#allocation2 + $0x31] sm:$0xff] %v2632_v52  ;;  %v2645_v61 = vmax.f32 %v7722_v2, 0.0  ;;  %v2646_v54 = vmax.f32 %v7724_v27, 0.0  ;;  %3153 = vmatpush.msrb.mxu3 %v5365_v48  ;;  %v9812_v59 = vmax.f32 %v7726_v42, 0.0  ;;  %3364 = vmatpush.msrb.mxu0 %v5397_v11  ;;  %v2648_v16 = vmax.f32 %v7728_v7, 0.0  ;;  %v5394_v48 = vld [vmem:[%s9747_s2 + $0x248] sm:$0xff] }
 0x4ab   : > { %2665 = vst [vmem:[#allocation2 + $0x39] sm:$0xff] %v2633_v15  ;;  %2991 = vmatpush.msrb.mxu2 %v2822_v4  ;;  %v9810_v51 = vmax.f32 %v7730_v25, 0.0  ;;  %v2650_v62 = vmax.f32 %v7732_v53, 0.0  ;;  %v9809_v14 = vmax.f32 %v7734_v22, 0.0  ;;  %v2819_v11 = vld [vmem:[%s9747_s2 + $0x48] sm:$0xff]  ;;  %v2652_v4 = vmax.f32 %v7736_v35, 0.0 }
 0x4ac   : > { %2666 = vst [vmem:[#allocation2 + $0x49] sm:$0xff] %v2634_v60  ;;  %3154 = vmatpush.msrb.mxu3 %v5364_v0  ;;  %3365 = vmatpush.msrb.mxu0 %v5396_v12  ;;  %v9811_v0 = vmax.f32 %v7738_v46, 0.0  ;;  %v5361_v12 = vld [vmem:[%s9747_s2 + $0x340] sm:$0xff]  ;;  %v5383_v28 = vld [vmem:[%s9747_s2 + $0xf0] sm:$0xff]  ;;  %v10021_v18 = vmax.f32 %v7726_v42, 0.0  ;;  %v10022_v8 = vmax.f32 %v7730_v25, 0.0 }
 0x4ad   : > { %2667 = vst [vmem:[#allocation2 + $0x51] sm:$0xff] %v2635_v43  ;;  %2992 = vmatpush.msrb.mxu2 %v2821_v6  ;;  %v5393_v6 = vld [vmem:[%s9747_s2 + $0x240] sm:$0xff]  ;;  %v5382_v37 = vld [vmem:[%s9747_s2 + $0xe8] sm:$0xff]  ;;  %v10023_v5 = vmax.f32 %v7734_v22, 0.0  ;;  %v10024_v20 = vmax.f32 %v7738_v46, 0.0  ;;  %v10025_v2 = vmax.f32 %v7742_v58, 0.0 }
 0x4ae   : > { %2668 = vst [vmem:[#allocation2 + $0x61] sm:$0xff] %v2636_v36  ;;  %3155 = vmatpush.msrb.mxu3 %v5363_v30  ;;  %3366 = vmatpush.msrb.mxu0 %v5395_v3  ;;  %v2818_v30 = vld [vmem:[%s9747_s2 + $0x40] sm:$0xff]  ;;  %v2654_v3 = vmax.f32 %v7740_v63, 0.0  ;;  %v10026_v27 = vmax.f32 %v7756_v34, 0.0 }
 0x4af   : > { %2669 = vst [vmem:[#allocation2 + $0x69] sm:$0xff] %v2637_v29  ;;  %2993 = vmatpush.msrb.mxu2 %v2820_v56  ;;  %v9813_v56 = vmax.f32 %v7742_v58, 0.0  ;;  %v2810_v26 = vld [vmem:[%s9747_s2] sm:$0xff] }
 0x4b0   : > { %2670 = vst [vmem:[#allocation2 + $0x79] sm:$0xff] %v2638_v23  ;;  %3156 = vmatpush.msrb.mxu3 %v5362_v44  ;;  %3367 = vmatpush.msrb.mxu0 %v5394_v48  ;;  %v5360_v44 = vld [vmem:[%s9747_s2 + $0x338] sm:$0xff]  ;;  %v2760_v31 = vld [vmem:[#allocation2 + $0x20] sm:$0xff] }
 0x4b1   : > { %2671 = vst [vmem:[#allocation2 + $0x81] sm:$0xff] %v2639_v50  ;;  %2994 = vmatpush.msrb.mxu2 %v2819_v11  ;;  %v5392_v48 = vld [vmem:[%s9747_s2 + $0x238] sm:$0xff]  ;;  %v5381_v46 = vld [vmem:[%s9747_s2 + $0xe0] sm:$0xff] }
 0x4b2   : > { %2672 = vst [vmem:[#allocation2 + $0x91] sm:$0xff] %v2640_v45  ;;  %3157 = vmatpush.msrb.mxu3 %v5361_v12  ;;  %3368 = vmatpush.msrb.mxu0 %v5393_v6  ;;  %v2817_v11 = vld [vmem:[%s9747_s2 + $0x38] sm:$0xff]  ;;  %v2656_v12 = vmax.f32 %v7744_v21, 0.0  ;;  %v2657_v6 = vmax.f32 %v7746_v10, 0.0 }
 0x4b3   : > { %2673 = vst [vmem:[#allocation2 + $0x99] sm:$0xff] %v2641_v55  ;;  %2995 = vmatpush.msrb.mxu2 %v2818_v30  ;;  %v5359_v30 = vld [vmem:[%s9747_s2 + $0x330] sm:$0xff]  ;;  %v2763_v19 = vld [vmem:[#allocation2 + $0x38] sm:$0xff] }
 0x4b4   : > { %2674 = vst [vmem:[#allocation2 + $0xa9] sm:$0xff] %v2642_v24  ;;  %3158 = vmatpush.msrb.mxu3 %v5360_v44  ;;  %3369 = vmatpush.msrb.mxu0 %v5392_v48  ;;  %v2658_v44 = vmax.f32 %v7751_v33, 0.0  ;;  %v9814_v48 = vmax.f32 %v7756_v34, 0.0  ;;  %v2766_v22 = vld [vmem:[#allocation2 + $0x50] sm:$0xff]  ;;  %v5380_v10 = vld [vmem:[%s9747_s2 + $0xd8] sm:$0xff] }
 0x4b5   : > { %2675 = vst [vmem:[#allocation2 + $0xb1] sm:$0xff] %v2643_v41  ;;  %2996 = vmatpush.msrb.mxu2 %v2817_v11  ;;  %v5358_v11 = vld [vmem:[%s9747_s2 + $0x328] sm:$0xff] }
 0x4b6   : > { %2676 = vst [vmem:[#allocation2 + $0xc1] sm:$0xff] %v2644_v13  ;;  %3159 = vmatpush.msrb.mxu3 %v5359_v30  ;;  %v2660_v30 = vmax.f32 %v7761_v40, 0.0  ;;  %v2769_v58 = vld [vmem:[#allocation2 + $0x68] sm:$0xff] }
 0x4b7   : > { %2677 = vst [vmem:[#allocation2 + $0xc9] sm:$0xff] %v2645_v61 }
 0x4b8   : > { %2678 = vst [vmem:[#allocation2 + $0xd9] sm:$0xff] %v2646_v54  ;;  %3160 = vmatpush.msrb.mxu3 %v5358_v11  ;;  %v5337_v11 = vld [vmem:[%s9747_s2 + $0x180] sm:$0xff] }
 0x4b9   : > { %2679 = vst [vmem:[#allocation2 + $0xe1] sm:$0xff] %v9812_v59  ;;  %v2815_v59 = vld [vmem:[%s9747_s2 + $0x28] sm:$0xff]  ;;  %v2772_v34 = vld [vmem:[#allocation2 + $0x80] sm:$0xff] }
 0x4ba   : > { %2680 = vst [vmem:[#allocation2 + $0xf1] sm:$0xff] %v2648_v16 }
 0x4bb   : > { %2681 = vst [vmem:[#allocation2 + $0xf9] sm:$0xff] %v9810_v51  ;;  %v2816_v51 = vld [vmem:[%s9747_s2 + $0x30] sm:$0xff] }
 0x4bc   : > { %2682 = vst [vmem:[#allocation2 + $0x109] sm:$0xff] %v2650_v62  ;;  %2997 = vmatpush.msrb.mxu2 %v2816_v51  ;;  %v5389_v51 = vld [vmem:[%s9747_s2 + $0x220] sm:$0xff] }
 0x4bd   : > { %2683 = vst [vmem:[#allocation2 + $0x111] sm:$0xff] %v9809_v14  ;;  %v5391_v14 = vld [vmem:[%s9747_s2 + $0x230] sm:$0xff] }
 0x4be   : > { %2684 = vst [vmem:[#allocation2 + $0x121] sm:$0xff] %v2652_v4  ;;  %3370 = vmatpush.msrb.mxu0 %v5391_v14  ;;  %v5357_v14 = vld [vmem:[%s9747_s2 + $0x320] sm:$0xff]  ;;  %2998 = vmatpush.msrb.mxu2 %v2815_v59  ;;  %v5356_v59 = vld [vmem:[%s9747_s2 + $0x318] sm:$0xff] }
 0x4bf   : > { %2685 = vst [vmem:[#allocation2 + $0x129] sm:$0xff] %v9811_v0  ;;  %v5390_v0 = vld [vmem:[%s9747_s2 + $0x228] sm:$0xff]  ;;  %3161 = vmatpush.msrb.mxu3 %v5357_v14  ;;  %v5388_v14 = vld [vmem:[%s9747_s2 + $0x218] sm:$0xff] }
 0x4c0   : > { %2686 = vst [vmem:[#allocation2 + $0x139] sm:$0xff] %v2654_v3  ;;  %3371 = vmatpush.msrb.mxu0 %v5390_v0  ;;  %v5338_v0 = vld [vmem:[%s9747_s2 + $0x188] sm:$0xff] }
 0x4c1   : > { %2687 = vst [vmem:[#allocation2 + $0x141] sm:$0xff] %v9813_v56  ;;  %v2814_v56 = vld [vmem:[%s9747_s2 + $0x20] sm:$0xff]  ;;  %2857 = vmatpush.msra.mxu1 %v5338_v0  ;;  %3162 = vmatpush.msrb.mxu3 %v5356_v59  ;;  %v5386_v0 = vld [vmem:[%s9747_s2 + $0x208] sm:$0xff]  ;;  %v5384_v59 = vld [vmem:[%s9747_s2 + $0xf8] sm:$0xff] }
 0x4c2   : > { %2688 = vst [vmem:[#allocation2 + $0x151] sm:$0xff] %v2656_v12  ;;  %3372 = vmatpush.msrb.mxu0 %v5389_v51  ;;  %2999 = vmatpush.msrb.mxu2 %v2814_v56  ;;  %v5387_v51 = vld [vmem:[%s9747_s2 + $0x210] sm:$0xff]  ;;  %v5354_v56 = vld [vmem:[%s9747_s2 + $0x308] sm:$0xff] }
 0x4c3   : > { %2689 = vst [vmem:[#allocation2 + $0x159] sm:$0xff] %v2657_v6  ;;  %2858 = vmatpush.msra.mxu1 %v5337_v11 }
 0x4c4   : > { %2690 = vst [vmem:[#allocation2 + $0x169] sm:$0xff] %v2658_v44  ;;  %3373 = vmatpush.msrb.mxu0 %v5388_v14  ;;  %3000 = vmatpush.msrb.mxu2 %v2813_v17 }
 0x4c5   : > { %2691 = vst [vmem:[#allocation2 + $0x171] sm:$0xff] %v9814_v48  ;;  %v5355_v48 = vld [vmem:[%s9747_s2 + $0x310] sm:$0xff]  ;;  %3522 = vmatpush.msrb.mxu1 %v5384_v59  ;;  %v8136_v59 = vld [vmem:[#allocation2 + $0xc8] sm:$0xff] }
 0x4c6   : > { %2692 = vst [vmem:[#allocation2 + $0x181] sm:$0xff] %v2660_v30  ;;  %3163 = vmatpush.msrb.mxu3 %v5355_v48  ;;  %3374 = vmatpush.msrb.mxu0 %v5387_v51 }
 0x4c7   : > { %2694 = vst [vmem:[#allocation2 + $0x17] sm:$0x2] %v2630_v38  ;;  %v2812_v38 = vld [vmem:[%s9747_s2 + $0x10] sm:$0xff]  ;;  %3523 = vmatpush.msrb.mxu1 %v5383_v28 }
 0x4c8   : > { %2695 = vst [vmem:[#allocation2 + $0x2f] sm:$0x2] %v2632_v52  ;;  %3164 = vmatpush.msrb.mxu3 %v5354_v56  ;;  %v5385_v52 = vld [vmem:[%s9747_s2 + $0x200] sm:$0xff]  ;;  %3375 = vmatpush.msrb.mxu0 %v5386_v0 }
 0x4c9   : > { %2696 = vst [vmem:[#allocation2 + $0x47] sm:$0x2] %v2634_v60  ;;  %v2811_v60 = vld [vmem:[%s9747_s2 + $0x8] sm:$0xff]  ;;  %3001 = vmatpush.msrb.mxu2 %v2812_v38  ;;  %3524 = vmatpush.msrb.mxu1 %v5382_v37 }
 0x4ca   : > { %2697 = vst [vmem:[#allocation2 + $0x5f] sm:$0x2] %v2636_v36  ;;  %3165 = vmatpush.msrb.mxu3 %v5353_v9  ;;  %3376 = vmatpush.msrb.mxu0 %v5385_v52 }
 0x4cb   : > { %2698 = vst [vmem:[#allocation2 + $0x77] sm:$0x2] %v2638_v23  ;;  %3002 = vmatpush.msrb.mxu2 %v2811_v60  ;;  %3525 = vmatpush.msrb.mxu1 %v5381_v46 }
 0x4cc   : > { %2699 = vst [vmem:[#allocation2 + $0x8f] sm:$0x2] %v2640_v45  ;;  %v8086_v25 = vld [vmem:[#allocation2 + $0x170] sm:$0xff] }
 0x4cd   : > { %2700 = vst [vmem:[#allocation2 + $0xa7] sm:$0x2] %v2642_v24  ;;  %3003 = vmatpush.msrb.mxu2 %v2810_v26  ;;  %3526 = vmatpush.msrb.mxu1 %v5380_v10  ;;  %v5375_v10 = vld [vmem:[%s9747_s2 + $0xb0] sm:$0xff] }
 0x4ce   : > { %2701 = vst [vmem:[#allocation2 + $0xbf] sm:$0x2] %v2644_v13  ;;  %v2759_v57 = vld [vmem:[#allocation2 + $0x18] sm:$0xff] }
 0x4cf   : > { %2702 = vst [vmem:[#allocation2 + $0xd7] sm:$0x2] %v2646_v54  ;;  %2859 = vmatmul.f32.vlgmr.msra.gmra.mxu1 %v2759_v57  ;;  %v8030_v32 = vld [vmem:[#allocation2 + $0x30] sm:$0xff]  ;;  %3377 = vmatmul.f32.vlgmr.msrb.gmra.mxu0 %v2759_v57 }
 0x4d0   : > { %2703 = vst [vmem:[#allocation2 + $0xef] sm:$0x2] %v2648_v16  ;;  %3166 = vmatmul.f32.vlgmr.msrb.gmra.mxu3 %v8030_v32  ;;  %3004 = vmatmul.f32.vlgmr.msrb.gmra.mxu2 %v8030_v32  ;;  %v2765_v7 = vld [vmem:[#allocation2 + $0x48] sm:$0xff] }
 0x4d1   : > { %2704 = vst [vmem:[#allocation2 + $0x107] sm:$0x2] %v2650_v62  ;;  %v2768_v63 = vld [vmem:[#allocation2 + $0x60] sm:$0xff] }
 0x4d2   : > { %2705 = vst [vmem:[#allocation2 + $0x11f] sm:$0x2] %v2652_v4  ;;  %v2771_v33 = vld [vmem:[#allocation2 + $0x78] sm:$0xff]  ;;  %v5377_v4 = vld [vmem:[%s9747_s2 + $0xc0] sm:$0xff] }
 0x4d3   : > { %2706 = vst [vmem:[#allocation2 + $0x137] sm:$0x2] %v2654_v3 }
 0x4d4   : > { %2707 = vst [vmem:[#allocation2 + $0x14f] sm:$0x2] %v2656_v12  ;;  %v8106_v23 = vld [vmem:[#allocation2 + $0xa8] sm:$0xff] }
 0x4d5   : > { %2708 = vst [vmem:[#allocation2 + $0x167] sm:$0x2] %v2658_v44 }
 0x4d6   : > { %2709 = vst [vmem:[#allocation2 + $0x17f] sm:$0x2] %v2660_v30  ;;  %v8127_v30 = vld [vmem:[#allocation2 + $0xc0] sm:$0xff] }
 0x4d7   : > { %2710 = vst [vmem:[#allocation2 + $0x23] sm:$0x40] %v2631_v1  ;;  %2862 = vmatmul.f32.gmra.mxu1 %v2760_v31  ;;  %3380 = vmatmul.f32.gmra.mxu0 %v2760_v31  ;;  %v5379_v1 = vld [vmem:[%s9747_s2 + $0xd0] sm:$0xff] }
 0x4d8   : > { %2711 = vst [vmem:[#allocation2 + $0x3b] sm:$0x40] %v2633_v15  ;;  %3169 = vmatmul.f32.gmra.mxu3 %v2763_v19  ;;  %3007 = vmatmul.f32.gmra.mxu2 %v2763_v19  ;;  %v2774_v15 = vld [vmem:[#allocation2 + $0x90] sm:$0xff] }
 0x4d9   : > { %2712 = vst [vmem:[#allocation2 + $0x53] sm:$0x40] %v2635_v43  ;;  %3527 = vmatpush.msrb.mxu1 %v5379_v1  ;;  %v2775_v43 = vld [vmem:[#allocation2 + $0x98] sm:$0xff] }
 0x4da   : > { %2713 = vst [vmem:[#allocation2 + $0x6b] sm:$0x40] %v2637_v29  ;;  %v5378_v29 = vld [vmem:[%s9747_s2 + $0xc8] sm:$0xff] }
 0x4db   : > { %2714 = vst [vmem:[#allocation2 + $0x83] sm:$0x40] %v2639_v50  ;;  %3528 = vmatpush.msrb.mxu1 %v5378_v29 }
 0x4dc   : > { %2715 = vst [vmem:[#allocation2 + $0x9b] sm:$0x40] %v2641_v55  ;;  %v8082_v42 = vld [vmem:[#allocation2 + $0x168] sm:$0xff]  ;;  %v8111_v55 = vld [vmem:[#allocation2 + $0xb0] sm:$0xff] }
 0x4dd   : > { %2716 = vst [vmem:[#allocation2 + $0xb3] sm:$0x40] %v2643_v41  ;;  %3529 = vmatpush.msrb.mxu1 %v5377_v4 }
 0x4de   : > { %2717 = vst [vmem:[#allocation2 + $0xcb] sm:$0x40] %v2645_v61  ;;  %v2761_v47 = vld [vmem:[#allocation2 + $0x28] sm:$0xff] }
 0x4df   : > { %2718 = vst [vmem:[#allocation2 + $0xe3] sm:$0x40] %v10021_v18  ;;  %2865 = vmatmul.f32.gmra.mxu1 %v2761_v47  ;;  %v2764_v39 = vld [vmem:[#allocation2 + $0x40] sm:$0xff]  ;;  %3383 = vmatmul.f32.gmra.mxu0 %v2761_v47 }
 0x4e0   : > { %2719 = vst [vmem:[#allocation2 + $0xfb] sm:$0x40] %v10022_v8  ;;  %3172 = vmatmul.f32.gmra.mxu3 %v2764_v39  ;;  %3010 = vmatmul.f32.gmra.mxu2 %v2764_v39  ;;  %v2767_v35 = vld [vmem:[#allocation2 + $0x58] sm:$0xff] }
 0x4e1   : > { %2720 = vst [vmem:[#allocation2 + $0x113] sm:$0x40] %v10023_v5  ;;  %v2770_v21 = vld [vmem:[#allocation2 + $0x70] sm:$0xff] }
 0x4e2   : > { %2721 = vst [vmem:[#allocation2 + $0x12b] sm:$0x40] %v10024_v20  ;;  %v2773_v40 = vld [vmem:[#allocation2 + $0x88] sm:$0xff] }
 0x4e3   : > { %2722 = vst [vmem:[#allocation2 + $0x143] sm:$0x40] %v10025_v2  ;;  %v2776_v36 = vld [vmem:[#allocation2 + $0xa0] sm:$0xff] }
 0x4e4   : > { %2723 = vst [vmem:[#allocation2 + $0x15b] sm:$0x40] %v2657_v6  ;;  %v8116_v16 = vld [vmem:[#allocation2 + $0xb8] sm:$0xff] }
 0x4e5   : > { %2724 = vst [vmem:[#allocation2 + $0x173] sm:$0x40] %v10026_v27  ;;  %v8143_v60 = vld [vmem:[#allocation2 + $0xd0] sm:$0xff]  ;;  %v8165_v27 = vld [vmem:[#allocation2 + $0xe0] sm:$0xff] }
 0x4e6   : > { %2747 = vst [vmem:[#allocation2] sm:$0xff] %v8030_v32 }
 0x4e7   : > { %2748 = vst [vmem:[#allocation2 + $0x8] sm:$0xff] %v2763_v19  ;;  %2867 = vmatmul.f32.gmra.mxu1 %v8030_v32  ;;  %3386 = vmatmul.f32.gmra.mxu0 %v8030_v32 }
 0x4e8   : > { %2749 = vst [vmem:[#allocation2 + $0x10] sm:$0xff] %v2764_v39  ;;  %3174 = vmatmul.f32.gmra.mxu3 %v2765_v7  ;;  %3012 = vmatmul.f32.gmra.mxu2 %v2759_v57  ;;  %v5376_v57 = vld [vmem:[%s9747_s2 + $0xb8] sm:$0xff] }
 0x4e9   : > { %2753 = vst [vmem:[#allocation2 + $0x198] sm:$0xff] %v8082_v42  ;;  %3530 = vmatpush.msrb.mxu1 %v5376_v57  ;;  %v8227_v57 = vld [vmem:[#allocation2 + $0x110] sm:$0xff] }
 0x4ea   : > { %2754 = vst [vmem:[#allocation2 + $0x1a0] sm:$0xff] %v8086_v25 }
 0x4eb   : > { %3531 = vmatpush.msrb.mxu1 %v5375_v10  ;;  %v8248_v10 = vld [vmem:[#allocation2 + $0x120] sm:$0xff] }
 0x4ec   : > { %v8090_v53 = vld [vmem:[#allocation2 + $0x178] sm:$0xff] }
 0x4ed   : > { %2755 = vst [vmem:[#allocation2 + $0x1a8] sm:$0xff] %v8090_v53 }
 0x4ef   : > { %2870 = vmatmul.f32.gmra.mxu1 %v2763_v19  ;;  %3389 = vmatmul.f32.gmra.mxu0 %v2763_v19 }
 0x4f0   : > { %3177 = vmatmul.f32.gmra.mxu3 %v2766_v22  ;;  %3015 = vmatmul.f32.gmra.mxu2 %v2760_v31 }
 0x4f7   : > { %2873 = vmatmul.f32.gmra.mxu1 %v2764_v39  ;;  %3392 = vmatmul.f32.gmra.mxu0 %v2764_v39 }
 0x4f8   : > { %3180 = vmatmul.f32.gmra.mxu3 %v2767_v35  ;;  %3018 = vmatmul.f32.gmra.mxu2 %v2761_v47 }
 0x4ff   : > { %2875 = vmatmul.f32.gmra.mxu1 %v2765_v7  ;;  %3395 = vmatmul.f32.gmra.mxu0 %v2765_v7 }
 0x500   : > { %3182 = vmatmul.f32.gmra.mxu3 %v2768_v63  ;;  %3020 = vmatmul.f32.gmra.mxu2 %v8030_v32 }
 0x507   : > { %2878 = vmatmul.f32.gmra.mxu1 %v2766_v22  ;;  %3398 = vmatmul.f32.gmra.mxu0 %v2766_v22 }
 0x508   : > { %3185 = vmatmul.f32.gmra.mxu3 %v2769_v58  ;;  %3023 = vmatmul.f32.gmra.mxu2 %v2763_v19 }
 0x50f   : > { %2881 = vmatmul.f32.gmra.mxu1 %v2767_v35  ;;  %3401 = vmatmul.f32.gmra.mxu0 %v2767_v35 }
 0x510   : > { %3188 = vmatmul.f32.gmra.mxu3 %v2770_v21  ;;  %3026 = vmatmul.f32.gmra.mxu2 %v2764_v39  ;;  %v8155_v39 = vld [vmem:[#allocation2 + $0xd8] sm:$0xff] }
 0x517   : > { %2883 = vmatmul.f32.gmra.mxu1 %v2768_v63  ;;  %3404 = vmatmul.f32.gmra.mxu0 %v2768_v63 }
 0x518   : > { %3190 = vmatmul.f32.gmra.mxu3 %v2771_v33  ;;  %3028 = vmatmul.f32.gmra.mxu2 %v2765_v7 }
 0x51f   : > { %2886 = vmatmul.f32.gmra.mxu1 %v2769_v58  ;;  %3407 = vmatmul.f32.gmra.mxu0 %v2769_v58 }
 0x520   : > { %3193 = vmatmul.f32.gmra.mxu3 %v2772_v34  ;;  %3031 = vmatmul.f32.gmra.mxu2 %v2766_v22 }
 0x527   : > { %2889 = vmatmul.f32.gmra.mxu1 %v2770_v21  ;;  %3410 = vmatmul.f32.gmra.mxu0 %v2770_v21 }
 0x528   : > { %3196 = vmatmul.f32.gmra.mxu3 %v2773_v40  ;;  %3034 = vmatmul.f32.gmra.mxu2 %v2767_v35 }
 0x52f   : > { %2891 = vmatmul.f32.gmra.mxu1 %v2771_v33  ;;  %3413 = vmatmul.f32.gmra.mxu0 %v2771_v33 }
 0x530   : > { %3198 = vmatmul.f32.gmra.mxu3 %v2774_v15  ;;  %3036 = vmatmul.f32.gmra.mxu2 %v2768_v63 }
 0x537   : > { %2894 = vmatmul.f32.gmra.mxu1 %v2772_v34  ;;  %3416 = vmatmul.f32.gmra.mxu0 %v2772_v34 }
 0x538   : > { %3201 = vmatmul.f32.gmra.mxu3 %v2775_v43  ;;  %3039 = vmatmul.f32.gmra.mxu2 %v2769_v58  ;;  %v8173_v58 = vld [vmem:[#allocation2 + $0xe8] sm:$0xff] }
 0x53f   : > { %2897 = vmatmul.f32.gmra.mxu1 %v2773_v40  ;;  %3419 = vmatmul.f32.gmra.mxu0 %v2773_v40 }
 0x540   : > { %3204 = vmatmul.f32.gmra.mxu3 %v2776_v36  ;;  %3042 = vmatmul.f32.gmra.mxu2 %v2770_v21 }
 0x547   : > { %2899 = vmatmul.f32.gmra.mxu1 %v2774_v15  ;;  %3422 = vmatmul.f32.gmra.mxu0 %v2774_v15 }
 0x548   : > { %3206 = vmatmul.f32.gmra.mxu3 %v8106_v23  ;;  %3044 = vmatmul.f32.gmra.mxu2 %v2771_v33 }
 0x54c   : > { %v2860_v50 = vpop.f32.mrf.mxu1  ;;  %v8109_v45 = vpop.f32.mrf.mxu0 }
 0x54f   : > { %2902 = vmatmul.f32.gmra.mxu1 %v2775_v43  ;;  %3425 = vmatmul.f32.gmra.mxu0 %v2775_v43 }
 0x550   : > { %3209 = vmatmul.f32.gmra.mxu3 %v8111_v55  ;;  %3047 = vmatmul.f32.gmra.mxu2 %v2772_v34 }
 0x553   : > { %v3167_v24 = vpop.f32.mrf.mxu3  ;;  %v3005_v61 = vpop.f32.mrf.mxu2 }
 0x554   : > { %v2863_v41 = vpop.f32.mrf.mxu1  ;;  %v8114_v13 = vpop.f32.mrf.mxu0  ;;  %v3006_v54 = vadd.f32 %v3005_v61, %v2860_v50 }
 0x556   : > { %v8119_v62 = vadd.f32 %v3167_v24, %v3006_v54  ;;  %v8196_v24 = vld [vmem:[#allocation2 + $0xf8] sm:$0xff] }
 0x557   : > { %2905 = vmatmul.f32.gmra.mxu1 %v2776_v36  ;;  %3428 = vmatmul.f32.gmra.mxu0 %v2776_v36 }
 0x558   : > { %3212 = vmatmul.f32.gmra.mxu3 %v8116_v16  ;;  %3050 = vmatmul.f32.gmra.mxu2 %v2773_v40 }
 0x55b   : > { %v3170_v3 = vpop.f32.mrf.mxu3  ;;  %v3008_v44 = vpop.f32.mrf.mxu2 }
 0x55c   : > { %v2866_v12 = vpop.f32.mrf.mxu1  ;;  %v8124_v6 = vpop.f32.mrf.mxu0  ;;  %v3009_v48 = vadd.f32 %v3008_v44, %v2863_v41  ;;  %v5374_v44 = vld [vmem:[%s9747_s2 + $0xa8] sm:$0xff] }
 0x55d   : > { %3532 = vmatpush.msrb.mxu1 %v5374_v44 }
 0x55e   : > { %v8131_v11 = vadd.f32 %v3170_v3, %v3009_v48  ;;  %v8204_v3 = vld [vmem:[#allocation2 + $0x100] sm:$0xff] }
 0x55f   : > { %2907 = vmatmul.f32.gmra.mxu1 %v8106_v23  ;;  %3431 = vmatmul.f32.gmra.mxu0 %v8106_v23 }
 0x560   : > { %3214 = vmatmul.f32.gmra.mxu3 %v8127_v30  ;;  %3052 = vmatmul.f32.gmra.mxu2 %v2774_v15 }
 0x563   : > { %v3173_v14 = vpop.f32.mrf.mxu3  ;;  %v3011_v0 = vpop.f32.mrf.mxu2 }
 0x564   : > { %v2868_v51 = vpop.f32.mrf.mxu1  ;;  %v8133_v56 = vpop.f32.mrf.mxu0 }
 0x567   : > { %2910 = vmatmul.f32.gmra.mxu1 %v8111_v55  ;;  %3434 = vmatmul.f32.gmra.mxu0 %v8111_v55 }
 0x568   : > { %3217 = vmatmul.f32.gmra.mxu3 %v8136_v59  ;;  %3055 = vmatmul.f32.gmra.mxu2 %v2775_v43  ;;  %v8186_v43 = vld [vmem:[#allocation2 + $0xf0] sm:$0xff] }
 0x56b   : > { %v3175_v17 = vpop.f32.mrf.mxu3  ;;  %v3013_v52 = vpop.f32.mrf.mxu2 }
 0x56c   : > { %v2871_v9 = vpop.f32.mrf.mxu1  ;;  %v8140_v38 = vpop.f32.mrf.mxu0  ;;  %v3014_v28 = vadd.f32 %v3013_v52, %v2868_v51 }
 0x56e   : > { %v8147_v26 = vadd.f32 %v3175_v17, %v3014_v28 }
 0x56f   : > { %2913 = vmatmul.f32.gmra.mxu1 %v8116_v16  ;;  %3437 = vmatmul.f32.gmra.mxu0 %v8116_v16 }
 0x570   : > { %3220 = vmatmul.f32.gmra.mxu3 %v8143_v60  ;;  %3058 = vmatmul.f32.gmra.mxu2 %v2776_v36 }
 0x573   : > { %v3178_v32 = vpop.f32.mrf.mxu3  ;;  %v3016_v47 = vpop.f32.mrf.mxu2 }
 0x574   : > { %v2874_v31 = vpop.f32.mrf.mxu1  ;;  %v8152_v19 = vpop.f32.mrf.mxu0  ;;  %v3017_v18 = vadd.f32 %v3016_v47, %v2871_v9 }
 0x576   : > { %v8159_v8 = vadd.f32 %v3178_v32, %v3017_v18 }
 0x577   : > { %2915 = vmatmul.f32.gmra.mxu1 %v8127_v30  ;;  %3440 = vmatmul.f32.gmra.mxu0 %v8127_v30 }
 0x578   : > { %3222 = vmatmul.f32.gmra.mxu3 %v8155_v39  ;;  %3060 = vmatmul.f32.gmra.mxu2 %v8106_v23 }
 0x57b   : > { %v3181_v37 = vpop.f32.mrf.mxu3  ;;  %v3019_v2 = vpop.f32.mrf.mxu2 }
 0x57c   : > { %v2876_v5 = vpop.f32.mrf.mxu1  ;;  %v8162_v20 = vpop.f32.mrf.mxu0  ;;  %v8235_v37 = vld [vmem:[#allocation2 + $0x118] sm:$0xff]  ;;  %v5373_v2 = vld [vmem:[%s9747_s2 + $0xa0] sm:$0xff] }
 0x57d   : > { %3533 = vmatpush.msrb.mxu1 %v5373_v2 }
 0x57f   : > { %2918 = vmatmul.f32.gmra.mxu1 %v8136_v59  ;;  %3443 = vmatmul.f32.gmra.mxu0 %v8136_v59 }
 0x580   : > { %3225 = vmatmul.f32.gmra.mxu3 %v8165_v27  ;;  %3063 = vmatmul.f32.gmra.mxu2 %v8111_v55 }
 0x583   : > { %v3183_v7 = vpop.f32.mrf.mxu3  ;;  %v3021_v46 = vpop.f32.mrf.mxu2 }
 0x584   : > { %v2879_v22 = vpop.f32.mrf.mxu1  ;;  %v8170_v35 = vpop.f32.mrf.mxu0  ;;  %v3022_v63 = vadd.f32 %v3021_v46, %v2876_v5 }
 0x586   : > { %v8177_v21 = vadd.f32 %v3183_v7, %v3022_v63 }
 0x587   : > { %2921 = vmatmul.f32.gmra.mxu1 %v8143_v60  ;;  %3446 = vmatmul.f32.gmra.mxu0 %v8143_v60 }
 0x588   : > { %3228 = vmatmul.f32.gmra.mxu3 %v8173_v58  ;;  %3066 = vmatmul.f32.gmra.mxu2 %v8116_v16 }
 0x58b   : > { %v3186_v33 = vpop.f32.mrf.mxu3  ;;  %v3024_v1 = vpop.f32.mrf.mxu2 }
 0x58c   : > { %v2882_v34 = vpop.f32.mrf.mxu1  ;;  %v8183_v40 = vpop.f32.mrf.mxu0  ;;  %v3025_v15 = vadd.f32 %v3024_v1, %v2879_v22 }
 0x58e   : > { %v8190_v36 = vadd.f32 %v3186_v33, %v3025_v15 }
 0x58f   : > { %2923 = vmatmul.f32.gmra.mxu1 %v8155_v39  ;;  %3449 = vmatmul.f32.gmra.mxu0 %v8155_v39 }
 0x590   : > { %3230 = vmatmul.f32.gmra.mxu3 %v8186_v43  ;;  %3068 = vmatmul.f32.gmra.mxu2 %v8127_v30 }
 0x593   : > { %v3189_v29 = vpop.f32.mrf.mxu3  ;;  %v3027_v55 = vpop.f32.mrf.mxu2 }
 0x594   : > { %v2884_v23 = vpop.f32.mrf.mxu1  ;;  %v8193_v50 = vpop.f32.mrf.mxu0  ;;  %v8258_v29 = vld [vmem:[#allocation2 + $0x128] sm:$0xff] }
 0x597   : > { %2926 = vmatmul.f32.gmra.mxu1 %v8165_v27  ;;  %3452 = vmatmul.f32.gmra.mxu0 %v8165_v27 }
 0x598   : > { %3233 = vmatmul.f32.gmra.mxu3 %v8196_v24  ;;  %3071 = vmatmul.f32.gmra.mxu2 %v8136_v59  ;;  %v8217_v59 = vld [vmem:[#allocation2 + $0x108] sm:$0xff] }
 0x59b   : > { %v3191_v41 = vpop.f32.mrf.mxu3  ;;  %v3029_v16 = vpop.f32.mrf.mxu2 }
 0x59c   : > { %v2887_v61 = vpop.f32.mrf.mxu1  ;;  %v8201_v54 = vpop.f32.mrf.mxu0  ;;  %v3030_v4 = vadd.f32 %v3029_v16, %v2884_v23  ;;  %v8266_v16 = vld [vmem:[#allocation2 + $0x130] sm:$0xff] }
 0x59e   : > { %v8208_v12 = vadd.f32 %v3191_v41, %v3030_v4 }
 0x59f   : > { %2929 = vmatmul.f32.gmra.mxu1 %v8173_v58  ;;  %3455 = vmatmul.f32.gmra.mxu0 %v8173_v58 }
 0x5a0   : > { %3236 = vmatmul.f32.gmra.mxu3 %v8204_v3  ;;  %3074 = vmatmul.f32.gmra.mxu2 %v8143_v60 }
 0x5a3   : > { %v3194_v48 = vpop.f32.mrf.mxu3  ;;  %v3032_v51 = vpop.f32.mrf.mxu2 }
 0x5a4   : > { %v2890_v30 = vpop.f32.mrf.mxu1  ;;  %v8214_v14 = vpop.f32.mrf.mxu0  ;;  %v3033_v0 = vadd.f32 %v3032_v51, %v2887_v61 }
 0x5a6   : > { %v8221_v17 = vadd.f32 %v3194_v48, %v3033_v0 }
 0x5a7   : > { %2931 = vmatmul.f32.gmra.mxu1 %v8186_v43  ;;  %3458 = vmatmul.f32.gmra.mxu0 %v8186_v43 }
 0x5a8   : > { %3238 = vmatmul.f32.gmra.mxu3 %v8217_v59  ;;  %3076 = vmatmul.f32.gmra.mxu2 %v8155_v39 }
 0x5ab   : > { %v3197_v9 = vpop.f32.mrf.mxu3  ;;  %v3035_v60 = vpop.f32.mrf.mxu2 }
 0x5ac   : > { %v2892_v52 = vpop.f32.mrf.mxu1  ;;  %v8224_v28 = vpop.f32.mrf.mxu0  ;;  %v8279_v9 = vld [vmem:[#allocation2 + $0x138] sm:$0xff] }
 0x5af   : > { %2934 = vmatmul.f32.gmra.mxu1 %v8196_v24  ;;  %3461 = vmatmul.f32.gmra.mxu0 %v8196_v24 }
 0x5b0   : > { %3241 = vmatmul.f32.gmra.mxu3 %v8227_v57  ;;  %3079 = vmatmul.f32.gmra.mxu2 %v8165_v27 }
 0x5b3   : > { %v3199_v32 = vpop.f32.mrf.mxu3  ;;  %v3037_v18 = vpop.f32.mrf.mxu2 }
 0x5b4   : > { %v2895_v31 = vpop.f32.mrf.mxu1  ;;  %v8232_v47 = vpop.f32.mrf.mxu0  ;;  %v3038_v39 = vadd.f32 %v3037_v18, %v2892_v52  ;;  %v8289_v18 = vld [vmem:[#allocation2 + $0x140] sm:$0xff] }
 0x5b6   : > { %v8239_v5 = vadd.f32 %v3199_v32, %v3038_v39 }
 0x5b7   : > { %2937 = vmatmul.f32.gmra.mxu1 %v8204_v3  ;;  %3464 = vmatmul.f32.gmra.mxu0 %v8204_v3 }
 0x5b8   : > { %3244 = vmatmul.f32.gmra.mxu3 %v8235_v37  ;;  %3082 = vmatmul.f32.gmra.mxu2 %v8173_v58 }
 0x5bb   : > { %v3202_v27 = vpop.f32.mrf.mxu3  ;;  %v3040_v46 = vpop.f32.mrf.mxu2 }
 0x5bc   : > { %v2898_v7 = vpop.f32.mrf.mxu1  ;;  %v8245_v22 = vpop.f32.mrf.mxu0  ;;  %v3041_v63 = vadd.f32 %v3040_v46, %v2895_v31  ;;  %v8297_v46 = vld [vmem:[#allocation2 + $0x148] sm:$0xff] }
 0x5be   : > { %v8252_v33 = vadd.f32 %v3202_v27, %v3041_v63 }
 0x5bf   : > { %2939 = vmatmul.f32.gmra.mxu1 %v8217_v59  ;;  %3467 = vmatmul.f32.gmra.mxu0 %v8217_v59 }
 0x5c0   : > { %3246 = vmatmul.f32.gmra.mxu3 %v8248_v10  ;;  %3084 = vmatmul.f32.gmra.mxu2 %v8186_v43 }
 0x5c3   : > { %v3205_v58 = vpop.f32.mrf.mxu3  ;;  %v3043_v15 = vpop.f32.mrf.mxu2 }
 0x5c4   : > { %v2900_v34 = vpop.f32.mrf.mxu1  ;;  %v8255_v1 = vpop.f32.mrf.mxu0 }
 0x5c7   : > { %2942 = vmatmul.f32.gmra.mxu1 %v8227_v57  ;;  %3470 = vmatmul.f32.gmra.mxu0 %v8227_v57 }
 0x5c8   : > { %3249 = vmatmul.f32.gmra.mxu3 %v8258_v29  ;;  %3087 = vmatmul.f32.gmra.mxu2 %v8196_v24  ;;  %v5372_v24 = vld [vmem:[%s9747_s2 + $0x98] sm:$0xff] }
 0x5c9   : > { %3534 = vmatpush.msrb.mxu1 %v5372_v24 }
 0x5cb   : > { %v3207_v23 = vpop.f32.mrf.mxu3  ;;  %v3045_v43 = vpop.f32.mrf.mxu2 }
 0x5cc   : > { %v2903_v55 = vpop.f32.mrf.mxu1  ;;  %v8263_v41 = vpop.f32.mrf.mxu0  ;;  %v3046_v61 = vadd.f32 %v3045_v43, %v2900_v34  ;;  %v8310_v43 = vld [vmem:[#allocation2 + $0x150] sm:$0xff] }
 0x5ce   : > { %v8270_v4 = vadd.f32 %v3207_v23, %v3046_v61 }
 0x5cf   : > { %2945 = vmatmul.f32.gmra.mxu1 %v8235_v37  ;;  %3473 = vmatmul.f32.gmra.mxu0 %v8235_v37 }
 0x5d0   : > { %3252 = vmatmul.f32.gmra.mxu3 %v8266_v16  ;;  %3090 = vmatmul.f32.gmra.mxu2 %v8204_v3 }
 0x5d3   : > { %v3210_v44 = vpop.f32.mrf.mxu3  ;;  %v3048_v51 = vpop.f32.mrf.mxu2 }
 0x5d4   : > { %v2906_v48 = vpop.f32.mrf.mxu1  ;;  %v8276_v30 = vpop.f32.mrf.mxu0  ;;  %v3049_v0 = vadd.f32 %v3048_v51, %v2903_v55  ;;  %v8320_v51 = vld [vmem:[#allocation2 + $0x158] sm:$0xff] }
 0x5d6   : > { %v8283_v52 = vadd.f32 %v3210_v44, %v3049_v0 }
 0x5d7   : > { %2947 = vmatmul.f32.gmra.mxu1 %v8248_v10  ;;  %3476 = vmatmul.f32.gmra.mxu0 %v8248_v10 }
 0x5d8   : > { %3254 = vmatmul.f32.gmra.mxu3 %v8279_v9  ;;  %3092 = vmatmul.f32.gmra.mxu2 %v8217_v59 }
 0x5db   : > { %v3213_v3 = vpop.f32.mrf.mxu3  ;;  %v3051_v31 = vpop.f32.mrf.mxu2 }
 0x5dc   : > { %v2908_v60 = vpop.f32.mrf.mxu1  ;;  %v8286_v32 = vpop.f32.mrf.mxu0 }
 0x5df   : > { %2950 = vmatmul.f32.gmra.mxu1 %v8258_v29  ;;  %3479 = vmatmul.f32.gmra.mxu0 %v8258_v29 }
 0x5e0   : > { %3257 = vmatmul.f32.gmra.mxu3 %v8289_v18  ;;  %3095 = vmatmul.f32.gmra.mxu2 %v8227_v57  ;;  %v5371_v57 = vld [vmem:[%s9747_s2 + $0x90] sm:$0xff] }
 0x5e1   : > { %3535 = vmatpush.msrb.mxu1 %v5371_v57 }
 0x5e3   : > { %v3215_v39 = vpop.f32.mrf.mxu3  ;;  %v3053_v59 = vpop.f32.mrf.mxu2 }
 0x5e4   : > { %v2911_v2 = vpop.f32.mrf.mxu1  ;;  %v8294_v27 = vpop.f32.mrf.mxu0  ;;  %v3054_v7 = vadd.f32 %v3053_v59, %v2908_v60 }
 0x5e6   : > { %v8301_v63 = vadd.f32 %v3215_v39, %v3054_v7  ;;  %v8328_v39 = vld [vmem:[#allocation2 + $0x160] sm:$0xff] }
 0x5e7   : > { %2953 = vmatmul.f32.gmra.mxu1 %v8266_v16  ;;  %3482 = vmatmul.f32.gmra.mxu0 %v8266_v16 }
 0x5e8   : > { %3260 = vmatmul.f32.gmra.mxu3 %v8297_v46  ;;  %3098 = vmatmul.f32.gmra.mxu2 %v8235_v37 }
 0x5eb   : > { %v3218_v58 = vpop.f32.mrf.mxu3  ;;  %v3056_v23 = vpop.f32.mrf.mxu2 }
 0x5ec   : > { %v2914_v34 = vpop.f32.mrf.mxu1  ;;  %v8307_v15 = vpop.f32.mrf.mxu0  ;;  %v3057_v55 = vadd.f32 %v3056_v23, %v2911_v2 }
 0x5ee   : > { %v8314_v61 = vadd.f32 %v3218_v58, %v3057_v55 }
 0x5ef   : > { %2955 = vmatmul.f32.gmra.mxu1 %v8279_v9  ;;  %3485 = vmatmul.f32.gmra.mxu0 %v8279_v9 }
 0x5f0   : > { %3262 = vmatmul.f32.gmra.mxu3 %v8310_v43  ;;  %3100 = vmatmul.f32.gmra.mxu2 %v8248_v10 }
 0x5f3   : > { %v3221_v37 = vpop.f32.mrf.mxu3  ;;  %v3059_v48 = vpop.f32.mrf.mxu2 }
 0x5f4   : > { %v2916_v24 = vpop.f32.mrf.mxu1  ;;  %v8317_v44 = vpop.f32.mrf.mxu0  ;;  %v5448_v48 = vld [vmem:[%s9747_s2 + $0x2f8] sm:$0xff] }
 0x5f5   : > { %4055 = vmatpush.msra.mxu3 %v5448_v48  ;;  %v5369_v48 = vld [vmem:[%s9747_s2 + $0x80] sm:$0xff] }
 0x5f7   : > { %2958 = vmatmul.f32.gmra.mxu1 %v8289_v18  ;;  %3488 = vmatmul.f32.gmra.mxu0 %v8289_v18 }
 0x5f8   : > { %3265 = vmatmul.f32.gmra.mxu3 %v8320_v51  ;;  %3103 = vmatmul.f32.gmra.mxu2 %v8258_v29  ;;  %v5370_v29 = vld [vmem:[%s9747_s2 + $0x88] sm:$0xff] }
 0x5f9   : > { %3536 = vmatpush.msrb.mxu1 %v5370_v29 }
 0x5fb   : > { %v3223_v0 = vpop.f32.mrf.mxu3  ;;  %v3061_v10 = vpop.f32.mrf.mxu2  ;;  %3537 = vmatpush.msrb.mxu1 %v5369_v48 }
 0x5fc   : > { %v2919_v3 = vpop.f32.mrf.mxu1  ;;  %v8325_v60 = vpop.f32.mrf.mxu0  ;;  %v3062_v31 = vadd.f32 %v3061_v10, %v2916_v24  ;;  %v5431_v10 = vld [vmem:[%s9747_s2 + $0x170] sm:$0xff] }
 0x5fe   : > { %v8332_v2 = vadd.f32 %v3223_v0, %v3062_v31  ;;  %v5432_v0 = vld [vmem:[%s9747_s2 + $0x178] sm:$0xff] }
 0x5ff   : > { %2961 = vmatmul.f32.gmra.mxu1 %v8297_v46  ;;  %3491 = vmatmul.f32.gmra.mxu0 %v8297_v46 }
 0x600   : > { %3268 = vmatmul.f32.gmra.mxu3 %v8328_v39  ;;  %3106 = vmatmul.f32.gmra.mxu2 %v8266_v16 }
 0x601   : > { %4216 = vmatpush.msra.mxu0 %v5432_v0  ;;  %v5444_v0 = vld [vmem:[%s9747_s2 + $0x2d8] sm:$0xff] }
 0x603   : > { %v3226_v59 = vpop.f32.mrf.mxu3  ;;  %v3064_v58 = vpop.f32.mrf.mxu2  ;;  %4217 = vmatpush.msra.mxu0 %v5431_v10  ;;  %v5415_v10 = vld [vmem:[%s9747_s2 + $0x3f0] sm:$0xff] }
 0x604   : > { %v2922_v7 = vpop.f32.mrf.mxu1  ;;  %v8338_v57 = vpop.f32.mrf.mxu0  ;;  %v3065_v34 = vadd.f32 %v3064_v58, %v2919_v3  ;;  %v5447_v3 = vld [vmem:[%s9747_s2 + $0x2f0] sm:$0xff]  ;;  %v5429_v58 = vld [vmem:[%s9747_s2 + $0x160] sm:$0xff] }
 0x605   : > { %4056 = vmatpush.msra.mxu3 %v5447_v3 }
 0x606   : > { %v8343_v23 = vadd.f32 %v3226_v59, %v3065_v34  ;;  %v5430_v59 = vld [vmem:[%s9747_s2 + $0x168] sm:$0xff] }
 0x607   : > { %2963 = vmatmul.f32.gmra.mxu1 %v8310_v43  ;;  %3494 = vmatmul.f32.gmra.mxu0 %v8310_v43 }
 0x608   : > { %3270 = vmatmul.f32.gmra.mxu3 %v8082_v42  ;;  %3108 = vmatmul.f32.gmra.mxu2 %v8279_v9 }
 0x609   : > { %4218 = vmatpush.msra.mxu0 %v5430_v59 }
 0x60b   : > { %v3229_v55 = vpop.f32.mrf.mxu3  ;;  %v3067_v24 = vpop.f32.mrf.mxu2  ;;  %4219 = vmatpush.msra.mxu0 %v5429_v58  ;;  %v5414_v58 = vld [vmem:[%s9747_s2 + $0x3e8] sm:$0xff] }
 0x60c   : > { %v2924_v37 = vpop.f32.mrf.mxu1  ;;  %v8346_v16 = vpop.f32.mrf.mxu0  ;;  %v5445_v55 = vld [vmem:[%s9747_s2 + $0x2e0] sm:$0xff] }
 0x60f   : > { %2966 = vmatmul.f32.gmra.mxu1 %v8320_v51  ;;  %3497 = vmatmul.f32.gmra.mxu0 %v8320_v51 }
 0x610   : > { %3273 = vmatmul.f32.gmra.mxu3 %v8086_v25  ;;  %3111 = vmatmul.f32.gmra.mxu2 %v8289_v18  ;;  %v5446_v18 = vld [vmem:[%s9747_s2 + $0x2e8] sm:$0xff] }
 0x611   : > { %4057 = vmatpush.msra.mxu3 %v5446_v18  ;;  %v5443_v18 = vld [vmem:[%s9747_s2 + $0x2d0] sm:$0xff] }
 0x613   : > { %v3231_v9 = vpop.f32.mrf.mxu3  ;;  %v3069_v7 = vpop.f32.mrf.mxu2  ;;  %4058 = vmatpush.msra.mxu3 %v5445_v55  ;;  %v5426_v55 = vld [vmem:[%s9747_s2 + $0x148] sm:$0xff] }
 0x614   : > { %v2927_v31 = vpop.f32.mrf.mxu1  ;;  %v8364_v29 = vpop.f32.mrf.mxu0  ;;  %v3070_v34 = vadd.f32 %v3069_v7, %v2924_v37  ;;  %v5416_v37 = vld [vmem:[%s9747_s2 + $0x3f8] sm:$0xff] }
 0x615   : > { %10027 = vst [vmem:[#allocation64_spill] sm:$0xff] %v8364_v29  ;;  %3700 = vmatpush.msra.mxu2 %v5416_v37  ;;  %4059 = vmatpush.msra.mxu3 %v5444_v0  ;;  %v5442_v37 = vld [vmem:[%s9747_s2 + $0x2c8] sm:$0xff]  ;;  %v8417_v0 = vld [vmem:[#allocation2 + $0x180] sm:$0xff] }
 0x616   : > { %v8381_v24 = vadd.f32 %v3231_v9, %v3070_v34  ;;  %v5428_v9 = vld [vmem:[%s9747_s2 + $0x158] sm:$0xff]  ;;  %v8702_v29 = vld [vmem:[#allocation2 + $0xc0] sm:$0xff] }
 0x617   : > { %2969 = vmatmul.f32.gmra.mxu1 %v8328_v39  ;;  %3500 = vmatmul.f32.gmra.mxu0 %v8328_v39 }
 0x618   : > { %3276 = vmatmul.f32.gmra.mxu3 %v8090_v53  ;;  %10028 = vst [vmem:[#allocation66_spill] sm:$0xff] %v8381_v24  ;;  %3114 = vmatmul.f32.gmra.mxu2 %v8297_v46  ;;  %v5427_v46 = vld [vmem:[%s9747_s2 + $0x150] sm:$0xff] }
 0x619   : > { %4220 = vmatpush.msra.mxu0 %v5428_v9  ;;  %3701 = vmatpush.msra.mxu2 %v5415_v10  ;;  %v5413_v9 = vld [vmem:[%s9747_s2 + $0x3e0] sm:$0xff] }
 0x61a   : > { %4060 = vmatpush.msra.mxu3 %v5443_v18  ;;  %v5425_v10 = vld [vmem:[%s9747_s2 + $0x140] sm:$0xff] }
 0x61b   : > { %v3234_v3 = vpop.f32.mrf.mxu3  ;;  %v3072_v34 = vpop.f32.mrf.mxu2  ;;  %4221 = vmatpush.msra.mxu0 %v5427_v46  ;;  %3702 = vmatpush.msra.mxu2 %v5414_v58  ;;  %v5441_v18 = vld [vmem:[%s9747_s2 + $0x2c0] sm:$0xff]  ;;  %v5412_v46 = vld [vmem:[%s9747_s2 + $0x3d8] sm:$0xff] }
 0x61c   : > { %v2930_v59 = vpop.f32.mrf.mxu1  ;;  %v8405_v7 = vpop.f32.mrf.mxu0  ;;  %v3073_v48 = vadd.f32 %v3072_v34, %v2927_v31  ;;  %4061 = vmatpush.msra.mxu3 %v5442_v37  ;;  %v5423_v34 = vld [vmem:[%s9747_s2 + $0x130] sm:$0xff] }
 0x61d   : > { %10029 = vst [vmem:[#allocation74_spill] sm:$0xff] %v8405_v7  ;;  %4222 = vmatpush.msra.mxu0 %v5426_v55  ;;  %v5424_v59 = vld [vmem:[%s9747_s2 + $0x138] sm:$0xff]  ;;  %3703 = vmatpush.msra.mxu2 %v5413_v9  ;;  %v5410_v9 = vld [vmem:[%s9747_s2 + $0x3c8] sm:$0xff]  ;;  %v2806_v7 = vld [vmem:[#allocation2 + $0x190] sm:$0xff] }
 0x61e   : > { %v8427_v31 = vadd.f32 %v3234_v3, %v3073_v48  ;;  %v5440_v3 = vld [vmem:[%s9747_s2 + $0x2b8] sm:$0xff]  ;;  %4062 = vmatpush.msra.mxu3 %v5441_v18  ;;  %v8457_v18 = vld [vmem:[#allocation2 + $0x188] sm:$0xff] }
 0x61f   : > { %2971 = vmatmul.f32.gmra.mxu1 %v8082_v42  ;;  %3503 = vmatmul.f32.gmra.mxu0 %v8082_v42 }
 0x620   : > { %3278 = vmatmul.f32.gmra.mxu3 %v8417_v0  ;;  %10030 = vst [vmem:[#allocation75_spill] sm:$0xff] %v8427_v31  ;;  %3116 = vmatmul.f32.gmra.mxu2 %v8310_v43  ;;  %v5411_v43 = vld [vmem:[%s9747_s2 + $0x3d0] sm:$0xff]  ;;  %v5436_v31 = vld [vmem:[%s9747_s2 + $0x298] sm:$0xff] }
 0x621   : > { %4223 = vmatpush.msra.mxu0 %v5425_v10  ;;  %3704 = vmatpush.msra.mxu2 %v5412_v46  ;;  %v5439_v10 = vld [vmem:[%s9747_s2 + $0x2b0] sm:$0xff]  ;;  %v5422_v46 = vld [vmem:[%s9747_s2 + $0x128] sm:$0xff] }
 0x622   : > { %4063 = vmatpush.msra.mxu3 %v5440_v3  ;;  %v5438_v3 = vld [vmem:[%s9747_s2 + $0x2a8] sm:$0xff] }
 0x623   : > { %v3237_v58 = vpop.f32.mrf.mxu3  ;;  %4224 = vmatpush.msra.mxu0 %v5424_v59  ;;  %v3075_v37 = vpop.f32.mrf.mxu2  ;;  %3705 = vmatpush.msra.mxu2 %v5411_v43  ;;  %v5409_v59 = vld [vmem:[%s9747_s2 + $0x3c0] sm:$0xff]  ;;  %v5408_v43 = vld [vmem:[%s9747_s2 + $0x3b8] sm:$0xff] }
 0x624   : > { %v2932_v55 = vpop.f32.mrf.mxu1  ;;  %v8448_v48 = vpop.f32.mrf.mxu0  ;;  %4064 = vmatpush.msra.mxu3 %v5439_v10  ;;  %v5421_v58 = vld [vmem:[%s9747_s2 + $0x120] sm:$0xff] }
 0x625   : > { %10031 = vst [vmem:[#allocation71_spill] sm:$0xff] %v8448_v48  ;;  %4225 = vmatpush.msra.mxu0 %v5423_v34  ;;  %3706 = vmatpush.msra.mxu2 %v5410_v9  ;;  %v5437_v34 = vld [vmem:[%s9747_s2 + $0x2a0] sm:$0xff]  ;;  %v5407_v9 = vld [vmem:[%s9747_s2 + $0x3b0] sm:$0xff] }
 0x626   : > { %4065 = vmatpush.msra.mxu3 %v5438_v3 }
 0x627   : > { %2974 = vmatmul.f32.gmra.mxu1 %v8086_v25  ;;  %3506 = vmatmul.f32.gmra.mxu0 %v8086_v25 }
 0x628   : > { %3281 = vmatmul.f32.gmra.mxu3 %v8457_v18  ;;  %3119 = vmatmul.f32.gmra.mxu2 %v8320_v51  ;;  %v5420_v51 = vld [vmem:[%s9747_s2 + $0x118] sm:$0xff] }
 0x629   : > { %4226 = vmatpush.msra.mxu0 %v5422_v46  ;;  %3707 = vmatpush.msra.mxu2 %v5409_v59  ;;  %v5419_v59 = vld [vmem:[%s9747_s2 + $0x110] sm:$0xff] }
 0x62a   : > { %4066 = vmatpush.msra.mxu3 %v5437_v34  ;;  %v5435_v34 = vld [vmem:[%s9747_s2 + $0x290] sm:$0xff] }
 0x62b   : > { %v3239_v37 = vpop.f32.mrf.mxu3  ;;  %4227 = vmatpush.msra.mxu0 %v5421_v58  ;;  %3708 = vmatpush.msra.mxu2 %v5408_v43  ;;  %v3077_v46 = vpop.f32.mrf.mxu2  ;;  %v5406_v58 = vld [vmem:[%s9747_s2 + $0x3a8] sm:$0xff] }
 0x62c   : > { %v2935_v10 = vpop.f32.mrf.mxu1  ;;  %v8486_v48 = vpop.f32.mrf.mxu0  ;;  %v3078_v3 = vadd.f32 %v3077_v46, %v2932_v55  ;;  %v5418_v43 = vld [vmem:[%s9747_s2 + $0x108] sm:$0xff]  ;;  %4067 = vmatpush.msra.mxu3 %v5436_v31 }
 0x62d   : > { %10032 = vst [vmem:[#allocation72_spill] sm:$0xff] %v8486_v48  ;;  %4228 = vmatpush.msra.mxu0 %v5420_v51  ;;  %3709 = vmatpush.msra.mxu2 %v5407_v9  ;;  %v5464_v51 = vld [vmem:[%s9747_s2 + $0x478] sm:$0xff]  ;;  %v5405_v9 = vld [vmem:[%s9747_s2 + $0x3a0] sm:$0xff]  ;;  %v5434_v46 = vld [vmem:[%s9747_s2 + $0x288] sm:$0xff] }
 0x62e   : > { %v8502_v55 = vadd.f32 %v3239_v37, %v3078_v3  ;;  %v5417_v37 = vld [vmem:[%s9747_s2 + $0x100] sm:$0xff]  ;;  %4068 = vmatpush.msra.mxu3 %v5435_v34  ;;  %4394 = vmatpush.msra.mxu1 %v5464_v51  ;;  %v5402_v34 = vld [vmem:[%s9747_s2 + $0x388] sm:$0xff] }
 0x62f   : > { %2977 = vmatmul.f32.gmra.mxu1 %v8090_v53  ;;  %3509 = vmatmul.f32.gmra.mxu0 %v8090_v53 }
 0x630   : > { %3284 = vmatmul.f32.gmra.mxu3 %v2806_v7  ;;  %10033 = vst [vmem:[#allocation65_spill] sm:$0xff] %v8502_v55  ;;  %4229 = vmatpush.msra.mxu0 %v5419_v59 }
 0x631   : > { %3122 = vmatmul.f32.gmra.mxu2 %v8328_v39  ;;  %v5404_v39 = vld [vmem:[%s9747_s2 + $0x398] sm:$0xff]  ;;  %4069 = vmatpush.msra.mxu3 %v5434_v46 }
 0x632   : > { %3710 = vmatpush.msra.mxu2 %v5406_v58  ;;  %4230 = vmatpush.msra.mxu0 %v5418_v43  ;;  %v5403_v58 = vld [vmem:[%s9747_s2 + $0x390] sm:$0xff]  ;;  %v5433_v43 = vld [vmem:[%s9747_s2 + $0x280] sm:$0xff] }
 0x633   : > { %v3242_v59 = vpop.f32.mrf.mxu3  ;;  %v3080_v55 = vpop.f32.mrf.mxu2  ;;  %4070 = vmatpush.msra.mxu3 %v5433_v43 }
 0x634   : > { %v2938_v31 = vpop.f32.mrf.mxu1  ;;  %v8523_v3 = vpop.f32.mrf.mxu0  ;;  %3711 = vmatpush.msra.mxu2 %v5405_v9  ;;  %4231 = vmatpush.msra.mxu0 %v5417_v37  ;;  %v3081_v48 = vadd.f32 %v3080_v55, %v2935_v10  ;;  %v5401_v10 = vld [vmem:[%s9747_s2 + $0x380] sm:$0xff] }
 0x635   : > { %10034 = vst [vmem:[#allocation62_spill] sm:$0xff] %v8523_v3 }
 0x636   : > { %3712 = vmatpush.msra.mxu2 %v5404_v39  ;;  %v8537_v51 = vadd.f32 %v3242_v59, %v3081_v48 }
 0x637   : > { %2979 = vmatmul.f32.gmra.mxu1 %v8417_v0  ;;  %3512 = vmatmul.f32.gmra.mxu0 %v8417_v0 }
 0x638   : > { %3286 = vmatmul.f32.gmra.mxu3 %v8082_v42  ;;  %10035 = vst [vmem:[#allocation68_spill] sm:$0xff] %v8537_v51  ;;  %3713 = vmatpush.msra.mxu2 %v5403_v58 }
 0x639   : > { %3124 = vmatmul.f32.gmra.mxu2 %v8082_v42 }
 0x63a   : > { %3714 = vmatpush.msra.mxu2 %v5402_v34 }
 0x63b   : > { %v3245_v55 = vpop.f32.mrf.mxu3  ;;  %v3083_v37 = vpop.f32.mrf.mxu2 }
 0x63c   : > { %v2940_v9 = vpop.f32.mrf.mxu1  ;;  %v8543_v0 = vpop.f32.mrf.mxu0  ;;  %3715 = vmatpush.msra.mxu2 %v5401_v10  ;;  %v8560_v55 = vld [vmem:[#allocation2] sm:$0xff] }
 0x63d   : > { %10036 = vst [vmem:[#allocation69_spill] sm:$0xff] %v8543_v0 }
 0x63f   : > { %2982 = vmatmul.f32.gmra.mxu1 %v8457_v18  ;;  %3515 = vmatmul.f32.gmra.mxu0 %v8457_v18  ;;  %v5463_v18 = vld [vmem:[%s9747_s2 + $0x470] sm:$0xff] }
 0x640   : > { %3289 = vmatmul.f32.gmra.mxu3 %v8086_v25  ;;  %4395 = vmatpush.msra.mxu1 %v5463_v18 }
 0x641   : > { %3127 = vmatmul.f32.gmra.mxu2 %v8086_v25 }
 0x643   : > { %v3247_v42 = vpop.f32.mrf.mxu3  ;;  %v3085_v59 = vpop.f32.mrf.mxu2 }
 0x644   : > { %v2943_v48 = vpop.f32.mrf.mxu1  ;;  %v8549_v46 = vpop.f32.mrf.mxu0  ;;  %v3086_v39 = vadd.f32 %v3085_v59, %v2940_v9 }
 0x645   : > { %10037 = vst [vmem:[#allocation83_spill] sm:$0xff] %v8549_v46 }
 0x646   : > { %v8552_v31 = vadd.f32 %v3247_v42, %v3086_v39  ;;  %v8569_v39 = vld [vmem:[#allocation2 + $0x8] sm:$0xff] }
 0x647   : > { %2985 = vmatmul.f32.gmra.mxu1 %v2806_v7  ;;  %3518 = vmatmul.f32.gmra.mxu0 %v2806_v7  ;;  %v5568_v7 = vld [vmem:[#allocation2 + $0x18] sm:$0xff] }
 0x648   : > { %3292 = vmatmul.f32.gmra.mxu3 %v8090_v53  ;;  %10038 = vst [vmem:[#allocation84_spill] sm:$0xff] %v8552_v31 }
 0x649   : > { %3130 = vmatmul.f32.gmra.mxu2 %v8090_v53 }
 0x64b   : > { %v3250_v25 = vpop.f32.mrf.mxu3  ;;  %v3088_v34 = vpop.f32.mrf.mxu2 }
 0x64c   : > { %v2946_v58 = vpop.f32.mrf.mxu1  ;;  %v8558_v43 = vpop.f32.mrf.mxu0  ;;  %v3089_v10 = vadd.f32 %v3088_v34, %v2943_v48  ;;  %v5570_v48 = vld [vmem:[#allocation2 + $0x20] sm:$0xff] }
 0x64d   : > { %10039 = vst [vmem:[#allocation73_spill] sm:$0xff] %v8558_v43 }
 0x64e   : > { %v8564_v9 = vadd.f32 %v3250_v25, %v3089_v10 }
 0x64f   : > { %3538 = vmatmul.f32.vlgmr.msrb.gmra.mxu1 %v8560_v55  ;;  %4232 = vmatmul.f32.vlgmr.msra.gmra.mxu0 %v8560_v55 }
 0x650   : > { %4071 = vmatmul.f32.vlgmr.msra.gmra.mxu3 %v5568_v7  ;;  %10040 = vst [vmem:[#allocation70_spill] sm:$0xff] %v8564_v9  ;;  %v5462_v9 = vld [vmem:[%s9747_s2 + $0x468] sm:$0xff] }
 0x651   : > { %3716 = vmatmul.f32.vlgmr.msra.gmra.mxu2 %v8560_v55  ;;  %4396 = vmatpush.msra.mxu1 %v5462_v9 }
 0x653   : > { %v3253_v53 = vpop.f32.mrf.mxu3  ;;  %v3091_v59 = vpop.f32.mrf.mxu2 }
 0x654   : > { %v2948_v37 = vpop.f32.mrf.mxu1  ;;  %v8567_v42 = vpop.f32.mrf.mxu0  ;;  %v8576_v53 = vld [vmem:[#allocation2 + $0x10] sm:$0xff]  ;;  %v5572_v59 = vld [vmem:[#allocation2 + $0x28] sm:$0xff] }
 0x655   : > { %10041 = vst [vmem:[#allocation80_spill] sm:$0xff] %v8567_v42 }
 0x657   : > { %3541 = vmatmul.f32.gmra.mxu1 %v8569_v39  ;;  %4235 = vmatmul.f32.gmra.mxu0 %v8569_v39 }
 0x658   : > { %4074 = vmatmul.f32.gmra.mxu3 %v5570_v48 }
 0x659   : > { %3719 = vmatmul.f32.gmra.mxu2 %v8569_v39 }
 0x65b   : > { %v3255_v18 = vpop.f32.mrf.mxu3  ;;  %v3093_v34 = vpop.f32.mrf.mxu2 }
 0x65c   : > { %v2951_v25 = vpop.f32.mrf.mxu1  ;;  %v8574_v58 = vpop.f32.mrf.mxu0  ;;  %v3094_v10 = vadd.f32 %v3093_v34, %v2948_v37 }
 0x65d   : > { %10042 = vst [vmem:[#allocation81_spill] sm:$0xff] %v8574_v58 }
 0x65e   : > { %v8580_v42 = vadd.f32 %v3255_v18, %v3094_v10  ;;  %v5573_v18 = vld [vmem:[#allocation2 + $0x48] sm:$0xff] }
 0x65f   : > { %3544 = vmatmul.f32.gmra.mxu1 %v8576_v53  ;;  %4238 = vmatmul.f32.gmra.mxu0 %v8576_v53 }
 0x660   : > { %4077 = vmatmul.f32.gmra.mxu3 %v5572_v59  ;;  %10043 = vst [vmem:[#allocation40_spill] sm:$0xff] %v8580_v42 }
 0x661   : > { %3722 = vmatmul.f32.gmra.mxu2 %v8576_v53 }
 0x663   : > { %v3258_v58 = vpop.f32.mrf.mxu3  ;;  %v3096_v34 = vpop.f32.mrf.mxu2 }
 0x664   : > { %v2954_v43 = vpop.f32.mrf.mxu1  ;;  %v8586_v37 = vpop.f32.mrf.mxu0  ;;  %v3097_v31 = vadd.f32 %v3096_v34, %v2951_v25 }
 0x665   : > { %10044 = vst [vmem:[#allocation67_spill] sm:$0xff] %v8586_v37  ;;  %v8594_v43 = vld [vmem:[#allocation2 + $0x50] sm:$0xff] }
 0x666   : > { %v8589_v46 = vadd.f32 %v3258_v58, %v3097_v31 }
 0x667   : > { %3547 = vmatmul.f32.gmra.mxu1 %v5568_v7  ;;  %4241 = vmatmul.f32.gmra.mxu0 %v5568_v7 }
 0x668   : > { %4080 = vmatmul.f32.gmra.mxu3 %v8560_v55  ;;  %10045 = vst [vmem:[#allocation77_spill] sm:$0xff] %v8589_v46 }
 0x669   : > { %3725 = vmatmul.f32.gmra.mxu2 %v5573_v18 }
 0x66b   : > { %v3261_v10 = vpop.f32.mrf.mxu3  ;;  %v3099_v51 = vpop.f32.mrf.mxu2 }
 0x66c   : > { %v2956_v42 = vpop.f32.mrf.mxu1  ;;  %v8591_v0 = vpop.f32.mrf.mxu0  ;;  %v5461_v51 = vld [vmem:[%s9747_s2 + $0x460] sm:$0xff] }
 0x66d   : > { %10046 = vst [vmem:[#allocation78_spill] sm:$0xff] %v8591_v0  ;;  %4397 = vmatpush.msra.mxu1 %v5461_v51 }
 0x66f   : > { %3550 = vmatmul.f32.gmra.mxu1 %v5570_v48  ;;  %4244 = vmatmul.f32.gmra.mxu0 %v5570_v48  ;;  %v5575_v48 = vld [vmem:[#allocation2 + $0x58] sm:$0xff] }
 0x670   : > { %4083 = vmatmul.f32.gmra.mxu3 %v8569_v39 }
 0x671   : > { %3728 = vmatmul.f32.gmra.mxu2 %v8594_v43 }
 0x673   : > { %v3263_v7 = vpop.f32.mrf.mxu3  ;;  %v3101_v31 = vpop.f32.mrf.mxu2 }
 0x674   : > { %v2959_v9 = vpop.f32.mrf.mxu1  ;;  %v8597_v25 = vpop.f32.mrf.mxu0  ;;  %v3102_v58 = vadd.f32 %v3101_v31, %v2956_v42 }
 0x675   : > { %10047 = vst [vmem:[#allocation82_spill] sm:$0xff] %v8597_v25 }
 0x676   : > { %v8600_v34 = vadd.f32 %v3263_v7, %v3102_v58 }
 0x677   : > { %3553 = vmatmul.f32.gmra.mxu1 %v5572_v59  ;;  %4247 = vmatmul.f32.gmra.mxu0 %v5572_v59  ;;  %v5576_v59 = vld [vmem:[#allocation2 + $0x60] sm:$0xff] }
 0x678   : > { %4086 = vmatmul.f32.gmra.mxu3 %v8576_v53  ;;  %10048 = vst [vmem:[#allocation79_spill] sm:$0xff] %v8600_v34 }
 0x679   : > { %3731 = vmatmul.f32.gmra.mxu2 %v5575_v48 }
 0x67b   : > { %v3266_v10 = vpop.f32.mrf.mxu3  ;;  %v3104_v25 = vpop.f32.mrf.mxu2 }
 0x67c   : > { %v2962_v0 = vpop.f32.mrf.mxu1  ;;  %v8605_v46 = vpop.f32.mrf.mxu0  ;;  %v3105_v37 = vadd.f32 %v3104_v25, %v2959_v9 }
 0x67d   : > { %10049 = vst [vmem:[#allocation86_spill] sm:$0xff] %v8605_v46  ;;  %v8616_v0 = vld [vmem:[#allocation2 + $0x68] sm:$0xff] }
 0x67e   : > { %v8609_v42 = vadd.f32 %v3266_v10, %v3105_v37 }
 0x67f   : > { %3556 = vmatmul.f32.gmra.mxu1 %v8560_v55  ;;  %4250 = vmatmul.f32.gmra.mxu0 %v8560_v55 }
 0x680   : > { %4089 = vmatmul.f32.gmra.mxu3 %v5573_v18  ;;  %10050 = vst [vmem:[#allocation87_spill] sm:$0xff] %v8609_v42 }
 0x681   : > { %3734 = vmatmul.f32.gmra.mxu2 %v5576_v59 }
 0x683   : > { %v3269_v7 = vpop.f32.mrf.mxu3  ;;  %v3107_v51 = vpop.f32.mrf.mxu2 }
 0x684   : > { %v2964_v31 = vpop.f32.mrf.mxu1  ;;  %v8611_v58 = vpop.f32.mrf.mxu0  ;;  %v5578_v51 = vld [vmem:[#allocation2 + $0x70] sm:$0xff] }
 0x685   : > { %10051 = vst [vmem:[#allocation41_spill] sm:$0xff] %v8611_v58 }
 0x687   : > { %3559 = vmatmul.f32.gmra.mxu1 %v8569_v39  ;;  %4253 = vmatmul.f32.gmra.mxu0 %v8569_v39  ;;  %v5460_v39 = vld [vmem:[%s9747_s2 + $0x458] sm:$0xff] }
 0x688   : > { %4092 = vmatmul.f32.gmra.mxu3 %v8594_v43  ;;  %4398 = vmatpush.msra.mxu1 %v5460_v39 }
 0x689   : > { %3737 = vmatmul.f32.gmra.mxu2 %v8616_v0 }
 0x68b   : > { %v3271_v55 = vpop.f32.mrf.mxu3  ;;  %v3109_v25 = vpop.f32.mrf.mxu2 }
 0x68c   : > { %v2967_v37 = vpop.f32.mrf.mxu1  ;;  %v8619_v9 = vpop.f32.mrf.mxu0  ;;  %v3110_v10 = vadd.f32 %v3109_v25, %v2964_v31 }
 0x68d   : > { %10052 = vst [vmem:[#allocation76_spill] sm:$0xff] %v8619_v9 }
 0x68e   : > { %v8623_v7 = vadd.f32 %v3271_v55, %v3110_v10  ;;  %v5579_v55 = vld [vmem:[#allocation2 + $0x78] sm:$0xff] }
 0x68f   : > { %3562 = vmatmul.f32.gmra.mxu1 %v8576_v53  ;;  %4256 = vmatmul.f32.gmra.mxu0 %v8576_v53 }
 0x690   : > { %4095 = vmatmul.f32.gmra.mxu3 %v5575_v48  ;;  %10053 = vst [vmem:[#allocation43_spill] sm:$0xff] %v8623_v7 }
 0x691   : > { %3740 = vmatmul.f32.gmra.mxu2 %v5578_v51 }
 0x693   : > { %v3274_v58 = vpop.f32.mrf.mxu3  ;;  %v3112_v9 = vpop.f32.mrf.mxu2 }
 0x694   : > { %v2970_v42 = vpop.f32.mrf.mxu1  ;;  %v8628_v46 = vpop.f32.mrf.mxu0  ;;  %v3113_v31 = vadd.f32 %v3112_v9, %v2967_v37 }
 0x695   : > { %10054 = vst [vmem:[#allocation85_spill] sm:$0xff] %v8628_v46  ;;  %v8637_v42 = vld [vmem:[#allocation2 + $0x80] sm:$0xff] }
 0x696   : > { %v8630_v53 = vadd.f32 %v3274_v58, %v3113_v31  ;;  %v5581_v31 = vld [vmem:[#allocation2 + $0x88] sm:$0xff] }
 0x697   : > { %3565 = vmatmul.f32.gmra.mxu1 %v5573_v18  ;;  %4259 = vmatmul.f32.gmra.mxu0 %v5573_v18 }
 0x698   : > { %4098 = vmatmul.f32.gmra.mxu3 %v5576_v59  ;;  %10055 = vst [vmem:[#allocation42_spill] sm:$0xff] %v8630_v53 }
 0x699   : > { %3743 = vmatmul.f32.gmra.mxu2 %v5579_v55 }
 0x69b   : > { %v3277_v25 = vpop.f32.mrf.mxu3  ;;  %v3115_v34 = vpop.f32.mrf.mxu2 }
 0x69c   : > { %v2972_v10 = vpop.f32.mrf.mxu1  ;;  %v8632_v7 = vpop.f32.mrf.mxu0 }
 0x69d   : > { %10056 = vst [vmem:[#allocation12_spill] sm:$0xff] %v8632_v7 }
 0x69f   : > { %3568 = vmatmul.f32.gmra.mxu1 %v8594_v43  ;;  %4262 = vmatmul.f32.gmra.mxu0 %v8594_v43  ;;  %v5459_v43 = vld [vmem:[%s9747_s2 + $0x450] sm:$0xff] }
 0x6a0   : > { %4101 = vmatmul.f32.gmra.mxu3 %v8616_v0  ;;  %4399 = vmatpush.msra.mxu1 %v5459_v43 }
 0x6a1   : > { %3746 = vmatmul.f32.gmra.mxu2 %v8637_v42 }
 0x6a3   : > { %v3279_v18 = vpop.f32.mrf.mxu3  ;;  %v3117_v9 = vpop.f32.mrf.mxu2 }
 0x6a4   : > { %v2975_v58 = vpop.f32.mrf.mxu1  ;;  %v8640_v37 = vpop.f32.mrf.mxu0  ;;  %v3118_v39 = vadd.f32 %v3117_v9, %v2972_v10  ;;  %v8651_v10 = vld [vmem:[#allocation2 + $0x90] sm:$0xff] }
 0x6a5   : > { %10057 = vst [vmem:[#allocation44_spill] sm:$0xff] %v8640_v37 }
 0x6a6   : > { %v8642_v34 = vadd.f32 %v3279_v18, %v3118_v39 }
 0x6a7   : > { %3571 = vmatmul.f32.gmra.mxu1 %v5575_v48  ;;  %4265 = vmatmul.f32.gmra.mxu0 %v5575_v48 }
 0x6a8   : > { %4104 = vmatmul.f32.gmra.mxu3 %v5578_v51  ;;  %10058 = vst [vmem:[#allocation47_spill] sm:$0xff] %v8642_v34 }
 0x6a9   : > { %3749 = vmatmul.f32.gmra.mxu2 %v5581_v31 }
 0x6ab   : > { %v3282_v25 = vpop.f32.mrf.mxu3  ;;  %v3120_v46 = vpop.f32.mrf.mxu2 }
 0x6ac   : > { %v2978_v53 = vpop.f32.mrf.mxu1  ;;  %v8647_v7 = vpop.f32.mrf.mxu0  ;;  %v3121_v37 = vadd.f32 %v3120_v46, %v2975_v58  ;;  %v8659_v46 = vld [vmem:[#allocation2 + $0x98] sm:$0xff] }
 0x6ad   : > { %10059 = vst [vmem:[#allocation45_spill] sm:$0xff] %v8647_v7 }
 0x6ae   : > { %v8649_v48 = vadd.f32 %v3282_v25, %v3121_v37 }
 0x6af   : > { %3574 = vmatmul.f32.gmra.mxu1 %v5576_v59  ;;  %4268 = vmatmul.f32.gmra.mxu0 %v5576_v59 }
 0x6b0   : > { %4107 = vmatmul.f32.gmra.mxu3 %v5579_v55  ;;  %10060 = vst [vmem:[#allocation48_spill] sm:$0xff] %v8649_v48 }
 0x6b1   : > { %3752 = vmatmul.f32.gmra.mxu2 %v8651_v10 }
 0x6b3   : > { %v3285_v18 = vpop.f32.mrf.mxu3 }
 0x6b4   : > { %v2980_v9 = vpop.f32.mrf.mxu1  ;;  %v8654_v39 = vpop.f32.mrf.mxu0 }
 0x6b5   : > { %10061 = vst [vmem:[#allocation15_spill] sm:$0xff] %v8654_v39  ;;  %v3123_v43 = vpop.f32.mrf.mxu2 }
 0x6b6   : > { %v8669_v43 = vld [vmem:[#allocation2 + $0xa0] sm:$0xff] }
 0x6b7   : > { %3577 = vmatmul.f32.gmra.mxu1 %v8616_v0  ;;  %4271 = vmatmul.f32.gmra.mxu0 %v8616_v0  ;;  %v5458_v0 = vld [vmem:[%s9747_s2 + $0x448] sm:$0xff] }
 0x6b8   : > { %4110 = vmatmul.f32.gmra.mxu3 %v8637_v42  ;;  %4400 = vmatpush.msra.mxu1 %v5458_v0 }
 0x6b9   : > { %3755 = vmatmul.f32.gmra.mxu2 %v8659_v46 }
 0x6bb   : > { %v3287_v59 = vpop.f32.mrf.mxu3 }
 0x6bc   : > { %v2983_v53 = vpop.f32.mrf.mxu1  ;;  %v8662_v58 = vpop.f32.mrf.mxu0 }
 0x6bd   : > { %10062 = vst [vmem:[#allocation20_spill] sm:$0xff] %v8662_v58  ;;  %v3125_v37 = vpop.f32.mrf.mxu2 }
 0x6be   : > { %v3126_v25 = vadd.f32 %v3125_v37, %v2980_v9 }
 0x6bf   : > { %3580 = vmatmul.f32.gmra.mxu1 %v5578_v51  ;;  %4274 = vmatmul.f32.gmra.mxu0 %v5578_v51 }
 0x6c0   : > { %4113 = vmatmul.f32.gmra.mxu3 %v5581_v31  ;;  %v8664_v18 = vadd.f32 %v3287_v59, %v3126_v25  ;;  %v8677_v59 = vld [vmem:[#allocation2 + $0xa8] sm:$0xff] }
 0x6c1   : > { %3758 = vmatmul.f32.gmra.mxu2 %v8669_v43 }
 0x6c2   : > { %10063 = vst [vmem:[#allocation46_spill] sm:$0xff] %v8664_v18 }
 0x6c3   : > { %v3290_v48 = vpop.f32.mrf.mxu3 }
 0x6c4   : > { %v2986_v39 = vpop.f32.mrf.mxu1  ;;  %v8672_v34 = vpop.f32.mrf.mxu0 }
 0x6c5   : > { %10064 = vst [vmem:[#allocation25_spill] sm:$0xff] %v8672_v34  ;;  %v3128_v58 = vpop.f32.mrf.mxu2  ;;  %v8683_v39 = vld [vmem:[#allocation2 + $0xb0] sm:$0xff] }
 0x6c6   : > { %v3129_v9 = vadd.f32 %v3128_v58, %v2983_v53 }
 0x6c7   : > { %3583 = vmatmul.f32.gmra.mxu1 %v5579_v55  ;;  %4277 = vmatmul.f32.gmra.mxu0 %v5579_v55 }
 0x6c8   : > { %4116 = vmatmul.f32.gmra.mxu3 %v8651_v10  ;;  %v8675_v51 = vadd.f32 %v3290_v48, %v3129_v9 }
 0x6c9   : > { %3761 = vmatmul.f32.gmra.mxu2 %v8677_v59 }
 0x6ca   : > { %10065 = vst [vmem:[#allocation49_spill] sm:$0xff] %v8675_v51 }
 0x6cb   : > { %v3293_v37 = vpop.f32.mrf.mxu3 }
 0x6cc   : > { %v3539_v25 = vpop.f32.mrf.mxu1  ;;  %v4233_v18 = vpop.f32.mrf.mxu0  ;;  %v8692_v37 = vld [vmem:[#allocation2 + $0xb8] sm:$0xff] }
 0x6cd   : > { %v3131_v0 = vpop.f32.mrf.mxu2 }
 0x6ce   : > { %v3540_v0 = vadd.f32 %v3539_v25, %v8109_v45 }
 0x6cf   : > { %3586 = vmatmul.f32.gmra.mxu1 %v8637_v42  ;;  %4280 = vmatmul.f32.gmra.mxu0 %v8637_v42  ;;  %v5457_v42 = vld [vmem:[%s9747_s2 + $0x440] sm:$0xff] }
 0x6d0   : > { %4119 = vmatmul.f32.gmra.mxu3 %v8659_v46  ;;  %4401 = vmatpush.msra.mxu1 %v5457_v42 }
 0x6d1   : > { %3764 = vmatmul.f32.gmra.mxu2 %v8683_v39 }
 0x6d3   : > { %v4072_v55 = vpop.f32.mrf.mxu3 }
 0x6d4   : > { %v8686_v48 = vadd.f32 %v4233_v18, %v4072_v55  ;;  %v3542_v53 = vpop.f32.mrf.mxu1  ;;  %v4236_v58 = vpop.f32.mrf.mxu0 }
 0x6d5   : > { %v3717_v9 = vpop.f32.mrf.mxu2  ;;  %v3543_v55 = vadd.f32 %v3542_v53, %v8114_v13 }
 0x6d6   : > { %10066 = vst [vmem:[#allocation50_spill] sm:$0xff] %v8686_v48  ;;  %v3861_v51 = vadd.f32 %v3717_v9, %v3540_v0 }
 0x6d7   : > { %3589 = vmatmul.f32.gmra.mxu1 %v5581_v31  ;;  %4283 = vmatmul.f32.gmra.mxu0 %v5581_v31 }
 0x6d8   : > { %4122 = vmatmul.f32.gmra.mxu3 %v8669_v43  ;;  %v3909_v24 = vrot.slane %v3861_v51, 1 }
 0x6d9   : > { %3767 = vmatmul.f32.gmra.mxu2 %v8692_v37 }
 0x6db   : > { %v4075_v18 = vpop.f32.mrf.mxu3 }
 0x6dc   : > { %v8697_v34 = vadd.f32 %v4236_v58, %v4075_v18  ;;  %v3545_v31 = vpop.f32.mrf.mxu1  ;;  %v4239_v7 = vpop.f32.mrf.mxu0 }
 0x6dd   : > { %v3720_v48 = vpop.f32.mrf.mxu2 }
 0x6de   : > { %v3862_v3 = vadd.f32 %v3720_v48, %v3543_v55  ;;  %v3546_v48 = vadd.f32 %v3545_v31, %v8124_v6 }
 0x6df   : > { %3592 = vmatmul.f32.gmra.mxu1 %v8651_v10  ;;  %4286 = vmatmul.f32.gmra.mxu0 %v8651_v10 }
 0x6e0   : > { %4125 = vmatmul.f32.gmra.mxu3 %v8677_v59  ;;  %v3910_v42 = vrot.slane %v3862_v3, 1 }
 0x6e1   : > { %3770 = vmatmul.f32.gmra.mxu2 %v8702_v29 }
 0x6e2   : > { %v3988_v45 = vsel %vm1504_vm0, %v3909_v24, %v3910_v42  ;;  %v8716_v24 = vld [vmem:[#allocation2 + $0xc8] sm:$0xff] }
 0x6e3   : > { %v8708_v13 = vadd.f32 %v3988_v45, %v8119_v62  ;;  %v4078_v25 = vpop.f32.mrf.mxu3 }
 0x6e4   : > { %v8711_v53 = vadd.f32 %v4239_v7, %v4078_v25  ;;  %v3548_v10 = vpop.f32.mrf.mxu1  ;;  %v4242_v51 = vpop.f32.mrf.mxu0 }
 0x6e5   : > { %v3723_v58 = vpop.f32.mrf.mxu2 }
 0x6e6   : > { %v3863_v9 = vadd.f32 %v3723_v58, %v3546_v48 }
 0x6e7   : > { %3595 = vmatmul.f32.gmra.mxu1 %v8659_v46  ;;  %4289 = vmatmul.f32.gmra.mxu0 %v8659_v46  ;;  %v5456_v46 = vld [vmem:[%s9747_s2 + $0x438] sm:$0xff] }
 0x6e8   : > { %4128 = vmatmul.f32.gmra.mxu3 %v8683_v39  ;;  %v3911_v3 = vrot.slane %v3863_v9, 1  ;;  %4402 = vmatpush.msra.mxu1 %v5456_v46  ;;  %v8742_v46 = vld [vmem:[#allocation2 + $0xd8] sm:$0xff] }
 0x6e9   : > { %3773 = vmatmul.f32.gmra.mxu2 %v8716_v24 }
 0x6ea   : > { %v3987_v62 = vsel %vm1504_vm0, %v3910_v42, %v3911_v3  ;;  %v8732_v42 = vld [vmem:[#allocation2 + $0xd0] sm:$0xff] }
 0x6eb   : > { %v8722_v6 = vadd.f32 %v3987_v62, %v8131_v11  ;;  %v4081_v7 = vpop.f32.mrf.mxu3  ;;  %v3549_v11 = vadd.f32 %v3548_v10, %v8133_v56 }
 0x6ec   : > { %v8724_v0 = vadd.f32 %v4242_v51, %v4081_v7  ;;  %v3551_v18 = vpop.f32.mrf.mxu1  ;;  %v4245_v55 = vpop.f32.mrf.mxu0 }
 0x6ed   : > { %v3726_v31 = vpop.f32.mrf.mxu2  ;;  %v3552_v25 = vadd.f32 %v3551_v18, %v8140_v38 }
 0x6ee   : > { %v3864_v48 = vadd.f32 %v3726_v31, %v3549_v11 }
 0x6ef   : > { %3598 = vmatmul.f32.gmra.mxu1 %v8669_v43  ;;  %4292 = vmatmul.f32.gmra.mxu0 %v8669_v43 }
 0x6f0   : > { %4131 = vmatmul.f32.gmra.mxu3 %v8692_v37  ;;  %v3912_v62 = vrot.slane %v3864_v48, 1  ;;  %v8756_v48 = vld [vmem:[#allocation2 + $0xe0] sm:$0xff] }
 0x6f1   : > { %3776 = vmatmul.f32.gmra.mxu2 %v8732_v42 }
 0x6f3   : > { %v4084_v45 = vpop.f32.mrf.mxu3 }
 0x6f4   : > { %v8737_v51 = vadd.f32 %v4245_v55, %v4084_v45  ;;  %v3554_v43 = vpop.f32.mrf.mxu1  ;;  %v4248_v58 = vpop.f32.mrf.mxu0 }
 0x6f5   : > { %v3729_v9 = vpop.f32.mrf.mxu2  ;;  %v3555_v18 = vadd.f32 %v3554_v43, %v8152_v19 }
 0x6f6   : > { %v3865_v3 = vadd.f32 %v3729_v9, %v3552_v25 }
 0x6f7   : > { %3601 = vmatmul.f32.gmra.mxu1 %v8677_v59  ;;  %4295 = vmatmul.f32.gmra.mxu0 %v8677_v59 }
 0x6f8   : > { %4134 = vmatmul.f32.gmra.mxu3 %v8702_v29  ;;  %v3913_v7 = vrot.slane %v3865_v3, 1 }
 0x6f9   : > { %3779 = vmatmul.f32.gmra.mxu2 %v8742_v46 }
 0x6fa   : > { %v3986_v56 = vsel %vm1504_vm0, %v3912_v62, %v3913_v7 }
 0x6fb   : > { %v8748_v38 = vadd.f32 %v3986_v56, %v8147_v26  ;;  %v4087_v10 = vpop.f32.mrf.mxu3 }
 0x6fc   : > { %v8751_v55 = vadd.f32 %v4248_v58, %v4087_v10  ;;  %v3557_v59 = vpop.f32.mrf.mxu1  ;;  %v4251_v31 = vpop.f32.mrf.mxu0 }
 0x6fd   : > { %v3732_v11 = vpop.f32.mrf.mxu2 }
 0x6fe   : > { %v3866_v45 = vadd.f32 %v3732_v11, %v3555_v18 }
 0x6ff   : > { %3604 = vmatmul.f32.gmra.mxu1 %v8683_v39  ;;  %4298 = vmatmul.f32.gmra.mxu0 %v8683_v39  ;;  %v5455_v39 = vld [vmem:[%s9747_s2 + $0x430] sm:$0xff] }
 0x700   : > { %4137 = vmatmul.f32.gmra.mxu3 %v8716_v24  ;;  %v3914_v25 = vrot.slane %v3866_v45, 1  ;;  %4403 = vmatpush.msra.mxu1 %v5455_v39  ;;  %v8782_v39 = vld [vmem:[#allocation2 + $0xf0] sm:$0xff] }
 0x701   : > { %3782 = vmatmul.f32.gmra.mxu2 %v8756_v48 }
 0x702   : > { %v3985_v26 = vsel %vm1504_vm0, %v3913_v7, %v3914_v25  ;;  %v8772_v7 = vld [vmem:[#allocation2 + $0xe8] sm:$0xff] }
 0x703   : > { %v8762_v19 = vadd.f32 %v3985_v26, %v8159_v8  ;;  %v4090_v43 = vpop.f32.mrf.mxu3  ;;  %v3558_v8 = vadd.f32 %v3557_v59, %v8162_v20 }
 0x704   : > { %v8764_v58 = vadd.f32 %v4251_v31, %v4090_v43  ;;  %v3560_v9 = vpop.f32.mrf.mxu1  ;;  %v4254_v3 = vpop.f32.mrf.mxu0 }
 0x705   : > { %v3735_v62 = vpop.f32.mrf.mxu2  ;;  %v3561_v10 = vadd.f32 %v3560_v9, %v8170_v35 }
 0x706   : > { %v3867_v18 = vadd.f32 %v3735_v62, %v3558_v8 }
 0x707   : > { %3607 = vmatmul.f32.gmra.mxu1 %v8692_v37  ;;  %4301 = vmatmul.f32.gmra.mxu0 %v8692_v37 }
 0x708   : > { %4140 = vmatmul.f32.gmra.mxu3 %v8732_v42  ;;  %v3915_v26 = vrot.slane %v3867_v18, 1  ;;  %v8796_v18 = vld [vmem:[#allocation2 + $0xf8] sm:$0xff] }
 0x709   : > { %3785 = vmatmul.f32.gmra.mxu2 %v8772_v7 }
 0x70b   : > { %v4093_v56 = vpop.f32.mrf.mxu3 }
 0x70c   : > { %v8777_v31 = vadd.f32 %v4254_v3, %v4093_v56  ;;  %v3563_v37 = vpop.f32.mrf.mxu1  ;;  %v4257_v11 = vpop.f32.mrf.mxu0 }
 0x70d   : > { %v3738_v45 = vpop.f32.mrf.mxu2  ;;  %v3564_v9 = vadd.f32 %v3563_v37, %v8183_v40 }
 0x70e   : > { %v3868_v25 = vadd.f32 %v3738_v45, %v3561_v10 }
 0x70f   : > { %3610 = vmatmul.f32.gmra.mxu1 %v8702_v29  ;;  %4304 = vmatmul.f32.gmra.mxu0 %v8702_v29 }
 0x710   : > { %4143 = vmatmul.f32.gmra.mxu3 %v8742_v46  ;;  %v3916_v43 = vrot.slane %v3868_v25, 1 }
 0x711   : > { %3788 = vmatmul.f32.gmra.mxu2 %v8782_v39 }
 0x712   : > { %v3984_v20 = vsel %vm1504_vm0, %v3915_v26, %v3916_v43 }
 0x713   : > { %v8788_v35 = vadd.f32 %v3984_v20, %v8177_v21  ;;  %v4096_v59 = vpop.f32.mrf.mxu3  ;;  %v5454_v20 = vld [vmem:[%s9747_s2 + $0x428] sm:$0xff] }
 0x714   : > { %v8791_v3 = vadd.f32 %v4257_v11, %v4096_v59  ;;  %v3566_v29 = vpop.f32.mrf.mxu1  ;;  %v4260_v62 = vpop.f32.mrf.mxu0  ;;  %4404 = vmatpush.msra.mxu1 %v5454_v20 }
 0x715   : > { %v3741_v8 = vpop.f32.mrf.mxu2 }
 0x716   : > { %v3869_v56 = vadd.f32 %v3741_v8, %v3564_v9 }
 0x717   : > { %3613 = vmatmul.f32.gmra.mxu1 %v8716_v24  ;;  %4307 = vmatmul.f32.gmra.mxu0 %v8716_v24 }
 0x718   : > { %4146 = vmatmul.f32.gmra.mxu3 %v8756_v48  ;;  %v3917_v10 = vrot.slane %v3869_v56, 1 }
 0x719   : > { %3791 = vmatmul.f32.gmra.mxu2 %v8796_v18 }
 0x71a   : > { %v3983_v21 = vsel %vm1504_vm0, %v3916_v43, %v3917_v10  ;;  %v8812_v43 = vld [vmem:[#allocation2 + $0x100] sm:$0xff] }
 0x71b   : > { %v8802_v40 = vadd.f32 %v3983_v21, %v8190_v36  ;;  %v4099_v37 = vpop.f32.mrf.mxu3  ;;  %v3567_v36 = vadd.f32 %v3566_v29, %v8193_v50 }
 0x71c   : > { %v8804_v11 = vadd.f32 %v4260_v62, %v4099_v37  ;;  %v3569_v45 = vpop.f32.mrf.mxu1  ;;  %v4263_v25 = vpop.f32.mrf.mxu0 }
 0x71d   : > { %10067 = vst [vmem:[#allocation30_spill] sm:$0xff] %v8802_v40  ;;  %v3744_v26 = vpop.f32.mrf.mxu2  ;;  %v3570_v9 = vadd.f32 %v3569_v45, %v8201_v54  ;;  %v8822_v40 = vld [vmem:[#allocation2 + $0x108] sm:$0xff] }
 0x71e   : > { %10068 = vst [vmem:[#allocation51_spill] sm:$0xff] %v8804_v11  ;;  %v3870_v62 = vadd.f32 %v3744_v26, %v3567_v36 }
 0x71f   : > { %3616 = vmatmul.f32.gmra.mxu1 %v8732_v42  ;;  %4310 = vmatmul.f32.gmra.mxu0 %v8732_v42 }
 0x720   : > { %4149 = vmatmul.f32.gmra.mxu3 %v8772_v7  ;;  %v3918_v11 = vrot.slane %v3870_v62, 1 }
 0x721   : > { %3794 = vmatmul.f32.gmra.mxu2 %v8812_v43 }
 0x723   : > { %v4102_v59 = vpop.f32.mrf.mxu3 }
 0x724   : > { %v8817_v8 = vadd.f32 %v4263_v25, %v4102_v59  ;;  %v3572_v56 = vpop.f32.mrf.mxu1  ;;  %v4266_v10 = vpop.f32.mrf.mxu0 }
 0x725   : > { %v3747_v21 = vpop.f32.mrf.mxu2  ;;  %v3573_v45 = vadd.f32 %v3572_v56, %v8214_v14 }
 0x726   : > { %v3871_v37 = vadd.f32 %v3747_v21, %v3570_v9 }
 0x727   : > { %3619 = vmatmul.f32.gmra.mxu1 %v8742_v46  ;;  %4313 = vmatmul.f32.gmra.mxu0 %v8742_v46 }
 0x728   : > { %4152 = vmatmul.f32.gmra.mxu3 %v8782_v39  ;;  %v3919_v20 = vrot.slane %v3871_v37, 1 }
 0x729   : > { %3797 = vmatmul.f32.gmra.mxu2 %v8822_v40 }
 0x72a   : > { %v3982_v50 = vsel %vm1504_vm0, %v3918_v11, %v3919_v20  ;;  %v8836_v11 = vld [vmem:[#allocation2 + $0x110] sm:$0xff] }
 0x72b   : > { %v8828_v54 = vadd.f32 %v3982_v50, %v8208_v12  ;;  %v4105_v29 = vpop.f32.mrf.mxu3 }
 0x72c   : > { %v8831_v25 = vadd.f32 %v4266_v10, %v4105_v29  ;;  %v3575_v26 = vpop.f32.mrf.mxu1  ;;  %v4269_v36 = vpop.f32.mrf.mxu0  ;;  %v5453_v29 = vld [vmem:[%s9747_s2 + $0x420] sm:$0xff] }
 0x72d   : > { %v3750_v59 = vpop.f32.mrf.mxu2  ;;  %4405 = vmatpush.msra.mxu1 %v5453_v29 }
 0x72e   : > { %10069 = vst [vmem:[#allocation52_spill] sm:$0xff] %v8831_v25  ;;  %v3872_v9 = vadd.f32 %v3750_v59, %v3573_v45  ;;  %v8862_v25 = vld [vmem:[#allocation2 + $0x120] sm:$0xff] }
 0x72f   : > { %3622 = vmatmul.f32.gmra.mxu1 %v8756_v48  ;;  %4316 = vmatmul.f32.gmra.mxu0 %v8756_v48 }
 0x730   : > { %4155 = vmatmul.f32.gmra.mxu3 %v8796_v18  ;;  %v3920_v62 = vrot.slane %v3872_v9, 1 }
 0x731   : > { %3800 = vmatmul.f32.gmra.mxu2 %v8836_v11 }
 0x732   : > { %v3981_v12 = vsel %vm1504_vm0, %v3919_v20, %v3920_v62  ;;  %v8852_v20 = vld [vmem:[#allocation2 + $0x118] sm:$0xff] }
 0x733   : > { %v8842_v14 = vadd.f32 %v3981_v12, %v8221_v17  ;;  %v4108_v56 = vpop.f32.mrf.mxu3  ;;  %v3576_v17 = vadd.f32 %v3575_v26, %v8224_v28 }
 0x734   : > { %v8844_v10 = vadd.f32 %v4269_v36, %v4108_v56  ;;  %v3578_v21 = vpop.f32.mrf.mxu1  ;;  %v4272_v37 = vpop.f32.mrf.mxu0 }
 0x735   : > { %10070 = vst [vmem:[#allocation53_spill] sm:$0xff] %v8842_v14  ;;  %v3753_v50 = vpop.f32.mrf.mxu2  ;;  %v3579_v36 = vadd.f32 %v3578_v21, %v8232_v47 }
 0x736   : > { %10071 = vst [vmem:[#allocation54_spill] sm:$0xff] %v8844_v10  ;;  %v3873_v59 = vadd.f32 %v3753_v50, %v3576_v17 }
 0x737   : > { %3625 = vmatmul.f32.gmra.mxu1 %v8772_v7  ;;  %4319 = vmatmul.f32.gmra.mxu0 %v8772_v7 }
 0x738   : > { %4158 = vmatmul.f32.gmra.mxu3 %v8812_v43  ;;  %v3921_v14 = vrot.slane %v3873_v59, 1 }
 0x739   : > { %3803 = vmatmul.f32.gmra.mxu2 %v8852_v20 }
 0x73b   : > { %v4111_v45 = vpop.f32.mrf.mxu3 }
 0x73c   : > { %v8857_v9 = vadd.f32 %v4272_v37, %v4111_v45  ;;  %v3581_v62 = vpop.f32.mrf.mxu1  ;;  %v4275_v12 = vpop.f32.mrf.mxu0 }
 0x73d   : > { %v3756_v56 = vpop.f32.mrf.mxu2  ;;  %v3582_v21 = vadd.f32 %v3581_v62, %v8245_v22 }
 0x73e   : > { %v3874_v10 = vadd.f32 %v3756_v56, %v3579_v36 }
 0x73f   : > { %3628 = vmatmul.f32.gmra.mxu1 %v8782_v39  ;;  %4322 = vmatmul.f32.gmra.mxu0 %v8782_v39 }
 0x740   : > { %4161 = vmatmul.f32.gmra.mxu3 %v8822_v40  ;;  %v3922_v29 = vrot.slane %v3874_v10, 1 }
 0x741   : > { %3806 = vmatmul.f32.gmra.mxu2 %v8862_v25 }
 0x742   : > { %v3980_v28 = vsel %vm1504_vm0, %v3921_v14, %v3922_v29  ;;  %v8876_v14 = vld [vmem:[#allocation2 + $0x128] sm:$0xff] }
 0x743   : > { %v8868_v47 = vadd.f32 %v3980_v28, %v8239_v5  ;;  %v4114_v26 = vpop.f32.mrf.mxu3 }
 0x744   : > { %v8871_v37 = vadd.f32 %v4275_v12, %v4114_v26  ;;  %v3584_v50 = vpop.f32.mrf.mxu1  ;;  %v4278_v17 = vpop.f32.mrf.mxu0  ;;  %v5452_v26 = vld [vmem:[%s9747_s2 + $0x418] sm:$0xff] }
 0x745   : > { %v3759_v45 = vpop.f32.mrf.mxu2  ;;  %4406 = vmatpush.msra.mxu1 %v5452_v26 }
 0x746   : > { %10072 = vst [vmem:[#allocation55_spill] sm:$0xff] %v8871_v37  ;;  %v3875_v36 = vadd.f32 %v3759_v45, %v3582_v21  ;;  %v8902_v37 = vld [vmem:[#allocation2 + $0x138] sm:$0xff] }
 0x747   : > { %3631 = vmatmul.f32.gmra.mxu1 %v8796_v18  ;;  %4325 = vmatmul.f32.gmra.mxu0 %v8796_v18 }
 0x748   : > { %4164 = vmatmul.f32.gmra.mxu3 %v8836_v11  ;;  %v3923_v10 = vrot.slane %v3875_v36, 1 }
 0x749   : > { %3809 = vmatmul.f32.gmra.mxu2 %v8876_v14 }
 0x74a   : > { %v3979_v5 = vsel %vm1504_vm0, %v3922_v29, %v3923_v10  ;;  %v8892_v29 = vld [vmem:[#allocation2 + $0x130] sm:$0xff] }
 0x74b   : > { %v8882_v22 = vadd.f32 %v3979_v5, %v8252_v33  ;;  %v4117_v59 = vpop.f32.mrf.mxu3  ;;  %v3585_v33 = vadd.f32 %v3584_v50, %v8255_v1 }
 0x74c   : > { %v8884_v62 = vadd.f32 %v4278_v17, %v4117_v59  ;;  %v3587_v12 = vpop.f32.mrf.mxu1  ;;  %v4281_v56 = vpop.f32.mrf.mxu0 }
 0x74d   : > { %10073 = vst [vmem:[#allocation56_spill] sm:$0xff] %v8882_v22  ;;  %v3762_v28 = vpop.f32.mrf.mxu2  ;;  %v3588_v17 = vadd.f32 %v3587_v12, %v8263_v41 }
 0x74e   : > { %10074 = vst [vmem:[#allocation57_spill] sm:$0xff] %v8884_v62  ;;  %v3876_v45 = vadd.f32 %v3762_v28, %v3585_v33 }
 0x74f   : > { %3634 = vmatmul.f32.gmra.mxu1 %v8812_v43  ;;  %4328 = vmatmul.f32.gmra.mxu0 %v8812_v43 }
 0x750   : > { %4167 = vmatmul.f32.gmra.mxu3 %v8852_v20  ;;  %v3924_v22 = vrot.slane %v3876_v45, 1 }
 0x751   : > { %3812 = vmatmul.f32.gmra.mxu2 %v8892_v29 }
 0x753   : > { %v4120_v21 = vpop.f32.mrf.mxu3 }
 0x754   : > { %v8897_v36 = vadd.f32 %v4281_v56, %v4120_v21  ;;  %v3590_v10 = vpop.f32.mrf.mxu1  ;;  %v4284_v5 = vpop.f32.mrf.mxu0 }
 0x755   : > { %v3765_v59 = vpop.f32.mrf.mxu2  ;;  %v3591_v12 = vadd.f32 %v3590_v10, %v8276_v30 }
 0x756   : > { %v3877_v62 = vadd.f32 %v3765_v59, %v3588_v17 }
 0x757   : > { %3637 = vmatmul.f32.gmra.mxu1 %v8822_v40  ;;  %4331 = vmatmul.f32.gmra.mxu0 %v8822_v40 }
 0x758   : > { %4170 = vmatmul.f32.gmra.mxu3 %v8862_v25  ;;  %v3925_v26 = vrot.slane %v3877_v62, 1 }
 0x759   : > { %3815 = vmatmul.f32.gmra.mxu2 %v8902_v37 }
 0x75a   : > { %v3978_v1 = vsel %vm1504_vm0, %v3924_v22, %v3925_v26  ;;  %v8916_v22 = vld [vmem:[#allocation2 + $0x140] sm:$0xff] }
 0x75b   : > { %v8908_v41 = vadd.f32 %v3978_v1, %v8270_v4  ;;  %v4123_v50 = vpop.f32.mrf.mxu3 }
 0x75c   : > { %v8911_v56 = vadd.f32 %v4284_v5, %v4123_v50  ;;  %v3593_v28 = vpop.f32.mrf.mxu1  ;;  %v4287_v33 = vpop.f32.mrf.mxu0  ;;  %v5451_v50 = vld [vmem:[%s9747_s2 + $0x410] sm:$0xff] }
 0x75d   : > { %v3768_v21 = vpop.f32.mrf.mxu2  ;;  %4407 = vmatpush.msra.mxu1 %v5451_v50 }
 0x75e   : > { %10075 = vst [vmem:[#allocation58_spill] sm:$0xff] %v8911_v56  ;;  %v3878_v17 = vadd.f32 %v3768_v21, %v3591_v12  ;;  %v8942_v56 = vld [vmem:[#allocation2 + $0x150] sm:$0xff] }
 0x75f   : > { %3640 = vmatmul.f32.gmra.mxu1 %v8836_v11  ;;  %4334 = vmatmul.f32.gmra.mxu0 %v8836_v11 }
 0x760   : > { %4173 = vmatmul.f32.gmra.mxu3 %v8876_v14  ;;  %v3926_v62 = vrot.slane %v3878_v17, 1 }
 0x761   : > { %3818 = vmatmul.f32.gmra.mxu2 %v8916_v22 }
 0x762   : > { %v3977_v4 = vsel %vm1504_vm0, %v3925_v26, %v3926_v62  ;;  %v8932_v26 = vld [vmem:[#allocation2 + $0x148] sm:$0xff] }
 0x763   : > { %v8922_v30 = vadd.f32 %v3977_v4, %v8283_v52  ;;  %v4126_v45 = vpop.f32.mrf.mxu3  ;;  %v3594_v52 = vadd.f32 %v3593_v28, %v8286_v32 }
 0x764   : > { %v8924_v10 = vadd.f32 %v4287_v33, %v4126_v45  ;;  %v3596_v5 = vpop.f32.mrf.mxu1  ;;  %v4290_v59 = vpop.f32.mrf.mxu0 }
 0x765   : > { %10076 = vst [vmem:[#allocation59_spill] sm:$0xff] %v8922_v30  ;;  %v3771_v1 = vpop.f32.mrf.mxu2  ;;  %v3597_v33 = vadd.f32 %v3596_v5, %v8294_v27 }
 0x766   : > { %10077 = vst [vmem:[#allocation60_spill] sm:$0xff] %v8924_v10  ;;  %v3879_v21 = vadd.f32 %v3771_v1, %v3594_v52 }
 0x767   : > { %3643 = vmatmul.f32.gmra.mxu1 %v8852_v20  ;;  %4337 = vmatmul.f32.gmra.mxu0 %v8852_v20 }
 0x768   : > { %4176 = vmatmul.f32.gmra.mxu3 %v8892_v29  ;;  %v3927_v30 = vrot.slane %v3879_v21, 1 }
 0x769   : > { %3821 = vmatmul.f32.gmra.mxu2 %v8932_v26 }
 0x76b   : > { %v4129_v12 = vpop.f32.mrf.mxu3 }
 0x76c   : > { %v8937_v17 = vadd.f32 %v4290_v59, %v4129_v12  ;;  %v3599_v62 = vpop.f32.mrf.mxu1  ;;  %v4293_v4 = vpop.f32.mrf.mxu0 }
 0x76d   : > { %v3774_v45 = vpop.f32.mrf.mxu2  ;;  %v3600_v5 = vadd.f32 %v3599_v62, %v8307_v15 }
 0x76e   : > { %v3880_v10 = vadd.f32 %v3774_v45, %v3597_v33 }
 0x76f   : > { %3646 = vmatmul.f32.gmra.mxu1 %v8862_v25  ;;  %4340 = vmatmul.f32.gmra.mxu0 %v8862_v25 }
 0x770   : > { %4179 = vmatmul.f32.gmra.mxu3 %v8902_v37  ;;  %v3928_v50 = vrot.slane %v3880_v10, 1 }
 0x771   : > { %3824 = vmatmul.f32.gmra.mxu2 %v8942_v56 }
 0x772   : > { %v3976_v32 = vsel %vm1504_vm0, %v3927_v30, %v3928_v50  ;;  %v8956_v30 = vld [vmem:[#allocation2 + $0x158] sm:$0xff] }
 0x773   : > { %v8948_v27 = vadd.f32 %v3976_v32, %v8301_v63  ;;  %v4132_v28 = vpop.f32.mrf.mxu3 }
 0x774   : > { %v8951_v59 = vadd.f32 %v4293_v4, %v4132_v28  ;;  %v3602_v1 = vpop.f32.mrf.mxu1  ;;  %v4296_v52 = vpop.f32.mrf.mxu0  ;;  %v5450_v28 = vld [vmem:[%s9747_s2 + $0x408] sm:$0xff] }
 0x775   : > { %v3777_v12 = vpop.f32.mrf.mxu2  ;;  %4408 = vmatpush.msra.mxu1 %v5450_v28 }
 0x776   : > { %10078 = vst [vmem:[#allocation61_spill] sm:$0xff] %v8951_v59  ;;  %v3881_v33 = vadd.f32 %v3777_v12, %v3600_v5  ;;  %v8982_v59 = vld [vmem:[#allocation2 + $0x198] sm:$0xff] }
 0x777   : > { %3649 = vmatmul.f32.gmra.mxu1 %v8876_v14  ;;  %4343 = vmatmul.f32.gmra.mxu0 %v8876_v14 }
 0x778   : > { %4182 = vmatmul.f32.gmra.mxu3 %v8916_v22  ;;  %v3929_v10 = vrot.slane %v3881_v33, 1 }
 0x779   : > { %3827 = vmatmul.f32.gmra.mxu2 %v8956_v30 }
 0x77a   : > { %v3975_v63 = vsel %vm1504_vm0, %v3928_v50, %v3929_v10  ;;  %v8972_v50 = vld [vmem:[#allocation2 + $0x160] sm:$0xff] }
 0x77b   : > { %v8962_v15 = vadd.f32 %v3975_v63, %v8314_v61  ;;  %v4135_v21 = vpop.f32.mrf.mxu3  ;;  %10081 = vst [vmem:[#allocation89_spill] sm:$0xff] %v8972_v50  ;;  %v3603_v61 = vadd.f32 %v3602_v1, %v8317_v44 }
 0x77c   : > { %v8964_v62 = vadd.f32 %v4296_v52, %v4135_v21  ;;  %v3605_v4 = vpop.f32.mrf.mxu1  ;;  %v4299_v45 = vpop.f32.mrf.mxu0 }
 0x77d   : > { %10079 = vst [vmem:[#allocation63_spill] sm:$0xff] %v8962_v15  ;;  %v3780_v32 = vpop.f32.mrf.mxu2  ;;  %v3606_v52 = vadd.f32 %v3605_v4, %v8325_v60 }
 0x77e   : > { %10080 = vst [vmem:[#allocation88_spill] sm:$0xff] %v8964_v62  ;;  %v3882_v12 = vadd.f32 %v3780_v32, %v3603_v61 }
 0x77f   : > { %3652 = vmatmul.f32.gmra.mxu1 %v8892_v29  ;;  %4346 = vmatmul.f32.gmra.mxu0 %v8892_v29 }
 0x780   : > { %4185 = vmatmul.f32.gmra.mxu3 %v8932_v26  ;;  %v3930_v15 = vrot.slane %v3882_v12, 1 }
 0x781   : > { %3830 = vmatmul.f32.gmra.mxu2 %v8972_v50 }
 0x783   : > { %v4138_v5 = vpop.f32.mrf.mxu3 }
 0x784   : > { %v8977_v33 = vadd.f32 %v4299_v45, %v4138_v5  ;;  %v3608_v10 = vpop.f32.mrf.mxu1  ;;  %v4302_v63 = vpop.f32.mrf.mxu0 }
 0x785   : > { %v3783_v21 = vpop.f32.mrf.mxu2  ;;  %v3609_v4 = vadd.f32 %v3608_v10, %v8338_v57 }
 0x786   : > { %10082 = vst [vmem:[#allocation90_spill] sm:$0xff] %v8977_v33  ;;  %v3883_v62 = vadd.f32 %v3783_v21, %v3606_v52 }
 0x787   : > { %3655 = vmatmul.f32.gmra.mxu1 %v8902_v37  ;;  %4349 = vmatmul.f32.gmra.mxu0 %v8902_v37 }
 0x788   : > { %4188 = vmatmul.f32.gmra.mxu3 %v8942_v56  ;;  %v3931_v28 = vrot.slane %v3883_v62, 1 }
 0x789   : > { %3833 = vmatmul.f32.gmra.mxu2 %v8982_v59 }
 0x78a   : > { %v3974_v44 = vsel %vm1504_vm0, %v3930_v15, %v3931_v28  ;;  %v8996_v15 = vld [vmem:[#allocation2 + $0x1a0] sm:$0xff] }
 0x78b   : > { %v8988_v60 = vadd.f32 %v3974_v44, %v8332_v2  ;;  %v4141_v1 = vpop.f32.mrf.mxu3 }
 0x78c   : > { %v8991_v45 = vadd.f32 %v4302_v63, %v4141_v1  ;;  %v3611_v32 = vpop.f32.mrf.mxu1  ;;  %v4305_v61 = vpop.f32.mrf.mxu0  ;;  %v5449_v1 = vld [vmem:[%s9747_s2 + $0x400] sm:$0xff] }
 0x78d   : > { %10083 = vst [vmem:[#allocation91_spill] sm:$0xff] %v8988_v60  ;;  %v3786_v5 = vpop.f32.mrf.mxu2  ;;  %4409 = vmatpush.msra.mxu1 %v5449_v1  ;;  %v9022_v60 = vld [vmem:[#allocation2 + $0x180] sm:$0xff] }
 0x78e   : > { %10084 = vst [vmem:[#allocation92_spill] sm:$0xff] %v8991_v45  ;;  %v3884_v52 = vadd.f32 %v3786_v5, %v3609_v4 }
 0x78f   : > { %3658 = vmatmul.f32.gmra.mxu1 %v8916_v22  ;;  %4352 = vmatmul.f32.gmra.mxu0 %v8916_v22  ;;  %10090 = vst [vmem:[#allocation96_spill] sm:$0xff] %v9022_v60 }
 0x790   : > { %4191 = vmatmul.f32.gmra.mxu3 %v8956_v30  ;;  %v3932_v62 = vrot.slane %v3884_v52, 1 }
 0x791   : > { %3836 = vmatmul.f32.gmra.mxu2 %v8996_v15 }
 0x792   : > { %v3973_v2 = vsel %vm1504_vm0, %v3931_v28, %v3932_v62  ;;  %v9012_v28 = vld [vmem:[#allocation2 + $0x1a8] sm:$0xff] }
 0x793   : > { %v9002_v57 = vadd.f32 %v3973_v2, %v8343_v23  ;;  %v4144_v12 = vpop.f32.mrf.mxu3  ;;  %10087 = vst [vmem:[#allocation95_spill] sm:$0xff] %v9012_v28  ;;  %v3612_v23 = vadd.f32 %v3611_v32, %v8346_v16  ;;  %v10091_v32 = vld [vmem:[#allocation66_spill] sm:$0xff] }
 0x794   : > { %v9004_v10 = vadd.f32 %v4305_v61, %v4144_v12  ;;  %v3614_v63 = vpop.f32.mrf.mxu1  ;;  %v4308_v21 = vpop.f32.mrf.mxu0  ;;  %v10088_v61 = vld [vmem:[#allocation64_spill] sm:$0xff] }
 0x795   : > { %10085 = vst [vmem:[#allocation93_spill] sm:$0xff] %v9002_v57  ;;  %v3789_v44 = vpop.f32.mrf.mxu2  ;;  %v3615_v5 = vadd.f32 %v3614_v63, %v10088_v61 }
 0x796   : > { %10086 = vst [vmem:[#allocation94_spill] sm:$0xff] %v9004_v10  ;;  %v3885_v52 = vadd.f32 %v3789_v44, %v3612_v23 }
 0x797   : > { %3661 = vmatmul.f32.gmra.mxu1 %v8932_v26  ;;  %4355 = vmatmul.f32.gmra.mxu0 %v8932_v26 }
 0x798   : > { %4194 = vmatmul.f32.gmra.mxu3 %v8972_v50  ;;  %v3933_v45 = vrot.slane %v3885_v52, 1 }
 0x799   : > { %3839 = vmatmul.f32.gmra.mxu2 %v9012_v28 }
 0x79b   : > { %v4147_v4 = vpop.f32.mrf.mxu3 }
 0x79c   : > { %v9017_v62 = vadd.f32 %v4308_v21, %v4147_v4  ;;  %v3617_v2 = vpop.f32.mrf.mxu1  ;;  %v4311_v12 = vpop.f32.mrf.mxu0 }
 0x79d   : > { %v3792_v10 = vpop.f32.mrf.mxu2 }
 0x79e   : > { %10089 = vst [vmem:[#allocation64_spill] sm:$0xff] %v9017_v62  ;;  %v3886_v57 = vadd.f32 %v3792_v10, %v3615_v5  ;;  %v10093_v10 = vld [vmem:[#allocation74_spill] sm:$0xff] }
 0x79f   : > { %3664 = vmatmul.f32.gmra.mxu1 %v8942_v56  ;;  %4358 = vmatmul.f32.gmra.mxu0 %v8942_v56  ;;  %v3618_v44 = vadd.f32 %v3617_v2, %v10093_v10 }
 0x7a0   : > { %4197 = vmatmul.f32.gmra.mxu3 %v8982_v59  ;;  %v3934_v1 = vrot.slane %v3886_v57, 1 }
 0x7a1   : > { %3842 = vmatmul.f32.gmra.mxu2 %v9022_v60 }
 0x7a2   : > { %v3972_v16 = vsel %vm1504_vm0, %v3933_v45, %v3934_v1  ;;  %v9036_v45 = vld [vmem:[#allocation2 + $0x188] sm:$0xff] }
 0x7a3   : > { %v9028_v63 = vadd.f32 %v3972_v16, %v10091_v32  ;;  %v4150_v21 = vpop.f32.mrf.mxu3  ;;  %10095 = vst [vmem:[#allocation97_spill] sm:$0xff] %v9036_v45 }
 0x7a4   : > { %v9031_v23 = vadd.f32 %v4311_v12, %v4150_v21  ;;  %v3620_v4 = vpop.f32.mrf.mxu1  ;;  %v4314_v61 = vpop.f32.mrf.mxu0  ;;  %v10096_v12 = vld [vmem:[#allocation75_spill] sm:$0xff] }
 0x7a5   : > { %10092 = vst [vmem:[#allocation66_spill] sm:$0xff] %v9028_v63  ;;  %v3795_v5 = vpop.f32.mrf.mxu2 }
 0x7a6   : > { %10094 = vst [vmem:[#allocation74_spill] sm:$0xff] %v9031_v23  ;;  %v3887_v52 = vadd.f32 %v3795_v5, %v3618_v44 }
 0x7a7   : > { %3667 = vmatmul.f32.gmra.mxu1 %v8956_v30  ;;  %4361 = vmatmul.f32.gmra.mxu0 %v8956_v30 }
 0x7a8   : > { %4200 = vmatmul.f32.gmra.mxu3 %v8996_v15  ;;  %v3935_v57 = vrot.slane %v3887_v52, 1  ;;  %v9049_v52 = vld [vmem:[#allocation2 + $0x190] sm:$0xff] }
 0x7a9   : > { %3845 = vmatmul.f32.gmra.mxu2 %v9036_v45  ;;  %10099 = vst [vmem:[#allocation99_spill] sm:$0xff] %v9049_v52 }
 0x7aa   : > { %v3971_v2 = vsel %vm1504_vm0, %v3934_v1, %v3935_v57  ;;  %v10100_v1 = vld [vmem:[#allocation71_spill] sm:$0xff] }
 0x7ab   : > { %v9042_v16 = vadd.f32 %v3971_v2, %v10096_v12  ;;  %v4153_v32 = vpop.f32.mrf.mxu3  ;;  %v3621_v57 = vadd.f32 %v3620_v4, %v10100_v1  ;;  %v10101_v12 = vld [vmem:[#allocation72_spill] sm:$0xff]  ;;  %v10105_v1 = vld [vmem:[#allocation62_spill] sm:$0xff] }
 0x7ac   : > { %v9044_v21 = vadd.f32 %v4314_v61, %v4153_v32  ;;  %v3623_v10 = vpop.f32.mrf.mxu1  ;;  %v4317_v44 = vpop.f32.mrf.mxu0 }
 0x7ad   : > { %10097 = vst [vmem:[#allocation75_spill] sm:$0xff] %v9042_v16  ;;  %v3798_v5 = vpop.f32.mrf.mxu2  ;;  %v3624_v16 = vadd.f32 %v3623_v10, %v10101_v12  ;;  %v10103_v10 = vld [vmem:[#allocation65_spill] sm:$0xff] }
 0x7ae   : > { %10098 = vst [vmem:[#allocation98_spill] sm:$0xff] %v9044_v21  ;;  %v3888_v61 = vadd.f32 %v3798_v5, %v3621_v57 }
 0x7af   : > { %3670 = vmatmul.f32.gmra.mxu1 %v8972_v50  ;;  %4364 = vmatmul.f32.gmra.mxu0 %v8972_v50 }
 0x7b0   : > { %4203 = vmatmul.f32.gmra.mxu3 %v9012_v28  ;;  %v3936_v50 = vrot.slane %v3888_v61, 1 }
 0x7b1   : > { %3848 = vmatmul.f32.gmra.mxu2 %v9049_v52 }
 0x7b3   : > { %v4156_v2 = vpop.f32.mrf.mxu3 }
 0x7b4   : > { %v9054_v32 = vadd.f32 %v4317_v44, %v4156_v2  ;;  %v3626_v21 = vpop.f32.mrf.mxu1  ;;  %v4320_v23 = vpop.f32.mrf.mxu0 }
 0x7b5   : > { %v3801_v63 = vpop.f32.mrf.mxu2  ;;  %v3627_v57 = vadd.f32 %v3626_v21, %v10105_v1 }
 0x7b6   : > { %10102 = vst [vmem:[#allocation71_spill] sm:$0xff] %v9054_v32  ;;  %v3889_v62 = vadd.f32 %v3801_v63, %v3624_v16 }
 0x7b7   : > { %3673 = vmatmul.f32.gmra.mxu1 %v8982_v59  ;;  %4367 = vmatmul.f32.gmra.mxu0 %v8982_v59 }
 0x7b8   : > { %4206 = vmatmul.f32.gmra.mxu3 %v9022_v60  ;;  %v3937_v33 = vrot.slane %v3889_v62, 1  ;;  %v10113_v60 = vld [vmem:[#allocation84_spill] sm:$0xff] }
 0x7b9   : > { %3851 = vmatmul.f32.gmra.mxu2 %v8982_v59 }
 0x7ba   : > { %v3970_v4 = vsel %vm1504_vm0, %v3936_v50, %v3937_v33 }
 0x7bb   : > { %v9063_v44 = vadd.f32 %v3970_v4, %v10103_v10  ;;  %v4159_v5 = vpop.f32.mrf.mxu3  ;;  %v10107_v4 = vld [vmem:[#allocation68_spill] sm:$0xff] }
 0x7bc   : > { %v9066_v63 = vadd.f32 %v4320_v23, %v4159_v5  ;;  %v3629_v16 = vpop.f32.mrf.mxu1  ;;  %v4323_v2 = vpop.f32.mrf.mxu0 }
 0x7bd   : > { %10104 = vst [vmem:[#allocation72_spill] sm:$0xff] %v9063_v44  ;;  %v3804_v12 = vpop.f32.mrf.mxu2  ;;  %v5615_v44 = vld [vmem:[#allocation2] sm:$0xff] }
 0x7be   : > { %10106 = vst [vmem:[#allocation65_spill] sm:$0xff] %v9066_v63  ;;  %v3890_v61 = vadd.f32 %v3804_v12, %v3627_v57  ;;  %v10110_v12 = vld [vmem:[#allocation69_spill] sm:$0xff] }
 0x7bf   : > { %3676 = vmatmul.f32.gmra.mxu1 %v8996_v15  ;;  %4370 = vmatmul.f32.gmra.mxu0 %v8996_v15 }
 0x7c0   : > { %4209 = vmatmul.f32.gmra.mxu3 %v9036_v45  ;;  %v3938_v62 = vrot.slane %v3890_v61, 1  ;;  %v3630_v61 = vadd.f32 %v3629_v16, %v10110_v12  ;;  %v10115_v12 = vld [vmem:[#allocation73_spill] sm:$0xff] }
 0x7c1   : > { %3854 = vmatmul.f32.gmra.mxu2 %v8996_v15 }
 0x7c2   : > { %v3969_v50 = vsel %vm1504_vm0, %v3937_v33, %v3938_v62  ;;  %v10111_v62 = vld [vmem:[#allocation83_spill] sm:$0xff] }
 0x7c3   : > { %v9075_v21 = vadd.f32 %v3969_v50, %v10107_v4  ;;  %v4162_v23 = vpop.f32.mrf.mxu3 }
 0x7c4   : > { %v9077_v10 = vadd.f32 %v4323_v2, %v4162_v23  ;;  %v3632_v5 = vpop.f32.mrf.mxu1  ;;  %v4326_v1 = vpop.f32.mrf.mxu0 }
 0x7c5   : > { %10108 = vst [vmem:[#allocation62_spill] sm:$0xff] %v9075_v21  ;;  %v3807_v57 = vpop.f32.mrf.mxu2  ;;  %v3633_v50 = vadd.f32 %v3632_v5, %v10111_v62 }
 0x7c6   : > { %10109 = vst [vmem:[#allocation68_spill] sm:$0xff] %v9077_v10  ;;  %v3891_v4 = vadd.f32 %v3807_v57, %v3630_v61 }
 0x7c7   : > { %3679 = vmatmul.f32.gmra.mxu1 %v9012_v28  ;;  %4373 = vmatmul.f32.gmra.mxu0 %v9012_v28 }
 0x7c8   : > { %4212 = vmatmul.f32.gmra.mxu3 %v9049_v52  ;;  %v3939_v32 = vrot.slane %v3891_v4, 1 }
 0x7c9   : > { %3857 = vmatmul.f32.gmra.mxu2 %v9012_v28 }
 0x7cb   : > { %v4165_v33 = vpop.f32.mrf.mxu3 }
 0x7cc   : > { %v9085_v21 = vadd.f32 %v4326_v1, %v4165_v33  ;;  %v3635_v2 = vpop.f32.mrf.mxu1  ;;  %v4329_v23 = vpop.f32.mrf.mxu0 }
 0x7cd   : > { %v3810_v10 = vpop.f32.mrf.mxu2  ;;  %v3636_v5 = vadd.f32 %v3635_v2, %v10115_v12  ;;  %v10120_v12 = vld [vmem:[#allocation80_spill] sm:$0xff] }
 0x7ce   : > { %10112 = vst [vmem:[#allocation69_spill] sm:$0xff] %v9085_v21  ;;  %v3892_v63 = vadd.f32 %v3810_v10, %v3633_v50  ;;  %v5616_v10 = vld [vmem:[#allocation2 + $0x8] sm:$0xff] }
 0x7cf   : > { %4410 = vmatmul.f32.vlgmr.msra.gmra.mxu1 %v5615_v44  ;;  %v10117_v50 = vld [vmem:[#allocation70_spill] sm:$0xff] }
 0x7d0   : > { %v3940_v45 = vrot.slane %v3892_v63, 1 }
 0x7d2   : > { %v3968_v52 = vsel %vm1504_vm0, %v3939_v32, %v3940_v45 }
 0x7d3   : > { %v9090_v28 = vadd.f32 %v3968_v52, %v10113_v60  ;;  %v4168_v16 = vpop.f32.mrf.mxu3 }
 0x7d4   : > { %v9093_v57 = vadd.f32 %v4329_v23, %v4168_v16  ;;  %v3638_v1 = vpop.f32.mrf.mxu1  ;;  %v4332_v61 = vpop.f32.mrf.mxu0  ;;  %v5617_v16 = vld [vmem:[#allocation2 + $0x10] sm:$0xff] }
 0x7d5   : > { %10114 = vst [vmem:[#allocation83_spill] sm:$0xff] %v9090_v28  ;;  %v3813_v33 = vpop.f32.mrf.mxu2 }
 0x7d6   : > { %10116 = vst [vmem:[#allocation84_spill] sm:$0xff] %v9093_v57  ;;  %v3893_v62 = vadd.f32 %v3813_v33, %v3636_v5  ;;  %v3639_v57 = vadd.f32 %v3638_v1, %v10120_v12  ;;  %v10121_v33 = vld [vmem:[#allocation81_spill] sm:$0xff]  ;;  %v10125_v12 = vld [vmem:[#allocation67_spill] sm:$0xff] }
 0x7d7   : > { %4413 = vmatmul.f32.gmra.mxu1 %v5616_v10 }
 0x7d8   : > { %v3941_v44 = vrot.slane %v3893_v62, 1 }
 0x7da   : > { %v3967_v63 = vsel %vm1504_vm0, %v3940_v45, %v3941_v44 }
 0x7db   : > { %v9098_v32 = vadd.f32 %v3967_v63, %v10117_v50  ;;  %v4171_v60 = vpop.f32.mrf.mxu3 }
 0x7dc   : > { %v9100_v52 = vadd.f32 %v4332_v61, %v4171_v60  ;;  %v3641_v4 = vpop.f32.mrf.mxu1  ;;  %v4335_v2 = vpop.f32.mrf.mxu0 }
 0x7dd   : > { %10118 = vst [vmem:[#allocation73_spill] sm:$0xff] %v9098_v32  ;;  %v3816_v23 = vpop.f32.mrf.mxu2  ;;  %v3642_v10 = vadd.f32 %v3641_v4, %v10121_v33  ;;  %v5618_v32 = vld [vmem:[#allocation2 + $0x48] sm:$0xff] }
 0x7de   : > { %10119 = vst [vmem:[#allocation70_spill] sm:$0xff] %v9100_v52  ;;  %v3894_v62 = vadd.f32 %v3816_v23, %v3639_v57 }
 0x7df   : > { %4416 = vmatmul.f32.gmra.mxu1 %v5617_v16  ;;  %v10123_v16 = vld [vmem:[#allocation40_spill] sm:$0xff] }
 0x7e0   : > { %v3942_v61 = vrot.slane %v3894_v62, 1 }
 0x7e3   : > { %v4174_v5 = vpop.f32.mrf.mxu3 }
 0x7e4   : > { %v9104_v28 = vadd.f32 %v4335_v2, %v4174_v5  ;;  %v3644_v45 = vpop.f32.mrf.mxu1  ;;  %v4338_v44 = vpop.f32.mrf.mxu0 }
 0x7e5   : > { %v3819_v63 = vpop.f32.mrf.mxu2  ;;  %v3645_v4 = vadd.f32 %v3644_v45, %v10125_v12  ;;  %v10130_v12 = vld [vmem:[#allocation78_spill] sm:$0xff] }
 0x7e6   : > { %10122 = vst [vmem:[#allocation80_spill] sm:$0xff] %v9104_v28  ;;  %v3895_v50 = vadd.f32 %v3819_v63, %v3642_v10  ;;  %v5619_v10 = vld [vmem:[#allocation2 + $0x50] sm:$0xff]  ;;  %v10127_v63 = vld [vmem:[#allocation77_spill] sm:$0xff] }
 0x7e7   : > { %4419 = vmatmul.f32.gmra.mxu1 %v5618_v32 }
 0x7e8   : > { %v3943_v60 = vrot.slane %v3895_v50, 1 }
 0x7ea   : > { %v3966_v52 = vsel %vm1504_vm0, %v3942_v61, %v3943_v60 }
 0x7eb   : > { %v9109_v21 = vadd.f32 %v3966_v52, %v10123_v16  ;;  %v4177_v1 = vpop.f32.mrf.mxu3 }
 0x7ec   : > { %v9112_v57 = vadd.f32 %v4338_v44, %v4177_v1  ;;  %v3647_v2 = vpop.f32.mrf.mxu1  ;;  %v4341_v33 = vpop.f32.mrf.mxu0  ;;  %v5620_v44 = vld [vmem:[#allocation2 + $0x58] sm:$0xff] }
 0x7ed   : > { %10124 = vst [vmem:[#allocation81_spill] sm:$0xff] %v9109_v21  ;;  %v3822_v23 = vpop.f32.mrf.mxu2 }
 0x7ee   : > { %10126 = vst [vmem:[#allocation40_spill] sm:$0xff] %v9112_v57  ;;  %v3896_v5 = vadd.f32 %v3822_v23, %v3645_v4  ;;  %v3648_v4 = vadd.f32 %v3647_v2, %v10130_v12  ;;  %v10131_v57 = vld [vmem:[#allocation82_spill] sm:$0xff] }
 0x7ef   : > { %4422 = vmatmul.f32.gmra.mxu1 %v5619_v10  ;;  %v10133_v12 = vld [vmem:[#allocation86_spill] sm:$0xff] }
 0x7f0   : > { %v3944_v32 = vrot.slane %v3896_v5, 1 }
 0x7f2   : > { %v3965_v62 = vsel %vm1504_vm0, %v3943_v60, %v3944_v32 }
 0x7f3   : > { %v9117_v50 = vadd.f32 %v3965_v62, %v10127_v63  ;;  %v4180_v52 = vpop.f32.mrf.mxu3  ;;  %v5621_v63 = vld [vmem:[#allocation2 + $0x60] sm:$0xff] }
 0x7f4   : > { %v9119_v61 = vadd.f32 %v4341_v33, %v4180_v52  ;;  %v3650_v16 = vpop.f32.mrf.mxu1  ;;  %v4344_v1 = vpop.f32.mrf.mxu0 }
 0x7f5   : > { %10128 = vst [vmem:[#allocation67_spill] sm:$0xff] %v9117_v50  ;;  %v3825_v45 = vpop.f32.mrf.mxu2  ;;  %v3651_v10 = vadd.f32 %v3650_v16, %v10131_v57  ;;  %v10132_v50 = vld [vmem:[#allocation79_spill] sm:$0xff] }
 0x7f6   : > { %10129 = vst [vmem:[#allocation77_spill] sm:$0xff] %v9119_v61  ;;  %v3897_v5 = vadd.f32 %v3825_v45, %v3648_v4 }
 0x7f7   : > { %4425 = vmatmul.f32.gmra.mxu1 %v5620_v44 }
 0x7f8   : > { %v3945_v33 = vrot.slane %v3897_v5, 1 }
 0x7fb   : > { %v4183_v23 = vpop.f32.mrf.mxu3 }
 0x7fc   : > { %v9123_v21 = vadd.f32 %v4344_v1, %v4183_v23  ;;  %v3653_v60 = vpop.f32.mrf.mxu1  ;;  %v4347_v44 = vpop.f32.mrf.mxu0  ;;  %v5622_v23 = vld [vmem:[#allocation2 + $0x68] sm:$0xff] }
 0x7fd   : > { %v3828_v32 = vpop.f32.mrf.mxu2  ;;  %v3654_v57 = vadd.f32 %v3653_v60, %v10133_v12  ;;  %v5626_v12 = vld [vmem:[#allocation2 + $0x88] sm:$0xff] }
 0x7fe   : > { %v3898_v62 = vadd.f32 %v3828_v32, %v3651_v10  ;;  %v10135_v32 = vld [vmem:[#allocation87_spill] sm:$0xff] }
 0x7ff   : > { %4428 = vmatmul.f32.gmra.mxu1 %v5621_v63  ;;  %v5624_v63 = vld [vmem:[#allocation2 + $0x78] sm:$0xff] }
 0x800   : > { %v3946_v52 = vrot.slane %v3898_v62, 1 }
 0x802   : > { %v3964_v61 = vsel %vm1504_vm0, %v3945_v33, %v3946_v52 }
 0x803   : > { %v9128_v28 = vadd.f32 %v3964_v61, %v10132_v50  ;;  %v4186_v2 = vpop.f32.mrf.mxu3  ;;  %v5623_v61 = vld [vmem:[#allocation2 + $0x70] sm:$0xff] }
 0x804   : > { %v9131_v16 = vadd.f32 %v4347_v44, %v4186_v2  ;;  %v9133_v45 = vpop.f32.mrf.mxu1  ;;  %v5625_v44 = vld [vmem:[#allocation2 + $0x80] sm:$0xff] }
 0x805   : > { %v3831_v1 = vpop.f32.mrf.mxu2 }
 0x806   : > { %10134 = vst [vmem:[#allocation78_spill] sm:$0xff] %v9131_v16  ;;  %v3899_v4 = vadd.f32 %v3831_v1, %v3654_v57  ;;  %v5627_v57 = vld [vmem:[#allocation2 + $0x90] sm:$0xff] }
 0x807   : > { %4431 = vmatmul.f32.gmra.mxu1 %v5622_v23 }
 0x808   : > { %v3947_v10 = vrot.slane %v3899_v4, 1  ;;  %v5628_v4 = vld [vmem:[#allocation2 + $0x98] sm:$0xff] }
 0x80a   : > { %v3963_v5 = vsel %vm1504_vm0, %v3946_v52, %v3947_v10  ;;  %v5629_v10 = vld [vmem:[#allocation2 + $0xa0] sm:$0xff] }
 0x80b   : > { %v9138_v62 = vadd.f32 %v3963_v5, %v10135_v32  ;;  %v5630_v32 = vld [vmem:[#allocation2 + $0xa8] sm:$0xff] }
 0x80c   : > { %v9140_v50 = vpop.f32.mrf.mxu1 }
 0x80d   : > { %10136 = vst [vmem:[#allocation82_spill] sm:$0xff] %v9138_v62 }
 0x80f   : > { %4434 = vmatmul.f32.gmra.mxu1 %v5623_v61 }
 0x814   : > { %v9142_v60 = vpop.f32.mrf.mxu1 }
 0x817   : > { %4437 = vmatmul.f32.gmra.mxu1 %v5624_v63  ;;  %v5631_v63 = vld [vmem:[#allocation2 + $0xb0] sm:$0xff] }
 0x81c   : > { %v9144_v33 = vpop.f32.mrf.mxu1 }
 0x81f   : > { %4440 = vmatmul.f32.gmra.mxu1 %v5625_v44  ;;  %v10141_v44 = vld [vmem:[#allocation50_spill] sm:$0xff] }
 0x824   : > { %v9146_v2 = vpop.f32.mrf.mxu1 }
 0x827   : > { %4443 = vmatmul.f32.gmra.mxu1 %v5626_v12 }
 0x82c   : > { %v9148_v52 = vpop.f32.mrf.mxu1 }
 0x82d   : > { %10137 = vst [vmem:[#allocation79_spill] sm:$0xff] %v9148_v52  ;;  %v5632_v52 = vld [vmem:[#allocation2 + $0xb8] sm:$0xff] }
 0x82f   : > { %4446 = vmatmul.f32.gmra.mxu1 %v5627_v57 }
 0x834   : > { %v9150_v1 = vpop.f32.mrf.mxu1 }
 0x835   : > { %10138 = vst [vmem:[#allocation86_spill] sm:$0xff] %v9150_v1 }
 0x837   : > { %4449 = vmatmul.f32.gmra.mxu1 %v5628_v4 }
 0x83c   : > { %v9152_v23 = vpop.f32.mrf.mxu1 }
 0x83d   : > { %10139 = vst [vmem:[#allocation87_spill] sm:$0xff] %v9152_v23 }
 0x83f   : > { %4452 = vmatmul.f32.gmra.mxu1 %v5629_v10 }
 0x844   : > { %v9154_v5 = vpop.f32.mrf.mxu1 }
 0x845   : > { %10140 = vst [vmem:[#allocation100_spill] sm:$0xff] %v9154_v5 }
 0x847   : > { %4455 = vmatmul.f32.gmra.mxu1 %v5630_v32 }
 0x84c   : > { %v4411_v61 = vpop.f32.mrf.mxu1 }
 0x84d   : > { %v4555_v12 = vadd.f32 %v4411_v61, %v10141_v44 }
 0x84f   : > { %4458 = vmatmul.f32.gmra.mxu1 %v5631_v63  ;;  %v4603_v16 = vrot.slane %v4555_v12, 2  ;;  %v5633_v63 = vld [vmem:[#allocation2 + $0xc0] sm:$0xff] }
 0x854   : > { %v4414_v62 = vpop.f32.mrf.mxu1 }
 0x855   : > { %v4556_v57 = vadd.f32 %v4414_v62, %v8697_v34 }
 0x857   : > { %v4604_v1 = vrot.slane %v4556_v57, 2  ;;  %4461 = vmatmul.f32.gmra.mxu1 %v5632_v52 }
 0x859   : > { %v4682_v4 = vsel %vm2199_vm1, %v4603_v16, %v4604_v1 }
 0x85a   : > { %v9161_v10 = vadd.f32 %v4682_v4, %v8708_v13 }
 0x85c   : > { %10142 = vst [vmem:[#allocation50_spill] sm:$0xff] %v9161_v10  ;;  %v4417_v5 = vpop.f32.mrf.mxu1 }
 0x85d   : > { %v4557_v32 = vadd.f32 %v4417_v5, %v8711_v53 }
 0x85f   : > { %v4605_v23 = vrot.slane %v4557_v32, 2  ;;  %4464 = vmatmul.f32.gmra.mxu1 %v5633_v63 }
 0x861   : > { %v4681_v61 = vsel %vm2199_vm1, %v4604_v1, %v4605_v23 }
 0x862   : > { %v9167_v34 = vadd.f32 %v4681_v61, %v8722_v6 }
 0x864   : > { %10143 = vst [vmem:[#allocation101_spill] sm:$0xff] %v9167_v34  ;;  %v4420_v62 = vpop.f32.mrf.mxu1 }
 0x865   : > { %v4558_v16 = vadd.f32 %v4420_v62, %v8724_v0 }
 0x867   : > { %4467 = vmatmul.f32.gmra.mxu1 %v8716_v24  ;;  %v4606_v44 = vrot.slane %v4558_v16, 2 }
 0x86c   : > { %v4423_v52 = vpop.f32.mrf.mxu1 }
 0x86d   : > { %v4559_v13 = vadd.f32 %v4423_v52, %v8737_v51 }
 0x86f   : > { %v4607_v12 = vrot.slane %v4559_v13, 2  ;;  %4470 = vmatmul.f32.gmra.mxu1 %v8732_v42 }
 0x871   : > { %v4680_v53 = vsel %vm2199_vm1, %v4606_v44, %v4607_v12 }
 0x872   : > { %v9176_v1 = vadd.f32 %v4680_v53, %v8748_v38  ;;  %v10151_v53 = vld [vmem:[#allocation52_spill] sm:$0xff] }
 0x874   : > { %10144 = vst [vmem:[#allocation102_spill] sm:$0xff] %v9176_v1  ;;  %v4426_v6 = vpop.f32.mrf.mxu1 }
 0x875   : > { %v4560_v23 = vadd.f32 %v4426_v6, %v8751_v55 }
 0x877   : > { %v4608_v5 = vrot.slane %v4560_v23, 2  ;;  %4473 = vmatmul.f32.gmra.mxu1 %v8742_v46 }
 0x879   : > { %v4679_v24 = vsel %vm2199_vm1, %v4607_v12, %v4608_v5 }
 0x87a   : > { %v9183_v0 = vadd.f32 %v4679_v24, %v8762_v19 }
 0x87c   : > { %10145 = vst [vmem:[#allocation103_spill] sm:$0xff] %v9183_v0  ;;  %v4429_v51 = vpop.f32.mrf.mxu1 }
 0x87d   : > { %v4561_v42 = vadd.f32 %v4429_v51, %v8764_v58  ;;  %v10147_v58 = vld [vmem:[#allocation30_spill] sm:$0xff] }
 0x87f   : > { %4476 = vmatmul.f32.gmra.mxu1 %v8756_v48  ;;  %v4609_v4 = vrot.slane %v4561_v42, 2 }
 0x884   : > { %v4432_v57 = vpop.f32.mrf.mxu1 }
 0x885   : > { %v4562_v38 = vadd.f32 %v4432_v57, %v8777_v31 }
 0x887   : > { %v4610_v32 = vrot.slane %v4562_v38, 2  ;;  %4479 = vmatmul.f32.gmra.mxu1 %v8772_v7  ;;  %v10149_v7 = vld [vmem:[#allocation51_spill] sm:$0xff] }
 0x889   : > { %v4678_v46 = vsel %vm2199_vm1, %v4609_v4, %v4610_v32 }
 0x88a   : > { %v9192_v55 = vadd.f32 %v4678_v46, %v8788_v35  ;;  %v10156_v46 = vld [vmem:[#allocation55_spill] sm:$0xff] }
 0x88c   : > { %10146 = vst [vmem:[#allocation104_spill] sm:$0xff] %v9192_v55  ;;  %v4435_v19 = vpop.f32.mrf.mxu1 }
 0x88d   : > { %v4563_v63 = vadd.f32 %v4435_v19, %v8791_v3 }
 0x88f   : > { %v4611_v61 = vrot.slane %v4563_v63, 2  ;;  %4482 = vmatmul.f32.gmra.mxu1 %v8782_v39 }
 0x891   : > { %v4677_v48 = vsel %vm2199_vm1, %v4610_v32, %v4611_v61 }
 0x892   : > { %v9199_v31 = vadd.f32 %v4677_v48, %v10147_v58 }
 0x894   : > { %10148 = vst [vmem:[#allocation30_spill] sm:$0xff] %v9199_v31  ;;  %v4438_v62 = vpop.f32.mrf.mxu1 }
 0x895   : > { %v4564_v16 = vadd.f32 %v4438_v62, %v10149_v7 }
 0x897   : > { %4485 = vmatmul.f32.gmra.mxu1 %v8796_v18  ;;  %v4612_v13 = vrot.slane %v4564_v16, 2 }
 0x89c   : > { %v4441_v52 = vpop.f32.mrf.mxu1 }
 0x89d   : > { %v4565_v35 = vadd.f32 %v4441_v52, %v8817_v8  ;;  %v10152_v8 = vld [vmem:[#allocation53_spill] sm:$0xff] }
 0x89f   : > { %v4613_v44 = vrot.slane %v4565_v35, 2  ;;  %4488 = vmatmul.f32.gmra.mxu1 %v8812_v43  ;;  %v10154_v43 = vld [vmem:[#allocation54_spill] sm:$0xff] }
 0x8a1   : > { %v4676_v39 = vsel %vm2199_vm1, %v4612_v13, %v4613_v44  ;;  %v10161_v13 = vld [vmem:[#allocation58_spill] sm:$0xff] }
 0x8a2   : > { %v9208_v3 = vadd.f32 %v4676_v39, %v8828_v54 }
 0x8a4   : > { %10150 = vst [vmem:[#allocation51_spill] sm:$0xff] %v9208_v3  ;;  %v4444_v12 = vpop.f32.mrf.mxu1 }
 0x8a5   : > { %v4566_v6 = vadd.f32 %v4444_v12, %v10151_v53 }
 0x8a7   : > { %v4614_v23 = vrot.slane %v4566_v6, 2  ;;  %4491 = vmatmul.f32.gmra.mxu1 %v8822_v40 }
 0x8a9   : > { %v4675_v18 = vsel %vm2199_vm1, %v4613_v44, %v4614_v23 }
 0x8aa   : > { %v9215_v5 = vadd.f32 %v4675_v18, %v10152_v8 }
 0x8ac   : > { %10153 = vst [vmem:[#allocation52_spill] sm:$0xff] %v9215_v5  ;;  %v4447_v24 = vpop.f32.mrf.mxu1 }
 0x8ad   : > { %v4567_v51 = vadd.f32 %v4447_v24, %v10154_v43 }
 0x8af   : > { %4494 = vmatmul.f32.gmra.mxu1 %v8836_v11  ;;  %v4615_v57 = vrot.slane %v4567_v51, 2  ;;  %v10166_v51 = vld [vmem:[#allocation61_spill] sm:$0xff] }
 0x8b4   : > { %v4450_v42 = vpop.f32.mrf.mxu1 }
 0x8b5   : > { %v4568_v54 = vadd.f32 %v4450_v42, %v8857_v9  ;;  %v10157_v9 = vld [vmem:[#allocation56_spill] sm:$0xff] }
 0x8b7   : > { %v4616_v38 = vrot.slane %v4568_v54, 2  ;;  %4497 = vmatmul.f32.gmra.mxu1 %v8852_v20  ;;  %v10159_v20 = vld [vmem:[#allocation57_spill] sm:$0xff] }
 0x8b9   : > { %v4674_v40 = vsel %vm2199_vm1, %v4615_v57, %v4616_v38 }
 0x8ba   : > { %v9224_v4 = vadd.f32 %v4674_v40, %v8868_v47 }
 0x8bc   : > { %10155 = vst [vmem:[#allocation53_spill] sm:$0xff] %v9224_v4  ;;  %v4453_v32 = vpop.f32.mrf.mxu1 }
 0x8bd   : > { %v4569_v19 = vadd.f32 %v4453_v32, %v10156_v46 }
 0x8bf   : > { %v4617_v63 = vrot.slane %v4569_v19, 2  ;;  %4500 = vmatmul.f32.gmra.mxu1 %v8862_v25 }
 0x8c1   : > { %v4673_v11 = vsel %vm2199_vm1, %v4616_v38, %v4617_v63 }
 0x8c2   : > { %v9231_v61 = vadd.f32 %v4673_v11, %v10157_v9  ;;  %v10171_v11 = vld [vmem:[#allocation89_spill] sm:$0xff]  ;;  %v10172_v9 = vld [vmem:[#allocation91_spill] sm:$0xff] }
 0x8c4   : > { %10158 = vst [vmem:[#allocation54_spill] sm:$0xff] %v9231_v61  ;;  %v4456_v48 = vpop.f32.mrf.mxu1 }
 0x8c5   : > { %v4570_v58 = vadd.f32 %v4456_v48, %v10159_v20 }
 0x8c7   : > { %4503 = vmatmul.f32.gmra.mxu1 %v8876_v14  ;;  %v4618_v7 = vrot.slane %v4570_v58, 2  ;;  %v10174_v58 = vld [vmem:[#allocation92_spill] sm:$0xff] }
 0x8cc   : > { %v4459_v62 = vpop.f32.mrf.mxu1 }
 0x8cd   : > { %v4571_v47 = vadd.f32 %v4459_v62, %v8897_v36  ;;  %v10162_v36 = vld [vmem:[#allocation59_spill] sm:$0xff] }
 0x8cf   : > { %v4619_v16 = vrot.slane %v4571_v47, 2  ;;  %4506 = vmatmul.f32.gmra.mxu1 %v8892_v29  ;;  %v10164_v29 = vld [vmem:[#allocation60_spill] sm:$0xff] }
 0x8d1   : > { %v4672_v25 = vsel %vm2199_vm1, %v4618_v7, %v4619_v16  ;;  %v10175_v7 = vld [vmem:[#allocation93_spill] sm:$0xff] }
 0x8d2   : > { %v9240_v52 = vadd.f32 %v4672_v25, %v8908_v41 }
 0x8d4   : > { %10160 = vst [vmem:[#allocation55_spill] sm:$0xff] %v9240_v52  ;;  %v4462_v35 = vpop.f32.mrf.mxu1 }
 0x8d5   : > { %v4572_v44 = vadd.f32 %v4462_v35, %v10161_v13  ;;  %v10177_v35 = vld [vmem:[#allocation94_spill] sm:$0xff] }
 0x8d7   : > { %v4620_v39 = vrot.slane %v4572_v44, 2  ;;  %4509 = vmatmul.f32.gmra.mxu1 %v8902_v37 }
 0x8d9   : > { %v4671_v14 = vsel %vm2199_vm1, %v4619_v16, %v4620_v39  ;;  %v10178_v39 = vld [vmem:[#allocation64_spill] sm:$0xff] }
 0x8da   : > { %v9247_v12 = vadd.f32 %v4671_v14, %v10162_v36 }
 0x8dc   : > { %10163 = vst [vmem:[#allocation56_spill] sm:$0xff] %v9247_v12  ;;  %v4465_v53 = vpop.f32.mrf.mxu1 }
 0x8dd   : > { %v4573_v6 = vadd.f32 %v4465_v53, %v10164_v29  ;;  %v10179_v29 = vld [vmem:[#allocation95_spill] sm:$0xff] }
 0x8df   : > { %4512 = vmatmul.f32.gmra.mxu1 %v8916_v22  ;;  %v4621_v18 = vrot.slane %v4573_v6, 2 }
 0x8e4   : > { %v4468_v23 = vpop.f32.mrf.mxu1 }
 0x8e5   : > { %v4574_v41 = vadd.f32 %v4468_v23, %v8937_v17  ;;  %v10167_v17 = vld [vmem:[#allocation63_spill] sm:$0xff]  ;;  %v10180_v23 = vld [vmem:[#allocation66_spill] sm:$0xff] }
 0x8e7   : > { %v4622_v8 = vrot.slane %v4574_v41, 2  ;;  %4515 = vmatmul.f32.gmra.mxu1 %v8932_v26  ;;  %v10169_v26 = vld [vmem:[#allocation88_spill] sm:$0xff] }
 0x8e9   : > { %v4670_v37 = vsel %vm2199_vm1, %v4621_v18, %v4622_v8 }
 0x8ea   : > { %v9256_v24 = vadd.f32 %v4670_v37, %v8948_v27  ;;  %v10170_v27 = vld [vmem:[#allocation90_spill] sm:$0xff] }
 0x8ec   : > { %10165 = vst [vmem:[#allocation57_spill] sm:$0xff] %v9256_v24  ;;  %v4471_v43 = vpop.f32.mrf.mxu1 }
 0x8ed   : > { %v4575_v42 = vadd.f32 %v4471_v43, %v10166_v51  ;;  %v10182_v51 = vld [vmem:[#allocation96_spill] sm:$0xff] }
 0x8ef   : > { %v4623_v54 = vrot.slane %v4575_v42, 2  ;;  %4518 = vmatmul.f32.gmra.mxu1 %v8942_v56 }
 0x8f1   : > { %v4669_v22 = vsel %vm2199_vm1, %v4622_v8, %v4623_v54  ;;  %v10181_v8 = vld [vmem:[#allocation74_spill] sm:$0xff]  ;;  %v10183_v54 = vld [vmem:[#allocation75_spill] sm:$0xff] }
 0x8f2   : > { %v9263_v57 = vadd.f32 %v4669_v22, %v10167_v17 }
 0x8f4   : > { %10168 = vst [vmem:[#allocation58_spill] sm:$0xff] %v9263_v57  ;;  %v4474_v38 = vpop.f32.mrf.mxu1 }
 0x8f5   : > { %v4576_v40 = vadd.f32 %v4474_v38, %v10169_v26  ;;  %v10184_v38 = vld [vmem:[#allocation98_spill] sm:$0xff] }
 0x8f7   : > { %4521 = vmatmul.f32.gmra.mxu1 %v8956_v30  ;;  %v4624_v19 = vrot.slane %v4576_v40, 2  ;;  %v10185_v40 = vld [vmem:[#allocation97_spill] sm:$0xff] }
 0x8fc   : > { %v4477_v32 = vpop.f32.mrf.mxu1 }
 0x8fd   : > { %v4577_v46 = vadd.f32 %v4477_v32, %v10170_v27  ;;  %v10186_v27 = vld [vmem:[#allocation71_spill] sm:$0xff] }
 0x8ff   : > { %v4625_v63 = vrot.slane %v4577_v46, 2  ;;  %4524 = vmatmul.f32.gmra.mxu1 %v10171_v11  ;;  %v10187_v11 = vld [vmem:[#allocation99_spill] sm:$0xff] }
 0x901   : > { %v4668_v56 = vsel %vm2199_vm1, %v4624_v19, %v4625_v63 }
 0x902   : > { %v9272_v48 = vadd.f32 %v4668_v56, %v10172_v9  ;;  %v10188_v9 = vld [vmem:[#allocation72_spill] sm:$0xff] }
 0x904   : > { %10173 = vst [vmem:[#allocation59_spill] sm:$0xff] %v9272_v48  ;;  %v4480_v20 = vpop.f32.mrf.mxu1 }
 0x905   : > { %v4578_v62 = vadd.f32 %v4480_v20, %v10174_v58 }
 0x907   : > { %v4626_v47 = vrot.slane %v4578_v62, 2  ;;  %4527 = vmatmul.f32.gmra.mxu1 %v8982_v59  ;;  %v10189_v62 = vld [vmem:[#allocation65_spill] sm:$0xff] }
 0x909   : > { %v4667_v30 = vsel %vm2199_vm1, %v4625_v63, %v4626_v47 }
 0x90a   : > { %v9279_v16 = vadd.f32 %v4667_v30, %v10175_v7 }
 0x90c   : > { %10176 = vst [vmem:[#allocation60_spill] sm:$0xff] %v9279_v16  ;;  %v4483_v25 = vpop.f32.mrf.mxu1 }
 0x90d   : > { %v4579_v13 = vadd.f32 %v4483_v25, %v10177_v35  ;;  %v10190_v25 = vld [vmem:[#allocation62_spill] sm:$0xff] }
 0x90f   : > { %4530 = vmatmul.f32.gmra.mxu1 %v8996_v15  ;;  %v4627_v36 = vrot.slane %v4579_v13, 2 }
 0x914   : > { %v4486_v44 = vpop.f32.mrf.mxu1 }
 0x915   : > { %v4580_v14 = vadd.f32 %v4486_v44, %v10178_v39  ;;  %v10191_v44 = vld [vmem:[#allocation68_spill] sm:$0xff] }
 0x917   : > { %v4628_v53 = vrot.slane %v4580_v14, 2  ;;  %4533 = vmatmul.f32.gmra.mxu1 %v10179_v29  ;;  %v3834_v14 = vpop.f32.mrf.mxu2 }
 0x919   : > { %v4666_v6 = vsel %vm2199_vm1, %v4627_v36, %v4628_v53 }
 0x91a   : > { %v9288_v41 = vadd.f32 %v4666_v6, %v10180_v23  ;;  %v9316_v23 = vpop.f32.mrf.mxu3 }
 0x91c   : > { %v4489_v18 = vpop.f32.mrf.mxu1 }
 0x91d   : > { %v4581_v37 = vadd.f32 %v4489_v18, %v10181_v8 }
 0x91f   : > { %v4629_v43 = vrot.slane %v4581_v37, 2  ;;  %4536 = vmatmul.f32.gmra.mxu1 %v10182_v51 }
 0x921   : > { %v4665_v42 = vsel %vm2199_vm1, %v4628_v53, %v4629_v43  ;;  %v10192_v53 = vld [vmem:[#allocation69_spill] sm:$0xff]  ;;  %v10193_v43 = vld [vmem:[#allocation83_spill] sm:$0xff] }
 0x922   : > { %v9295_v22 = vadd.f32 %v4665_v42, %v10183_v54  ;;  %v3837_v42 = vpop.f32.mrf.mxu2  ;;  %v10195_v54 = vld [vmem:[#allocation84_spill] sm:$0xff] }
 0x924   : > { %v4492_v17 = vpop.f32.mrf.mxu1 }
 0x925   : > { %v4582_v26 = vadd.f32 %v4492_v17, %v10184_v38 }
 0x927   : > { %4539 = vmatmul.f32.gmra.mxu1 %v10185_v40  ;;  %v4630_v19 = vrot.slane %v4582_v26, 2  ;;  %v4192_v26 = vpop.f32.mrf.mxu3 }
 0x92c   : > { %v4495_v32 = vpop.f32.mrf.mxu1 }
 0x92d   : > { %v4583_v46 = vadd.f32 %v4495_v32, %v10186_v27  ;;  %v10196_v32 = vld [vmem:[#allocation73_spill] sm:$0xff] }
 0x92f   : > { %v4631_v63 = vrot.slane %v4583_v46, 2  ;;  %4542 = vmatmul.f32.gmra.mxu1 %v10187_v11 }
 0x931   : > { %v4664_v56 = vsel %vm2199_vm1, %v4630_v19, %v4631_v63  ;;  %v3840_v19 = vpop.f32.mrf.mxu2 }
 0x932   : > { %v9304_v20 = vadd.f32 %v4664_v56, %v10188_v9  ;;  %v9333_v56 = vpop.f32.mrf.mxu3 }
 0x934   : > { %v4498_v58 = vpop.f32.mrf.mxu1 }
 0x935   : > { %v4584_v47 = vadd.f32 %v4498_v58, %v10189_v62  ;;  %v10198_v62 = vld [vmem:[#allocation80_spill] sm:$0xff] }
 0x937   : > { %v4632_v30 = vrot.slane %v4584_v47, 2  ;;  %4545 = vmatmul.f32.gmra.mxu1 %v8982_v59  ;;  %v9319_v59 = vpop.f32.mrf.mxu0 }
 0x939   : > { %v4663_v7 = vsel %vm2199_vm1, %v4631_v63, %v4632_v30  ;;  %v10197_v63 = vld [vmem:[#allocation70_spill] sm:$0xff]  ;;  %v3843_v30 = vpop.f32.mrf.mxu2 }
 0x93a   : > { %v9311_v35 = vadd.f32 %v4663_v7, %v10190_v25 }
 0x93c   : > { %v4501_v13 = vpop.f32.mrf.mxu1 }
 0x93d   : > { %v4585_v39 = vadd.f32 %v4501_v13, %v10191_v44  ;;  %v10199_v44 = vld [vmem:[#allocation81_spill] sm:$0xff] }
 0x93f   : > { %4548 = vmatmul.f32.gmra.mxu1 %v8996_v15  ;;  %v4633_v18 = vrot.slane %v4585_v39, 2 }
 0x944   : > { %v4504_v36 = vpop.f32.mrf.mxu1 }
 0x945   : > { %v4586_v6 = vadd.f32 %v4504_v36, %v10192_v53  ;;  %v4198_v53 = vpop.f32.mrf.mxu3 }
 0x947   : > { %v4634_v8 = vrot.slane %v4586_v6, 2  ;;  %4551 = vmatmul.f32.gmra.mxu1 %v10179_v29  ;;  %v4353_v29 = vpop.f32.mrf.mxu0  ;;  %v10201_v6 = vld [vmem:[#allocation40_spill] sm:$0xff] }
 0x949   : > { %v4662_v37 = vsel %vm2199_vm1, %v4633_v18, %v4634_v8 }
 0x94a   : > { %v9324_v51 = vadd.f32 %v4662_v37, %v10193_v43  ;;  %v3846_v43 = vpop.f32.mrf.mxu2 }
 0x94c   : > { %10194 = vst [vmem:[#allocation61_spill] sm:$0xff] %v9324_v51  ;;  %v4507_v15 = vpop.f32.mrf.mxu1 }
 0x94d   : > { %v4587_v17 = vadd.f32 %v4507_v15, %v10195_v54  ;;  %v10202_v54 = vld [vmem:[#allocation67_spill] sm:$0xff] }
 0x94f   : > { %v4635_v38 = vrot.slane %v4587_v17, 2  ;;  %v9335_v58 = vpop.f32.mrf.mxu0 }
 0x951   : > { %v4661_v40 = vsel %vm2199_vm1, %v4634_v8, %v4635_v38 }
 0x952   : > { %v9330_v27 = vadd.f32 %v4661_v40, %v10196_v32  ;;  %v10204_v40 = vld [vmem:[#allocation77_spill] sm:$0xff] }
 0x954   : > { %v4510_v46 = vpop.f32.mrf.mxu1 }
 0x955   : > { %v4588_v11 = vadd.f32 %v4510_v46, %v10197_v63  ;;  %v4201_v46 = vpop.f32.mrf.mxu3 }
 0x957   : > { %v4636_v7 = vrot.slane %v4588_v11, 2  ;;  %v4359_v8 = vpop.f32.mrf.mxu0  ;;  %v3849_v11 = vpop.f32.mrf.mxu2 }
 0x95c   : > { %v4513_v9 = vpop.f32.mrf.mxu1 }
 0x95d   : > { %v4589_v47 = vadd.f32 %v4513_v9, %v10198_v62  ;;  %v10205_v62 = vld [vmem:[#allocation76_spill] sm:$0xff] }
 0x95f   : > { %v4637_v25 = vrot.slane %v4589_v47, 2  ;;  %v4362_v63 = vpop.f32.mrf.mxu0  ;;  %v3660_v47 = vadd.f32 %v9140_v50, %v10205_v62 }
 0x961   : > { %v4660_v13 = vsel %vm2199_vm1, %v4636_v7, %v4637_v25 }
 0x962   : > { %v9341_v39 = vadd.f32 %v4660_v13, %v10199_v44  ;;  %v10206_v13 = vld [vmem:[#allocation41_spill] sm:$0xff] }
 0x963   : > { %v3657_v44 = vadd.f32 %v9133_v45, %v10206_v13  ;;  %v10210_v45 = vld [vmem:[#allocation12_spill] sm:$0xff] }
 0x964   : > { %10200 = vst [vmem:[#allocation63_spill] sm:$0xff] %v9341_v39  ;;  %v4516_v36 = vpop.f32.mrf.mxu1  ;;  %v4204_v39 = vpop.f32.mrf.mxu3  ;;  %v3666_v62 = vadd.f32 %v9144_v33, %v10210_v45  ;;  %v4845_v33 = vmul.f32 %v9183_v0, %v9183_v0 }
 0x965   : > { %v4590_v18 = vadd.f32 %v4516_v36, %v10201_v6  ;;  %v10207_v36 = vld [vmem:[#allocation85_spill] sm:$0xff]  ;;  %v3901_v6 = vadd.f32 %v3837_v42, %v3660_v47  ;;  %v10212_v47 = vld [vmem:[#allocation79_spill] sm:$0xff] }
 0x967   : > { %v4638_v37 = vrot.slane %v4590_v18, 2 }
 0x969   : > { %v4659_v15 = vsel %vm2199_vm1, %v4637_v25, %v4638_v37  ;;  %v3663_v25 = vadd.f32 %v9142_v60, %v10207_v36  ;;  %v4365_v60 = vpop.f32.mrf.mxu0  ;;  %v10213_v36 = vld [vmem:[#allocation78_spill] sm:$0xff] }
 0x96a   : > { %v9347_v17 = vadd.f32 %v4659_v15, %v10202_v54  ;;  %v3900_v15 = vadd.f32 %v3834_v14, %v3657_v44  ;;  %v3852_v44 = vpop.f32.mrf.mxu2 }
 0x96b   : > { %v3902_v54 = vadd.f32 %v3840_v19, %v3663_v25 }
 0x96c   : > { %10203 = vst [vmem:[#allocation88_spill] sm:$0xff] %v9347_v17  ;;  %v4519_v38 = vpop.f32.mrf.mxu1 }
 0x96d   : > { %v4591_v32 = vadd.f32 %v4519_v38, %v10204_v40  ;;  %v10208_v38 = vld [vmem:[#allocation44_spill] sm:$0xff]  ;;  %v3950_v13 = vrot.slane %v3902_v54, 1 }
 0x96e   : > { %v3669_v40 = vadd.f32 %v9146_v2, %v10208_v38  ;;  %v3903_v2 = vadd.f32 %v3843_v30, %v3666_v62 }
 0x96f   : > { %v4639_v18 = vrot.slane %v4591_v32, 2  ;;  %v10211_v32 = vld [vmem:[#allocation45_spill] sm:$0xff] }
 0x970   : > { %v3904_v42 = vadd.f32 %v3846_v43, %v3669_v40  ;;  %v3672_v14 = vadd.f32 %v10212_v47, %v10211_v32  ;;  %v9375_v43 = vadd.f32 %v9319_v59, %v9316_v23  ;;  %v9377_v40 = vadd.f32 %v4353_v29, %v4192_v26  ;;  %v10216_v59 = vld [vmem:[#allocation82_spill] sm:$0xff] }
 0x971   : > { %v4715_v23 = vadd.f32 %v9167_v34, %v9161_v10  ;;  %v9401_v47 = vadd.f32 %v9335_v58, %v9333_v56  ;;  %v4729_v56 = vadd.f32 %v9199_v31, %v9192_v55  ;;  %v4849_v58 = vmul.f32 %v9215_v5, %v9215_v5 }
 0x974   : > { %v4522_v9 = vpop.f32.mrf.mxu1 }
 0x975   : > { %v4592_v7 = vadd.f32 %v4522_v9, %v9123_v21  ;;  %v3949_v9 = vrot.slane %v3901_v6, 1  ;;  %v3952_v6 = vrot.slane %v3904_v42, 1  ;;  %v4843_v42 = vmul.f32 %v9167_v34, %v9167_v34 }
 0x977   : > { %v4640_v37 = vrot.slane %v4592_v7, 2  ;;  %v3948_v7 = vrot.slane %v3900_v15, 1  ;;  %v3961_v30 = vsel %vm1504_vm0, %v3949_v9, %v3950_v13  ;;  %v3951_v15 = vrot.slane %v3903_v2, 1 }
 0x978   : > { %v4847_v13 = vmul.f32 %v9199_v31, %v9199_v31 }
 0x979   : > { %v4658_v50 = vsel %vm2199_vm1, %v4639_v18, %v4640_v37  ;;  %v3905_v18 = vadd.f32 %v3849_v11, %v3672_v14  ;;  %v4844_v11 = vmul.f32 %v9176_v1, %v9176_v1  ;;  %v3960_v29 = vsel %vm1504_vm0, %v3951_v15, %v3952_v6  ;;  %v10218_v14 = vld [vmem:[#allocation42_spill] sm:$0xff] }
 0x97a   : > { %v9362_v21 = vadd.f32 %v4658_v50, %v9128_v28  ;;  %v3962_v28 = vsel %vm1504_vm0, %v3948_v7, %v3949_v9  ;;  %v10214_v50 = vld [vmem:[#allocation43_spill] sm:$0xff]  ;;  %v4207_v9 = vpop.f32.mrf.mxu3  ;;  %v9406_v7 = vadd.f32 %v4359_v8, %v4198_v53 }
 0x97b   : > { %v9386_v45 = vadd.f32 %v3962_v28, %v10214_v50  ;;  %v3953_v62 = vrot.slane %v3905_v18, 1  ;;  %v4881_v32 = vadd.f32 %v4845_v33, %v4844_v11  ;;  %v4842_v18 = vmul.f32 %v9161_v10, %v9161_v10  ;;  %v10220_v28 = vld [vmem:[#allocation47_spill] sm:$0xff]  ;;  %v10222_v50 = vld [vmem:[#allocation86_spill] sm:$0xff] }
 0x97c   : > { %10209 = vst [vmem:[#allocation90_spill] sm:$0xff] %v9362_v21  ;;  %v4525_v19 = vpop.f32.mrf.mxu1  ;;  %v9421_v53 = vadd.f32 %v3960_v29, %v10220_v28  ;;  %v4716_v33 = vrot.slane %v4715_v23, 4  ;;  %v4848_v11 = vmul.f32 %v9208_v3, %v9208_v3  ;;  %v10224_v29 = vld [vmem:[#allocation87_spill] sm:$0xff] }
 0x97d   : > { %v4593_v25 = vadd.f32 %v4525_v19, %v10213_v36  ;;  %10215 = vst [vmem:[#allocation89_spill] sm:$0xff] %v9386_v45  ;;  %v9404_v19 = vadd.f32 %v3961_v30, %v10218_v14  ;;  %v9412_v36 = vadd.f32 %v4362_v63, %v4201_v46  ;;  %v3959_v8 = vsel %vm1504_vm0, %v3952_v6, %v3953_v62  ;;  %v3855_v63 = vpop.f32.mrf.mxu2  ;;  %v10223_v14 = vld [vmem:[#allocation20_spill] sm:$0xff]  ;;  %v10232_v45 = vld [vmem:[#allocation46_spill] sm:$0xff] }
 0x97e   : > { %v4846_v46 = vmul.f32 %v9192_v55, %v9192_v55  ;;  %v4882_v15 = vrot.slane %v4881_v32, 4  ;;  %v3678_v28 = vadd.f32 %v10224_v29, %v10223_v14  ;;  %v4736_v6 = vadd.f32 %v9215_v5, %v9208_v3 }
 0x97f   : > { %v4641_v38 = vrot.slane %v4593_v25, 2  ;;  %10219 = vst [vmem:[#allocation92_spill] sm:$0xff] %v9404_v19  ;;  %v4368_v25 = vpop.f32.mrf.mxu0  ;;  %v9435_v62 = vadd.f32 %v4365_v60, %v4204_v39  ;;  %v4730_v55 = vrot.slane %v4729_v56, 4 }
 0x980   : > { %v4888_v31 = vadd.f32 %v4847_v13, %v4846_v46  ;;  %v9442_v10 = vadd.f32 %v3855_v63, %v3678_v28  ;;  %v4883_v13 = vadd.f32 %v4882_v15, %v4881_v32  ;;  %v4850_v46 = vmul.f32 %v9224_v4, %v9224_v4 }
 0x981   : > { %v4657_v54 = vsel %vm2199_vm1, %v4640_v37, %v4641_v38  ;;  %v4722_v37 = vadd.f32 %v9183_v0, %v9176_v1  ;;  %v4874_v38 = vadd.f32 %v4843_v42, %v4842_v18  ;;  %v4895_v0 = vadd.f32 %v4849_v58, %v4848_v11  ;;  %v10225_v18 = vld [vmem:[#allocation48_spill] sm:$0xff] }
 0x982   : > { %v9391_v26 = vadd.f32 %v4657_v54, %v10216_v59  ;;  %v10221_v54 = vld [vmem:[#allocation15_spill] sm:$0xff]  ;;  %v4851_v42 = vmul.f32 %v9231_v61, %v9231_v61  ;;  %v9440_v1 = vadd.f32 %v3959_v8, %v10225_v18  ;;  %v9446_v39 = vadd.f32 %v4368_v25, %v4207_v9  ;;  %v4210_v8 = vpop.f32.mrf.mxu3 }
 0x983   : > { %v4723_v30 = vrot.slane %v4722_v37, 4  ;;  %v3675_v59 = vadd.f32 %v10222_v50, %v10221_v54  ;;  %v4717_v54 = vadd.f32 %v4716_v33, %v4715_v23  ;;  %v4875_v50 = vrot.slane %v4874_v38, 4 }
 0x984   : > { %10217 = vst [vmem:[#allocation91_spill] sm:$0xff] %v9391_v26  ;;  %v9410_v2 = vpop.f32.mrf.mxu1  ;;  %v4889_v60 = vrot.slane %v4888_v31, 4  ;;  %v4737_v58 = vrot.slane %v4736_v6, 4  ;;  %v4853_v11 = vmul.f32 %v9247_v12, %v9247_v12  ;;  %v4896_v63 = vrot.slane %v4895_v0, 4 }
 0x985   : > { %10226 = vst [vmem:[#allocation93_spill] sm:$0xff] %v9440_v1  ;;  %v3906_v34 = vadd.f32 %v3852_v44, %v3675_v59  ;;  %v4724_v14 = vadd.f32 %v4723_v30, %v4722_v37  ;;  %v4731_v44 = vadd.f32 %v4730_v55, %v4729_v56  ;;  %v4743_v23 = vadd.f32 %v9231_v61, %v9224_v4 }
 0x986   : > { %10227 = vst [vmem:[#allocation94_spill] sm:$0xff] %v9446_v39  ;;  %v4902_v37 = vadd.f32 %v4851_v42, %v4850_v46  ;;  %v4718_v30 = vrot.slane %v4717_v54, 2  ;;  %v4852_v9 = vmul.f32 %v9240_v52, %v9240_v52  ;;  %v4876_v15 = vadd.f32 %v4875_v50, %v4874_v38 }
 0x987   : > { %v3954_v32 = vrot.slane %v3906_v34, 1  ;;  %v4371_v25 = vpop.f32.mrf.mxu0  ;;  %v4725_v59 = vrot.slane %v4724_v14, 2  ;;  %v4884_v28 = vrot.slane %v4883_v13, 2  ;;  %v4750_v18 = vadd.f32 %v9247_v12, %v9240_v52  ;;  %v10230_v12 = vld [vmem:[#allocation25_spill] sm:$0xff]  ;;  %v10231_v52 = vld [vmem:[#allocation100_spill] sm:$0xff] }
 0x988   : > { %v9459_v55 = vadd.f32 %v4371_v25, %v4210_v8  ;;  %v4890_v56 = vadd.f32 %v4889_v60, %v4888_v31  ;;  %v4738_v5 = vadd.f32 %v4737_v58, %v4736_v6  ;;  %v4909_v61 = vadd.f32 %v4853_v11, %v4852_v9 }
 0x989   : > { %v4732_v42 = vrot.slane %v4731_v44, 2  ;;  %v4897_v34 = vadd.f32 %v4896_v63, %v4895_v0  ;;  %v4744_v46 = vrot.slane %v4743_v23, 4  ;;  %v4903_v33 = vrot.slane %v4902_v37, 4 }
 0x98a   : > { %10228 = vst [vmem:[#allocation64_spill] sm:$0xff] %v9459_v55  ;;  %v10229_v4 = vrot.slane %v9442_v10, 1  ;;  %v4719_v38 = vadd.f32 %v4718_v30, %v4717_v54  ;;  %v4757_v50 = vadd.f32 %v9263_v57, %v9256_v24  ;;  %v4855_v8 = vmul.f32 %v9263_v57, %v9263_v57 }
 0x98b   : > { %v4877_v25 = vrot.slane %v4876_v15, 2  ;;  %v4726_v31 = vadd.f32 %v4725_v59, %v4724_v14  ;;  %v4885_v6 = vadd.f32 %v4884_v28, %v4883_v13  ;;  %v4751_v60 = vrot.slane %v4750_v18, 4 }
 0x98c   : > { %v9450_v29 = vpop.f32.mrf.mxu1  ;;  %v3958_v3 = vsel %vm1504_vm0, %v3954_v32, %v10229_v4  ;;  %v4891_v58 = vrot.slane %v4890_v56, 2  ;;  %v4739_v0 = vrot.slane %v4738_v5, 2  ;;  %v4910_v11 = vrot.slane %v4909_v61, 4 }
 0x98d   : > { %v4854_v63 = vmul.f32 %v9256_v24, %v9256_v24  ;;  %v4733_v4 = vadd.f32 %v4732_v42, %v4731_v44  ;;  %v4898_v54 = vrot.slane %v4897_v34, 2  ;;  %v4745_v32 = vadd.f32 %v4744_v46, %v4743_v23 }
 0x98e   : > { %v4904_v30 = vadd.f32 %v4903_v33, %v4902_v37  ;;  %v3681_v39 = vadd.f32 %v10231_v52, %v10230_v12  ;;  %v4720_v57 = vrot.slane %v4719_v38, 1  ;;  %v4758_v55 = vrot.slane %v4757_v50, 4 }
 0x98f   : > { %v4916_v14 = vadd.f32 %v4855_v8, %v4854_v63  ;;  %v4878_v13 = vadd.f32 %v4877_v25, %v4876_v15  ;;  %v4727_v59 = vrot.slane %v4726_v31, 1  ;;  %v4886_v28 = vrot.slane %v4885_v6, 1 }
 0x990   : > { %v4752_v21 = vadd.f32 %v4751_v60, %v4750_v18  ;;  %v9476_v26 = vadd.f32 %v3958_v3, %v10232_v45  ;;  %v4892_v24 = vadd.f32 %v4891_v58, %v4890_v56  ;;  %v4740_v19 = vadd.f32 %v4739_v0, %v4738_v5  ;;  %v3858_v60 = vpop.f32.mrf.mxu2 }
 0x991   : > { %v4911_v17 = vadd.f32 %v4910_v11, %v4909_v61  ;;  %v4734_v44 = vrot.slane %v4733_v4, 1  ;;  %v4899_v42 = vadd.f32 %v4898_v54, %v4897_v34  ;;  %v4746_v23 = vrot.slane %v4745_v32, 2 }
 0x992   : > { %10233 = vst [vmem:[#allocation95_spill] sm:$0xff] %v9476_v26  ;;  %v4905_v37 = vrot.slane %v4904_v30, 2  ;;  %v4721_v33 = vadd.f32 %v4720_v57, %v4719_v38  ;;  %v4759_v46 = vadd.f32 %v4758_v55, %v4757_v50  ;;  %v4917_v52 = vrot.slane %v4916_v14, 4 }
 0x993   : > { %v4764_v12 = vadd.f32 %v9279_v16, %v9272_v48  ;;  %v4879_v15 = vrot.slane %v4878_v13, 1  ;;  %v4728_v8 = vadd.f32 %v4727_v59, %v4726_v31  ;;  %v4887_v25 = vadd.f32 %v4886_v28, %v4885_v6  ;;  %v4213_v59 = vpop.f32.mrf.mxu3 }
 0x994   : > { %v9471_v9 = vpop.f32.mrf.mxu1  ;;  %v4753_v18 = vrot.slane %v4752_v21, 2  ;;  %v4893_v3 = vrot.slane %v4892_v24, 1  ;;  %v4741_v45 = vrot.slane %v4740_v19, 1  ;;  %v4912_v56 = vrot.slane %v4911_v17, 2 }
 0x995   : > { %v4857_v5 = vmul.f32 %v9279_v16, %v9279_v16  ;;  %v4735_v34 = vadd.f32 %v4734_v44, %v4733_v4  ;;  %v4900_v58 = vrot.slane %v4899_v42, 1  ;;  %v4747_v57 = vadd.f32 %v4746_v23, %v4745_v32 }
 0x996   : > { %v4906_v55 = vadd.f32 %v4905_v37, %v4904_v30  ;;  %v4760_v38 = vrot.slane %v4759_v46, 2  ;;  %v4918_v50 = vadd.f32 %v4917_v52, %v4916_v14  ;;  %v4856_v0 = vmul.f32 %v9272_v48, %v9272_v48  ;;  %v4374_v30 = vpop.f32.mrf.mxu0 }
 0x997   : > { %v4765_v31 = vrot.slane %v4764_v12, 4  ;;  %v3908_v6 = vadd.f32 %v3858_v60, %v3681_v39  ;;  %v4880_v11 = vadd.f32 %v4879_v15, %v4878_v13  ;;  %v4827_v63 = vadd.f32 %v4728_v8, %v4721_v33 }
 0x998   : > { %v4754_v54 = vadd.f32 %v4753_v18, %v4752_v21  ;;  %v4894_v28 = vadd.f32 %v4893_v3, %v4892_v24  ;;  %v4742_v26 = vadd.f32 %v4741_v45, %v4740_v19  ;;  %v4913_v1 = vadd.f32 %v4912_v56, %v4911_v17 }
 0x999   : > { %v4923_v16 = vadd.f32 %v4857_v5, %v4856_v0  ;;  %v4986_v51 = vadd.f32 %v4887_v25, %v4880_v11  ;;  %v4828_v4 = vadd.f32 %v4827_v63, %v4735_v34  ;;  %v4748_v44 = vrot.slane %v4747_v57, 1 }
 0x99a   : > { %v4907_v32 = vrot.slane %v4906_v55, 1  ;;  %v4901_v23 = vadd.f32 %v4900_v58, %v4899_v42  ;;  %v4761_v14 = vadd.f32 %v4760_v38, %v4759_v46  ;;  %v4919_v37 = vrot.slane %v4918_v50, 2 }
 0x99b   : > { %v4766_v52 = vadd.f32 %v4765_v31, %v4764_v12  ;;  %v9484_v48 = vadd.f32 %v4374_v30, %v4213_v59  ;;  %v3956_v39 = vrot.slane %v3908_v6, 1  ;;  %v4755_v13 = vrot.slane %v4754_v54, 1 }
 0x99c   : > { %v4537_v61 = vpop.f32.mrf.mxu1  ;;  %v4771_v21 = vadd.f32 %v9295_v22, %v9288_v41  ;;  %v4987_v24 = vadd.f32 %v4986_v51, %v4894_v28  ;;  %v4829_v19 = vadd.f32 %v4828_v4, %v4742_v26  ;;  %v4914_v17 = vrot.slane %v4913_v1, 1 }
 0x99d   : > { %v4924_v33 = vrot.slane %v4923_v16, 4  ;;  %v4749_v8 = vadd.f32 %v4748_v44, %v4747_v57  ;;  %v4908_v25 = vadd.f32 %v4907_v32, %v4906_v55  ;;  %v4859_v42 = vmul.f32 %v9295_v22, %v9295_v22 }
 0x99e   : > { %v4988_v12 = vadd.f32 %v4987_v24, %v4901_v23  ;;  %v4762_v18 = vrot.slane %v4761_v14, 1  ;;  %v4920_v60 = vadd.f32 %v4919_v37, %v4918_v50  ;;  %v4767_v3 = vrot.slane %v4766_v52, 2 }
 0x99f   : > { %v4756_v45 = vadd.f32 %v4755_v13, %v4754_v54  ;;  %v4858_v56 = vmul.f32 %v9288_v41, %v9288_v41  ;;  %v4772_v51 = vrot.slane %v4771_v21, 4  ;;  %v4597_v26 = vadd.f32 %v4537_v61, %v9406_v7  ;;  %v10235_v61 = vld [vmem:[#allocation49_spill] sm:$0xff] }
 0x9a0   : > { %v10234_v5 = vrot.slane %v9442_v10, 1  ;;  %v4915_v58 = vadd.f32 %v4914_v17, %v4913_v1  ;;  %v4925_v57 = vadd.f32 %v4924_v33, %v4923_v16  ;;  %v4830_v55 = vadd.f32 %v4829_v19, %v4749_v8 }
 0x9a1   : > { %v4989_v38 = vadd.f32 %v4988_v12, %v4908_v25  ;;  %v4930_v50 = vadd.f32 %v4859_v42, %v4858_v56  ;;  %v4763_v31 = vadd.f32 %v4762_v18, %v4761_v14  ;;  %v4921_v6 = vrot.slane %v4920_v60, 1 }
 0x9a2   : > { %v3957_v34 = vsel %vm1504_vm0, %v10234_v5, %v3956_v39  ;;  %v4768_v11 = vadd.f32 %v4767_v3, %v4766_v52  ;;  %v4595_v7 = vadd.f32 %v9450_v29, %v9377_v40  ;;  %v4831_v63 = vadd.f32 %v4830_v55, %v4756_v45  ;;  %v10239_v45 = vld [vmem:[#allocation92_spill] sm:$0xff] }
 0x9a3   : > { %v9503_v10 = vadd.f32 %v3957_v34, %v10235_v61  ;;  %v4773_v54 = vadd.f32 %v4772_v51, %v4771_v21  ;;  %v4645_v1 = vrot.slane %v4597_v26, 2  ;;  %v4990_v16 = vadd.f32 %v4989_v38, %v4915_v58  ;;  %v10241_v38 = vld [vmem:[#allocation91_spill] sm:$0xff] }
 0x9a4   : > { %v4540_v15 = vpop.f32.mrf.mxu1  ;;  %v4926_v59 = vrot.slane %v4925_v57, 2  ;;  %v4931_v4 = vrot.slane %v4930_v50, 4  ;;  %v4861_v44 = vmul.f32 %v9311_v35, %v9311_v35  ;;  %v4832_v32 = vadd.f32 %v4831_v63, %v4763_v31 }
 0x9a5   : > { %v4598_v46 = vadd.f32 %v4540_v15, %v9412_v36  ;;  %v4596_v36 = vadd.f32 %v9471_v9, %v9401_v47  ;;  %v4594_v47 = vadd.f32 %v9410_v2, %v9375_v43  ;;  %v4922_v30 = vadd.f32 %v4921_v6, %v4920_v60  ;;  %v10236_v15 = vld [vmem:[#allocation61_spill] sm:$0xff]  ;;  %v10238_v60 = vld [vmem:[#allocation88_spill] sm:$0xff] }
 0x9a6   : > { %v4769_v23 = vrot.slane %v4768_v11, 1  ;;  %v4643_v14 = vrot.slane %v4595_v7, 2  ;;  %v4774_v37 = vrot.slane %v4773_v54, 2  ;;  %v4860_v52 = vmul.f32 %v9304_v20, %v9304_v20 }
 0x9a7   : > { %v4646_v0 = vrot.slane %v4598_v46, 2  ;;  %v4644_v9 = vrot.slane %v4596_v36, 2  ;;  %v4778_v43 = vadd.f32 %v9311_v35, %v9304_v20  ;;  %v4863_v39 = vmul.f32 %v9330_v27, %v9330_v27  ;;  %v10237_v46 = vld [vmem:[#allocation93_spill] sm:$0xff] }
 0x9a8   : > { %v4642_v13 = vrot.slane %v4594_v47, 2  ;;  %v4927_v24 = vadd.f32 %v4926_v59, %v4925_v57  ;;  %v4932_v19 = vadd.f32 %v4931_v4, %v4930_v50  ;;  %v4937_v17 = vadd.f32 %v4861_v44, %v4860_v52  ;;  %v10240_v57 = vld [vmem:[#allocation63_spill] sm:$0xff] }
 0x9a9   : > { %v4654_v40 = vsel %vm2199_vm1, %v4645_v1, %v4646_v0  ;;  %v4655_v21 = vsel %vm2199_vm1, %v4643_v14, %v4644_v9  ;;  %v4862_v8 = vmul.f32 %v10236_v15, %v10236_v15  ;;  %v4785_v25 = vadd.f32 %v9330_v27, %v10236_v15  ;;  %v10243_v1 = vld [vmem:[#allocation90_spill] sm:$0xff] }
 0x9aa   : > { %v4656_v42 = vsel %vm2199_vm1, %v4642_v13, %v4643_v14  ;;  %v4779_v18 = vrot.slane %v4778_v43, 4  ;;  %v4865_v3 = vmul.f32 %v10238_v60, %v10238_v60  ;;  %v9537_v56 = vadd.f32 %v4655_v21, %v10239_v45 }
 0x9ab   : > { %v4944_v51 = vadd.f32 %v4863_v39, %v4862_v8  ;;  %v4864_v36 = vmul.f32 %v10240_v57, %v10240_v57  ;;  %v4792_v55 = vadd.f32 %v10238_v60, %v10240_v57  ;;  %v4867_v50 = vmul.f32 %v10241_v38, %v10241_v38 }
 0x9ac   : > { %v4543_v28 = vpop.f32.mrf.mxu1  ;;  %v4928_v6 = vrot.slane %v4927_v24, 1  ;;  %v4938_v7 = vrot.slane %v4937_v17, 4  ;;  %v4786_v61 = vrot.slane %v4785_v25, 4  ;;  %v4866_v59 = vmul.f32 %v10243_v1, %v10243_v1 }
 0x9ad   : > { %v4599_v29 = vadd.f32 %v4543_v28, %v9435_v62  ;;  %v9521_v62 = vadd.f32 %v4654_v40, %v9421_v53  ;;  %v4775_v53 = vadd.f32 %v4774_v37, %v4773_v54  ;;  %v4951_v54 = vadd.f32 %v4865_v3, %v4864_v36  ;;  %v10244_v36 = vld [vmem:[#allocation64_spill] sm:$0xff] }
 0x9ae   : > { %v4799_v47 = vadd.f32 %v10241_v38, %v10243_v1  ;;  %v4869_v9 = vmul.f32 %v9537_v56, %v9537_v56  ;;  %v4770_v28 = vadd.f32 %v4769_v23, %v4768_v11  ;;  %v4933_v4 = vrot.slane %v4932_v19, 2 }
 0x9af   : > { %v4647_v2 = vrot.slane %v4599_v29, 2  ;;  %v4870_v26 = vmul.f32 %v9521_v62, %v9521_v62  ;;  %v4780_v44 = vadd.f32 %v4779_v18, %v4778_v43  ;;  %v4945_v40 = vrot.slane %v4944_v51, 4 }
 0x9b0   : > { %v4776_v29 = vrot.slane %v4775_v53, 1  ;;  %v4793_v14 = vrot.slane %v4792_v55, 4  ;;  %v4958_v37 = vadd.f32 %v4867_v50, %v4866_v59  ;;  %v4939_v39 = vadd.f32 %v4938_v7, %v4937_v17 }
 0x9b1   : > { %v4653_v33 = vsel %vm2199_vm1, %v4646_v0, %v4647_v2  ;;  %v10242_v0 = vld [vmem:[#allocation89_spill] sm:$0xff]  ;;  %v4929_v2 = vadd.f32 %v4928_v6, %v4927_v24  ;;  %v4787_v13 = vadd.f32 %v4786_v61, %v4785_v25  ;;  %v4952_v8 = vrot.slane %v4951_v54, 4 }
 0x9b2   : > { %v9532_v12 = vadd.f32 %v4653_v33, %v10237_v46  ;;  %v9554_v31 = vadd.f32 %v4656_v42, %v10242_v0  ;;  %v4991_v33 = vadd.f32 %v4990_v16, %v4922_v30  ;;  %v4800_v42 = vrot.slane %v4799_v47, 4  ;;  %v10245_v30 = vld [vmem:[#allocation94_spill] sm:$0xff] }
 0x9b3   : > { %v4833_v11 = vadd.f32 %v4832_v32, %v4770_v28  ;;  %v4934_v23 = vadd.f32 %v4933_v4, %v4932_v19  ;;  %v4781_v43 = vrot.slane %v4780_v44, 2  ;;  %v4946_v18 = vadd.f32 %v4945_v40, %v4944_v51 }
 0x9b4   : > { %v9543_v5 = vadd.f32 %v9532_v12, %v9521_v62  ;;  %v4871_v34 = vmul.f32 %v9532_v12, %v9532_v12  ;;  %v4546_v58 = vpop.f32.mrf.mxu1  ;;  %v4868_v52 = vmul.f32 %v9554_v31, %v9554_v31  ;;  %v4806_v21 = vadd.f32 %v9537_v56, %v9554_v31 }
 0x9b5   : > { %v4777_v45 = vadd.f32 %v4776_v29, %v4775_v53  ;;  %v4992_v24 = vadd.f32 %v4991_v33, %v4929_v2  ;;  %v4940_v17 = vrot.slane %v4939_v39, 2  ;;  %v4788_v25 = vrot.slane %v4787_v13, 2 }
 0x9b6   : > { %v9556_v63 = vadd.f32 %v4871_v34, %v4870_v26  ;;  %v4965_v46 = vadd.f32 %v4869_v9, %v4868_v52  ;;  %v4794_v26 = vadd.f32 %v4793_v14, %v4792_v55  ;;  %v4959_v34 = vrot.slane %v4958_v37, 4 }
 0x9b7   : > { %v4807_v0 = vrot.slane %v4806_v21, 4  ;;  %v4953_v6 = vadd.f32 %v4952_v8, %v4951_v54  ;;  %v4801_v7 = vadd.f32 %v4800_v42, %v4799_v47  ;;  %v4600_v61 = vadd.f32 %v4546_v58, %v10245_v30 }
 0x9b8   : > { %v4966_v16 = vrot.slane %v4965_v46, 4  ;;  %v4935_v59 = vrot.slane %v4934_v23, 1  ;;  %v4782_v32 = vadd.f32 %v4781_v43, %v4780_v44  ;;  %v4947_v19 = vrot.slane %v4946_v18, 2 }
 0x9b9   : > { %v4814_v51 = vrot.slane %v9543_v5, 4  ;;  %v4834_v9 = vadd.f32 %v4833_v11, %v4777_v45  ;;  %v4795_v53 = vrot.slane %v4794_v26, 2  ;;  %v4960_v55 = vadd.f32 %v4959_v34, %v4958_v37 }
 0x9ba   : > { %v4941_v4 = vadd.f32 %v4940_v17, %v4939_v39  ;;  %v4789_v40 = vadd.f32 %v4788_v25, %v4787_v13  ;;  %v4808_v29 = vadd.f32 %v4807_v0, %v4806_v21  ;;  %v4973_v14 = vrot.slane %v9556_v63, 4  ;;  %v10246_v17 = vld [vmem:[#allocation95_spill] sm:$0xff] }
 0x9bb   : > { %v4954_v52 = vrot.slane %v4953_v6, 2  ;;  %v4802_v54 = vrot.slane %v4801_v7, 2  ;;  %v4967_v47 = vadd.f32 %v4966_v16, %v4965_v46  ;;  %v4648_v2 = vrot.slane %v4600_v61, 2 }
 0x9bc   : > { %v4549_v3 = vpop.f32.mrf.mxu1  ;;  %v4936_v33 = vadd.f32 %v4935_v59, %v4934_v23  ;;  %v4783_v58 = vrot.slane %v4782_v32, 1  ;;  %v4948_v8 = vadd.f32 %v4947_v19, %v4946_v18  ;;  %v4815_v44 = vadd.f32 %v4814_v51, %v9543_v5 }
 0x9bd   : > { %v4601_v50 = vadd.f32 %v4549_v3, %v10244_v36  ;;  %v4796_v43 = vadd.f32 %v4795_v53, %v4794_v26  ;;  %v4961_v11 = vrot.slane %v4960_v55, 2  ;;  %v4942_v13 = vrot.slane %v4941_v4, 1 }
 0x9be   : > { %v4790_v21 = vrot.slane %v4789_v40, 1  ;;  %v4809_v3 = vrot.slane %v4808_v29, 2  ;;  %v4974_v45 = vadd.f32 %v4973_v14, %v9556_v63  ;;  %v4955_v46 = vadd.f32 %v4954_v52, %v4953_v6 }
 0x9bf   : > { %v4649_v28 = vrot.slane %v4601_v50, 2  ;;  %v4803_v34 = vadd.f32 %v4802_v54, %v4801_v7  ;;  %v4968_v23 = vrot.slane %v4967_v47, 2  ;;  %v4993_v18 = vadd.f32 %v4992_v24, %v4936_v33 }
 0x9c0   : > { %v4784_v50 = vadd.f32 %v4783_v58, %v4782_v32  ;;  %v4816_v5 = vrot.slane %v4815_v44, 2  ;;  %v4949_v25 = vrot.slane %v4948_v8, 1  ;;  %v4797_v0 = vrot.slane %v4796_v43, 1 }
 0x9c1   : > { %v4652_v37 = vsel %vm2199_vm1, %v4648_v2, %v4649_v28  ;;  %v4962_v16 = vadd.f32 %v4961_v11, %v4960_v55  ;;  %v4943_v30 = vadd.f32 %v4942_v13, %v4941_v4  ;;  %v4810_v61 = vadd.f32 %v4809_v3, %v4808_v29 }
 0x9c2   : > { %v9578_v26 = vadd.f32 %v4652_v37, %v10246_v17  ;;  %v4975_v59 = vrot.slane %v4974_v45, 2  ;;  %v4791_v6 = vadd.f32 %v4790_v21, %v4789_v40  ;;  %v4956_v7 = vrot.slane %v4955_v46, 1 }
 0x9c3   : > { %v4804_v24 = vrot.slane %v4803_v34, 1  ;;  %v4969_v32 = vadd.f32 %v4968_v23, %v4967_v47  ;;  %v4817_v19 = vadd.f32 %v4816_v5, %v4815_v44  ;;  %v4835_v55 = vadd.f32 %v4834_v9, %v4784_v50 }
 0x9c4   : > { %v4552_v42 = vpop.f32.mrf.mxu1  ;;  %v4872_v51 = vmul.f32 %v9578_v26, %v9578_v26  ;;  %v4798_v4 = vadd.f32 %v4797_v0, %v4796_v43  ;;  %v4963_v29 = vrot.slane %v4962_v16, 1  ;;  %v4976_v14 = vadd.f32 %v4975_v59, %v4974_v45 }
 0x9c5   : > { %v4602_v39 = vadd.f32 %v4552_v42, %v9484_v48  ;;  %v4994_v54 = vadd.f32 %v4993_v18, %v4943_v30  ;;  %v4836_v47 = vadd.f32 %v4835_v55, %v4791_v6  ;;  %v4957_v2 = vadd.f32 %v4956_v7, %v4955_v46 }
 0x9c6   : > { %v4805_v33 = vadd.f32 %v4804_v24, %v4803_v34  ;;  %v4970_v58 = vrot.slane %v4969_v32, 1  ;;  %v4818_v44 = vrot.slane %v4817_v19, 1  ;;  %v4964_v13 = vadd.f32 %v4963_v29, %v4962_v16 }
 0x9c7   : > { %v4650_v36 = vrot.slane %v4602_v39, 2  ;;  %v4837_v39 = vadd.f32 %v4836_v47, %v4798_v4  ;;  %v4977_v9 = vrot.slane %v4976_v14, 1 }
 0x9c8   : > { %v4971_v45 = vadd.f32 %v4970_v58, %v4969_v32 }
 0x9c9   : > { %v4651_v48 = vsel %vm2199_vm1, %v4649_v28, %v4650_v36  ;;  %v4950_v28 = vadd.f32 %v4949_v25, %v4948_v8  ;;  %v4838_v23 = vadd.f32 %v4837_v39, %v4805_v33  ;;  %v4819_v36 = vadd.f32 %v4818_v44, %v4817_v19  ;;  %v10249_v33 = vld [vmem:[#allocation102_spill] sm:$0xff]  ;;  %v10250_v44 = vld [vmem:[#allocation103_spill] sm:$0xff] }
 0x9ca   : > { %v9583_v63 = vadd.f32 %v4651_v48, %v9503_v10  ;;  %v4811_v10 = vrot.slane %v4810_v61, 1  ;;  %v4978_v34 = vadd.f32 %v4977_v9, %v4976_v14  ;;  %v10252_v39 = vld [vmem:[#allocation30_spill] sm:$0xff] }
 0x9cb   : > { %v4995_v37 = vadd.f32 %v4994_v54, %v4950_v28  ;;  %v10248_v54 = vld [vmem:[#allocation101_spill] sm:$0xff] }
 0x9cc   : > { %v4820_v53 = vadd.f32 %v9583_v63, %v9578_v26  ;;  %v4873_v49 = vmul.f32 %v9583_v63, %v9583_v63  ;;  %v4812_v21 = vadd.f32 %v4811_v10, %v4810_v61 }
 0x9cd   : > { %v4996_v3 = vadd.f32 %v4995_v37, %v4957_v2 }
 0x9ce   : > { %v4821_v40 = vrot.slane %v4820_v53, 4  ;;  %v4979_v52 = vadd.f32 %v4873_v49, %v4872_v51  ;;  %v4839_v46 = vadd.f32 %v4838_v23, %v4812_v21  ;;  %v10253_v21 = vld [vmem:[#allocation51_spill] sm:$0xff] }
 0x9cf   : > { %v4997_v5 = vadd.f32 %v4996_v3, %v4964_v13  ;;  %v10255_v3 = vld [vmem:[#allocation53_spill] sm:$0xff] }
 0x9d0   : > { %v4822_v42 = vadd.f32 %v4821_v40, %v4820_v53  ;;  %v4980_v11 = vrot.slane %v4979_v52, 4  ;;  %v4840_v48 = vadd.f32 %v4839_v46, %v4819_v36  ;;  %v10247_v40 = vld [vmem:[#allocation50_spill] sm:$0xff]  ;;  %v10258_v46 = vld [vmem:[#allocation56_spill] sm:$0xff] }
 0x9d1   : > { %v4998_v0 = vadd.f32 %v4997_v5, %v4971_v45  ;;  %v10256_v36 = vld [vmem:[#allocation54_spill] sm:$0xff] }
 0x9d2   : > { %v4823_v8 = vrot.slane %v4822_v42, 2  ;;  %v4981_v43 = vadd.f32 %v4980_v11, %v4979_v52  ;;  %v10251_v11 = vld [vmem:[#allocation104_spill] sm:$0xff] }
 0x9d3   : > { %v4999_v16 = vadd.f32 %v4998_v0, %v4978_v34  ;;  %v10260_v0 = vld [vmem:[#allocation58_spill] sm:$0xff] }
 0x9d4   : > { %v4824_v50 = vadd.f32 %v4823_v8, %v4822_v42  ;;  %v4982_v18 = vrot.slane %v4981_v43, 2  ;;  %v10254_v8 = vld [vmem:[#allocation52_spill] sm:$0xff] }
 0x9d6   : > { %v4825_v17 = vrot.slane %v4824_v50, 1  ;;  %v4983_v25 = vadd.f32 %v4982_v18, %v4981_v43  ;;  %v10257_v18 = vld [vmem:[#allocation55_spill] sm:$0xff] }
 0x9d8   : > { %v4826_v30 = vadd.f32 %v4825_v17, %v4824_v50  ;;  %v4984_v59 = vrot.slane %v4983_v25, 1  ;;  %v10259_v17 = vld [vmem:[#allocation57_spill] sm:$0xff] }
 0x9da   : > { %v4841_v61 = vadd.f32 %v4840_v48, %v4826_v30  ;;  %v4985_v6 = vadd.f32 %v4984_v59, %v4983_v25  ;;  %v10261_v30 = vld [vmem:[#allocation59_spill] sm:$0xff] }
 0x9dc   : > { %v5000_v7 = vadd.f32 %v4999_v16, %v4985_v6  ;;  %v9591_v24 = vmul.f32 0.00390625, %v4841_v61  ;;  %v10262_v61 = vld [vmem:[#allocation60_spill] sm:$0xff] }
 0x9de   : > { %v5002_v51 = vmul.f32 0.00390625, %v5000_v7  ;;  %v5003_v32 = vmul.f32 %v9591_v24, %v9591_v24  ;;  %v5034_v49 = vsub.f32 %v9521_v62, %v9591_v24  ;;  %v5035_v55 = vsub.f32 %v9532_v12, %v9591_v24 }
 0x9df   : > { %v5036_v28 = vsub.f32 %v9578_v26, %v9591_v24  ;;  %v5037_v4 = vsub.f32 %v9583_v63, %v9591_v24  ;;  %v5006_v52 = vsub.f32 %v10247_v40, %v9591_v24  ;;  %v5007_v47 = vsub.f32 %v10248_v54, %v9591_v24  ;;  %v10268_v26 = vld [vmem:[#allocation18_spill] sm:$0xff]  ;;  %v10269_v63 = vld [vmem:[#allocation21_spill] sm:$0xff] }
 0x9e0   : > { %v5004_v19 = vsub.f32 %v5002_v51, %v5003_v32  ;;  %v5008_v58 = vsub.f32 %v10249_v33, %v9591_v24  ;;  %v5009_v42 = vsub.f32 %v10250_v44, %v9591_v24  ;;  %v5010_v37 = vsub.f32 %v10251_v11, %v9591_v24 }
 0x9e1   : > { %v5011_v13 = vsub.f32 %v10252_v39, %v9591_v24  ;;  %v5012_v9 = vsub.f32 %v10253_v21, %v9591_v24  ;;  %v5013_v43 = vsub.f32 %v10254_v8, %v9591_v24  ;;  %v5014_v23 = vsub.f32 %v10255_v3, %v9591_v24 }
 0x9e2   : > { %v5005_v53 = vmax.f32 %v5004_v19, 0.0  ;;  %v5015_v50 = vsub.f32 %v10256_v36, %v9591_v24  ;;  %v5016_v5 = vsub.f32 %v10257_v18, %v9591_v24  ;;  %v5017_v34 = vsub.f32 %v10258_v46, %v9591_v24 }
 0x9e3   : > { %v5018_v25 = vsub.f32 %v10259_v17, %v9591_v24  ;;  %v5019_v48 = vsub.f32 %v10260_v0, %v9591_v24  ;;  %v5020_v59 = vsub.f32 %v10261_v30, %v9591_v24  ;;  %v5021_v6 = vsub.f32 %v10262_v61, %v9591_v24  ;;  %v10263_v17 = vld [vmem:[#allocation5_spill] sm:$0xff]  ;;  %v10266_v30 = vld [vmem:[#allocation10_spill] sm:$0xff] }
 0x9e4   : > { %v5038_v29 = vadd.f32 1e-05, %v5005_v53  ;;  %v5022_v7 = vsub.f32 %v9288_v41, %v9591_v24  ;;  %v5023_v51 = vsub.f32 %v9295_v22, %v9591_v24  ;;  %v5024_v32 = vsub.f32 %v9304_v20, %v9591_v24  ;;  %v10271_v61 = vld [vmem:[#allocation26_spill] sm:$0xff] }
 0x9e5   : > { %v5025_v19 = vsub.f32 %v9311_v35, %v9591_v24  ;;  %v5026_v53 = vsub.f32 %v10236_v15, %v9591_v24  ;;  %v5027_v40 = vsub.f32 %v9330_v27, %v9591_v24  ;;  %v5028_v41 = vsub.f32 %v10240_v57, %v9591_v24 }
 0x9e6   : > { %5512 = vrsqrt.f32 %v5038_v29  ;;  %vm5045_vm6 = vweird.f32 %v5038_v29  ;;  %v5029_v22 = vsub.f32 %v10238_v60, %v9591_v24  ;;  %v5030_v20 = vsub.f32 %v10243_v1, %v9591_v24 }
 0x9e7   : > { %v5031_v35 = vsub.f32 %v10241_v38, %v9591_v24  ;;  %v5032_v15 = vsub.f32 %v9554_v31, %v9591_v24 }
 0x9ec   : > { %v5513_v10 = vpop.eup %5512 }
 0x9ed   : > { %v5040_v14 = vmul.f32 %v5513_v10, %v5038_v29  ;;  %vm5046_vm5 = vweird.f32 %v5513_v10  ;;  %v5033_v29 = vsub.f32 %v9537_v56, %v9591_v24 }
 0x9ee   : > { %vm5047_vm7 = vmor %vm5045_vm6, %vm5046_vm5 }
 0x9ef   : > { %v5041_v2 = vmul.f32 %v5513_v10, %v5040_v14 }
 0x9f1   : > { %v5042_v45 = vmul.f32 0.5, %v5041_v2 }
 0x9f3   : > { %v5043_v16 = vsub.f32 1.5, %v5042_v45 }
 0x9f5   : > { %v5044_v14 = vmul.f32 %v5513_v10, %v5043_v16 }
 0x9f7   : > { %v5048_v27 = vsel %vm5047_vm7, %v5513_v10, %v5044_v14 }
 0x9f8   : > { %v5049_v54 = vmul.f32 %v5048_v27, %v5006_v52  ;;  %v5050_v2 = vmul.f32 %v5048_v27, %v5007_v47  ;;  %v5051_v57 = vmul.f32 %v5048_v27, %v5008_v58  ;;  %v5052_v33 = vmul.f32 %v5048_v27, %v5009_v42 }
 0x9f9   : > { %v5053_v44 = vmul.f32 %v5048_v27, %v5010_v37  ;;  %v5054_v60 = vmul.f32 %v5048_v27, %v5011_v13  ;;  %v5055_v11 = vmul.f32 %v5048_v27, %v5012_v9  ;;  %v5056_v39 = vmul.f32 %v5048_v27, %v5013_v43 }
 0x9fa   : > { %v5057_v1 = vmul.f32 %v5048_v27, %v5014_v23  ;;  %v5058_v21 = vmul.f32 %v5048_v27, %v5015_v50  ;;  %v5059_v8 = vmul.f32 %v5048_v27, %v5016_v5  ;;  %v5060_v3 = vmul.f32 %v5048_v27, %v5017_v34 }
 0x9fb   : > { %v5061_v38 = vmul.f32 %v5048_v27, %v5018_v25  ;;  %v5062_v45 = vmul.f32 %v5048_v27, %v5019_v48  ;;  %v5063_v31 = vmul.f32 %v5048_v27, %v5020_v59  ;;  %v5064_v36 = vmul.f32 %v5048_v27, %v5021_v6  ;;  %v10264_v25 = vld [vmem:[#allocation9_spill] sm:$0xff]  ;;  %v10265_v48 = vld [vmem:[#allocation7_spill] sm:$0xff] }
 0x9fc   : > { %v5065_v18 = vmul.f32 %v5048_v27, %v5022_v7  ;;  %v5066_v56 = vmul.f32 %v5048_v27, %v5023_v51  ;;  %v5067_v10 = vmul.f32 %v5048_v27, %v5024_v32  ;;  %v5068_v52 = vmul.f32 %v5048_v27, %v5025_v19  ;;  %v10272_v7 = vld [vmem:[#allocation28_spill] sm:$0xff]  ;;  %v10273_v32 = vld [vmem:[#allocation31_spill] sm:$0xff] }
 0x9fd   : > { %v5069_v47 = vmul.f32 %v5048_v27, %v5026_v53  ;;  %v5070_v58 = vmul.f32 %v5048_v27, %v5027_v40  ;;  %v5071_v42 = vmul.f32 %v5048_v27, %v5028_v41  ;;  %v5072_v37 = vmul.f32 %v5048_v27, %v5029_v22  ;;  %v10274_v53 = vld [vmem:[#allocation33_spill] sm:$0xff]  ;;  %v10275_v40 = vld [vmem:[#allocation35_spill] sm:$0xff] }
 0x9fe   : > { %v5073_v13 = vmul.f32 %v5048_v27, %v5030_v20  ;;  %v5074_v9 = vmul.f32 %v5048_v27, %v5031_v35  ;;  %v5075_v43 = vmul.f32 %v5048_v27, %v5032_v15  ;;  %v5076_v23 = vmul.f32 %v5048_v27, %v5033_v29  ;;  %v10276_v22 = vld [vmem:[#allocation37_spill] sm:$0xff]  ;;  %v10277_v35 = vld [vmem:[#allocation4_spill] sm:$0xff] }
 0x9ff   : > { %v5077_v50 = vmul.f32 %v5048_v27, %v5034_v49  ;;  %v5078_v5 = vmul.f32 %v5048_v27, %v5035_v55  ;;  %v5079_v46 = vmul.f32 %v5048_v27, %v5036_v28  ;;  %v5080_v34 = vmul.f32 %v5048_v27, %v5037_v4  ;;  %v10267_v55 = vld [vmem:[#allocation16_spill] sm:$0xff]  ;;  %v10270_v4 = vld [vmem:[#allocation23_spill] sm:$0xff] }
 0xa00   : > { %v5081_v62 = vadd.f32 %v5049_v54, %v10263_v17  ;;  %v5082_v0 = vadd.f32 %v5050_v2, %v10264_v25  ;;  %v5083_v49 = vadd.f32 %v5051_v57, %v10265_v48  ;;  %v5084_v12 = vadd.f32 %v5052_v33, %v10266_v30  ;;  %v10278_v29 = vld [vmem:[#allocation8_spill] sm:$0xff]  ;;  %v10279_v54 = vld [vmem:[#allocation3_spill] sm:$0xff]  ;;  %v10280_v57 = vld [vmem:[#allocation6_spill] sm:$0xff] }
 0xa01   : > { %v5085_v59 = vadd.f32 %v5053_v44, %v10267_v55  ;;  %v5086_v28 = vadd.f32 %v5054_v60, %v10268_v26  ;;  %v5087_v24 = vadd.f32 %v5055_v11, %v10269_v63  ;;  %v5088_v16 = vadd.f32 %v5056_v39, %v10270_v4  ;;  %v10281_v44 = vld [vmem:[#allocation11_spill] sm:$0xff]  ;;  %v10282_v11 = vld [vmem:[#allocation13_spill] sm:$0xff]  ;;  %v10292_v25 = vld [vmem:[#allocation36_spill] sm:$0xff] }
 0xa02   : > { %5113 = vst [vmem:[%s9664_s24] sm:$0xff] %v5081_v62  ;;  %v5089_v6 = vadd.f32 %v5057_v1, %v10271_v61  ;;  %v5090_v51 = vadd.f32 %v5058_v21, %v10272_v7  ;;  %v5091_v19 = vadd.f32 %v5059_v8, %v10273_v32  ;;  %v5092_v14 = vadd.f32 %v5060_v3, %v10274_v53  ;;  %v10283_v1 = vld [vmem:[#allocation14_spill] sm:$0xff]  ;;  %v10284_v8 = vld [vmem:[#allocation17_spill] sm:$0xff] }
 0xa03   : > { %5114 = vst [vmem:[%s9664_s24 + $0x8] sm:$0xff] %v5082_v0  ;;  %v5093_v41 = vadd.f32 %v5061_v38, %v10275_v40  ;;  %v5094_v20 = vadd.f32 %v5062_v45, %v10276_v22  ;;  %v5095_v15 = vadd.f32 %v5063_v31, %v10277_v35  ;;  %v5096_v27 = vadd.f32 %v5064_v36, %v10278_v29  ;;  %v10285_v38 = vld [vmem:[#allocation19_spill] sm:$0xff]  ;;  %v10286_v31 = vld [vmem:[#allocation22_spill] sm:$0xff] }
 0xa04   : > { %5115 = vst [vmem:[%s9664_s24 + $0x10] sm:$0xff] %v5083_v49  ;;  %v5097_v2 = vadd.f32 %v5065_v18, %v10279_v54  ;;  %v5098_v33 = vadd.f32 %v5066_v56, %v10280_v57  ;;  %v5099_v60 = vadd.f32 %v5067_v10, %v10281_v44  ;;  %v5100_v39 = vadd.f32 %v5068_v52, %v10282_v11  ;;  %v10287_v18 = vld [vmem:[#allocation24_spill] sm:$0xff]  ;;  %v10288_v10 = vld [vmem:[#allocation27_spill] sm:$0xff]  ;;  %v10291_v62 = vld [vmem:[#allocation34_spill] sm:$0xff] }
 0xa05   : > { %5116 = vst [vmem:[%s9664_s24 + $0x18] sm:$0xff] %v5084_v12  ;;  %v5101_v21 = vadd.f32 %v5069_v47, %v10283_v1  ;;  %v5102_v3 = vadd.f32 %v5070_v58, %v10284_v8  ;;  %v5103_v45 = vadd.f32 %v5071_v42, %v10285_v38  ;;  %v5104_v36 = vadd.f32 %v5072_v37, %v10286_v31  ;;  %v10289_v47 = vld [vmem:[#allocation29_spill] sm:$0xff]  ;;  %v10290_v42 = vld [vmem:[#allocation32_spill] sm:$0xff]  ;;  %v10294_v49 = vld [vmem:[#allocation39_spill] sm:$0xff] }
 0xa06   : > { %5117 = vst [vmem:[%s9664_s24 + $0x20] sm:$0xff] %v5085_v59  ;;  %v5105_v56 = vadd.f32 %v5073_v13, %v10287_v18  ;;  %v5106_v52 = vadd.f32 %v5074_v9, %v10288_v10  ;;  %v5107_v58 = vadd.f32 %v5075_v43, %v10289_v47  ;;  %v5108_v17 = vadd.f32 %v5076_v23, %v10290_v42  ;;  %v10293_v13 = vld [vmem:[#allocation38_spill] sm:$0xff] }
 0xa07   : > { %5118 = vst [vmem:[%s9664_s24 + $0x28] sm:$0xff] %v5086_v28  ;;  %v5109_v37 = vadd.f32 %v5077_v50, %v10291_v62  ;;  %v5110_v0 = vadd.f32 %v5078_v5, %v10292_v25  ;;  %v5111_v48 = vadd.f32 %v5079_v46, %v10293_v13  ;;  %v5112_v9 = vadd.f32 %v5080_v34, %v10294_v49 }
 0xa08   : > { %5119 = vst [vmem:[%s9664_s24 + $0x30] sm:$0xff] %v5087_v24 }
 0xa09   : > { %5120 = vst [vmem:[%s9664_s24 + $0x38] sm:$0xff] %v5088_v16 }
 0xa0a   : > { %5121 = vst [vmem:[%s9664_s24 + $0x40] sm:$0xff] %v5089_v6 }
 0xa0b   : > { %5122 = vst [vmem:[%s9664_s24 + $0x48] sm:$0xff] %v5090_v51 }
 0xa0c   : > { %5123 = vst [vmem:[%s9664_s24 + $0x50] sm:$0xff] %v5091_v19 }
 0xa0d   : > { %5124 = vst [vmem:[%s9664_s24 + $0x58] sm:$0xff] %v5092_v14 }
 0xa0e   : > { %5125 = vst [vmem:[%s9664_s24 + $0x60] sm:$0xff] %v5093_v41 }
 0xa0f   : > { %5126 = vst [vmem:[%s9664_s24 + $0x68] sm:$0xff] %v5094_v20 }
 0xa10   : > { %5127 = vst [vmem:[%s9664_s24 + $0x70] sm:$0xff] %v5095_v15 }
 0xa11   : > { %5128 = vst [vmem:[%s9664_s24 + $0x78] sm:$0xff] %v5096_v27 }
 0xa12   : > { %5129 = vst [vmem:[%s9664_s24 + $0x80] sm:$0xff] %v5097_v2 }
 0xa13   : > { %5130 = vst [vmem:[%s9664_s24 + $0x88] sm:$0xff] %v5098_v33 }
 0xa14   : > { %5131 = vst [vmem:[%s9664_s24 + $0x90] sm:$0xff] %v5099_v60 }
 0xa15   : > { %5132 = vst [vmem:[%s9664_s24 + $0x98] sm:$0xff] %v5100_v39 }
 0xa16   : > { %5133 = vst [vmem:[%s9664_s24 + $0xa0] sm:$0xff] %v5101_v21 }
 0xa17   : > { %5134 = vst [vmem:[%s9664_s24 + $0xa8] sm:$0xff] %v5102_v3 }
 0xa18   : > { %5135 = vst [vmem:[%s9664_s24 + $0xb0] sm:$0xff] %v5103_v45 }
 0xa19   : > { %5136 = vst [vmem:[%s9664_s24 + $0xb8] sm:$0xff] %v5104_v36 }
 0xa1a   : > { %5137 = vst [vmem:[%s9664_s24 + $0xc0] sm:$0xff] %v5105_v56 }
 0xa1b   : > { %5138 = vst [vmem:[%s9664_s24 + $0xc8] sm:$0xff] %v5106_v52 }
 0xa1c   : > { %5139 = vst [vmem:[%s9664_s24 + $0xd0] sm:$0xff] %v5107_v58 }
 0xa1d   : > { %5140 = vst [vmem:[%s9664_s24 + $0xd8] sm:$0xff] %v5108_v17 }
 0xa1e   : > { %5141 = vst [vmem:[%s9664_s24 + $0xe0] sm:$0xff] %v5109_v37 }
 0xa1f   : > { %5142 = vst [vmem:[%s9664_s24 + $0xe8] sm:$0xff] %v5110_v0 }
 0xa20   : > { %5143 = vst [vmem:[%s9664_s24 + $0xf0] sm:$0xff] %v5111_v48 }
 0xa21   : > { %5144 = vst [vmem:[%s9664_s24 + $0xf8] sm:$0xff] %v5112_v9 }
 0xa22 PF: > { %s13_s12 = sadd.s32 1, %s5640_s12  }
 0xa23   : > { %p10_p4 = scmp.ge.s32.totalorder %s13_s12, 4  }
 0xa25   :  { %12 = sbr.rel (!%p10_p4) target bundleno = 1 (0x1), region = 82 }

</bundles_post_ra>
